<compile_context>
chip_gen: v7x
topology: tpu7x:2x2x1
jax: 0.10.0
libtpu: 0.0.40
codegen_flags: <defaults>
</compile_context>

<pallas_src>
import numpy as np
import jax
import jax.numpy as jnp
from jax.experimental import pallas as pl
from jax.experimental.pallas import tpu as pltpu

HID = 384                 # self.hidden (hard-coded in the module)
NG = 4 * HID              # i, f, g, o gates (PyTorch LSTM gate order)
NG2 = 2 * NG              # both directions fused along the gate axis
MLP_PAD = 128             # lane-dense padding for the 6-wide classifier tail

# Permutation that reorders one direction's hidden features to [even | odd];
# with this ordering MaxPool1d(2) over the feature axis is a half-roll + max.
_PERM = np.concatenate([np.arange(0, HID, 2), np.arange(1, HID, 2)])


def _row_block(m, pref=256):
    """Largest row tile <= pref that divides m (capped at 256 for v7x VMEM)."""
    if m <= pref:
        return m
    for b in (pref, 128, 64, 32, 16, 8):
        if m % b == 0:
            return b
    return m


def _nbytes(shape, dtype):
    return int(np.prod(shape)) * jnp.dtype(dtype).itemsize


def _mosaic_params(sems, buffered_bytes, headroom=12 << 20):
    """CompilerParams with an explicit VMEM budget sized from the block shapes.

    Clamped to [32 MiB, 56 MiB]: above default scoped limits everywhere, below
    v7x's 64 MiB physical VMEM per TensorCore.
    """
    limit = int(min(max(buffered_bytes + headroom, 32 << 20), 56 << 20))
    return pltpu.CompilerParams(dimension_semantics=sems,
                                vmem_limit_bytes=limit)


def _spec(shape, index_map, single=False):
    """BlockSpec; grid-invariant operands request a single pipeline buffer."""
    if single:
        try:
            return pl.BlockSpec(shape, index_map, pipeline_mode=pl.Buffered(1))
        except (TypeError, AttributeError):   # older jax without pipeline_mode
            pass
    return pl.BlockSpec(shape, index_map)


def _fast_sigmoid(x):
    # sigmoid(x) == 0.5 * tanh(0.5 * x) + 0.5  -> one EUP op instead of exp+recip
    return 0.5 * jnp.tanh(0.5 * x) + 0.5


# ----------------------------------------------------------------------------
# Hoisted LSTM input projections (grid-parallel over rows, both directions
# fused along the gate axis).  Outputs are a stacked (2, M, 4*HID) bf16 array.
# ----------------------------------------------------------------------------
def _proj_l0_kernel(x_ref, w_ref, b_ref, g_ref):
    g = (jnp.dot(x_ref[...], w_ref[...], preferred_element_type=jnp.float32)
         + b_ref[...])
    g = g.astype(jnp.bfloat16)
    g_ref[0] = g[:, :NG]      # forward-direction gate inputs
    g_ref[1] = g[:, NG:]      # backward-direction gate inputs


def input_projection_l0(x2d, w_all, b_all):
    """x2d: (M, K) bf16 -> stacked gates_x (2, M, 4*HID) bf16."""
    M, K = x2d.shape
    bm = _row_block(M)
    buffered = (2 * _nbytes((bm, K), jnp.bfloat16)
                + _nbytes((K, NG2), jnp.bfloat16)
                + _nbytes((1, NG2), jnp.float32)
                + 2 * _nbytes((2, bm, NG), jnp.bfloat16)
                + _nbytes((bm, NG2), jnp.float32))      # in-kernel f32 temp
    return pl.pallas_call(
        _proj_l0_kernel,
        out_shape=jax.ShapeDtypeStruct((2, M, NG), jnp.bfloat16),
        grid_spec=pltpu.PrefetchScalarGridSpec(
            num_scalar_prefetch=0,
            grid=(M // bm,),
            in_specs=[
                _spec((bm, K), lambda i: (i, 0)),
                _spec((K, NG2), lambda i: (0, 0), single=True),
                _spec((1, NG2), lambda i: (0, 0), single=True),
            ],
            out_specs=pl.BlockSpec((2, bm, NG), lambda i: (0, i, 0)),
        ),
        compiler_params=_mosaic_params(("parallel",), buffered),
    )(x2d, w_all, b_all)


def _proj_l1_kernel(y_ref, wt_ref, wb_ref, b_ref, g_ref):
    # y_ref[0] / y_ref[1] are the layer-0 fwd / bwd outputs: the [fwd | bwd]
    # concat is folded into the split (top/bottom) weight rows.
    g = (jnp.dot(y_ref[0], wt_ref[...], preferred_element_type=jnp.float32)
         + jnp.dot(y_ref[1], wb_ref[...], preferred_element_type=jnp.float32)
         + b_ref[...])
    g = g.astype(jnp.bfloat16)
    g_ref[0] = g[:, :NG]
    g_ref[1] = g[:, NG:]


def input_projection_l1(y0, w_top, w_bot, b_all):
    """y0: (2, M, HID) bf16 stacked layer-0 outputs -> (2, M, 4*HID) bf16."""
    _, M, _ = y0.shape
    bm = _row_block(M)
    buffered = (2 * _nbytes((2, bm, HID), jnp.bfloat16)
                + 2 * _nbytes((HID, NG2), jnp.bfloat16)
                + _nbytes((1, NG2), jnp.float32)
                + 2 * _nbytes((2, bm, NG), jnp.bfloat16)
                + _nbytes((bm, NG2), jnp.float32))
    return pl.pallas_call(
        _proj_l1_kernel,
        out_shape=jax.ShapeDtypeStruct((2, M, NG), jnp.bfloat16),
        grid_spec=pltpu.PrefetchScalarGridSpec(
            num_scalar_prefetch=0,
            grid=(M // bm,),
            in_specs=[
                _spec((2, bm, HID), lambda i: (0, i, 0)),
                _spec((HID, NG2), lambda i: (0, 0), single=True),
                _spec((HID, NG2), lambda i: (0, 0), single=True),
                _spec((1, NG2), lambda i: (0, 0), single=True),
            ],
            out_specs=pl.BlockSpec((2, bm, NG), lambda i: (0, i, 0)),
        ),
        compiler_params=_mosaic_params(("parallel",), buffered),
    )(y0, w_top, w_bot, b_all)


# ----------------------------------------------------------------------------
# Bidirectional LSTM layer.  Grid (direction, time): direction is `parallel`
# (one direction per TensorCore on v7x; sequential outer loop on v5e/v6e),
# time is `arbitrary`.  The backward direction's time reversal lives only in
# the index_maps.  h/c state persists in per-core VMEM scratch.
# ----------------------------------------------------------------------------
def _bilstm_layer_kernel(gx_ref, whh_ref, h0_ref, c0_ref, out_ref, h_sc, c_sc):
    @pl.when(pl.program_id(1) == 0)
    def _():
        h_sc[...] = h0_ref[0]
        c_sc[...] = c0_ref[0]

    gates = gx_ref[0, 0].astype(jnp.float32) + jnp.dot(
        h_sc[...].astype(jnp.bfloat16), whh_ref[0],
        preferred_element_type=jnp.float32)
    i = _fast_sigmoid(gates[:, 0 * HID:1 * HID])
    f = _fast_sigmoid(gates[:, 1 * HID:2 * HID])
    g = jnp.tanh(gates[:, 2 * HID:3 * HID])
    o = _fast_sigmoid(gates[:, 3 * HID:4 * HID])
    c_new = f * c_sc[...] + i * g
    h_new = o * jnp.tanh(c_new)
    h_sc[...] = h_new
    c_sc[...] = c_new
    out_ref[0, 0] = h_new.astype(out_ref.dtype)


def bilstm_layer(gx, whh, h0, c0):
    """gx: (2, T, N, 4*HID) bf16, whh: (2, HID, 4*HID) bf16, h0/c0: (2, N, HID) f32.

    Returns stacked outputs (2, T, N, HID) bf16 in original time order
    (out[1, t] is the backward hidden state at original time t).
    """
    _, T, N, _ = gx.shape

    def tsel(d, t):
        # forward direction (d=0): original time t; backward (d=1): T-1-t
        return (d, d * (T - 1 - t) + (1 - d) * t, 0, 0)

    buffered = (2 * _nbytes((1, 1, N, NG), jnp.bfloat16)
                + 2 * _nbytes((1, HID, NG), jnp.bfloat16)
                + 4 * _nbytes((1, N, HID), jnp.float32)
                + 2 * _nbytes((1, 1, N, HID), jnp.bfloat16)
                + 2 * _nbytes((N, HID), jnp.float32)
                + 5 * _nbytes((N, NG), jnp.float32))     # f32 gate temporaries
    return pl.pallas_call(
        _bilstm_layer_kernel,
        out_shape=jax.ShapeDtypeStruct((2, T, N, HID), jnp.bfloat16),
        grid_spec=pltpu.PrefetchScalarGridSpec(
            num_scalar_prefetch=0,
            grid=(2, T),
            in_specs=[
                pl.BlockSpec((1, 1, N, NG), tsel),
                # direction-dependent blocks: default buffering (Pallas skips
                # the re-DMA while the block index is unchanged within a dir).
                pl.BlockSpec((1, HID, NG), lambda d, t: (d, 0, 0)),
                pl.BlockSpec((1, N, HID), lambda d, t: (d, 0, 0)),
                pl.BlockSpec((1, N, HID), lambda d, t: (d, 0, 0)),
            ],
            out_specs=pl.BlockSpec((1, 1, N, HID), tsel),
            scratch_shapes=[pltpu.VMEM((N, HID), jnp.float32),
                            pltpu.VMEM((N, HID), jnp.float32)],
        ),
        compiler_params=_mosaic_params(("parallel", "arbitrary"), buffered),
    )(gx, whh, h0, c0)


# ----------------------------------------------------------------------------
# Fused MaxPool1d(2) + MLP classifier (Linear->ReLU->Linear->Sigmoid->Linear).
# Layer-1 hidden features arrive in [even | odd] order, so the pool is
# max(x, roll(x, HID//2)); the duplicated half is zeroed out by w1f/w1b rows.
# Output is padded to 128 lanes (lane-dense store); logits sliced in wrapper.
# ----------------------------------------------------------------------------
def _pool_mlp_kernel(y_ref, w1f_ref, w1b_ref, b1_ref,
                     w2_ref, b2_ref, w3_ref, b3_ref, out_ref):
    yf = y_ref[0].astype(jnp.float32)
    yb = y_ref[1].astype(jnp.float32)
    mf = jnp.maximum(yf, pltpu.roll(yf, shift=HID // 2, axis=1))   # MaxPool1d(2)
    mb = jnp.maximum(yb, pltpu.roll(yb, shift=HID // 2, axis=1))
    h1 = (jnp.dot(mf.astype(jnp.bfloat16), w1f_ref[...],
                  preferred_element_type=jnp.float32)
          + jnp.dot(mb.astype(jnp.bfloat16), w1b_ref[...],
                    preferred_element_type=jnp.float32)
          + b1_ref[...])
    h1 = jnp.maximum(h1, 0.0).astype(jnp.bfloat16)                 # ReLU
    h2 = jax.nn.sigmoid(
        jnp.dot(h1, w2_ref[...], preferred_element_type=jnp.float32)
        + b2_ref[...])
    out_ref[...] = (jnp.dot(h2.astype(jnp.bfloat16), w3_ref[...],
                            preferred_element_type=jnp.float32) + b3_ref[...])


def pool_and_classify(y1, mlp, B, S):
    """y1: (2, M, HID) bf16 stacked, permuted layer-1 outputs -> (B, S, 6) f32."""
    _, M, _ = y1.shape
    bm = _row_block(M)
    w1f, w1b, b1, w2p, b2p, w3p, b3p = mlp
    buffered = (2 * _nbytes((2, bm, HID), jnp.bfloat16)
                + 2 * _nbytes((HID, HID), jnp.bfloat16)
                + _nbytes((1, HID), jnp.float32)
                + _nbytes((HID, MLP_PAD), jnp.bfloat16)
                + _nbytes((MLP_PAD, MLP_PAD), jnp.bfloat16)
                + 2 * _nbytes((1, MLP_PAD), jnp.float32)
                + 2 * _nbytes((bm, MLP_PAD), jnp.float32)
                + 6 * _nbytes((bm, HID), jnp.float32))   # f32 pool/ReLU temps
    out = pl.pallas_call(
        _pool_mlp_kernel,
        out_shape=jax.ShapeDtypeStruct((M, MLP_PAD), jnp.float32),
        grid_spec=pltpu.PrefetchScalarGridSpec(
            num_scalar_prefetch=0,
            grid=(M // bm,),
            in_specs=[
                _spec((2, bm, HID), lambda i: (0, i, 0)),
                _spec((HID, HID), lambda i: (0, 0), single=True),
                _spec((HID, HID), lambda i: (0, 0), single=True),
                _spec((1, HID), lambda i: (0, 0), single=True),
                _spec((HID, MLP_PAD), lambda i: (0, 0), single=True),
                _spec((1, MLP_PAD), lambda i: (0, 0), single=True),
                _spec((MLP_PAD, MLP_PAD), lambda i: (0, 0), single=True),
                _spec((1, MLP_PAD), lambda i: (0, 0), single=True),
            ],
            out_specs=pl.BlockSpec((bm, MLP_PAD), lambda i: (i, 0)),
        ),
        compiler_params=_mosaic_params(("parallel",), buffered),
    )(y1, w1f, w1b, b1, w2p, b2p, w3p, b3p)
    return out[:, :6].reshape(B, S, 6)


# ----------------------------------------------------------------------------
# CrossEntropyLoss (mean, ignore_index=-100) -- scalar glue in plain JAX.
# ----------------------------------------------------------------------------
def cross_entropy_mean(logits, targets, ignore_index=-100):
    logits = logits.astype(jnp.float32)
    valid = targets != ignore_index
    safe_t = jnp.where(valid, targets, 0)
    logz = jax.nn.logsumexp(logits, axis=-1)
    picked = jnp.take_along_axis(logits, safe_t[:, None], axis=-1)[:, 0]
    per = logz - picked
    n = jnp.sum(valid.astype(jnp.float32))
    return jnp.sum(jnp.where(valid, per, 0.0)) / n   # nan if all ignored (as torch)


# ----------------------------------------------------------------------------
# Parameter preparation: canonical (torch-layout) params -> kernel-ready params.
# ----------------------------------------------------------------------------
def _permute_gate_cols(w):
    """Permute columns within each of the 4 gate blocks by _PERM."""
    shp = w.shape
    w4 = w.reshape(shp[:-1] + (4, HID))
    return w4[..., _PERM].reshape(shp)


def prepare_params(params):
    bf = lambda x: jnp.asarray(x, jnp.bfloat16)
    f32 = lambda x: jnp.asarray(x, jnp.float32)

    lstm = params["lstm"]           # [l0_fwd, l0_bwd, l1_fwd, l1_bwd]
    wih_l0f, whh_l0f, b_l0f = lstm[0]
    wih_l0b, whh_l0b, b_l0b = lstm[1]
    wih_l1f, whh_l1f, b_l1f = lstm[2]
    wih_l1b, whh_l1b, b_l1b = lstm[3]

    # Layer 0: fuse fwd|bwd along the gate axis; stack Whh by direction.
    l0 = dict(
        w=bf(jnp.concatenate([wih_l0f, wih_l0b], axis=1)),        # (K, 2*NG)
        b=f32(jnp.concatenate([b_l0f, b_l0b], axis=1)),           # (1, 2*NG)
        whh=bf(jnp.stack([whh_l0f, whh_l0b], axis=0)))            # (2, HID, NG)

    # Layer 1: permute hidden features to [even | odd] so MaxPool1d(2) becomes
    # a half-roll + max downstream.  (Permutes Wih/Whh gate columns, Whh rows.)
    def perm_l1(wih_t, whh_t, b):
        return (_permute_gate_cols(wih_t),
                _permute_gate_cols(whh_t[_PERM, :]),
                _permute_gate_cols(b))

    wih_l1f, whh_l1f, b_l1f = perm_l1(wih_l1f, whh_l1f, b_l1f)
    wih_l1b, whh_l1b, b_l1b = perm_l1(wih_l1b, whh_l1b, b_l1b)

    # Layer-1 Wih input is the (unpermuted) concat [h_l0_fwd | h_l0_bwd]; split
    # its rows (top/bot) and fuse both directions along the gate axis.
    w_top = jnp.concatenate([wih_l1f[:HID], wih_l1b[:HID]], axis=1)   # (HID, 2*NG)
    w_bot = jnp.concatenate([wih_l1f[HID:], wih_l1b[HID:]], axis=1)   # (HID, 2*NG)
    l1 = dict(
        w_top=bf(w_top), w_bot=bf(w_bot),
        b=f32(jnp.concatenate([b_l1f, b_l1b], axis=1)),
        whh=bf(jnp.stack([whh_l1f, whh_l1b], axis=0)))

    # MLP: W1 split into fwd/bwd halves with zero rows cancelling the rolled
    # duplicate half; W2/W3/bias padded to 128 lanes for lane-dense stores.
    w1t, b1, w2t, b2, w3t, b3 = params["mlp"]
    zeros_h = jnp.zeros((HID // 2, HID), jnp.float32)
    w1f = bf(jnp.concatenate([w1t[:HID // 2], zeros_h], axis=0))     # (384, 384)
    w1b = bf(jnp.concatenate([w1t[HID // 2:], zeros_h], axis=0))     # (384, 384)
    w2p = bf(jnp.zeros((HID, MLP_PAD), jnp.float32).at[:, :6].set(w2t))
    b2p = f32(jnp.zeros((1, MLP_PAD), jnp.float32).at[:, :6].set(b2))
    w3p = bf(jnp.zeros((MLP_PAD, MLP_PAD), jnp.float32).at[:6, :6].set(w3t))
    b3p = f32(jnp.zeros((1, MLP_PAD), jnp.float32).at[:, :6].set(b3))

    return {"l0": l0, "l1": l1,
            "mlp": (w1f, w1b, f32(b1), w2p, b2p, w3p, b3p),
            "sig_w": params["sig_w"], "sig_b": params["sig_b"]}


# ----------------------------------------------------------------------------
# Full forward (post-encoder part of ST2ModelV2.forward).
# ----------------------------------------------------------------------------
def st2_forward(sequence_output, h0, c0, kparams,
                start_positions=None, end_positions=None):
    B, S, h_enc = sequence_output.shape
    T, N = B, S          # nn.LSTM(batch_first=False) on (B, S, H): time=B, batch=S

    seq = sequence_output            # nn.Dropout at inference -> identity
    x2d = seq.reshape(T * N, h_enc).astype(jnp.bfloat16)

    p0, p1 = kparams["l0"], kparams["l1"]

    # --- layer 0 (input projection hoisted, direction-parallel recurrence) ---
    g0 = input_projection_l0(x2d, p0["w"], p0["b"])              # (2, T*N, NG)
    y0 = bilstm_layer(g0.reshape(2, T, N, NG), p0["whh"],
                      h0[0:2], c0[0:2])                          # (2, T, N, HID)

    # --- layer 1 (concat folded into split Wih; hidden features permuted) ---
    g1 = input_projection_l1(y0.reshape(2, T * N, HID),
                             p1["w_top"], p1["w_bot"], p1["b"])
    y1 = bilstm_layer(g1.reshape(2, T, N, NG), p1["whh"],
                      h0[2:4][:, :, _PERM], c0[2:4][:, :, _PERM])

    logits = pool_and_classify(y1.reshape(2, T * N, HID),
                               kparams["mlp"], B, S)             # (B, S, 6)

    start_arg0 = logits[..., 0]
    end_arg0 = logits[..., 1]
    start_arg1 = logits[..., 2]
    end_arg1 = logits[..., 3]
    start_sig = logits[..., 4]
    end_sig = logits[..., 5]

    # Tiny (B, H) @ (H, 2): plain XLA (a dedicated kernel is pure overhead).
    sig_cls_logits = seq[:, 0, :] @ kparams["sig_w"] + kparams["sig_b"]

    arg0_loss = arg1_loss = sig_loss = sig_cls_loss = total_loss = None
    if start_positions is not None and end_positions is not None:
        sp, ep = start_positions, end_positions
        arg0_loss = (cross_entropy_mean(start_arg0, sp[:, 0])
                     + cross_entropy_mean(end_arg0, ep[:, 0])) / 2
        arg1_loss = (cross_entropy_mean(start_arg1, sp[:, 1])
                     + cross_entropy_mean(end_arg1, ep[:, 1])) / 2
        sig_loss = (cross_entropy_mean(start_sig, sp[:, 2])
                    + cross_entropy_mean(end_sig, ep[:, 2])) / 2
        sig_loss = jnp.where(jnp.isnan(sig_loss), 0.0, sig_loss)
        sig_labels = (ep[:, 2] != -100).astype(jnp.int32)
        sig_cls_loss = cross_entropy_mean(sig_cls_logits, sig_labels)
        total_loss = (arg0_loss + arg1_loss + sig_loss + sig_cls_loss) / 4

    return {
        "start_arg0_logits": start_arg0,
        "end_arg0_logits": end_arg0,
        "start_arg1_logits": start_arg1,
        "end_arg1_logits": end_arg1,
        "start_sig_logits": start_sig,
        "end_sig_logits": end_sig,
        "signal_classification_logits": sig_cls_logits,
        "arg0_loss": arg0_loss,
        "arg1_loss": arg1_loss,
        "sig_loss": sig_loss,
        "signal_classification_loss": sig_cls_loss,
        "loss": total_loss,
    }


# ----------------------------------------------------------------------------
# Deterministic parameter init (canonical torch-style layout, args.mlp=True).
# ----------------------------------------------------------------------------
def init_params(key, h_enc):
    keys = iter(jax.random.split(key, 24))

    def nrm(shape, scale=0.05):
        return scale * jax.random.normal(next(keys), shape, dtype=jnp.float32)

    lstm = []
    for layer in range(2):
        in_size = h_enc if layer == 0 else 2 * HID
        for _ in range(2):                     # forward, reverse
            wih_t = nrm((in_size, NG))         # weight_ih.T
            whh_t = nrm((HID, NG))             # weight_hh.T
            bias = nrm((1, NG))                # b_ih + b_hh combined
            lstm.append((wih_t, whh_t, bias))

    mlp = (nrm((HID, HID)), nrm((1, HID)),     # Linear(384, 384)
           nrm((HID, 6)), nrm((1, 6)),         # Linear(384, 6)
           nrm((6, 6)), nrm((1, 6)))           # Linear(6, 6)

    sig_w = nrm((h_enc, 2))                    # signal_classifier Linear(H, 2)
    sig_b = nrm((1, 2))
    return {"lstm": lstm, "mlp": mlp, "sig_w": sig_w, "sig_b": sig_b}


if __name__ == "__main__":
    B, S, H_ENC = 2, 8, 128                    # small encoder hidden size
    key = jax.random.PRNGKey(0)
    k_seq, k_h0, k_c0, k_par = jax.random.split(key, 4)

    # synthetic encoder output (stands in for outputs[0] of the HF backbone)
    sequence_output = jax.random.normal(k_seq, (B, S, H_ENC), dtype=jnp.float32)
    # the PyTorch forward draws fresh randn h0/c0 of shape (4, seq_len_dim=S, hidden)
    h0 = jax.random.normal(k_h0, (4, S, HID), dtype=jnp.float32)
    c0 = jax.random.normal(k_c0, (4, S, HID), dtype=jnp.float32)

    params = init_params(k_par, H_ENC)
    kparams = prepare_params(params)           # one-time weight re-layout (bf16)

    start_positions = jnp.array([[1, 3, 2], [2, 4, -100]], dtype=jnp.int32)
    end_positions = jnp.array([[2, 5, 3], [3, 6, -100]], dtype=jnp.int32)

    fwd = jax.jit(st2_forward)
    out = fwd(sequence_output, h0, c0, kparams, start_positions, end_positions)
    jax.block_until_ready(out)
    print("KERNEL_OK")
</pallas_src>

<mosaic_0001>
module attributes {stable_mosaic.version = 11 : i64} {
  func.func @_proj_l0_kernel(%arg0: i32, %arg1: memref<16x128xbf16, #tpu.memory_space<vmem>>, %arg2: memref<128x3072xbf16, #tpu.memory_space<vmem>>, %arg3: memref<1x3072xf32, #tpu.memory_space<vmem>>, %arg4: memref<2x16x1536xbf16, #tpu.memory_space<vmem>>) attributes {dimension_semantics = [#tpu.dimension_semantics<parallel>], iteration_bounds = array<i64: 1>, scalar_prefetch = 0 : i64, scratch_operands = 0 : i64, tpu.core_type = #tpu.core_type<tc>, window_params = [{transform_indices = @transform_0, window_bounds = array<i64: 16, 128>}, {pipeline_mode = #tpu.pipeline_mode<synchronous>, transform_indices = @transform_1, window_bounds = array<i64: 128, 3072>}, {pipeline_mode = #tpu.pipeline_mode<synchronous>, transform_indices = @transform_2, window_bounds = array<i64: 1, 3072>}, {transform_indices = @transform_3, window_bounds = array<i64: 2, 16, 1536>}]} {
    %c0 = arith.constant 0 : index
    %c0_0 = arith.constant 0 : index
    %0 = vector.load %arg1[%c0, %c0_0] : memref<16x128xbf16, #tpu.memory_space<vmem>>, vector<16x128xbf16>
    %c0_1 = arith.constant 0 : index
    %c0_2 = arith.constant 0 : index
    %1 = vector.load %arg2[%c0_1, %c0_2] : memref<128x3072xbf16, #tpu.memory_space<vmem>>, vector<128x3072xbf16>
    %cst = arith.constant dense<0.000000e+00> : vector<16x3072xf32>
    %2 = tpu.matmul %0, %1, %cst {dimension_numbers = #tpu.dot_dimension_numbers<[1], [0], [0], [1], [0, 0, 1, 1], [], []>} : vector<16x128xbf16>, vector<128x3072xbf16>, vector<16x3072xf32> -> vector<16x3072xf32>
    %c0_3 = arith.constant 0 : index
    %c0_4 = arith.constant 0 : index
    %3 = vector.load %arg3[%c0_3, %c0_4] : memref<1x3072xf32, #tpu.memory_space<vmem>>, vector<1x3072xf32>
    %4 = vector.broadcast %3 : vector<1x3072xf32> to vector<16x3072xf32>
    %5 = arith.addf %2, %4 : vector<16x3072xf32>
    %6 = arith.truncf %5 : vector<16x3072xf32> to vector<16x3072xbf16>
    %7 = vector.extract_strided_slice %6 {offsets = [0, 0], sizes = [16, 1536], strides = [1, 1]} : vector<16x3072xbf16> to vector<16x1536xbf16>
    %c0_5 = arith.constant 0 : index
    %c0_6 = arith.constant 0 : index
    %c0_7 = arith.constant 0 : index
    %8 = vector.load %arg4[%c0_5, %c0_6, %c0_7] : memref<2x16x1536xbf16, #tpu.memory_space<vmem>>, vector<1x16x1536xbf16>
    %9 = vector.shape_cast %8 : vector<1x16x1536xbf16> to vector<16x1536xbf16>
    %10 = vector.shape_cast %7 : vector<16x1536xbf16> to vector<1x16x1536xbf16>
    tpu.vector_store %arg4[%c0_5, %c0_6, %c0_7], %10 {strides = array<i32>} : memref<2x16x1536xbf16, #tpu.memory_space<vmem>>, vector<1x16x1536xbf16>,
    %11 = vector.extract_strided_slice %6 {offsets = [0, 1536], sizes = [16, 1536], strides = [1, 1]} : vector<16x3072xbf16> to vector<16x1536xbf16>
    %c1 = arith.constant 1 : index
    %c0_8 = arith.constant 0 : index
    %c0_9 = arith.constant 0 : index
    %12 = vector.load %arg4[%c1, %c0_8, %c0_9] : memref<2x16x1536xbf16, #tpu.memory_space<vmem>>, vector<1x16x1536xbf16>
    %13 = vector.shape_cast %12 : vector<1x16x1536xbf16> to vector<16x1536xbf16>
    %14 = vector.shape_cast %11 : vector<16x1536xbf16> to vector<1x16x1536xbf16>
    tpu.vector_store %arg4[%c1, %c0_8, %c0_9], %14 {strides = array<i32>} : memref<2x16x1536xbf16, #tpu.memory_space<vmem>>, vector<1x16x1536xbf16>,
    return
  }
  func.func @transform_0(%arg0: i32) -> (i32, i32) {
    %c0_i32 = arith.constant 0 : i32
    %c0_i32_0 = arith.constant 0 : i32
    return %arg0, %c0_i32 : i32, i32
  }
  func.func @transform_1(%arg0: i32) -> (i32, i32) {
    %c0_i32 = arith.constant 0 : i32
    %c0_i32_0 = arith.constant 0 : i32
    %c0_i32_1 = arith.constant 0 : i32
    return %c0_i32, %c0_i32_0 : i32, i32
  }
  func.func @transform_2(%arg0: i32) -> (i32, i32) {
    %c0_i32 = arith.constant 0 : i32
    %c0_i32_0 = arith.constant 0 : i32
    %c0_i32_1 = arith.constant 0 : i32
    return %c0_i32, %c0_i32_0 : i32, i32
  }
  func.func @transform_3(%arg0: i32) -> (i32, i32, i32) {
    %c0_i32 = arith.constant 0 : i32
    %c0_i32_0 = arith.constant 0 : i32
    %c0_i32_1 = arith.constant 0 : i32
    return %c0_i32, %arg0, %c0_i32_0 : i32, i32, i32
  }
}

module attributes {stable_mosaic.version = 11 : i64} {
  func.func @_bilstm_layer_kernel(%arg0: i32, %arg1: i32, %arg2: memref<1x1x8x1536xbf16, #tpu.memory_space<vmem>>, %arg3: memref<1x384x1536xbf16, #tpu.memory_space<vmem>>, %arg4: memref<1x8x384xf32, #tpu.memory_space<vmem>>, %arg5: memref<1x8x384xf32, #tpu.memory_space<vmem>>, %arg6: memref<1x1x8x384xbf16, #tpu.memory_space<vmem>>, %arg7: memref<8x384xf32, #tpu.memory_space<vmem>>, %arg8: memref<8x384xf32, #tpu.memory_space<vmem>>) attributes {dimension_semantics = [#tpu.dimension_semantics<parallel>, #tpu.dimension_semantics<arbitrary>], iteration_bounds = array<i64: 2, 2>, scalar_prefetch = 0 : i64, scratch_operands = 2 : i64, tpu.core_type = #tpu.core_type<tc>, window_params = [{transform_indices = @transform_0, window_bounds = array<i64: 1, 1, 8, 1536>}, {transform_indices = @transform_1, window_bounds = array<i64: 1, 384, 1536>}, {transform_indices = @transform_2, window_bounds = array<i64: 1, 8, 384>}, {transform_indices = @transform_3, window_bounds = array<i64: 1, 8, 384>}, {transform_indices = @transform_4, window_bounds = array<i64: 1, 1, 8, 384>}]} {
    %c0_i32 = arith.constant 0 : i32
    %0 = arith.cmpi eq, %arg1, %c0_i32 : i32
    %1 = arith.extui %0 : i1 to i32
    %c0_i32_0 = arith.constant 0 : i32
    %2 = arith.cmpi ne, %1, %c0_i32_0 : i32
    scf.if %2 {
      %c0_28 = arith.constant 0 : index
      %c0_29 = arith.constant 0 : index
      %c0_30 = arith.constant 0 : index
      %50 = vector.load %arg4[%c0_28, %c0_29, %c0_30] : memref<1x8x384xf32, #tpu.memory_space<vmem>>, vector<1x8x384xf32>
      %51 = vector.shape_cast %50 : vector<1x8x384xf32> to vector<8x384xf32>
      %c0_31 = arith.constant 0 : index
      %c0_32 = arith.constant 0 : index
      %52 = vector.load %arg7[%c0_31, %c0_32] : memref<8x384xf32, #tpu.memory_space<vmem>>, vector<8x384xf32>
      tpu.vector_store %arg7[%c0_31, %c0_32], %51 {strides = array<i32>} : memref<8x384xf32, #tpu.memory_space<vmem>>, vector<8x384xf32>,
      %c0_33 = arith.constant 0 : index
      %c0_34 = arith.constant 0 : index
      %c0_35 = arith.constant 0 : index
      %53 = vector.load %arg5[%c0_33, %c0_34, %c0_35] : memref<1x8x384xf32, #tpu.memory_space<vmem>>, vector<1x8x384xf32>
      %54 = vector.shape_cast %53 : vector<1x8x384xf32> to vector<8x384xf32>
      %c0_36 = arith.constant 0 : index
      %c0_37 = arith.constant 0 : index
      %55 = vector.load %arg8[%c0_36, %c0_37] : memref<8x384xf32, #tpu.memory_space<vmem>>, vector<8x384xf32>
      tpu.vector_store %arg8[%c0_36, %c0_37], %54 {strides = array<i32>} : memref<8x384xf32, #tpu.memory_space<vmem>>, vector<8x384xf32>,
    } else {
    }
    %c0 = arith.constant 0 : index
    %c0_1 = arith.constant 0 : index
    %c0_2 = arith.constant 0 : index
    %c0_3 = arith.constant 0 : index
    %3 = vector.load %arg2[%c0, %c0_1, %c0_2, %c0_3] : memref<1x1x8x1536xbf16, #tpu.memory_space<vmem>>, vector<1x1x8x1536xbf16>
    %4 = vector.shape_cast %3 : vector<1x1x8x1536xbf16> to vector<8x1536xbf16>
    %5 = arith.extf %4 : vector<8x1536xbf16> to vector<8x1536xf32>
    %c0_4 = arith.constant 0 : index
    %c0_5 = arith.constant 0 : index
    %6 = vector.load %arg7[%c0_4, %c0_5] : memref<8x384xf32, #tpu.memory_space<vmem>>, vector<8x384xf32>
    %7 = arith.truncf %6 : vector<8x384xf32> to vector<8x384xbf16>
    %c0_6 = arith.constant 0 : index
    %c0_7 = arith.constant 0 : index
    %c0_8 = arith.constant 0 : index
    %8 = vector.load %arg3[%c0_6, %c0_7, %c0_8] : memref<1x384x1536xbf16, #tpu.memory_space<vmem>>, vector<1x384x1536xbf16>
    %9 = vector.shape_cast %8 : vector<1x384x1536xbf16> to vector<384x1536xbf16>
    %cst = arith.constant dense<0.000000e+00> : vector<8x1536xf32>
    %10 = tpu.matmul %7, %9, %cst {dimension_numbers = #tpu.dot_dimension_numbers<[1], [0], [0], [1], [0, 0, 1, 1], [], []>} : vector<8x384xbf16>, vector<384x1536xbf16>, vector<8x1536xf32> -> vector<8x1536xf32>
    %11 = arith.addf %5, %10 : vector<8x1536xf32>
    %12 = vector.extract_strided_slice %11 {offsets = [0, 0], sizes = [8, 384], strides = [1, 1]} : vector<8x1536xf32> to vector<8x384xf32>
    %cst_9 = arith.constant 5.000000e-01 : f32
    %13 = vector.broadcast %cst_9 : f32 to vector<8x384xf32>
    %14 = arith.mulf %13, %12 : vector<8x384xf32>
    %15 = math.tanh %14 : vector<8x384xf32>
    %cst_10 = arith.constant 5.000000e-01 : f32
    %16 = vector.broadcast %cst_10 : f32 to vector<8x384xf32>
    %17 = arith.mulf %16, %15 : vector<8x384xf32>
    %cst_11 = arith.constant 5.000000e-01 : f32
    %18 = vector.broadcast %cst_11 : f32 to vector<8x384xf32>
    %19 = arith.addf %17, %18 : vector<8x384xf32>
    %20 = vector.extract_strided_slice %11 {offsets = [0, 384], sizes = [8, 384], strides = [1, 1]} : vector<8x1536xf32> to vector<8x384xf32>
    %cst_12 = arith.constant 5.000000e-01 : f32
    %21 = vector.broadcast %cst_12 : f32 to vector<8x384xf32>
    %22 = arith.mulf %21, %20 : vector<8x384xf32>
    %23 = math.tanh %22 : vector<8x384xf32>
    %cst_13 = arith.constant 5.000000e-01 : f32
    %24 = vector.broadcast %cst_13 : f32 to vector<8x384xf32>
    %25 = arith.mulf %24, %23 : vector<8x384xf32>
    %cst_14 = arith.constant 5.000000e-01 : f32
    %26 = vector.broadcast %cst_14 : f32 to vector<8x384xf32>
    %27 = arith.addf %25, %26 : vector<8x384xf32>
    %28 = vector.extract_strided_slice %11 {offsets = [0, 768], sizes = [8, 384], strides = [1, 1]} : vector<8x1536xf32> to vector<8x384xf32>
    %29 = math.tanh %28 : vector<8x384xf32>
    %30 = vector.extract_strided_slice %11 {offsets = [0, 1152], sizes = [8, 384], strides = [1, 1]} : vector<8x1536xf32> to vector<8x384xf32>
    %cst_15 = arith.constant 5.000000e-01 : f32
    %31 = vector.broadcast %cst_15 : f32 to vector<8x384xf32>
    %32 = arith.mulf %31, %30 : vector<8x384xf32>
    %33 = math.tanh %32 : vector<8x384xf32>
    %cst_16 = arith.constant 5.000000e-01 : f32
    %34 = vector.broadcast %cst_16 : f32 to vector<8x384xf32>
    %35 = arith.mulf %34, %33 : vector<8x384xf32>
    %cst_17 = arith.constant 5.000000e-01 : f32
    %36 = vector.broadcast %cst_17 : f32 to vector<8x384xf32>
    %37 = arith.addf %35, %36 : vector<8x384xf32>
    %c0_18 = arith.constant 0 : index
    %c0_19 = arith.constant 0 : index
    %38 = vector.load %arg8[%c0_18, %c0_19] : memref<8x384xf32, #tpu.memory_space<vmem>>, vector<8x384xf32>
    %39 = arith.mulf %27, %38 : vector<8x384xf32>
    %40 = arith.mulf %19, %29 : vector<8x384xf32>
    %41 = arith.addf %39, %40 : vector<8x384xf32>
    %42 = math.tanh %41 : vector<8x384xf32>
    %43 = arith.mulf %37, %42 : vector<8x384xf32>
    %c0_20 = arith.constant 0 : index
    %c0_21 = arith.constant 0 : index
    %44 = vector.load %arg7[%c0_20, %c0_21] : memref<8x384xf32, #tpu.memory_space<vmem>>, vector<8x384xf32>
    tpu.vector_store %arg7[%c0_20, %c0_21], %43 {strides = array<i32>} : memref<8x384xf32, #tpu.memory_space<vmem>>, vector<8x384xf32>,
    %c0_22 = arith.constant 0 : index
    %c0_23 = arith.constant 0 : index
    %45 = vector.load %arg8[%c0_22, %c0_23] : memref<8x384xf32, #tpu.memory_space<vmem>>, vector<8x384xf32>
    tpu.vector_store %arg8[%c0_22, %c0_23], %41 {strides = array<i32>} : memref<8x384xf32, #tpu.memory_space<vmem>>, vector<8x384xf32>,
    %46 = arith.truncf %43 : vector<8x384xf32> to vector<8x384xbf16>
    %c0_24 = arith.constant 0 : index
    %c0_25 = arith.constant 0 : index
    %c0_26 = arith.constant 0 : index
    %c0_27 = arith.constant 0 : index
    %47 = vector.load %arg6[%c0_24, %c0_25, %c0_26, %c0_27] : memref<1x1x8x384xbf16, #tpu.memory_space<vmem>>, vector<1x1x8x384xbf16>
    %48 = vector.shape_cast %47 : vector<1x1x8x384xbf16> to vector<8x384xbf16>
    %49 = vector.shape_cast %46 : vector<8x384xbf16> to vector<1x1x8x384xbf16>
    tpu.vector_store %arg6[%c0_24, %c0_25, %c0_26, %c0_27], %49 {strides = array<i32>} : memref<1x1x8x384xbf16, #tpu.memory_space<vmem>>, vector<1x1x8x384xbf16>,
    return
  }
  func.func @transform_0(%arg0: i32, %arg1: i32) -> (i32, i32, i32, i32) {
    %c1_i32 = arith.constant 1 : i32
    %0 = arith.subi %c1_i32, %arg1 : i32
    %1 = arith.muli %arg0, %0 : i32
    %c1_i32_0 = arith.constant 1 : i32
    %2 = arith.subi %c1_i32_0, %arg0 : i32
    %3 = arith.muli %2, %arg1 : i32
    %4 = arith.addi %1, %3 : i32
    %c0_i32 = arith.constant 0 : i32
    %c0_i32_1 = arith.constant 0 : i32
    %c0_i32_2 = arith.constant 0 : i32
    return %arg0, %4, %c0_i32, %c0_i32_1 : i32, i32, i32, i32
  }
  func.func @transform_1(%arg0: i32, %arg1: i32) -> (i32, i32, i32) {
    %c0_i32 = arith.constant 0 : i32
    %c0_i32_0 = arith.constant 0 : i32
    %c0_i32_1 = arith.constant 0 : i32
    return %arg0, %c0_i32, %c0_i32_0 : i32, i32, i32
  }
  func.func @transform_2(%arg0: i32, %arg1: i32) -> (i32, i32, i32) {
    %c0_i32 = arith.constant 0 : i32
    %c0_i32_0 = arith.constant 0 : i32
    %c0_i32_1 = arith.constant 0 : i32
    return %arg0, %c0_i32, %c0_i32_0 : i32, i32, i32
  }
  func.func @transform_3(%arg0: i32, %arg1: i32) -> (i32, i32, i32) {
    %c0_i32 = arith.constant 0 : i32
    %c0_i32_0 = arith.constant 0 : i32
    %c0_i32_1 = arith.constant 0 : i32
    return %arg0, %c0_i32, %c0_i32_0 : i32, i32, i32
  }
  func.func @transform_4(%arg0: i32, %arg1: i32) -> (i32, i32, i32, i32) {
    %c1_i32 = arith.constant 1 : i32
    %0 = arith.subi %c1_i32, %arg1 : i32
    %1 = arith.muli %arg0, %0 : i32
    %c1_i32_0 = arith.constant 1 : i32
    %2 = arith.subi %c1_i32_0, %arg0 : i32
    %3 = arith.muli %2, %arg1 : i32
    %4 = arith.addi %1, %3 : i32
    %c0_i32 = arith.constant 0 : i32
    %c0_i32_1 = arith.constant 0 : i32
    %c0_i32_2 = arith.constant 0 : i32
    return %arg0, %4, %c0_i32, %c0_i32_1 : i32, i32, i32, i32
  }
}

module attributes {stable_mosaic.version = 11 : i64} {
  func.func @_proj_l1_kernel(%arg0: i32, %arg1: memref<2x16x384xbf16, #tpu.memory_space<vmem>>, %arg2: memref<384x3072xbf16, #tpu.memory_space<vmem>>, %arg3: memref<384x3072xbf16, #tpu.memory_space<vmem>>, %arg4: memref<1x3072xf32, #tpu.memory_space<vmem>>, %arg5: memref<2x16x1536xbf16, #tpu.memory_space<vmem>>) attributes {dimension_semantics = [#tpu.dimension_semantics<parallel>], iteration_bounds = array<i64: 1>, scalar_prefetch = 0 : i64, scratch_operands = 0 : i64, tpu.core_type = #tpu.core_type<tc>, window_params = [{transform_indices = @transform_0, window_bounds = array<i64: 2, 16, 384>}, {pipeline_mode = #tpu.pipeline_mode<synchronous>, transform_indices = @transform_1, window_bounds = array<i64: 384, 3072>}, {pipeline_mode = #tpu.pipeline_mode<synchronous>, transform_indices = @transform_2, window_bounds = array<i64: 384, 3072>}, {pipeline_mode = #tpu.pipeline_mode<synchronous>, transform_indices = @transform_3, window_bounds = array<i64: 1, 3072>}, {transform_indices = @transform_4, window_bounds = array<i64: 2, 16, 1536>}]} {
    %c0 = arith.constant 0 : index
    %c0_0 = arith.constant 0 : index
    %c0_1 = arith.constant 0 : index
    %0 = vector.load %arg1[%c0, %c0_0, %c0_1] : memref<2x16x384xbf16, #tpu.memory_space<vmem>>, vector<1x16x384xbf16>
    %1 = vector.shape_cast %0 : vector<1x16x384xbf16> to vector<16x384xbf16>
    %c0_2 = arith.constant 0 : index
    %c0_3 = arith.constant 0 : index
    %2 = vector.load %arg2[%c0_2, %c0_3] : memref<384x3072xbf16, #tpu.memory_space<vmem>>, vector<384x3072xbf16>
    %cst = arith.constant dense<0.000000e+00> : vector<16x3072xf32>
    %3 = tpu.matmul %1, %2, %cst {dimension_numbers = #tpu.dot_dimension_numbers<[1], [0], [0], [1], [0, 0, 1, 1], [], []>} : vector<16x384xbf16>, vector<384x3072xbf16>, vector<16x3072xf32> -> vector<16x3072xf32>
    %c1 = arith.constant 1 : index
    %c0_4 = arith.constant 0 : index
    %c0_5 = arith.constant 0 : index
    %4 = vector.load %arg1[%c1, %c0_4, %c0_5] : memref<2x16x384xbf16, #tpu.memory_space<vmem>>, vector<1x16x384xbf16>
    %5 = vector.shape_cast %4 : vector<1x16x384xbf16> to vector<16x384xbf16>
    %c0_6 = arith.constant 0 : index
    %c0_7 = arith.constant 0 : index
    %6 = vector.load %arg3[%c0_6, %c0_7] : memref<384x3072xbf16, #tpu.memory_space<vmem>>, vector<384x3072xbf16>
    %cst_8 = arith.constant dense<0.000000e+00> : vector<16x3072xf32>
    %7 = tpu.matmul %5, %6, %cst_8 {dimension_numbers = #tpu.dot_dimension_numbers<[1], [0], [0], [1], [0, 0, 1, 1], [], []>} : vector<16x384xbf16>, vector<384x3072xbf16>, vector<16x3072xf32> -> vector<16x3072xf32>
    %8 = arith.addf %3, %7 : vector<16x3072xf32>
    %c0_9 = arith.constant 0 : index
    %c0_10 = arith.constant 0 : index
    %9 = vector.load %arg4[%c0_9, %c0_10] : memref<1x3072xf32, #tpu.memory_space<vmem>>, vector<1x3072xf32>
    %10 = vector.broadcast %9 : vector<1x3072xf32> to vector<16x3072xf32>
    %11 = arith.addf %8, %10 : vector<16x3072xf32>
    %12 = arith.truncf %11 : vector<16x3072xf32> to vector<16x3072xbf16>
    %13 = vector.extract_strided_slice %12 {offsets = [0, 0], sizes = [16, 1536], strides = [1, 1]} : vector<16x3072xbf16> to vector<16x1536xbf16>
    %c0_11 = arith.constant 0 : index
    %c0_12 = arith.constant 0 : index
    %c0_13 = arith.constant 0 : index
    %14 = vector.load %arg5[%c0_11, %c0_12, %c0_13] : memref<2x16x1536xbf16, #tpu.memory_space<vmem>>, vector<1x16x1536xbf16>
    %15 = vector.shape_cast %14 : vector<1x16x1536xbf16> to vector<16x1536xbf16>
    %16 = vector.shape_cast %13 : vector<16x1536xbf16> to vector<1x16x1536xbf16>
    tpu.vector_store %arg5[%c0_11, %c0_12, %c0_13], %16 {strides = array<i32>} : memref<2x16x1536xbf16, #tpu.memory_space<vmem>>, vector<1x16x1536xbf16>,
    %17 = vector.extract_strided_slice %12 {offsets = [0, 1536], sizes = [16, 1536], strides = [1, 1]} : vector<16x3072xbf16> to vector<16x1536xbf16>
    %c1_14 = arith.constant 1 : index
    %c0_15 = arith.constant 0 : index
    %c0_16 = arith.constant 0 : index
    %18 = vector.load %arg5[%c1_14, %c0_15, %c0_16] : memref<2x16x1536xbf16, #tpu.memory_space<vmem>>, vector<1x16x1536xbf16>
    %19 = vector.shape_cast %18 : vector<1x16x1536xbf16> to vector<16x1536xbf16>
    %20 = vector.shape_cast %17 : vector<16x1536xbf16> to vector<1x16x1536xbf16>
    tpu.vector_store %arg5[%c1_14, %c0_15, %c0_16], %20 {strides = array<i32>} : memref<2x16x1536xbf16, #tpu.memory_space<vmem>>, vector<1x16x1536xbf16>,
    return
  }
  func.func @transform_0(%arg0: i32) -> (i32, i32, i32) {
    %c0_i32 = arith.constant 0 : i32
    %c0_i32_0 = arith.constant 0 : i32
    %c0_i32_1 = arith.constant 0 : i32
    return %c0_i32, %arg0, %c0_i32_0 : i32, i32, i32
  }
  func.func @transform_1(%arg0: i32) -> (i32, i32) {
    %c0_i32 = arith.constant 0 : i32
    %c0_i32_0 = arith.constant 0 : i32
    %c0_i32_1 = arith.constant 0 : i32
    return %c0_i32, %c0_i32_0 : i32, i32
  }
  func.func @transform_2(%arg0: i32) -> (i32, i32) {
    %c0_i32 = arith.constant 0 : i32
    %c0_i32_0 = arith.constant 0 : i32
    %c0_i32_1 = arith.constant 0 : i32
    return %c0_i32, %c0_i32_0 : i32, i32
  }
  func.func @transform_3(%arg0: i32) -> (i32, i32) {
    %c0_i32 = arith.constant 0 : i32
    %c0_i32_0 = arith.constant 0 : i32
    %c0_i32_1 = arith.constant 0 : i32
    return %c0_i32, %c0_i32_0 : i32, i32
  }
  func.func @transform_4(%arg0: i32) -> (i32, i32, i32) {
    %c0_i32 = arith.constant 0 : i32
    %c0_i32_0 = arith.constant 0 : i32
    %c0_i32_1 = arith.constant 0 : i32
    return %c0_i32, %arg0, %c0_i32_0 : i32, i32, i32
  }
}

module attributes {stable_mosaic.version = 11 : i64} {
  func.func @_pool_mlp_kernel(%arg0: i32, %arg1: memref<2x16x384xbf16, #tpu.memory_space<vmem>>, %arg2: memref<384x384xbf16, #tpu.memory_space<vmem>>, %arg3: memref<384x384xbf16, #tpu.memory_space<vmem>>, %arg4: memref<1x384xf32, #tpu.memory_space<vmem>>, %arg5: memref<384x128xbf16, #tpu.memory_space<vmem>>, %arg6: memref<1x128xf32, #tpu.memory_space<vmem>>, %arg7: memref<128x128xbf16, #tpu.memory_space<vmem>>, %arg8: memref<1x128xf32, #tpu.memory_space<vmem>>, %arg9: memref<16x128xf32, #tpu.memory_space<vmem>>) attributes {dimension_semantics = [#tpu.dimension_semantics<parallel>], iteration_bounds = array<i64: 1>, scalar_prefetch = 0 : i64, scratch_operands = 0 : i64, tpu.core_type = #tpu.core_type<tc>, window_params = [{transform_indices = @transform_0, window_bounds = array<i64: 2, 16, 384>}, {pipeline_mode = #tpu.pipeline_mode<synchronous>, transform_indices = @transform_1, window_bounds = array<i64: 384, 384>}, {pipeline_mode = #tpu.pipeline_mode<synchronous>, transform_indices = @transform_2, window_bounds = array<i64: 384, 384>}, {pipeline_mode = #tpu.pipeline_mode<synchronous>, transform_indices = @transform_3, window_bounds = array<i64: 1, 384>}, {pipeline_mode = #tpu.pipeline_mode<synchronous>, transform_indices = @transform_4, window_bounds = array<i64: 384, 128>}, {pipeline_mode = #tpu.pipeline_mode<synchronous>, transform_indices = @transform_5, window_bounds = array<i64: 1, 128>}, {pipeline_mode = #tpu.pipeline_mode<synchronous>, transform_indices = @transform_6, window_bounds = array<i64: 128, 128>}, {pipeline_mode = #tpu.pipeline_mode<synchronous>, transform_indices = @transform_7, window_bounds = array<i64: 1, 128>}, {transform_indices = @transform_8, window_bounds = array<i64: 16, 128>}]} {
    %c0 = arith.constant 0 : index
    %c0_0 = arith.constant 0 : index
    %c0_1 = arith.constant 0 : index
    %0 = vector.load %arg1[%c0, %c0_0, %c0_1] : memref<2x16x384xbf16, #tpu.memory_space<vmem>>, vector<1x16x384xbf16>
    %1 = vector.shape_cast %0 : vector<1x16x384xbf16> to vector<16x384xbf16>
    %2 = arith.extf %1 : vector<16x384xbf16> to vector<16x384xf32>
    %c1 = arith.constant 1 : index
    %c0_2 = arith.constant 0 : index
    %c0_3 = arith.constant 0 : index
    %3 = vector.load %arg1[%c1, %c0_2, %c0_3] : memref<2x16x384xbf16, #tpu.memory_space<vmem>>, vector<1x16x384xbf16>
    %4 = vector.shape_cast %3 : vector<1x16x384xbf16> to vector<16x384xbf16>
    %5 = arith.extf %4 : vector<16x384xbf16> to vector<16x384xf32>
    %c192_i32 = arith.constant 192 : i32
    %6 = tpu.dynamic_rotate %2 by %c192_i32 dim 1 : vector<16x384xf32>, i32 -> vector<16x384xf32>
    %7 = arith.maximumf %2, %6 : vector<16x384xf32>
    %c192_i32_4 = arith.constant 192 : i32
    %8 = tpu.dynamic_rotate %5 by %c192_i32_4 dim 1 : vector<16x384xf32>, i32 -> vector<16x384xf32>
    %9 = arith.maximumf %5, %8 : vector<16x384xf32>
    %10 = arith.truncf %7 : vector<16x384xf32> to vector<16x384xbf16>
    %c0_5 = arith.constant 0 : index
    %c0_6 = arith.constant 0 : index
    %11 = vector.load %arg2[%c0_5, %c0_6] : memref<384x384xbf16, #tpu.memory_space<vmem>>, vector<384x384xbf16>
    %cst = arith.constant dense<0.000000e+00> : vector<16x384xf32>
    %12 = tpu.matmul %10, %11, %cst {dimension_numbers = #tpu.dot_dimension_numbers<[1], [0], [0], [1], [0, 0, 1, 1], [], []>} : vector<16x384xbf16>, vector<384x384xbf16>, vector<16x384xf32> -> vector<16x384xf32>
    %13 = arith.truncf %9 : vector<16x384xf32> to vector<16x384xbf16>
    %c0_7 = arith.constant 0 : index
    %c0_8 = arith.constant 0 : index
    %14 = vector.load %arg3[%c0_7, %c0_8] : memref<384x384xbf16, #tpu.memory_space<vmem>>, vector<384x384xbf16>
    %cst_9 = arith.constant dense<0.000000e+00> : vector<16x384xf32>
    %15 = tpu.matmul %13, %14, %cst_9 {dimension_numbers = #tpu.dot_dimension_numbers<[1], [0], [0], [1], [0, 0, 1, 1], [], []>} : vector<16x384xbf16>, vector<384x384xbf16>, vector<16x384xf32> -> vector<16x384xf32>
    %16 = arith.addf %12, %15 : vector<16x384xf32>
    %c0_10 = arith.constant 0 : index
    %c0_11 = arith.constant 0 : index
    %17 = vector.load %arg4[%c0_10, %c0_11] : memref<1x384xf32, #tpu.memory_space<vmem>>, vector<1x384xf32>
    %18 = vector.broadcast %17 : vector<1x384xf32> to vector<16x384xf32>
    %19 = arith.addf %16, %18 : vector<16x384xf32>
    %cst_12 = arith.constant 0.000000e+00 : f32
    %20 = vector.broadcast %cst_12 : f32 to vector<16x384xf32>
    %21 = arith.maximumf %19, %20 : vector<16x384xf32>
    %22 = arith.truncf %21 : vector<16x384xf32> to vector<16x384xbf16>
    %c0_13 = arith.constant 0 : index
    %c0_14 = arith.constant 0 : index
    %23 = vector.load %arg5[%c0_13, %c0_14] : memref<384x128xbf16, #tpu.memory_space<vmem>>, vector<384x128xbf16>
    %cst_15 = arith.constant dense<0.000000e+00> : vector<16x128xf32>
    %24 = tpu.matmul %22, %23, %cst_15 {dimension_numbers = #tpu.dot_dimension_numbers<[1], [0], [0], [1], [0, 0, 1, 1], [], []>} : vector<16x384xbf16>, vector<384x128xbf16>, vector<16x128xf32> -> vector<16x128xf32>
    %c0_16 = arith.constant 0 : index
    %c0_17 = arith.constant 0 : index
    %25 = vector.load %arg6[%c0_16, %c0_17] : memref<1x128xf32, #tpu.memory_space<vmem>>, vector<1x128xf32>
    %26 = vector.broadcast %25 : vector<1x128xf32> to vector<16x128xf32>
    %27 = arith.addf %24, %26 : vector<16x128xf32>
    %28 = arith.negf %27 : vector<16x128xf32>
    %29 = math.exp %28 : vector<16x128xf32>
    %cst_18 = arith.constant 1.000000e+00 : f32
    %30 = vector.broadcast %cst_18 : f32 to vector<16x128xf32>
    %31 = arith.addf %30, %29 : vector<16x128xf32>
    %32 = arith.divf %30, %31 : vector<16x128xf32>
    %33 = arith.truncf %32 : vector<16x128xf32> to vector<16x128xbf16>
    %c0_19 = arith.constant 0 : index
    %c0_20 = arith.constant 0 : index
    %34 = vector.load %arg7[%c0_19, %c0_20] : memref<128x128xbf16, #tpu.memory_space<vmem>>, vector<128x128xbf16>
    %cst_21 = arith.constant dense<0.000000e+00> : vector<16x128xf32>
    %35 = tpu.matmul %33, %34, %cst_21 {dimension_numbers = #tpu.dot_dimension_numbers<[1], [0], [0], [1], [0, 0, 1, 1], [], []>} : vector<16x128xbf16>, vector<128x128xbf16>, vector<16x128xf32> -> vector<16x128xf32>
    %c0_22 = arith.constant 0 : index
    %c0_23 = arith.constant 0 : index
    %36 = vector.load %arg8[%c0_22, %c0_23] : memref<1x128xf32, #tpu.memory_space<vmem>>, vector<1x128xf32>
    %37 = vector.broadcast %36 : vector<1x128xf32> to vector<16x128xf32>
    %38 = arith.addf %35, %37 : vector<16x128xf32>
    %c0_24 = arith.constant 0 : index
    %c0_25 = arith.constant 0 : index
    %39 = vector.load %arg9[%c0_24, %c0_25] : memref<16x128xf32, #tpu.memory_space<vmem>>, vector<16x128xf32>
    tpu.vector_store %arg9[%c0_24, %c0_25], %38 {strides = array<i32>} : memref<16x128xf32, #tpu.memory_space<vmem>>, vector<16x128xf32>,
    return
  }
  func.func @transform_0(%arg0: i32) -> (i32, i32, i32) {
    %c0_i32 = arith.constant 0 : i32
    %c0_i32_0 = arith.constant 0 : i32
    %c0_i32_1 = arith.constant 0 : i32
    return %c0_i32, %arg0, %c0_i32_0 : i32, i32, i32
  }
  func.func @transform_1(%arg0: i32) -> (i32, i32) {
    %c0_i32 = arith.constant 0 : i32
    %c0_i32_0 = arith.constant 0 : i32
    %c0_i32_1 = arith.constant 0 : i32
    return %c0_i32, %c0_i32_0 : i32, i32
  }
  func.func @transform_2(%arg0: i32) -> (i32, i32) {
    %c0_i32 = arith.constant 0 : i32
    %c0_i32_0 = arith.constant 0 : i32
    %c0_i32_1 = arith.constant 0 : i32
    return %c0_i32, %c0_i32_0 : i32, i32
  }
  func.func @transform_3(%arg0: i32) -> (i32, i32) {
    %c0_i32 = arith.constant 0 : i32
    %c0_i32_0 = arith.constant 0 : i32
    %c0_i32_1 = arith.constant 0 : i32
    return %c0_i32, %c0_i32_0 : i32, i32
  }
  func.func @transform_4(%arg0: i32) -> (i32, i32) {
    %c0_i32 = arith.constant 0 : i32
    %c0_i32_0 = arith.constant 0 : i32
    %c0_i32_1 = arith.constant 0 : i32
    return %c0_i32, %c0_i32_0 : i32, i32
  }
  func.func @transform_5(%arg0: i32) -> (i32, i32) {
    %c0_i32 = arith.constant 0 : i32
    %c0_i32_0 = arith.constant 0 : i32
    %c0_i32_1 = arith.constant 0 : i32
    return %c0_i32, %c0_i32_0 : i32, i32
  }
  func.func @transform_6(%arg0: i32) -> (i32, i32) {
    %c0_i32 = arith.constant 0 : i32
    %c0_i32_0 = arith.constant 0 : i32
    %c0_i32_1 = arith.constant 0 : i32
    return %c0_i32, %c0_i32_0 : i32, i32
  }
  func.func @transform_7(%arg0: i32) -> (i32, i32) {
    %c0_i32 = arith.constant 0 : i32
    %c0_i32_0 = arith.constant 0 : i32
    %c0_i32_1 = arith.constant 0 : i32
    return %c0_i32, %c0_i32_0 : i32, i32
  }
  func.func @transform_8(%arg0: i32) -> (i32, i32) {
    %c0_i32 = arith.constant 0 : i32
    %c0_i32_0 = arith.constant 0 : i32
    return %arg0, %c0_i32 : i32, i32
  }
}

</mosaic_0001>

<bundles_post_ra>
// kernel: st2_forward.5
= control target key start
LH: loop header
LB: loop body
LE: loop exit
PB: predicated region body
PF: predicated region fallthrough
CT: control target
= control target key end

     0   :  { %8 = vsyncpa [#allocation3], 0  ;;  %s2515_s0 = inlined_call_operand.vmem [shape: bf16[16,128], index: 0, kind: input, shape index: {}]   ;;  %s2516_s1 = inlined_call_operand.hbm [shape: bf16[128,3072], index: 1, kind: input, shape index: {}]   ;;  %s2517_s2 = inlined_call_operand.hbm [shape: f32[1,3072], index: 2, kind: input, shape index: {}]   ;;  %s2518_s3 = inlined_call_operand.vmem [shape: bf16[2,16,1536], index: 3, kind: output, shape index: {}]  }
   0x1   :  { %9 = vsyncpa [#allocation5], 0  ;;  %s2325_s12 = smov [#allocation2]   ;;  %s2277_s16 = scalar_lea.hbm %s2516_s1, 24576 }
   0x2   :  { %s17_s13 = sshll.u32 %s2325_s12, 4  ;;  %p2278_p0 = scmp.ne.s32.totalorder %s2516_s1, %s2277_s16  ;;  %s18_s13 = int_to_ptr.vmem [resolvable:$true] %s17_s13 }
   0x3   :  { %p2281_p1 = scmp.lt.u32.totalorder %s2277_s16, %s2516_s1 }
   0x5   :  { %p2283_p2 = pnand %p2281_p1, %p2278_p0 }
   0x7   :  { %2286 = shalt.err (!%p2283_p2)
}
   0x8   :  { %s2287_s21 = scalar_lea.vmem %s18_s13, 24576  ;;  %p2292_p4 = scmp.lt.s32.totalorder %s18_s13, %s18_s13 }
   0x9   :  { %p2288_p3 = scmp.ne.s32.totalorder %s18_s13, %s2287_s21  ;;  %p2293_p5 = scmp.lt.s32.totalorder %s2287_s21, %s2287_s21 }
   0xb   :  { %p2294_p6 = por %p2293_p5, %p2292_p4 }
   0xd   :  { %p2295_p7 = pnand %p2294_p6, %p2288_p3 }
   0xf   :  { %2298 = shalt.err (!%p2295_p7)
}
  0x10   :  { %s2326_s22 = smov 1536   ;;  %s2327_s23 = smov 96  }
  0x11   :  { %23 = dma.hbm_to_vmem [thread:$0]  %s2516_s1, 24576, %s18_s13, [#allocation3], %s2326_s22, %s2326_s22, %s2327_s23  }
  0x12   :  { %s2328_s26 = smov [#allocation4]   ;;  %s2299_s30 = scalar_lea.hbm %s2517_s2, 384 }
  0x13   :  { %s30_s27 = sshll.u32 %s2328_s26, 4  ;;  %p2300_p8 = scmp.ne.s32.totalorder %s2517_s2, %s2299_s30  ;;  %s31_s27 = int_to_ptr.vmem [resolvable:$true] %s30_s27 }
  0x14   :  { %p2303_p9 = scmp.lt.u32.totalorder %s2299_s30, %s2517_s2 }
  0x16   :  { %p2305_p10 = pnand %p2303_p9, %p2300_p8 }
  0x18   :  { %2308 = shalt.err (!%p2305_p10)
}
  0x19   :  { %s2309_s8 = scalar_lea.vmem %s31_s27, 384  ;;  %p2314_p12 = scmp.lt.s32.totalorder %s31_s27, %s31_s27 }
  0x1a   :  { %p2310_p11 = scmp.ne.s32.totalorder %s31_s27, %s2309_s8  ;;  %p2315_p13 = scmp.lt.s32.totalorder %s2309_s8, %s2309_s8 }
  0x1c   :  { %p2316_p0 = por %p2315_p13, %p2314_p12 }
  0x1e   :  { %p2317_p1 = pnand %p2316_p0, %p2310_p11 }
  0x20   :  { %2320 = shalt.err (!%p2317_p1)
}
  0x21   :  { %33 = dma.hbm_to_vmem [thread:$0]  %s2517_s2, 384, %s31_s27, [#allocation5]  }
  0x22   :  { %2321 = dma.done.wait [#allocation3], 24576  }
  0x23   :  { %2322 = vsyncadd [#allocation3], 4294942720 }
  0x24   :  { %2323 = dma.done.wait [#allocation5], 384  }
  0x25   :  { %2324 = vsyncadd [#allocation5], 4294966912  ;;  %v2329_v0 = vmov 0   ;;  %v43_v1 = vld [vmem:[#allocation2] sm:$0xff]  ;;  %v44_v3 = vld [vmem:[#allocation2 + $0x8] sm:$0xff] }
  0x26   :  { %1359 = vmatprep.mubr.bf16.mxu0 %v2329_v0  ;;  %1402 = vmatprep.mubr.bf16.mxu1 %v2329_v0  ;;  %v55_v2 = vld [vmem:[#allocation2 + $0x60] sm:$0xff]  ;;  %v56_v5 = vld [vmem:[#allocation2 + $0x68] sm:$0xff]  ;;  %v45_v63 = vld [vmem:[#allocation2 + $0x10] sm:$0xff] }
  0x27   :  { %v2020_v4 = vcombine.high %v43_v1, %v55_v2  ;;  %v2019_v6 = vcombine.low %v43_v1, %v55_v2  ;;  %v67_v7 = vld [vmem:[#allocation2 + $0xc0] sm:$0xff]  ;;  %v2022_v9 = vcombine.high %v44_v3, %v56_v5  ;;  %v2021_v10 = vcombine.low %v44_v3, %v56_v5  ;;  %v68_v12 = vld [vmem:[#allocation2 + $0xc8] sm:$0xff]  ;;  %v57_v1 = vld [vmem:[#allocation2 + $0x70] sm:$0xff] }
  0x28   :  { %v79_v8 = vld [vmem:[#allocation2 + $0x120] sm:$0xff]  ;;  %v80_v13 = vld [vmem:[#allocation2 + $0x128] sm:$0xff]  ;;  %v46_v2 = vld [vmem:[#allocation2 + $0x18] sm:$0xff] }
  0x29   :  { %v2044_v11 = vcombine.high %v67_v7, %v79_v8  ;;  %v91_v14 = vld [vmem:[#allocation2 + $0x180] sm:$0xff]  ;;  %1327 = vmatprep.subr.bf16.mxu0 %v2020_v4  ;;  %v2046_v15 = vcombine.high %v68_v12, %v80_v13  ;;  %v92_v17 = vld [vmem:[#allocation2 + $0x188] sm:$0xff]  ;;  %1370 = vmatprep.subr.bf16.mxu1 %v2022_v9  ;;  %v2043_v19 = vcombine.low %v67_v7, %v79_v8  ;;  %v58_v3 = vld [vmem:[#allocation2 + $0x78] sm:$0xff] }
  0x2a   :  { %v103_v16 = vld [vmem:[#allocation2 + $0x1e0] sm:$0xff]  ;;  %v104_v18 = vld [vmem:[#allocation2 + $0x1e8] sm:$0xff]  ;;  %1328 = vmatpush1.bf16.msra.mxu0 %v2019_v6  ;;  %1371 = vmatpush1.bf16.msra.mxu1 %v2021_v10  ;;  %v2045_v20 = vcombine.low %v68_v12, %v80_v13  ;;  %v2024_v6 = vcombine.high %v45_v63, %v57_v1  ;;  %v2026_v7 = vcombine.high %v46_v2, %v58_v3  ;;  %v69_v8 = vld [vmem:[#allocation2 + $0xd0] sm:$0xff] }
  0x2b   :  { %1329 = vmatprep.subr.bf16.mxu0 %v2044_v11  ;;  %v2068_v21 = vcombine.high %v91_v14, %v103_v16  ;;  %1372 = vmatprep.subr.bf16.mxu1 %v2046_v15  ;;  %v2070_v22 = vcombine.high %v92_v17, %v104_v18  ;;  %v115_v23 = vld [vmem:[#allocation2 + $0x240] sm:$0xff]  ;;  %v116_v25 = vld [vmem:[#allocation2 + $0x248] sm:$0xff]  ;;  %v2067_v27 = vcombine.low %v91_v14, %v103_v16  ;;  %v81_v9 = vld [vmem:[#allocation2 + $0x130] sm:$0xff] }
  0x2c   :  { %v127_v24 = vld [vmem:[#allocation2 + $0x2a0] sm:$0xff]  ;;  %v128_v26 = vld [vmem:[#allocation2 + $0x2a8] sm:$0xff]  ;;  %v2069_v28 = vcombine.low %v92_v17, %v104_v18  ;;  %v70_v11 = vld [vmem:[#allocation2 + $0xd8] sm:$0xff]  ;;  %v2023_v13 = vcombine.low %v45_v63, %v57_v1  ;;  %v2025_v14 = vcombine.low %v46_v2, %v58_v3  ;;  %v2048_v15 = vcombine.high %v69_v8, %v81_v9 }
  0x2d   :  { %v2092_v29 = vcombine.high %v115_v23, %v127_v24  ;;  %v2094_v30 = vcombine.high %v116_v25, %v128_v26  ;;  %v139_v31 = vld [vmem:[#allocation2 + $0x300] sm:$0xff]  ;;  %v140_v33 = vld [vmem:[#allocation2 + $0x308] sm:$0xff]  ;;  %v2091_v35 = vcombine.low %v115_v23, %v127_v24  ;;  %v2093_v36 = vcombine.low %v116_v25, %v128_v26  ;;  %v82_v12 = vld [vmem:[#allocation2 + $0x138] sm:$0xff] }
  0x2e   :  { %1330 = vmatpush1.bf16.msra.mxu0 %v2043_v19  ;;  %1373 = vmatpush1.bf16.msra.mxu1 %v2045_v20  ;;  %v151_v32 = vld [vmem:[#allocation2 + $0x360] sm:$0xff]  ;;  %v152_v34 = vld [vmem:[#allocation2 + $0x368] sm:$0xff]  ;;  %v2050_v16 = vcombine.high %v70_v11, %v82_v12  ;;  %v93_v17 = vld [vmem:[#allocation2 + $0x190] sm:$0xff] }
  0x2f   :  { %1331 = vmatprep.subr.bf16.mxu0 %v2068_v21  ;;  %1374 = vmatprep.subr.bf16.mxu1 %v2070_v22  ;;  %v2116_v37 = vcombine.high %v139_v31, %v151_v32  ;;  %v2118_v38 = vcombine.high %v140_v33, %v152_v34  ;;  %v163_v39 = vld [vmem:[#allocation2 + $0x3c0] sm:$0xff]  ;;  %v164_v41 = vld [vmem:[#allocation2 + $0x3c8] sm:$0xff]  ;;  %v2115_v43 = vcombine.low %v139_v31, %v151_v32  ;;  %v105_v18 = vld [vmem:[#allocation2 + $0x1f0] sm:$0xff] }
  0x30   :  { %v175_v40 = vld [vmem:[#allocation2 + $0x420] sm:$0xff]  ;;  %v176_v42 = vld [vmem:[#allocation2 + $0x428] sm:$0xff]  ;;  %v2117_v44 = vcombine.low %v140_v33, %v152_v34  ;;  %v94_v19 = vld [vmem:[#allocation2 + $0x198] sm:$0xff]  ;;  %v2047_v21 = vcombine.low %v69_v8, %v81_v9  ;;  %v2049_v22 = vcombine.low %v70_v11, %v82_v12  ;;  %v2072_v23 = vcombine.high %v93_v17, %v105_v18 }
  0x31   :  { %v2140_v45 = vcombine.high %v163_v39, %v175_v40  ;;  %v2142_v46 = vcombine.high %v164_v41, %v176_v42  ;;  %v187_v47 = vld [vmem:[#allocation2 + $0x480] sm:$0xff]  ;;  %v188_v49 = vld [vmem:[#allocation2 + $0x488] sm:$0xff]  ;;  %v2139_v51 = vcombine.low %v163_v39, %v175_v40  ;;  %v2141_v52 = vcombine.low %v164_v41, %v176_v42  ;;  %v106_v20 = vld [vmem:[#allocation2 + $0x1f8] sm:$0xff] }
  0x32   :  { %1332 = vmatpush1.bf16.msra.mxu0 %v2067_v27  ;;  %1375 = vmatpush1.bf16.msra.mxu1 %v2069_v28  ;;  %v199_v48 = vld [vmem:[#allocation2 + $0x4e0] sm:$0xff]  ;;  %v200_v50 = vld [vmem:[#allocation2 + $0x4e8] sm:$0xff]  ;;  %v2074_v24 = vcombine.high %v94_v19, %v106_v20  ;;  %v117_v25 = vld [vmem:[#allocation2 + $0x250] sm:$0xff] }
  0x33   :  { %1333 = vmatprep.subr.bf16.mxu0 %v2092_v29  ;;  %1376 = vmatprep.subr.bf16.mxu1 %v2094_v30  ;;  %v2164_v53 = vcombine.high %v187_v47, %v199_v48  ;;  %v2166_v54 = vcombine.high %v188_v49, %v200_v50  ;;  %v211_v55 = vld [vmem:[#allocation2 + $0x540] sm:$0xff]  ;;  %v212_v57 = vld [vmem:[#allocation2 + $0x548] sm:$0xff]  ;;  %v2163_v59 = vcombine.low %v187_v47, %v199_v48  ;;  %v129_v26 = vld [vmem:[#allocation2 + $0x2b0] sm:$0xff] }
  0x34   :  { %v223_v56 = vld [vmem:[#allocation2 + $0x5a0] sm:$0xff]  ;;  %v224_v58 = vld [vmem:[#allocation2 + $0x5a8] sm:$0xff]  ;;  %v2165_v60 = vcombine.low %v188_v49, %v200_v50  ;;  %v118_v27 = vld [vmem:[#allocation2 + $0x258] sm:$0xff]  ;;  %v2071_v29 = vcombine.low %v93_v17, %v105_v18  ;;  %v2073_v30 = vcombine.low %v94_v19, %v106_v20  ;;  %v2096_v31 = vcombine.high %v117_v25, %v129_v26 }
  0x35   :  { %v2188_v61 = vcombine.high %v211_v55, %v223_v56  ;;  %v2190_v62 = vcombine.high %v212_v57, %v224_v58  ;;  %v2187_v4 = vcombine.low %v211_v55, %v223_v56  ;;  %v2189_v5 = vcombine.low %v212_v57, %v224_v58  ;;  %v2379_v10 = vld [vmem:[%s2515_s0] sm:$0xff]   ;;  %v130_v28 = vld [vmem:[#allocation2 + $0x2b8] sm:$0xff]  ;;  %v141_v33 = vld [vmem:[#allocation2 + $0x310] sm:$0xff] }
  0x36   :  { %1334 = vmatpush1.bf16.msra.mxu0 %v2091_v35  ;;  %1377 = vmatpush1.bf16.msra.mxu1 %v2093_v36  ;;  %v2098_v32 = vcombine.high %v118_v27, %v130_v28  ;;  %v153_v34 = vld [vmem:[#allocation2 + $0x370] sm:$0xff]  ;;  %v142_v35 = vld [vmem:[#allocation2 + $0x318] sm:$0xff]  ;;  %v47_v2 = vld [vmem:[#allocation2 + $0x20] sm:$0xff] }
  0x37   :  { %1335 = vmatprep.subr.bf16.mxu0 %v2116_v37  ;;  %1378 = vmatprep.subr.bf16.mxu1 %v2118_v38  ;;  %v154_v36 = vld [vmem:[#allocation2 + $0x378] sm:$0xff]  ;;  %v2095_v37 = vcombine.low %v117_v25, %v129_v26  ;;  %v2097_v38 = vcombine.low %v118_v27, %v130_v28  ;;  %v2120_v39 = vcombine.high %v141_v33, %v153_v34  ;;  %v165_v41 = vld [vmem:[#allocation2 + $0x3d0] sm:$0xff]  ;;  %v59_v3 = vld [vmem:[#allocation2 + $0x80] sm:$0xff] }
  0x38   :  { %v2122_v40 = vcombine.high %v142_v35, %v154_v36  ;;  %v177_v42 = vld [vmem:[#allocation2 + $0x430] sm:$0xff]  ;;  %v2028_v8 = vcombine.high %v47_v2, %v59_v3  ;;  %v71_v11 = vld [vmem:[#allocation2 + $0xe0] sm:$0xff] }
  0x39   :  { %v2144_v47 = vcombine.high %v165_v41, %v177_v42  ;;  %v189_v49 = vld [vmem:[#allocation2 + $0x490] sm:$0xff]  ;;  %v83_v12 = vld [vmem:[#allocation2 + $0x140] sm:$0xff] }
  0x3a   :  { %1336 = vmatpush1.bf16.msra.mxu0 %v2115_v43  ;;  %1379 = vmatpush1.bf16.msra.mxu1 %v2117_v44  ;;  %v166_v43 = vld [vmem:[#allocation2 + $0x3d8] sm:$0xff]  ;;  %v201_v50 = vld [vmem:[#allocation2 + $0x4f0] sm:$0xff]  ;;  %v2052_v17 = vcombine.high %v71_v11, %v83_v12  ;;  %v95_v19 = vld [vmem:[#allocation2 + $0x1a0] sm:$0xff] }
  0x3b   :  { %1337 = vmatprep.subr.bf16.mxu0 %v2140_v45  ;;  %1380 = vmatprep.subr.bf16.mxu1 %v2142_v46  ;;  %v178_v44 = vld [vmem:[#allocation2 + $0x438] sm:$0xff]  ;;  %v2119_v45 = vcombine.low %v141_v33, %v153_v34  ;;  %v2121_v46 = vcombine.low %v142_v35, %v154_v36  ;;  %v2168_v55 = vcombine.high %v189_v49, %v201_v50  ;;  %v213_v57 = vld [vmem:[#allocation2 + $0x550] sm:$0xff]  ;;  %v107_v20 = vld [vmem:[#allocation2 + $0x200] sm:$0xff] }
  0x3c   :  { %v2146_v48 = vcombine.high %v166_v43, %v178_v44  ;;  %v225_v58 = vld [vmem:[#allocation2 + $0x5b0] sm:$0xff]  ;;  %v2076_v25 = vcombine.high %v95_v19, %v107_v20  ;;  %v119_v27 = vld [vmem:[#allocation2 + $0x260] sm:$0xff] }
  0x3d   :  { %v2192_v63 = vcombine.high %v213_v57, %v225_v58  ;;  %v131_v28 = vld [vmem:[#allocation2 + $0x2c0] sm:$0xff] }
  0x3e   :  { %1338 = vmatpush1.bf16.msra.mxu0 %v2139_v51  ;;  %1381 = vmatpush1.bf16.msra.mxu1 %v2141_v52  ;;  %v190_v51 = vld [vmem:[#allocation2 + $0x498] sm:$0xff]  ;;  %v2100_v33 = vcombine.high %v119_v27, %v131_v28  ;;  %v143_v35 = vld [vmem:[#allocation2 + $0x320] sm:$0xff] }
  0x3f   :  { %1339 = vmatprep.subr.bf16.mxu0 %v2164_v53  ;;  %1382 = vmatprep.subr.bf16.mxu1 %v2166_v54  ;;  %v202_v52 = vld [vmem:[#allocation2 + $0x4f8] sm:$0xff]  ;;  %v2143_v53 = vcombine.low %v165_v41, %v177_v42  ;;  %v2145_v54 = vcombine.low %v166_v43, %v178_v44  ;;  %v155_v36 = vld [vmem:[#allocation2 + $0x380] sm:$0xff] }
  0x40   :  { %v2170_v56 = vcombine.high %v190_v51, %v202_v52  ;;  %v2124_v41 = vcombine.high %v143_v35, %v155_v36  ;;  %v167_v43 = vld [vmem:[#allocation2 + $0x3e0] sm:$0xff] }
  0x41   :  { %v179_v44 = vld [vmem:[#allocation2 + $0x440] sm:$0xff] }
  0x42   :  { %1340 = vmatpush1.bf16.msra.mxu0 %v2163_v59  ;;  %1383 = vmatpush1.bf16.msra.mxu1 %v2165_v60  ;;  %v214_v59 = vld [vmem:[#allocation2 + $0x558] sm:$0xff] }
  0x43   :  { %1341 = vmatprep.subr.bf16.mxu0 %v2188_v61  ;;  %1384 = vmatprep.subr.bf16.mxu1 %v2190_v62  ;;  %v226_v60 = vld [vmem:[#allocation2 + $0x5b8] sm:$0xff]  ;;  %v2167_v61 = vcombine.low %v189_v49, %v201_v50  ;;  %v2169_v62 = vcombine.low %v190_v51, %v202_v52  ;;  %v2148_v49 = vcombine.high %v167_v43, %v179_v44  ;;  %v191_v51 = vld [vmem:[#allocation2 + $0x4a0] sm:$0xff] }
  0x44   :  { %v2194_v1 = vcombine.high %v214_v59, %v226_v60  ;;  %v203_v52 = vld [vmem:[#allocation2 + $0x500] sm:$0xff] }
  0x46   :  { %1342 = vmatpush1.bf16.msra.mxu0 %v2187_v4  ;;  %1385 = vmatpush1.bf16.msra.mxu1 %v2189_v5  ;;  %v48_v4 = vld [vmem:[#allocation2 + $0x28] sm:$0xff] }
  0x47   :  { %1413 = vmatprep.subr.bf16.mxu0 %v2024_v6  ;;  %1456 = vmatprep.subr.bf16.mxu1 %v2026_v7  ;;  %v60_v5 = vld [vmem:[#allocation2 + $0x88] sm:$0xff]  ;;  %v2191_v6 = vcombine.low %v213_v57, %v225_v58  ;;  %v2193_v7 = vcombine.low %v214_v59, %v226_v60  ;;  %v2172_v57 = vcombine.high %v191_v51, %v203_v52  ;;  %v215_v59 = vld [vmem:[#allocation2 + $0x560] sm:$0xff] }
  0x48   :  { %v2030_v9 = vcombine.high %v48_v4, %v60_v5  ;;  %v227_v60 = vld [vmem:[#allocation2 + $0x5c0] sm:$0xff] }
  0x49   :  { %1360 = vmatmul.mubr.bf16.vlgmr.msra.gmra.mrb[0].mxu0 %v2379_v10  ;;  %1403 = vmatmul.mubr.bf16.vlgmr.msra.gmra.mrb[0].mxu1 %v2379_v10 }
  0x4a   :  { %1414 = vmatpush1.bf16.msra.mxu0 %v2023_v13  ;;  %1457 = vmatpush1.bf16.msra.mxu1 %v2025_v14  ;;  %v72_v13 = vld [vmem:[#allocation2 + $0xe8] sm:$0xff] }
  0x4b   :  { %1415 = vmatprep.subr.bf16.mxu0 %v2048_v15  ;;  %1458 = vmatprep.subr.bf16.mxu1 %v2050_v16  ;;  %v84_v14 = vld [vmem:[#allocation2 + $0x148] sm:$0xff]  ;;  %v2027_v15 = vcombine.low %v47_v2, %v59_v3  ;;  %v2029_v16 = vcombine.low %v48_v4, %v60_v5  ;;  %v2196_v2 = vcombine.high %v215_v59, %v227_v60  ;;  %v49_v4 = vld [vmem:[#allocation2 + $0x30] sm:$0xff] }
  0x4c   :  { %1445 = vmatprep.mubr.bf16.mxu0 %v2329_v0  ;;  %1488 = vmatprep.mubr.bf16.mxu1 %v2329_v0  ;;  %v2054_v18 = vcombine.high %v72_v13, %v84_v14  ;;  %v61_v5 = vld [vmem:[#allocation2 + $0x90] sm:$0xff] }
  0x4e   :  { %1416 = vmatpush1.bf16.msra.mxu0 %v2047_v21  ;;  %1459 = vmatpush1.bf16.msra.mxu1 %v2049_v22  ;;  %v96_v21 = vld [vmem:[#allocation2 + $0x1a8] sm:$0xff] }
  0x4f   :  { %1417 = vmatprep.subr.bf16.mxu0 %v2072_v23  ;;  %1460 = vmatprep.subr.bf16.mxu1 %v2074_v24  ;;  %v108_v22 = vld [vmem:[#allocation2 + $0x208] sm:$0xff]  ;;  %v2051_v23 = vcombine.low %v71_v11, %v83_v12  ;;  %v2053_v24 = vcombine.low %v72_v13, %v84_v14  ;;  %v2032_v11 = vcombine.high %v49_v4, %v61_v5  ;;  %v73_v13 = vld [vmem:[#allocation2 + $0xf0] sm:$0xff] }
  0x50   :  { %v2078_v26 = vcombine.high %v96_v21, %v108_v22  ;;  %v85_v14 = vld [vmem:[#allocation2 + $0x150] sm:$0xff] }
  0x52   :  { %1418 = vmatpush1.bf16.msra.mxu0 %v2071_v29  ;;  %1461 = vmatpush1.bf16.msra.mxu1 %v2073_v30  ;;  %v120_v29 = vld [vmem:[#allocation2 + $0x268] sm:$0xff] }
  0x53   :  { %1419 = vmatprep.subr.bf16.mxu0 %v2096_v31  ;;  %1462 = vmatprep.subr.bf16.mxu1 %v2098_v32  ;;  %v132_v30 = vld [vmem:[#allocation2 + $0x2c8] sm:$0xff]  ;;  %v2075_v31 = vcombine.low %v95_v19, %v107_v20  ;;  %v2077_v32 = vcombine.low %v96_v21, %v108_v22  ;;  %v2056_v19 = vcombine.high %v73_v13, %v85_v14  ;;  %v97_v21 = vld [vmem:[#allocation2 + $0x1b0] sm:$0xff] }
  0x54   :  { %v2102_v34 = vcombine.high %v120_v29, %v132_v30  ;;  %v109_v22 = vld [vmem:[#allocation2 + $0x210] sm:$0xff] }
  0x56   :  { %1420 = vmatpush1.bf16.msra.mxu0 %v2095_v37  ;;  %1463 = vmatpush1.bf16.msra.mxu1 %v2097_v38  ;;  %v144_v37 = vld [vmem:[#allocation2 + $0x328] sm:$0xff] }
  0x57   :  { %1421 = vmatprep.subr.bf16.mxu0 %v2120_v39  ;;  %1464 = vmatprep.subr.bf16.mxu1 %v2122_v40  ;;  %v156_v38 = vld [vmem:[#allocation2 + $0x388] sm:$0xff]  ;;  %v2099_v39 = vcombine.low %v119_v27, %v131_v28  ;;  %v2101_v40 = vcombine.low %v120_v29, %v132_v30  ;;  %v2080_v27 = vcombine.high %v97_v21, %v109_v22  ;;  %v121_v29 = vld [vmem:[#allocation2 + $0x270] sm:$0xff] }
  0x58   :  { %v2126_v42 = vcombine.high %v144_v37, %v156_v38  ;;  %v133_v30 = vld [vmem:[#allocation2 + $0x2d0] sm:$0xff] }
  0x5a   :  { %1422 = vmatpush1.bf16.msra.mxu0 %v2119_v45  ;;  %1465 = vmatpush1.bf16.msra.mxu1 %v2121_v46  ;;  %v168_v45 = vld [vmem:[#allocation2 + $0x3e8] sm:$0xff] }
  0x5b   :  { %1423 = vmatprep.subr.bf16.mxu0 %v2144_v47  ;;  %1466 = vmatprep.subr.bf16.mxu1 %v2146_v48  ;;  %v180_v46 = vld [vmem:[#allocation2 + $0x448] sm:$0xff]  ;;  %v2123_v47 = vcombine.low %v143_v35, %v155_v36  ;;  %v2125_v48 = vcombine.low %v144_v37, %v156_v38  ;;  %v2104_v35 = vcombine.high %v121_v29, %v133_v30  ;;  %v145_v37 = vld [vmem:[#allocation2 + $0x330] sm:$0xff] }
  0x5c   :  { %v2150_v50 = vcombine.high %v168_v45, %v180_v46  ;;  %v157_v38 = vld [vmem:[#allocation2 + $0x390] sm:$0xff] }
  0x5e   :  { %1424 = vmatpush1.bf16.msra.mxu0 %v2143_v53  ;;  %1467 = vmatpush1.bf16.msra.mxu1 %v2145_v54  ;;  %v192_v53 = vld [vmem:[#allocation2 + $0x4a8] sm:$0xff] }
  0x5f   :  { %1425 = vmatprep.subr.bf16.mxu0 %v2168_v55  ;;  %1468 = vmatprep.subr.bf16.mxu1 %v2170_v56  ;;  %v204_v54 = vld [vmem:[#allocation2 + $0x508] sm:$0xff]  ;;  %v2147_v55 = vcombine.low %v167_v43, %v179_v44  ;;  %v2149_v56 = vcombine.low %v168_v45, %v180_v46  ;;  %v2128_v43 = vcombine.high %v145_v37, %v157_v38  ;;  %v169_v45 = vld [vmem:[#allocation2 + $0x3f0] sm:$0xff] }
  0x60   :  { %v2174_v58 = vcombine.high %v192_v53, %v204_v54  ;;  %v181_v46 = vld [vmem:[#allocation2 + $0x450] sm:$0xff] }
  0x62   :  { %1426 = vmatpush1.bf16.msra.mxu0 %v2167_v61  ;;  %1469 = vmatpush1.bf16.msra.mxu1 %v2169_v62  ;;  %v216_v61 = vld [vmem:[#allocation2 + $0x568] sm:$0xff] }
  0x63   :  { %1427 = vmatprep.subr.bf16.mxu0 %v2192_v63  ;;  %1470 = vmatprep.subr.bf16.mxu1 %v2194_v1  ;;  %v228_v62 = vld [vmem:[#allocation2 + $0x5c8] sm:$0xff]  ;;  %v2171_v63 = vcombine.low %v191_v51, %v203_v52  ;;  %v2173_v1 = vcombine.low %v192_v53, %v204_v54  ;;  %v2152_v51 = vcombine.high %v169_v45, %v181_v46  ;;  %v193_v53 = vld [vmem:[#allocation2 + $0x4b0] sm:$0xff] }
  0x64   :  { %v2198_v3 = vcombine.high %v216_v61, %v228_v62  ;;  %v205_v54 = vld [vmem:[#allocation2 + $0x510] sm:$0xff] }
  0x66   :  { %1428 = vmatpush1.bf16.msra.mxu0 %v2191_v6  ;;  %1471 = vmatpush1.bf16.msra.mxu1 %v2193_v7  ;;  %v50_v6 = vld [vmem:[#allocation2 + $0x38] sm:$0xff] }
  0x67   :  { %1499 = vmatprep.subr.bf16.mxu0 %v2028_v8  ;;  %1542 = vmatprep.subr.bf16.mxu1 %v2030_v9  ;;  %v62_v7 = vld [vmem:[#allocation2 + $0x98] sm:$0xff]  ;;  %v2195_v8 = vcombine.low %v215_v59, %v227_v60  ;;  %v2197_v9 = vcombine.low %v216_v61, %v228_v62  ;;  %v2176_v59 = vcombine.high %v193_v53, %v205_v54  ;;  %v217_v61 = vld [vmem:[#allocation2 + $0x570] sm:$0xff] }
  0x68   :  { %v2034_v12 = vcombine.high %v50_v6, %v62_v7  ;;  %v229_v62 = vld [vmem:[#allocation2 + $0x5d0] sm:$0xff] }
  0x69   :  { %1446 = vmatmul.mubr.bf16.vlgmr.msra.gmra.mrb[4].mxu0 %v2379_v10  ;;  %1489 = vmatmul.mubr.bf16.vlgmr.msra.gmra.mrb[4].mxu1 %v2379_v10 }
  0x6a   :  { %1500 = vmatpush1.bf16.msra.mxu0 %v2027_v15  ;;  %1543 = vmatpush1.bf16.msra.mxu1 %v2029_v16  ;;  %v74_v15 = vld [vmem:[#allocation2 + $0xf8] sm:$0xff] }
  0x6b   :  { %1501 = vmatprep.subr.bf16.mxu0 %v2052_v17  ;;  %1544 = vmatprep.subr.bf16.mxu1 %v2054_v18  ;;  %v86_v16 = vld [vmem:[#allocation2 + $0x158] sm:$0xff]  ;;  %v2031_v17 = vcombine.low %v49_v4, %v61_v5  ;;  %v2033_v18 = vcombine.low %v50_v6, %v62_v7  ;;  %v2200_v4 = vcombine.high %v217_v61, %v229_v62  ;;  %v51_v6 = vld [vmem:[#allocation2 + $0x40] sm:$0xff] }
  0x6c   :  { %1531 = vmatprep.mubr.bf16.mxu0 %v2329_v0  ;;  %1574 = vmatprep.mubr.bf16.mxu1 %v2329_v0  ;;  %v2058_v20 = vcombine.high %v74_v15, %v86_v16  ;;  %v63_v7 = vld [vmem:[#allocation2 + $0xa0] sm:$0xff] }
  0x6e   :  { %1502 = vmatpush1.bf16.msra.mxu0 %v2051_v23  ;;  %1545 = vmatpush1.bf16.msra.mxu1 %v2053_v24  ;;  %v98_v23 = vld [vmem:[#allocation2 + $0x1b8] sm:$0xff] }
  0x6f   :  { %1503 = vmatprep.subr.bf16.mxu0 %v2076_v25  ;;  %1546 = vmatprep.subr.bf16.mxu1 %v2078_v26  ;;  %v110_v24 = vld [vmem:[#allocation2 + $0x218] sm:$0xff]  ;;  %v2055_v25 = vcombine.low %v73_v13, %v85_v14  ;;  %v2057_v26 = vcombine.low %v74_v15, %v86_v16  ;;  %v2036_v13 = vcombine.high %v51_v6, %v63_v7  ;;  %v75_v15 = vld [vmem:[#allocation2 + $0x100] sm:$0xff] }
  0x70   :  { %v2082_v28 = vcombine.high %v98_v23, %v110_v24  ;;  %v87_v16 = vld [vmem:[#allocation2 + $0x160] sm:$0xff] }
  0x72   :  { %1504 = vmatpush1.bf16.msra.mxu0 %v2075_v31  ;;  %1547 = vmatpush1.bf16.msra.mxu1 %v2077_v32  ;;  %v122_v31 = vld [vmem:[#allocation2 + $0x278] sm:$0xff] }
  0x73   :  { %1505 = vmatprep.subr.bf16.mxu0 %v2100_v33  ;;  %1548 = vmatprep.subr.bf16.mxu1 %v2102_v34  ;;  %v134_v32 = vld [vmem:[#allocation2 + $0x2d8] sm:$0xff]  ;;  %v2079_v33 = vcombine.low %v97_v21, %v109_v22  ;;  %v2081_v34 = vcombine.low %v98_v23, %v110_v24  ;;  %v2060_v21 = vcombine.high %v75_v15, %v87_v16  ;;  %v99_v23 = vld [vmem:[#allocation2 + $0x1c0] sm:$0xff] }
  0x74   :  { %v2106_v36 = vcombine.high %v122_v31, %v134_v32  ;;  %v111_v24 = vld [vmem:[#allocation2 + $0x220] sm:$0xff] }
  0x76   :  { %1506 = vmatpush1.bf16.msra.mxu0 %v2099_v39  ;;  %1549 = vmatpush1.bf16.msra.mxu1 %v2101_v40  ;;  %v146_v39 = vld [vmem:[#allocation2 + $0x338] sm:$0xff] }
  0x77   :  { %1507 = vmatprep.subr.bf16.mxu0 %v2124_v41  ;;  %1550 = vmatprep.subr.bf16.mxu1 %v2126_v42  ;;  %v158_v40 = vld [vmem:[#allocation2 + $0x398] sm:$0xff]  ;;  %v2103_v41 = vcombine.low %v121_v29, %v133_v30  ;;  %v2105_v42 = vcombine.low %v122_v31, %v134_v32  ;;  %v2084_v29 = vcombine.high %v99_v23, %v111_v24  ;;  %v123_v31 = vld [vmem:[#allocation2 + $0x280] sm:$0xff] }
  0x78   :  { %v2130_v44 = vcombine.high %v146_v39, %v158_v40  ;;  %v135_v32 = vld [vmem:[#allocation2 + $0x2e0] sm:$0xff] }
  0x7a   :  { %1508 = vmatpush1.bf16.msra.mxu0 %v2123_v47  ;;  %1551 = vmatpush1.bf16.msra.mxu1 %v2125_v48  ;;  %v170_v47 = vld [vmem:[#allocation2 + $0x3f8] sm:$0xff] }
  0x7b   :  { %1509 = vmatprep.subr.bf16.mxu0 %v2148_v49  ;;  %1552 = vmatprep.subr.bf16.mxu1 %v2150_v50  ;;  %v182_v48 = vld [vmem:[#allocation2 + $0x458] sm:$0xff]  ;;  %v2127_v49 = vcombine.low %v145_v37, %v157_v38  ;;  %v2129_v50 = vcombine.low %v146_v39, %v158_v40  ;;  %v2108_v37 = vcombine.high %v123_v31, %v135_v32  ;;  %v147_v39 = vld [vmem:[#allocation2 + $0x340] sm:$0xff] }
  0x7c   :  { %v2154_v52 = vcombine.high %v170_v47, %v182_v48  ;;  %v159_v40 = vld [vmem:[#allocation2 + $0x3a0] sm:$0xff] }
  0x7e   :  { %1510 = vmatpush1.bf16.msra.mxu0 %v2147_v55  ;;  %1553 = vmatpush1.bf16.msra.mxu1 %v2149_v56  ;;  %v194_v55 = vld [vmem:[#allocation2 + $0x4b8] sm:$0xff] }
  0x7f   :  { %1511 = vmatprep.subr.bf16.mxu0 %v2172_v57  ;;  %1554 = vmatprep.subr.bf16.mxu1 %v2174_v58  ;;  %v206_v56 = vld [vmem:[#allocation2 + $0x518] sm:$0xff]  ;;  %v2151_v57 = vcombine.low %v169_v45, %v181_v46  ;;  %v2153_v58 = vcombine.low %v170_v47, %v182_v48  ;;  %v2132_v45 = vcombine.high %v147_v39, %v159_v40  ;;  %v171_v47 = vld [vmem:[#allocation2 + $0x400] sm:$0xff] }
  0x80   :  { %v2178_v60 = vcombine.high %v194_v55, %v206_v56  ;;  %v183_v48 = vld [vmem:[#allocation2 + $0x460] sm:$0xff] }
  0x82   :  { %1512 = vmatpush1.bf16.msra.mxu0 %v2171_v63  ;;  %1555 = vmatpush1.bf16.msra.mxu1 %v2173_v1  ;;  %v218_v63 = vld [vmem:[#allocation2 + $0x578] sm:$0xff] }
  0x83   :  { %1513 = vmatprep.subr.bf16.mxu0 %v2196_v2  ;;  %1556 = vmatprep.subr.bf16.mxu1 %v2198_v3  ;;  %v230_v1 = vld [vmem:[#allocation2 + $0x5d8] sm:$0xff]  ;;  %v2175_v2 = vcombine.low %v193_v53, %v205_v54  ;;  %v2177_v3 = vcombine.low %v194_v55, %v206_v56  ;;  %v2156_v53 = vcombine.high %v171_v47, %v183_v48  ;;  %v195_v55 = vld [vmem:[#allocation2 + $0x4c0] sm:$0xff] }
  0x84   :  { %v2202_v5 = vcombine.high %v218_v63, %v230_v1  ;;  %v207_v56 = vld [vmem:[#allocation2 + $0x520] sm:$0xff] }
  0x86   :  { %1514 = vmatpush1.bf16.msra.mxu0 %v2195_v8  ;;  %1557 = vmatpush1.bf16.msra.mxu1 %v2197_v9  ;;  %v52_v8 = vld [vmem:[#allocation2 + $0x48] sm:$0xff] }
  0x87   :  { %1585 = vmatprep.subr.bf16.mxu0 %v2032_v11  ;;  %1628 = vmatprep.subr.bf16.mxu1 %v2034_v12  ;;  %v64_v9 = vld [vmem:[#allocation2 + $0xa8] sm:$0xff]  ;;  %v2199_v11 = vcombine.low %v217_v61, %v229_v62  ;;  %v2201_v12 = vcombine.low %v218_v63, %v230_v1  ;;  %v2180_v61 = vcombine.high %v195_v55, %v207_v56  ;;  %v219_v63 = vld [vmem:[#allocation2 + $0x580] sm:$0xff] }
  0x88   :  { %v2038_v14 = vcombine.high %v52_v8, %v64_v9  ;;  %v231_v1 = vld [vmem:[#allocation2 + $0x5e0] sm:$0xff] }
  0x89   :  { %1532 = vmatmul.mubr.bf16.vlgmr.msra.gmra.mrb[8].mxu0 %v2379_v10  ;;  %1575 = vmatmul.mubr.bf16.vlgmr.msra.gmra.mrb[8].mxu1 %v2379_v10 }
  0x8a   :  { %1586 = vmatpush1.bf16.msra.mxu0 %v2031_v17  ;;  %1629 = vmatpush1.bf16.msra.mxu1 %v2033_v18  ;;  %v76_v17 = vld [vmem:[#allocation2 + $0x108] sm:$0xff] }
  0x8b   :  { %1587 = vmatprep.subr.bf16.mxu0 %v2056_v19  ;;  %1630 = vmatprep.subr.bf16.mxu1 %v2058_v20  ;;  %v88_v18 = vld [vmem:[#allocation2 + $0x168] sm:$0xff]  ;;  %v2035_v19 = vcombine.low %v51_v6, %v63_v7  ;;  %v2037_v20 = vcombine.low %v52_v8, %v64_v9  ;;  %v2204_v6 = vcombine.high %v219_v63, %v231_v1  ;;  %v53_v8 = vld [vmem:[#allocation2 + $0x50] sm:$0xff] }
  0x8c   :  { %1617 = vmatprep.mubr.bf16.mxu0 %v2329_v0  ;;  %1660 = vmatprep.mubr.bf16.mxu1 %v2329_v0  ;;  %v2062_v22 = vcombine.high %v76_v17, %v88_v18  ;;  %v65_v9 = vld [vmem:[#allocation2 + $0xb0] sm:$0xff] }
  0x8e   :  { %1588 = vmatpush1.bf16.msra.mxu0 %v2055_v25  ;;  %1631 = vmatpush1.bf16.msra.mxu1 %v2057_v26  ;;  %v100_v25 = vld [vmem:[#allocation2 + $0x1c8] sm:$0xff] }
  0x8f   :  { %1589 = vmatprep.subr.bf16.mxu0 %v2080_v27  ;;  %1632 = vmatprep.subr.bf16.mxu1 %v2082_v28  ;;  %v112_v26 = vld [vmem:[#allocation2 + $0x228] sm:$0xff]  ;;  %v2059_v27 = vcombine.low %v75_v15, %v87_v16  ;;  %v2061_v28 = vcombine.low %v76_v17, %v88_v18  ;;  %v2040_v15 = vcombine.high %v53_v8, %v65_v9  ;;  %v77_v17 = vld [vmem:[#allocation2 + $0x110] sm:$0xff] }
  0x90   :  { %v2086_v30 = vcombine.high %v100_v25, %v112_v26  ;;  %v89_v18 = vld [vmem:[#allocation2 + $0x170] sm:$0xff] }
  0x92   :  { %1590 = vmatpush1.bf16.msra.mxu0 %v2079_v33  ;;  %1633 = vmatpush1.bf16.msra.mxu1 %v2081_v34  ;;  %v124_v33 = vld [vmem:[#allocation2 + $0x288] sm:$0xff] }
  0x93   :  { %1591 = vmatprep.subr.bf16.mxu0 %v2104_v35  ;;  %1634 = vmatprep.subr.bf16.mxu1 %v2106_v36  ;;  %v136_v34 = vld [vmem:[#allocation2 + $0x2e8] sm:$0xff]  ;;  %v2083_v35 = vcombine.low %v99_v23, %v111_v24  ;;  %v2085_v36 = vcombine.low %v100_v25, %v112_v26  ;;  %v2064_v23 = vcombine.high %v77_v17, %v89_v18  ;;  %v101_v25 = vld [vmem:[#allocation2 + $0x1d0] sm:$0xff] }
  0x94   :  { %v2110_v38 = vcombine.high %v124_v33, %v136_v34  ;;  %v113_v26 = vld [vmem:[#allocation2 + $0x230] sm:$0xff] }
  0x96   :  { %1592 = vmatpush1.bf16.msra.mxu0 %v2103_v41  ;;  %1635 = vmatpush1.bf16.msra.mxu1 %v2105_v42  ;;  %v148_v41 = vld [vmem:[#allocation2 + $0x348] sm:$0xff] }
  0x97   :  { %1593 = vmatprep.subr.bf16.mxu0 %v2128_v43  ;;  %1636 = vmatprep.subr.bf16.mxu1 %v2130_v44  ;;  %v160_v42 = vld [vmem:[#allocation2 + $0x3a8] sm:$0xff]  ;;  %v2107_v43 = vcombine.low %v123_v31, %v135_v32  ;;  %v2109_v44 = vcombine.low %v124_v33, %v136_v34  ;;  %v2088_v31 = vcombine.high %v101_v25, %v113_v26  ;;  %v125_v33 = vld [vmem:[#allocation2 + $0x290] sm:$0xff] }
  0x98   :  { %v2134_v46 = vcombine.high %v148_v41, %v160_v42  ;;  %v137_v34 = vld [vmem:[#allocation2 + $0x2f0] sm:$0xff] }
  0x9a   :  { %1594 = vmatpush1.bf16.msra.mxu0 %v2127_v49  ;;  %1637 = vmatpush1.bf16.msra.mxu1 %v2129_v50  ;;  %v172_v49 = vld [vmem:[#allocation2 + $0x408] sm:$0xff] }
  0x9b   :  { %1595 = vmatprep.subr.bf16.mxu0 %v2152_v51  ;;  %1638 = vmatprep.subr.bf16.mxu1 %v2154_v52  ;;  %v184_v50 = vld [vmem:[#allocation2 + $0x468] sm:$0xff]  ;;  %v2131_v51 = vcombine.low %v147_v39, %v159_v40  ;;  %v2133_v52 = vcombine.low %v148_v41, %v160_v42  ;;  %v2112_v39 = vcombine.high %v125_v33, %v137_v34  ;;  %v149_v41 = vld [vmem:[#allocation2 + $0x350] sm:$0xff] }
  0x9c   :  { %v2158_v54 = vcombine.high %v172_v49, %v184_v50  ;;  %v161_v42 = vld [vmem:[#allocation2 + $0x3b0] sm:$0xff] }
  0x9e   :  { %1596 = vmatpush1.bf16.msra.mxu0 %v2151_v57  ;;  %1639 = vmatpush1.bf16.msra.mxu1 %v2153_v58  ;;  %v196_v57 = vld [vmem:[#allocation2 + $0x4c8] sm:$0xff] }
  0x9f   :  { %1597 = vmatprep.subr.bf16.mxu0 %v2176_v59  ;;  %1640 = vmatprep.subr.bf16.mxu1 %v2178_v60  ;;  %v208_v58 = vld [vmem:[#allocation2 + $0x528] sm:$0xff]  ;;  %v2155_v59 = vcombine.low %v171_v47, %v183_v48  ;;  %v2157_v60 = vcombine.low %v172_v49, %v184_v50  ;;  %v2136_v47 = vcombine.high %v149_v41, %v161_v42  ;;  %v173_v48 = vld [vmem:[#allocation2 + $0x410] sm:$0xff]  ;;  %v174_v50 = vld [vmem:[#allocation2 + $0x418] sm:$0xff] }
  0xa0   :  { %v2182_v62 = vcombine.high %v196_v57, %v208_v58  ;;  %v185_v49 = vld [vmem:[#allocation2 + $0x470] sm:$0xff] }
  0xa2   :  { %1598 = vmatpush1.bf16.msra.mxu0 %v2175_v2  ;;  %1641 = vmatpush1.bf16.msra.mxu1 %v2177_v3  ;;  %v220_v2 = vld [vmem:[#allocation2 + $0x588] sm:$0xff] }
  0xa3   :  { %1599 = vmatprep.subr.bf16.mxu0 %v2200_v4  ;;  %1642 = vmatprep.subr.bf16.mxu1 %v2202_v5  ;;  %v232_v3 = vld [vmem:[#allocation2 + $0x5e8] sm:$0xff]  ;;  %v2179_v4 = vcombine.low %v195_v55, %v207_v56  ;;  %v2181_v5 = vcombine.low %v196_v57, %v208_v58  ;;  %v197_v56 = vld [vmem:[#allocation2 + $0x4d0] sm:$0xff]  ;;  %v198_v58 = vld [vmem:[#allocation2 + $0x4d8] sm:$0xff] }
  0xa4   :  { %v2206_v7 = vcombine.high %v220_v2, %v232_v3  ;;  %v209_v57 = vld [vmem:[#allocation2 + $0x530] sm:$0xff] }
  0xa6   :  { %1600 = vmatpush1.bf16.msra.mxu0 %v2199_v11  ;;  %1643 = vmatpush1.bf16.msra.mxu1 %v2201_v12  ;;  %v54_v11 = vld [vmem:[#allocation2 + $0x58] sm:$0xff] }
  0xa7   :  { %1671 = vmatprep.subr.bf16.mxu0 %v2036_v13  ;;  %1714 = vmatprep.subr.bf16.mxu1 %v2038_v14  ;;  %v66_v12 = vld [vmem:[#allocation2 + $0xb8] sm:$0xff]  ;;  %v2203_v13 = vcombine.low %v219_v63, %v231_v1  ;;  %v2205_v14 = vcombine.low %v220_v2, %v232_v3  ;;  %v221_v1 = vld [vmem:[#allocation2 + $0x590] sm:$0xff] }
  0xa8   :  { %v2042_v16 = vcombine.high %v54_v11, %v66_v12  ;;  %v233_v2 = vld [vmem:[#allocation2 + $0x5f0] sm:$0xff]  ;;  %v222_v3 = vld [vmem:[#allocation2 + $0x598] sm:$0xff] }
  0xa9   :  { %1618 = vmatmul.mubr.bf16.vlgmr.msra.gmra.mrb[12].mxu0 %v2379_v10  ;;  %1661 = vmatmul.mubr.bf16.vlgmr.msra.gmra.mrb[12].mxu1 %v2379_v10 }
  0xaa   :  { %1672 = vmatpush1.bf16.msra.mxu0 %v2035_v19  ;;  %1715 = vmatpush1.bf16.msra.mxu1 %v2037_v20  ;;  %v78_v19 = vld [vmem:[#allocation2 + $0x118] sm:$0xff] }
  0xab   :  { %1673 = vmatprep.subr.bf16.mxu0 %v2060_v21  ;;  %1716 = vmatprep.subr.bf16.mxu1 %v2062_v22  ;;  %v90_v20 = vld [vmem:[#allocation2 + $0x178] sm:$0xff]  ;;  %v2039_v21 = vcombine.low %v53_v8, %v65_v9  ;;  %v2041_v22 = vcombine.low %v54_v11, %v66_v12  ;;  %v2207_v9 = vcombine.low %v221_v1, %v233_v2  ;;  %v241_v12 = vlaneseq }
  0xac   :  { %1703 = vmatprep.mubr.bf16.mxu0 %v2329_v0  ;;  %1746 = vmatprep.mubr.bf16.mxu1 %v2329_v0  ;;  %v2066_v24 = vcombine.high %v78_v19, %v90_v20 }
  0xae   :  { %1674 = vmatpush1.bf16.msra.mxu0 %v2059_v27  ;;  %1717 = vmatpush1.bf16.msra.mxu1 %v2061_v28  ;;  %v102_v27 = vld [vmem:[#allocation2 + $0x1d8] sm:$0xff] }
  0xaf   :  { %1675 = vmatprep.subr.bf16.mxu0 %v2084_v29  ;;  %1718 = vmatprep.subr.bf16.mxu1 %v2086_v30  ;;  %v114_v28 = vld [vmem:[#allocation2 + $0x238] sm:$0xff]  ;;  %v2063_v29 = vcombine.low %v77_v17, %v89_v18  ;;  %v2065_v30 = vcombine.low %v78_v19, %v90_v20 }
  0xb0   :  { %v2090_v32 = vcombine.high %v102_v27, %v114_v28 }
  0xb2   :  { %1676 = vmatpush1.bf16.msra.mxu0 %v2083_v35  ;;  %1719 = vmatpush1.bf16.msra.mxu1 %v2085_v36  ;;  %v126_v35 = vld [vmem:[#allocation2 + $0x298] sm:$0xff] }
  0xb3   :  { %1677 = vmatprep.subr.bf16.mxu0 %v2108_v37  ;;  %1720 = vmatprep.subr.bf16.mxu1 %v2110_v38  ;;  %v138_v36 = vld [vmem:[#allocation2 + $0x2f8] sm:$0xff]  ;;  %v2087_v37 = vcombine.low %v101_v25, %v113_v26  ;;  %v2089_v38 = vcombine.low %v102_v27, %v114_v28 }
  0xb4   :  { %v2114_v40 = vcombine.high %v126_v35, %v138_v36 }
  0xb6   :  { %1678 = vmatpush1.bf16.msra.mxu0 %v2107_v43  ;;  %1721 = vmatpush1.bf16.msra.mxu1 %v2109_v44  ;;  %v150_v43 = vld [vmem:[#allocation2 + $0x358] sm:$0xff] }
  0xb7   :  { %1679 = vmatprep.subr.bf16.mxu0 %v2132_v45  ;;  %1722 = vmatprep.subr.bf16.mxu1 %v2134_v46  ;;  %v162_v44 = vld [vmem:[#allocation2 + $0x3b8] sm:$0xff]  ;;  %v2111_v45 = vcombine.low %v125_v33, %v137_v34  ;;  %v2113_v46 = vcombine.low %v126_v35, %v138_v36 }
  0xba   :  { %1680 = vmatpush1.bf16.msra.mxu0 %v2131_v51  ;;  %1723 = vmatpush1.bf16.msra.mxu1 %v2133_v52  ;;  %v186_v51 = vld [vmem:[#allocation2 + $0x478] sm:$0xff]  ;;  %v2135_v52 = vcombine.low %v149_v41, %v161_v42 }
  0xbb   :  { %1681 = vmatprep.subr.bf16.mxu0 %v2156_v53  ;;  %1724 = vmatprep.subr.bf16.mxu1 %v2158_v54  ;;  %v2137_v53 = vcombine.low %v150_v43, %v162_v44  ;;  %v2160_v54 = vcombine.high %v173_v48, %v185_v49  ;;  %v2162_v55 = vcombine.high %v174_v50, %v186_v51 }
  0xbe   :  { %1682 = vmatpush1.bf16.msra.mxu0 %v2155_v59  ;;  %1725 = vmatpush1.bf16.msra.mxu1 %v2157_v60  ;;  %v210_v59 = vld [vmem:[#allocation2 + $0x538] sm:$0xff]  ;;  %v2159_v60 = vcombine.low %v173_v48, %v185_v49 }
  0xbf   :  { %1683 = vmatprep.subr.bf16.mxu0 %v2180_v61  ;;  %1726 = vmatprep.subr.bf16.mxu1 %v2182_v62  ;;  %v2161_v61 = vcombine.low %v174_v50, %v186_v51  ;;  %v2184_v62 = vcombine.high %v197_v56, %v209_v57  ;;  %v2186_v63 = vcombine.high %v198_v58, %v210_v59 }
  0xc2   :  { %1684 = vmatpush1.bf16.msra.mxu0 %v2179_v4  ;;  %1727 = vmatpush1.bf16.msra.mxu1 %v2181_v5  ;;  %v234_v4 = vld [vmem:[#allocation2 + $0x5f8] sm:$0xff]  ;;  %v2183_v5 = vcombine.low %v197_v56, %v209_v57 }
  0xc3   :  { %1685 = vmatprep.subr.bf16.mxu0 %v2204_v6  ;;  %1728 = vmatprep.subr.bf16.mxu1 %v2206_v7  ;;  %v2185_v6 = vcombine.low %v198_v58, %v210_v59  ;;  %v2208_v7 = vcombine.high %v221_v1, %v233_v2  ;;  %v2210_v8 = vcombine.high %v222_v3, %v234_v4 }
  0xc4   :  { %v2209_v11 = vcombine.low %v222_v3, %v234_v4 }
  0xc6   :  { %1686 = vmatpush1.bf16.msra.mxu0 %v2203_v13  ;;  %1729 = vmatpush1.bf16.msra.mxu1 %v2205_v14  ;;  %v242_v13 = vshrl.u32 %v241_v12, 7 }
  0xc7   :  { %1757 = vmatprep.subr.bf16.mxu0 %v2040_v15  ;;  %1800 = vmatprep.subr.bf16.mxu1 %v2042_v16  ;;  %v235_v15 = vld [vmem:[#allocation4] sm:$0xff] }
  0xc8   :  { %v2403_v14 = vsub.s32 0, %v242_v13  ;;  %v2405_v16 = vsub.s32 2, %v242_v13  ;;  %v2407_v17 = vsub.s32 1, %v242_v13  ;;  %v2409_v18 = vsub.s32 3, %v242_v13 }
  0xc9   :  { %1704 = vmatmul.mubr.bf16.vlgmr.msra.gmra.mrb[16].mxu0 %v2379_v10  ;;  %1747 = vmatmul.mubr.bf16.vlgmr.msra.gmra.mrb[16].mxu1 %v2379_v10  ;;  %v2427_v42 = vsub.s32 4, %v242_v13 }
  0xca   :  { %1758 = vmatpush1.bf16.msra.mxu0 %v2039_v21  ;;  %1801 = vmatpush1.bf16.msra.mxu1 %v2041_v22  ;;  %v244_v19 = vrot.slane %v235_v15, %v2403_v14  ;;  %v252_v20 = vrot.slane %v235_v15, %v2405_v16  ;;  %v248_v21 = vrot.slane %v235_v15, %v2407_v17 }
  0xcb   :  { %1759 = vmatprep.subr.bf16.mxu0 %v2064_v23  ;;  %1802 = vmatprep.subr.bf16.mxu1 %v2066_v24  ;;  %v256_v22 = vrot.slane %v235_v15, %v2409_v18 }
  0xcc   :  { %1789 = vmatprep.mubr.bf16.mxu0 %v2329_v0  ;;  %1832 = vmatprep.mubr.bf16.mxu1 %v2329_v0  ;;  %v2138_v0 = vcombine.high %v150_v43, %v162_v44  ;;  %v2429_v43 = vsub.s32 6, %v242_v13  ;;  %v2431_v44 = vsub.s32 5, %v242_v13 }
  0xce   :  { %1760 = vmatpush1.bf16.msra.mxu0 %v2063_v29  ;;  %1803 = vmatpush1.bf16.msra.mxu1 %v2065_v30 }
  0xcf   :  { %1761 = vmatprep.subr.bf16.mxu0 %v2088_v31  ;;  %1804 = vmatprep.subr.bf16.mxu1 %v2090_v32 }
  0xd2   :  { %1762 = vmatpush1.bf16.msra.mxu0 %v2087_v37  ;;  %1805 = vmatpush1.bf16.msra.mxu1 %v2089_v38 }
  0xd3   :  { %1763 = vmatprep.subr.bf16.mxu0 %v2112_v39  ;;  %1806 = vmatprep.subr.bf16.mxu1 %v2114_v40 }
  0xd6   :  { %1764 = vmatpush1.bf16.msra.mxu0 %v2111_v45  ;;  %1807 = vmatpush1.bf16.msra.mxu1 %v2113_v46  ;;  %v2433_v45 = vsub.s32 7, %v242_v13  ;;  %v260_v46 = vrot.slane %v235_v15, %v2427_v42 }
  0xd7   :  { %1765 = vmatprep.subr.bf16.mxu0 %v2136_v47  ;;  %1808 = vmatprep.subr.bf16.mxu1 %v2138_v0  ;;  %v268_v47 = vrot.slane %v235_v15, %v2429_v43  ;;  %v264_v0 = vrot.slane %v235_v15, %v2431_v44 }
  0xd8   :  { %v272_v48 = vrot.slane %v235_v15, %v2433_v45 }
  0xda   :  { %1766 = vmatpush1.bf16.msra.mxu0 %v2135_v52  ;;  %1809 = vmatpush1.bf16.msra.mxu1 %v2137_v53 }
  0xdb   :  { %1767 = vmatprep.subr.bf16.mxu0 %v2160_v54  ;;  %1810 = vmatprep.subr.bf16.mxu1 %v2162_v55 }
  0xde   :  { %1768 = vmatpush1.bf16.msra.mxu0 %v2159_v60  ;;  %1811 = vmatpush1.bf16.msra.mxu1 %v2161_v61 }
  0xdf   :  { %1769 = vmatprep.subr.bf16.mxu0 %v2184_v62  ;;  %1812 = vmatprep.subr.bf16.mxu1 %v2186_v63 }
  0xe2   :  { %1770 = vmatpush1.bf16.msra.mxu0 %v2183_v5  ;;  %1813 = vmatpush1.bf16.msra.mxu1 %v2185_v6  ;;  %v236_v6 = vld [vmem:[#allocation4 + $0x8] sm:$0xff] }
  0xe3   :  { %1771 = vmatprep.subr.bf16.mxu0 %v2208_v7  ;;  %1814 = vmatprep.subr.bf16.mxu1 %v2210_v8  ;;  %v276_v7 = vrot.slane %v236_v6, %v2403_v14  ;;  %v284_v8 = vrot.slane %v236_v6, %v2405_v16 }
  0xe6   :  { %1772 = vmatpush1.bf16.msra.mxu0 %v2207_v9  ;;  %1815 = vmatpush1.bf16.msra.mxu1 %v2209_v11  ;;  %v280_v9 = vrot.slane %v236_v6, %v2407_v17  ;;  %v288_v11 = vrot.slane %v236_v6, %v2409_v18 }
  0xe9   :  { %1790 = vmatmul.mubr.bf16.vlgmr.msra.gmra.mrb[20].mxu0 %v2379_v10  ;;  %1833 = vmatmul.mubr.bf16.vlgmr.msra.gmra.mrb[20].mxu1 %v2379_v10 }
 0x11c   :  { %v1361_v10 = vpop.f32.mrb[0].mxu0  ;;  %v1404_v24 = vpop.f32.mrb[0].mxu1 }
 0x11d   :  { %v1362_v23 = vadd.f32 %v1361_v10, %v244_v19  ;;  %v1363_v25 = vpop.f32.mrb[1].mxu0  ;;  %v1405_v26 = vadd.f32 %v1404_v24, %v252_v20  ;;  %v1406_v28 = vpop.f32.mrb[1].mxu1 }
 0x11e   :  { %v1364_v27 = vadd.f32 %v1363_v25, %v248_v21  ;;  %v1365_v29 = vpop.f32.mrb[2].mxu0  ;;  %v1407_v30 = vadd.f32 %v1406_v28, %v256_v22  ;;  %v1408_v32 = vpop.f32.mrb[2].mxu1 }
 0x11f   :  { %v1366_v31 = vadd.f32 %v1365_v29, %v244_v19  ;;  %v1367_v33 = vpop.f32.mrb[3].mxu0  ;;  %v1409_v35 = vadd.f32 %v1408_v32, %v252_v20  ;;  %v1410_v37 = vpop.f32.mrb[3].mxu1 }
 0x120   :  { %v2247_v34 = vpack.c.bf16 %v1364_v27, %v1362_v23  ;;  %v1368_v36 = vadd.f32 %v1367_v33, %v248_v21  ;;  %v2248_v38 = vpack.c.bf16 %v1407_v30, %v1405_v26  ;;  %v1411_v39 = vadd.f32 %v1410_v37, %v256_v22 }
 0x121   :  { %v296_v37 = vrot.slane %v236_v6, %v2431_v44 }
 0x122   :  { %1927 = vst [vmem:[%s2518_s3] sm:$0xff] %v2247_v34  ;;  %v2253_v40 = vpack.c.bf16 %v1368_v36, %v1366_v31  ;;  %1928 = vst [vmem:[%s2518_s3 + $0x8] sm:$0xff] %v2248_v38  ;;  %v2254_v41 = vpack.c.bf16 %v1411_v39, %v1409_v35  ;;  %v292_v35 = vrot.slane %v236_v6, %v2427_v42 }
 0x123   :  { %v300_v36 = vrot.slane %v236_v6, %v2429_v43  ;;  %v304_v38 = vrot.slane %v236_v6, %v2433_v45 }
 0x124   :  { %1933 = vst [vmem:[%s2518_s3 + $0x30] sm:$0xff] %v2253_v40  ;;  %1934 = vst [vmem:[%s2518_s3 + $0x38] sm:$0xff] %v2254_v41 }
 0x13c   :  { %v1447_v49 = vpop.f32.mrb[4].mxu0  ;;  %v1490_v51 = vpop.f32.mrb[4].mxu1 }
 0x13d   :  { %v1448_v50 = vadd.f32 %v1447_v49, %v260_v46  ;;  %v1449_v52 = vpop.f32.mrb[5].mxu0  ;;  %v1491_v53 = vadd.f32 %v1490_v51, %v268_v47  ;;  %v1492_v55 = vpop.f32.mrb[5].mxu1 }
 0x13e   :  { %v1450_v54 = vadd.f32 %v1449_v52, %v264_v0  ;;  %v1451_v56 = vpop.f32.mrb[6].mxu0  ;;  %v1493_v57 = vadd.f32 %v1492_v55, %v272_v48  ;;  %v1494_v59 = vpop.f32.mrb[6].mxu1 }
 0x13f   :  { %v1452_v58 = vadd.f32 %v1451_v56, %v260_v46  ;;  %v1453_v60 = vpop.f32.mrb[7].mxu0  ;;  %v1495_v62 = vadd.f32 %v1494_v59, %v268_v47  ;;  %v1496_v1 = vpop.f32.mrb[7].mxu1 }
 0x140   :  { %v2249_v61 = vpack.c.bf16 %v1450_v54, %v1448_v50  ;;  %v1454_v63 = vadd.f32 %v1453_v60, %v264_v0  ;;  %v2250_v2 = vpack.c.bf16 %v1493_v57, %v1491_v53  ;;  %v1497_v3 = vadd.f32 %v1496_v1, %v272_v48 }
 0x142   :  { %1929 = vst [vmem:[%s2518_s3 + $0x10] sm:$0xff] %v2249_v61  ;;  %v2255_v4 = vpack.c.bf16 %v1454_v63, %v1452_v58  ;;  %1930 = vst [vmem:[%s2518_s3 + $0x18] sm:$0xff] %v2250_v2  ;;  %v2256_v5 = vpack.c.bf16 %v1497_v3, %v1495_v62  ;;  %v237_v62 = vld [vmem:[#allocation4 + $0x10] sm:$0xff] }
 0x143   :  { %v308_v63 = vrot.slane %v237_v62, %v2403_v14  ;;  %v316_v1 = vrot.slane %v237_v62, %v2405_v16  ;;  %v312_v2 = vrot.slane %v237_v62, %v2407_v17  ;;  %v320_v3 = vrot.slane %v237_v62, %v2409_v18 }
 0x144   :  { %1935 = vst [vmem:[%s2518_s3 + $0x40] sm:$0xff] %v2255_v4  ;;  %1936 = vst [vmem:[%s2518_s3 + $0x48] sm:$0xff] %v2256_v5 }
 0x15c   :  { %v1533_v12 = vpop.f32.mrb[8].mxu0  ;;  %v1576_v15 = vpop.f32.mrb[8].mxu1 }
 0x15d   :  { %v1534_v13 = vadd.f32 %v1533_v12, %v276_v7  ;;  %v1535_v19 = vpop.f32.mrb[9].mxu0  ;;  %v1577_v20 = vadd.f32 %v1576_v15, %v284_v8  ;;  %v1578_v22 = vpop.f32.mrb[9].mxu1 }
 0x15e   :  { %v1536_v21 = vadd.f32 %v1535_v19, %v280_v9  ;;  %v1537_v10 = vpop.f32.mrb[10].mxu0  ;;  %v1579_v23 = vadd.f32 %v1578_v22, %v288_v11  ;;  %v1580_v25 = vpop.f32.mrb[10].mxu1 }
 0x15f   :  { %v1538_v24 = vadd.f32 %v1537_v10, %v276_v7  ;;  %v1539_v26 = vpop.f32.mrb[11].mxu0  ;;  %v1581_v28 = vadd.f32 %v1580_v25, %v284_v8  ;;  %v1582_v30 = vpop.f32.mrb[11].mxu1  ;;  %v332_v25 = vrot.slane %v237_v62, %v2429_v43 }
 0x160   :  { %v2251_v27 = vpack.c.bf16 %v1536_v21, %v1534_v13  ;;  %v1540_v29 = vadd.f32 %v1539_v26, %v280_v9  ;;  %v2252_v31 = vpack.c.bf16 %v1579_v23, %v1577_v20  ;;  %v1583_v32 = vadd.f32 %v1582_v30, %v288_v11 }
 0x161   :  { %v328_v26 = vrot.slane %v237_v62, %v2431_v44 }
 0x162   :  { %1931 = vst [vmem:[%s2518_s3 + $0x20] sm:$0xff] %v2251_v27  ;;  %v2257_v33 = vpack.c.bf16 %v1540_v29, %v1538_v24  ;;  %1932 = vst [vmem:[%s2518_s3 + $0x28] sm:$0xff] %v2252_v31  ;;  %v2258_v34 = vpack.c.bf16 %v1583_v32, %v1581_v28  ;;  %v324_v24 = vrot.slane %v237_v62, %v2427_v42 }
 0x163   :  { %v336_v27 = vrot.slane %v237_v62, %v2433_v45 }
 0x164   :  { %1937 = vst [vmem:[%s2518_s3 + $0x50] sm:$0xff] %v2257_v33  ;;  %1938 = vst [vmem:[%s2518_s3 + $0x58] sm:$0xff] %v2258_v34 }
 0x17c   :  { %v1619_v39 = vpop.f32.mrb[12].mxu0  ;;  %v1662_v41 = vpop.f32.mrb[12].mxu1 }
 0x17d   :  { %v1620_v40 = vadd.f32 %v1619_v39, %v292_v35  ;;  %v1621_v46 = vpop.f32.mrb[13].mxu0  ;;  %v1663_v47 = vadd.f32 %v1662_v41, %v300_v36  ;;  %v1664_v48 = vpop.f32.mrb[13].mxu1 }
 0x17e   :  { %v1622_v0 = vadd.f32 %v1621_v46, %v296_v37  ;;  %v1623_v49 = vpop.f32.mrb[14].mxu0  ;;  %v1665_v50 = vadd.f32 %v1664_v48, %v304_v38  ;;  %v1666_v52 = vpop.f32.mrb[14].mxu1 }
 0x17f   :  { %v1624_v51 = vadd.f32 %v1623_v49, %v292_v35  ;;  %v1625_v53 = vpop.f32.mrb[15].mxu0  ;;  %v1667_v55 = vadd.f32 %v1666_v52, %v300_v36  ;;  %v1668_v57 = vpop.f32.mrb[15].mxu1 }
 0x180   :  { %v2259_v54 = vpack.c.bf16 %v1622_v0, %v1620_v40  ;;  %v1626_v56 = vadd.f32 %v1625_v53, %v296_v37  ;;  %v2260_v58 = vpack.c.bf16 %v1665_v50, %v1663_v47  ;;  %v1669_v59 = vadd.f32 %v1668_v57, %v304_v38 }
 0x182   :  { %2235 = vst [vmem:[%s2518_s3 + $0x60] sm:$0xff] %v2259_v54  ;;  %v2265_v60 = vpack.c.bf16 %v1626_v56, %v1624_v51  ;;  %2236 = vst [vmem:[%s2518_s3 + $0x68] sm:$0xff] %v2260_v58  ;;  %v2266_v61 = vpack.c.bf16 %v1669_v59, %v1667_v55 }
 0x184   :  { %2241 = vst [vmem:[%s2518_s3 + $0x90] sm:$0xff] %v2265_v60  ;;  %2242 = vst [vmem:[%s2518_s3 + $0x98] sm:$0xff] %v2266_v61 }
 0x19c   :  { %v1705_v4 = vpop.f32.mrb[16].mxu0  ;;  %v1748_v6 = vpop.f32.mrb[16].mxu1 }
 0x19d   :  { %v1706_v5 = vadd.f32 %v1705_v4, %v308_v63  ;;  %v1707_v7 = vpop.f32.mrb[17].mxu0  ;;  %v1749_v8 = vadd.f32 %v1748_v6, %v316_v1  ;;  %v1750_v11 = vpop.f32.mrb[17].mxu1 }
 0x19e   :  { %v1708_v9 = vadd.f32 %v1707_v7, %v312_v2  ;;  %v1709_v12 = vpop.f32.mrb[18].mxu0  ;;  %v1751_v13 = vadd.f32 %v1750_v11, %v320_v3  ;;  %v1752_v19 = vpop.f32.mrb[18].mxu1 }
 0x19f   :  { %v1710_v15 = vadd.f32 %v1709_v12, %v308_v63  ;;  %v1711_v20 = vpop.f32.mrb[19].mxu0  ;;  %v1753_v14 = vadd.f32 %v1752_v19, %v316_v1  ;;  %v1754_v16 = vpop.f32.mrb[19].mxu1 }
 0x1a0   :  { %v2261_v21 = vpack.c.bf16 %v1708_v9, %v1706_v5  ;;  %v1712_v22 = vadd.f32 %v1711_v20, %v312_v2  ;;  %v2262_v10 = vpack.c.bf16 %v1751_v13, %v1749_v8  ;;  %v1755_v17 = vadd.f32 %v1754_v16, %v320_v3 }
 0x1a2   :  { %2237 = vst [vmem:[%s2518_s3 + $0x70] sm:$0xff] %v2261_v21  ;;  %v2267_v18 = vpack.c.bf16 %v1712_v22, %v1710_v15  ;;  %2238 = vst [vmem:[%s2518_s3 + $0x78] sm:$0xff] %v2262_v10  ;;  %v2268_v23 = vpack.c.bf16 %v1755_v17, %v1753_v14 }
 0x1a4   :  { %2243 = vst [vmem:[%s2518_s3 + $0xa0] sm:$0xff] %v2267_v18  ;;  %2244 = vst [vmem:[%s2518_s3 + $0xa8] sm:$0xff] %v2268_v23 }
 0x1bc   :  { %v1791_v28 = vpop.f32.mrb[20].mxu0  ;;  %v1834_v30 = vpop.f32.mrb[20].mxu1 }
 0x1bd   :  { %v1792_v29 = vadd.f32 %v1791_v28, %v324_v24  ;;  %v1793_v31 = vpop.f32.mrb[21].mxu0  ;;  %v1835_v32 = vadd.f32 %v1834_v30, %v332_v25  ;;  %v1836_v34 = vpop.f32.mrb[21].mxu1 }
 0x1be   :  { %v1794_v33 = vadd.f32 %v1793_v31, %v328_v26  ;;  %v1795_v35 = vpop.f32.mrb[22].mxu0  ;;  %v1837_v36 = vadd.f32 %v1836_v34, %v336_v27  ;;  %v1838_v38 = vpop.f32.mrb[22].mxu1 }
 0x1bf   :  { %v1796_v37 = vadd.f32 %v1795_v35, %v324_v24  ;;  %v1797_v39 = vpop.f32.mrb[23].mxu0  ;;  %v1839_v42 = vadd.f32 %v1838_v38, %v332_v25  ;;  %v1840_v43 = vpop.f32.mrb[23].mxu1 }
 0x1c0   :  { %v2263_v40 = vpack.c.bf16 %v1794_v33, %v1792_v29  ;;  %v1798_v41 = vadd.f32 %v1797_v39, %v328_v26  ;;  %v2264_v46 = vpack.c.bf16 %v1837_v36, %v1835_v32  ;;  %v1841_v44 = vadd.f32 %v1840_v43, %v336_v27 }
 0x1c2   :  { %2239 = vst [vmem:[%s2518_s3 + $0x80] sm:$0xff] %v2263_v40  ;;  %v2269_v45 = vpack.c.bf16 %v1798_v41, %v1796_v37  ;;  %2240 = vst [vmem:[%s2518_s3 + $0x88] sm:$0xff] %v2264_v46  ;;  %v2270_v47 = vpack.c.bf16 %v1841_v44, %v1839_v42 }
 0x1c4   :  { %2245 = vst [vmem:[%s2518_s3 + $0xb0] sm:$0xff] %v2269_v45  ;;  %2246 = vst [vmem:[%s2518_s3 + $0xb8] sm:$0xff] %v2270_v47 }
 0x1c5   :  { %2016 = vsyncpa [#allocation3], 1 }
 0x1c6   :  { %2017 = vsyncpa [#allocation5], 1 }

// kernel: st2_forward.6
= control target key start
LH: loop header
LB: loop body
LE: loop exit
PB: predicated region body
PF: predicated region fallthrough
CT: control target
= control target key end

     0   :  { %s3731_s15 = smov 0   ;;  %s3733_s16 = smov 0   ;;  %s4148_s0 = inlined_call_operand.vmem [shape: bf16[2,2,8,1536], index: 0, kind: input, shape index: {}]   ;;  %s4149_s1 = inlined_call_operand.vmem [shape: bf16[2,384,1536], index: 1, kind: input, shape index: {}]   ;;  %s4150_s2 = inlined_call_operand.vmem [shape: f32[2,8,384], index: 2, kind: input, shape index: {}]   ;;  %s4151_s3 = inlined_call_operand.vmem [shape: f32[2,8,384], index: 3, kind: input, shape index: {}]   ;;  %s4152_s4 = inlined_call_operand.vmem [shape: bf16[2,2,8,384], index: 4, kind: output, shape index: {}]  }
   0x1   :  { %4153 = sst [smem:[#allocation5_spill]] %s4149_s1  ;;  %s3735_s17 = smov 0  }
   0x2   :  { %s3737_s18 = smov 0   ;;  %s3739_s19 = smov 0  }
   0x3 LB: > { %s23_s20 = sadd.s32 1, %s3695_s17  ;;  %s26_s21 = sadd.s32 1, %s3699_s18  ;;  %s3703_s19 = sphi %s3739_s19, %s14_s19   ;;  %s3699_s18 = sphi %s3737_s18, %s4160_s18   ;;  %s3695_s17 = sphi %s3735_s17, %s4159_s17   ;;  %s3691_s16 = sphi %s3733_s16, %s4158_s16   ;;  %s3687_s15 = sphi %s3731_s15, %s4157_s15  }
   0x4   : > { %p24_p0 = scmp.ge.s32.totalorder %s23_s20, 2  ;;  %p2856_p1 = scmp.ge.s32.totalorder %s3703_s19, 1 }
   0x5   : > { %p242_p2 = scmp.lt.s32.totalorder %s3703_s19, 5 }
   0x6   : > { %s4162_s20 = smov (%p24_p0, %s23_s20), 0  ;;  %s4164_s21 = smov (!%p24_p0, %s26_s21), %s3699_s18 }
   0x7   : > { %p243_p3 = pnand %p2856_p1, %p242_p2  ;;  %p28_p4 = scmp.ge.s32.totalorder %s4164_s21, 2 }
   0x8   : > { %s301_s22 = ssub.s32 (!%p243_p3), 1, %s3687_s15  ;;  %s303_s23 = ssub.s32 (!%p243_p3), 1, %s3691_s16 }
   0x9   : > { %s4166_s21 = smov (%p28_p4, %s4164_s21), 0  ;;  %246 = sbr.rel (%p243_p3) target bundleno = 559 (0x22f), region = 36 }
   0xa   : > { %4154 = sst [smem:[#allocation4_spill]] %s4166_s21  ;;  %s302_s24 = smul.u32 (!%p243_p3), %s3691_s16, %s301_s22 }
   0xb   : > { %p306_p5 = scmp.lt.s32.totalorder (!%p243_p3), %s3691_s16, 1  ;;  %s304_s25 = smul.u32 (!%p243_p3), %s3687_s15, %s303_s23 }
   0xc   : > { %s4155_s1 = sld [smem:[#allocation5_spill]] (!%p243_p3)  ;;  %p2862_p7 = scmp.ne.s32.totalorder (!%p243_p3), %s3687_s15, 0 }
   0xd   : > { %s305_s26 = sadd.s32 (!%p243_p3), %s304_s25, %s302_s24 }
   0xe   : > { %p308_p6 = scmp.lt.s32.totalorder (!%p243_p3), %s305_s26, 1 }
  0x10   : > { %s4168_s16 = smov (!%p306_p5, %s3691_s16), 1  ;;  %s4170_s26 = smov (!%p308_p6, %s305_s26), 1 }
  0x11   : > { %s3158_s27 = smul.u32 24, %s4168_s16 }
  0x12   : > { %s3159_s28 = smul.u32 2304, %s4168_s16 }
  0x13   : > { %s329_s8 = scalar_lea.vmem %s4150_s2, %s3158_s27  ;;  %s3157_s9 = smul.u32 12, %s4170_s26 }
  0x14   : > { %s3768_s5 = scalar_lea.vmem %s4155_s1, %s3159_s28  ;;  %s334_s12 = scalar_lea.vmem %s4151_s3, %s3158_s27  ;;  %v359_v0 = vld [vmem:[%s329_s8] sm:$0xff] (!%p2862_p7)  ;;  %v360_v1 = vld [vmem:[%s329_s8 + $0x8] sm:$0xff] (!%p2862_p7)  ;;  %v361_v2 = vld [vmem:[%s329_s8 + $0x10] sm:$0xff] (!%p2862_p7) }
  0x15   : > { %s3160_s13 = smul.u32 3, %s4170_s26  ;;  %s312_s14 = sadd.s32 %s3158_s27, %s3157_s9  ;;  %362 = vst [vmem:[#allocation2] sm:$0xff] (!%p2862_p7), %v359_v0  ;;  %363 = vst [vmem:[#allocation2 + $0x8] sm:$0xff] (!%p2862_p7), %v360_v1  ;;  %v365_v3 = vld [vmem:[%s334_s12] sm:$0xff] (!%p2862_p7)  ;;  %v366_v4 = vld [vmem:[%s334_s12 + $0x8] sm:$0xff] (!%p2862_p7) }
  0x16   : > { %s3161_s22 = smul.u32 6, %s4168_s16  ;;  %s2857_s23 = sshll.u32 %s312_s14, 2  ;;  %364 = vst [vmem:[#allocation2 + $0x10] sm:$0xff] (!%p2862_p7), %v361_v2  ;;  %v367_v5 = vld [vmem:[%s334_s12 + $0x10] sm:$0xff] (!%p2862_p7)  ;;  %368 = vst [vmem:[#allocation3] sm:$0xff] (!%p2862_p7), %v365_v3 }
  0x17   : > { %s3779_s21 = scalar_lea.vmem %s4148_s0, %s2857_s23  ;;  %358 = sbr.rel (%p2862_p7) target bundleno = 30 (0x1e), region = 40  ;;  %369 = vst [vmem:[#allocation3 + $0x8] sm:$0xff] (!%p2862_p7), %v366_v4  ;;  %370 = vst [vmem:[#allocation3 + $0x10] sm:$0xff] (!%p2862_p7), %v367_v5 }
  0x18   : > { %s346_s28 = sadd.s32 %s3161_s22, %s3160_s13 }
  0x19   : > { %s2861_s29 = sshll.u32 %s346_s28, 2 }
  0x1a   : > { %s3784_s6 = scalar_lea.vmem %s4152_s4, %s2861_s29 }
  0x1e PF: > { %v3203_v6 = vld [vmem:[%s3768_s5 + $0x4] ss:$48 sps:$4 sm:$0xff]   ;;  %v3705_v8 = vmov 0   ;;  %v3207_v9 = vld [vmem:[%s3768_s5] ss:$48 sps:$4 sm:$0xff]   ;;  %v390_v56 = vld [vmem:[#allocation2 + $0x8] sm:$0xff] }
  0x1f   : > { %v3205_v7 = vld [vmem:[%s3768_s5 + $0x604] ss:$48 sps:$4 sm:$0xff]   ;;  %2196 = vmatprep.mubr.bf16.mxu1 %v3705_v8  ;;  %2123 = vmatprep.subr.bf16.mxu0 %v3203_v6  ;;  %v3208_v10 = vld [vmem:[%s3768_s5 + $0x600] ss:$48 sps:$4 sm:$0xff]   ;;  %v3255_v41 = vld [vmem:[%s3768_s5 + $0xc] ss:$48 sps:$4 sm:$0xff]   ;;  %v3840_v59 = vpack.c.bf16 %v390_v56, %v390_v56 }
  0x20   : > { %2164 = vmatprep.subr.bf16.mxu1 %v3205_v7  ;;  %v3209_v11 = vld [vmem:[%s3768_s5 + $0x64] ss:$48 sps:$4 sm:$0xff]   ;;  %2124 = vmatpush1.bf16.msra.mxu0 %v3207_v9  ;;  %v3213_v13 = vld [vmem:[%s3768_s5 + $0x60] ss:$48 sps:$4 sm:$0xff]   ;;  %v3253_v43 = vld [vmem:[%s3768_s5 + $0x8] ss:$48 sps:$4 sm:$0xff]  }
  0x21   : > { %2165 = vmatpush1.bf16.msra.mxu1 %v3208_v10  ;;  %v3211_v12 = vld [vmem:[%s3768_s5 + $0x664] ss:$48 sps:$4 sm:$0xff]   ;;  %2125 = vmatprep.subr.bf16.mxu0 %v3209_v11  ;;  %v3214_v14 = vld [vmem:[%s3768_s5 + $0x660] ss:$48 sps:$4 sm:$0xff]   ;;  %v3261_v46 = vld [vmem:[%s3768_s5 + $0x6c] ss:$48 sps:$4 sm:$0xff]  }
  0x22   : > { %2166 = vmatprep.subr.bf16.mxu1 %v3211_v12  ;;  %v3215_v15 = vld [vmem:[%s3768_s5 + $0xc4] ss:$48 sps:$4 sm:$0xff]   ;;  %v3219_v17 = vld [vmem:[%s3768_s5 + $0xc0] ss:$48 sps:$4 sm:$0xff]   ;;  %v3259_v47 = vld [vmem:[%s3768_s5 + $0x68] ss:$48 sps:$4 sm:$0xff]   ;;  %2155 = vmatprep.mubr.bf16.mxu0 %v3840_v59 }
  0x23   : > { %v3217_v16 = vld [vmem:[%s3768_s5 + $0x6c4] ss:$48 sps:$4 sm:$0xff]   ;;  %v3220_v18 = vld [vmem:[%s3768_s5 + $0x6c0] ss:$48 sps:$4 sm:$0xff]   ;;  %v3267_v50 = vld [vmem:[%s3768_s5 + $0xcc] ss:$48 sps:$4 sm:$0xff]  }
  0x24   : > { %2126 = vmatpush1.bf16.msra.mxu0 %v3213_v13  ;;  %v3221_v19 = vld [vmem:[%s3768_s5 + $0x124] ss:$48 sps:$4 sm:$0xff]   ;;  %v3225_v21 = vld [vmem:[%s3768_s5 + $0x120] ss:$48 sps:$4 sm:$0xff]   ;;  %v3265_v51 = vld [vmem:[%s3768_s5 + $0xc8] ss:$48 sps:$4 sm:$0xff]  }
  0x25   : > { %2167 = vmatpush1.bf16.msra.mxu1 %v3214_v14  ;;  %2127 = vmatprep.subr.bf16.mxu0 %v3215_v15  ;;  %v3223_v20 = vld [vmem:[%s3768_s5 + $0x724] ss:$48 sps:$4 sm:$0xff]   ;;  %v3226_v22 = vld [vmem:[%s3768_s5 + $0x720] ss:$48 sps:$4 sm:$0xff]   ;;  %v3273_v54 = vld [vmem:[%s3768_s5 + $0x12c] ss:$48 sps:$4 sm:$0xff]  }
  0x26   : > { %2168 = vmatprep.subr.bf16.mxu1 %v3217_v16  ;;  %v3227_v23 = vld [vmem:[%s3768_s5 + $0x184] ss:$48 sps:$4 sm:$0xff]   ;;  %v3231_v25 = vld [vmem:[%s3768_s5 + $0x180] ss:$48 sps:$4 sm:$0xff]   ;;  %v3271_v55 = vld [vmem:[%s3768_s5 + $0x128] ss:$48 sps:$4 sm:$0xff]  }
  0x27   : > { %v3229_v24 = vld [vmem:[%s3768_s5 + $0x784] ss:$48 sps:$4 sm:$0xff]   ;;  %v3232_v26 = vld [vmem:[%s3768_s5 + $0x780] ss:$48 sps:$4 sm:$0xff]   ;;  %v3279_v60 = vld [vmem:[%s3768_s5 + $0x18c] ss:$48 sps:$4 sm:$0xff]  }
  0x28   : > { %2128 = vmatpush1.bf16.msra.mxu0 %v3219_v17  ;;  %v3233_v27 = vld [vmem:[%s3768_s5 + $0x1e4] ss:$48 sps:$4 sm:$0xff]   ;;  %v3237_v29 = vld [vmem:[%s3768_s5 + $0x1e0] ss:$48 sps:$4 sm:$0xff]   ;;  %v3277_v61 = vld [vmem:[%s3768_s5 + $0x188] ss:$48 sps:$4 sm:$0xff]  }
  0x29   : > { %2169 = vmatpush1.bf16.msra.mxu1 %v3220_v18  ;;  %2129 = vmatprep.subr.bf16.mxu0 %v3221_v19  ;;  %v3235_v28 = vld [vmem:[%s3768_s5 + $0x7e4] ss:$48 sps:$4 sm:$0xff]   ;;  %v3238_v30 = vld [vmem:[%s3768_s5 + $0x7e0] ss:$48 sps:$4 sm:$0xff]   ;;  %v3285_v0 = vld [vmem:[%s3768_s5 + $0x1ec] ss:$48 sps:$4 sm:$0xff]  }
  0x2a   : > { %2170 = vmatprep.subr.bf16.mxu1 %v3223_v20  ;;  %v3239_v31 = vld [vmem:[%s3768_s5 + $0x244] ss:$48 sps:$4 sm:$0xff]   ;;  %v3243_v33 = vld [vmem:[%s3768_s5 + $0x240] ss:$48 sps:$4 sm:$0xff]   ;;  %v3283_v1 = vld [vmem:[%s3768_s5 + $0x1e8] ss:$48 sps:$4 sm:$0xff]  }
  0x2b   : > { %v3241_v32 = vld [vmem:[%s3768_s5 + $0x844] ss:$48 sps:$4 sm:$0xff]   ;;  %v3244_v34 = vld [vmem:[%s3768_s5 + $0x840] ss:$48 sps:$4 sm:$0xff]   ;;  %v3291_v4 = vld [vmem:[%s3768_s5 + $0x24c] ss:$48 sps:$4 sm:$0xff]  }
  0x2c   : > { %2130 = vmatpush1.bf16.msra.mxu0 %v3225_v21  ;;  %v3245_v35 = vld [vmem:[%s3768_s5 + $0x2a4] ss:$48 sps:$4 sm:$0xff]   ;;  %v3249_v37 = vld [vmem:[%s3768_s5 + $0x2a0] ss:$48 sps:$4 sm:$0xff]   ;;  %v3289_v5 = vld [vmem:[%s3768_s5 + $0x248] ss:$48 sps:$4 sm:$0xff]  }
  0x2d   : > { %2171 = vmatpush1.bf16.msra.mxu1 %v3226_v22  ;;  %2131 = vmatprep.subr.bf16.mxu0 %v3227_v23  ;;  %v3247_v36 = vld [vmem:[%s3768_s5 + $0x8a4] ss:$48 sps:$4 sm:$0xff]   ;;  %v3250_v38 = vld [vmem:[%s3768_s5 + $0x8a0] ss:$48 sps:$4 sm:$0xff]   ;;  %v3297_v9 = vld [vmem:[%s3768_s5 + $0x2ac] ss:$48 sps:$4 sm:$0xff]  }
  0x2e   : > { %2172 = vmatprep.subr.bf16.mxu1 %v3229_v24  ;;  %v391_v39 = vld [vmem:[#allocation2 + $0x10] sm:$0xff]  ;;  %v3295_v10 = vld [vmem:[%s3768_s5 + $0x2a8] ss:$48 sps:$4 sm:$0xff]   ;;  %v389_v12 = vld [vmem:[#allocation2] sm:$0xff] }
  0x2f   : > { %v3251_v40 = vld [vmem:[%s3768_s5 + $0x304] ss:$48 sps:$4 sm:$0xff]   ;;  %v3822_v42 = vpack.c.bf16 %v391_v39, %v391_v39  ;;  %v3256_v44 = vld [vmem:[%s3768_s5 + $0x300] ss:$48 sps:$4 sm:$0xff]   ;;  %v3301_v13 = vld [vmem:[%s3768_s5 + $0x30c] ss:$48 sps:$4 sm:$0xff]   ;;  %v3861_v15 = vpack.c.bf16 %v389_v12, %v389_v12 }
  0x30   : > { %2132 = vmatpush1.bf16.msra.mxu0 %v3231_v25  ;;  %v3257_v45 = vld [vmem:[%s3768_s5 + $0x364] ss:$48 sps:$4 sm:$0xff]   ;;  %v3262_v48 = vld [vmem:[%s3768_s5 + $0x360] ss:$48 sps:$4 sm:$0xff]   ;;  %v3304_v14 = vld [vmem:[%s3768_s5 + $0x60c] ss:$48 sps:$4 sm:$0xff]  }
  0x31   : > { %2173 = vmatpush1.bf16.msra.mxu1 %v3232_v26  ;;  %2133 = vmatprep.subr.bf16.mxu0 %v3233_v27  ;;  %v3263_v49 = vld [vmem:[%s3768_s5 + $0x3c4] ss:$48 sps:$4 sm:$0xff]   ;;  %v3268_v52 = vld [vmem:[%s3768_s5 + $0x3c0] ss:$48 sps:$4 sm:$0xff]   ;;  %v3299_v16 = vld [vmem:[%s3768_s5 + $0x308] ss:$48 sps:$4 sm:$0xff]  }
  0x32   : > { %2174 = vmatprep.subr.bf16.mxu1 %v3235_v28  ;;  %v3269_v53 = vld [vmem:[%s3768_s5 + $0x424] ss:$48 sps:$4 sm:$0xff]   ;;  %v3274_v57 = vld [vmem:[%s3768_s5 + $0x420] ss:$48 sps:$4 sm:$0xff]   ;;  %v3302_v17 = vld [vmem:[%s3768_s5 + $0x608] ss:$48 sps:$4 sm:$0xff]  }
  0x33   : > { %v3275_v58 = vld [vmem:[%s3768_s5 + $0x484] ss:$48 sps:$4 sm:$0xff]   ;;  %v3280_v62 = vld [vmem:[%s3768_s5 + $0x480] ss:$48 sps:$4 sm:$0xff]   ;;  %v3307_v18 = vld [vmem:[%s3768_s5 + $0x36c] ss:$48 sps:$4 sm:$0xff]  }
  0x34   : > { %2134 = vmatpush1.bf16.msra.mxu0 %v3237_v29  ;;  %v3281_v63 = vld [vmem:[%s3768_s5 + $0x4e4] ss:$48 sps:$4 sm:$0xff]   ;;  %v3286_v2 = vld [vmem:[%s3768_s5 + $0x4e0] ss:$48 sps:$4 sm:$0xff]   ;;  %v3310_v19 = vld [vmem:[%s3768_s5 + $0x66c] ss:$48 sps:$4 sm:$0xff]  }
  0x35   : > { %2175 = vmatpush1.bf16.msra.mxu1 %v3238_v30  ;;  %2135 = vmatprep.subr.bf16.mxu0 %v3239_v31  ;;  %v3287_v3 = vld [vmem:[%s3768_s5 + $0x544] ss:$48 sps:$4 sm:$0xff]   ;;  %v3292_v6 = vld [vmem:[%s3768_s5 + $0x540] ss:$48 sps:$4 sm:$0xff]   ;;  %v3305_v20 = vld [vmem:[%s3768_s5 + $0x368] ss:$48 sps:$4 sm:$0xff]  }
  0x36   : > { %2176 = vmatprep.subr.bf16.mxu1 %v3241_v32  ;;  %v3293_v7 = vld [vmem:[%s3768_s5 + $0x5a4] ss:$48 sps:$4 sm:$0xff]   ;;  %v3298_v11 = vld [vmem:[%s3768_s5 + $0x5a0] ss:$48 sps:$4 sm:$0xff]   ;;  %v3308_v21 = vld [vmem:[%s3768_s5 + $0x668] ss:$48 sps:$4 sm:$0xff]  }
  0x37   : > { %v3313_v22 = vld [vmem:[%s3768_s5 + $0x3cc] ss:$48 sps:$4 sm:$0xff]   ;;  %v3311_v24 = vld [vmem:[%s3768_s5 + $0x3c8] ss:$48 sps:$4 sm:$0xff]   ;;  %v3364_v56 = vld [vmem:[%s3768_s5 + $0x6d4] ss:$48 sps:$4 sm:$0xff]  }
  0x38   : > { %2136 = vmatpush1.bf16.msra.mxu0 %v3243_v33  ;;  %v3316_v23 = vld [vmem:[%s3768_s5 + $0x6cc] ss:$48 sps:$4 sm:$0xff]   ;;  %v3314_v25 = vld [vmem:[%s3768_s5 + $0x6c8] ss:$48 sps:$4 sm:$0xff]   ;;  %v3386_v12 = vld [vmem:[%s3768_s5 + $0x850] ss:$48 sps:$4 sm:$0xff]  }
  0x39   : > { %2177 = vmatpush1.bf16.msra.mxu1 %v3244_v34  ;;  %2137 = vmatprep.subr.bf16.mxu0 %v3245_v35  ;;  %v3319_v26 = vld [vmem:[%s3768_s5 + $0x42c] ss:$48 sps:$4 sm:$0xff]   ;;  %v3317_v28 = vld [vmem:[%s3768_s5 + $0x428] ss:$48 sps:$4 sm:$0xff]  }
  0x3a   : > { %2178 = vmatprep.subr.bf16.mxu1 %v3247_v36  ;;  %v3322_v27 = vld [vmem:[%s3768_s5 + $0x72c] ss:$48 sps:$4 sm:$0xff]   ;;  %v3320_v29 = vld [vmem:[%s3768_s5 + $0x728] ss:$48 sps:$4 sm:$0xff]  }
  0x3b   : > { %v3325_v30 = vld [vmem:[%s3768_s5 + $0x48c] ss:$48 sps:$4 sm:$0xff]   ;;  %v3323_v32 = vld [vmem:[%s3768_s5 + $0x488] ss:$48 sps:$4 sm:$0xff]  }
  0x3c   : > { %2138 = vmatpush1.bf16.msra.mxu0 %v3249_v37  ;;  %v3328_v31 = vld [vmem:[%s3768_s5 + $0x78c] ss:$48 sps:$4 sm:$0xff]   ;;  %v3326_v33 = vld [vmem:[%s3768_s5 + $0x788] ss:$48 sps:$4 sm:$0xff]  }
  0x3d   : > { %2179 = vmatpush1.bf16.msra.mxu1 %v3250_v38  ;;  %2139 = vmatprep.subr.bf16.mxu0 %v3251_v40  ;;  %v3331_v34 = vld [vmem:[%s3768_s5 + $0x4ec] ss:$48 sps:$4 sm:$0xff]   ;;  %v3329_v36 = vld [vmem:[%s3768_s5 + $0x4e8] ss:$48 sps:$4 sm:$0xff]  }
  0x3e   : > { %2205 = vmatprep.subr.bf16.mxu1 %v3255_v41  ;;  %v3334_v35 = vld [vmem:[%s3768_s5 + $0x7ec] ss:$48 sps:$4 sm:$0xff]   ;;  %v3332_v37 = vld [vmem:[%s3768_s5 + $0x7e8] ss:$48 sps:$4 sm:$0xff]  }
  0x3f   : > { %v3337_v38 = vld [vmem:[%s3768_s5 + $0x54c] ss:$48 sps:$4 sm:$0xff]   ;;  %v3335_v40 = vld [vmem:[%s3768_s5 + $0x548] ss:$48 sps:$4 sm:$0xff]  }
  0x40   : > { %2197 = vmatmul.mubr.bf16.vlgmr.msra.gmra.mrb[0].mxu1 %v3822_v42  ;;  %2140 = vmatpush1.bf16.msra.mxu0 %v3256_v44  ;;  %v3340_v39 = vld [vmem:[%s3768_s5 + $0x84c] ss:$48 sps:$4 sm:$0xff]   ;;  %v3338_v41 = vld [vmem:[%s3768_s5 + $0x848] ss:$48 sps:$4 sm:$0xff]  }
  0x41   : > { %2206 = vmatpush1.bf16.msra.mxu1 %v3253_v43  ;;  %2141 = vmatprep.subr.bf16.mxu0 %v3257_v45  ;;  %v3343_v43 = vld [vmem:[%s3768_s5 + $0x5ac] ss:$48 sps:$4 sm:$0xff]   ;;  %v3341_v45 = vld [vmem:[%s3768_s5 + $0x5a8] ss:$48 sps:$4 sm:$0xff]  }
  0x42   : > { %2207 = vmatprep.subr.bf16.mxu1 %v3261_v46  ;;  %2237 = vmatprep.mubr.bf16.mxu1 %v3840_v59  ;;  %v3346_v44 = vld [vmem:[%s3768_s5 + $0x8ac] ss:$48 sps:$4 sm:$0xff]   ;;  %v3344_v46 = vld [vmem:[%s3768_s5 + $0x8a8] ss:$48 sps:$4 sm:$0xff]  }
  0x44   : > { %2142 = vmatpush1.bf16.msra.mxu0 %v3262_v48  ;;  %v3352_v48 = vld [vmem:[%s3768_s5 + $0x614] ss:$48 sps:$4 sm:$0xff]  }
  0x45   : > { %2208 = vmatpush1.bf16.msra.mxu1 %v3259_v47  ;;  %2143 = vmatprep.subr.bf16.mxu0 %v3263_v49  ;;  %v3349_v47 = vld [vmem:[%s3768_s5 + $0x14] ss:$48 sps:$4 sm:$0xff]   ;;  %v3347_v49 = vld [vmem:[%s3768_s5 + $0x10] ss:$48 sps:$4 sm:$0xff]  }
  0x46   : > { %2209 = vmatprep.subr.bf16.mxu1 %v3267_v50  ;;  %v3350_v50 = vld [vmem:[%s3768_s5 + $0x610] ss:$48 sps:$4 sm:$0xff]  }
  0x48   : > { %2144 = vmatpush1.bf16.msra.mxu0 %v3268_v52  ;;  %v3358_v52 = vld [vmem:[%s3768_s5 + $0x674] ss:$48 sps:$4 sm:$0xff]  }
  0x49   : > { %2210 = vmatpush1.bf16.msra.mxu1 %v3265_v51  ;;  %2145 = vmatprep.subr.bf16.mxu0 %v3269_v53  ;;  %v3355_v51 = vld [vmem:[%s3768_s5 + $0x74] ss:$48 sps:$4 sm:$0xff]   ;;  %v3353_v53 = vld [vmem:[%s3768_s5 + $0x70] ss:$48 sps:$4 sm:$0xff]  }
  0x4a   : > { %2211 = vmatprep.subr.bf16.mxu1 %v3273_v54  ;;  %v3356_v54 = vld [vmem:[%s3768_s5 + $0x670] ss:$48 sps:$4 sm:$0xff]  }
  0x4c   : > { %2146 = vmatpush1.bf16.msra.mxu0 %v3274_v57  ;;  %v3359_v57 = vld [vmem:[%s3768_s5 + $0xd0] ss:$48 sps:$4 sm:$0xff]  }
  0x4d   : > { %2212 = vmatpush1.bf16.msra.mxu1 %v3271_v55  ;;  %2147 = vmatprep.subr.bf16.mxu0 %v3275_v58  ;;  %v3361_v55 = vld [vmem:[%s3768_s5 + $0xd4] ss:$48 sps:$4 sm:$0xff]   ;;  %v3362_v58 = vld [vmem:[%s3768_s5 + $0x6d0] ss:$48 sps:$4 sm:$0xff]  }
  0x4e   : > { %2213 = vmatprep.subr.bf16.mxu1 %v3279_v60  ;;  %v3367_v60 = vld [vmem:[%s3768_s5 + $0x134] ss:$48 sps:$4 sm:$0xff]  }
  0x50   : > { %2148 = vmatpush1.bf16.msra.mxu0 %v3280_v62  ;;  %v3365_v62 = vld [vmem:[%s3768_s5 + $0x130] ss:$48 sps:$4 sm:$0xff]  }
  0x51   : > { %2214 = vmatpush1.bf16.msra.mxu1 %v3277_v61  ;;  %2149 = vmatprep.subr.bf16.mxu0 %v3281_v63  ;;  %v3370_v61 = vld [vmem:[%s3768_s5 + $0x734] ss:$48 sps:$4 sm:$0xff]   ;;  %v3368_v63 = vld [vmem:[%s3768_s5 + $0x730] ss:$48 sps:$4 sm:$0xff]  }
  0x52   : > { %2215 = vmatprep.subr.bf16.mxu1 %v3285_v0  ;;  %v3373_v0 = vld [vmem:[%s3768_s5 + $0x194] ss:$48 sps:$4 sm:$0xff]  }
  0x54   : > { %2150 = vmatpush1.bf16.msra.mxu0 %v3286_v2  ;;  %v3371_v2 = vld [vmem:[%s3768_s5 + $0x190] ss:$48 sps:$4 sm:$0xff]  }
  0x55   : > { %2216 = vmatpush1.bf16.msra.mxu1 %v3283_v1  ;;  %2151 = vmatprep.subr.bf16.mxu0 %v3287_v3  ;;  %v3376_v1 = vld [vmem:[%s3768_s5 + $0x794] ss:$48 sps:$4 sm:$0xff]   ;;  %v3374_v3 = vld [vmem:[%s3768_s5 + $0x790] ss:$48 sps:$4 sm:$0xff]  }
  0x56   : > { %2217 = vmatprep.subr.bf16.mxu1 %v3291_v4  ;;  %v3379_v4 = vld [vmem:[%s3768_s5 + $0x1f4] ss:$48 sps:$4 sm:$0xff]  }
  0x58   : > { %2152 = vmatpush1.bf16.msra.mxu0 %v3292_v6  ;;  %v3377_v6 = vld [vmem:[%s3768_s5 + $0x1f0] ss:$48 sps:$4 sm:$0xff]  }
  0x59   : > { %2218 = vmatpush1.bf16.msra.mxu1 %v3289_v5  ;;  %2153 = vmatprep.subr.bf16.mxu0 %v3293_v7  ;;  %v3382_v5 = vld [vmem:[%s3768_s5 + $0x7f4] ss:$48 sps:$4 sm:$0xff]   ;;  %v3380_v7 = vld [vmem:[%s3768_s5 + $0x7f0] ss:$48 sps:$4 sm:$0xff]  }
  0x5a   : > { %2219 = vmatprep.subr.bf16.mxu1 %v3297_v9  ;;  %v3385_v9 = vld [vmem:[%s3768_s5 + $0x254] ss:$48 sps:$4 sm:$0xff]  }
  0x5c   : > { %2154 = vmatpush1.bf16.msra.mxu0 %v3298_v11  ;;  %v3383_v11 = vld [vmem:[%s3768_s5 + $0x250] ss:$48 sps:$4 sm:$0xff]  }
  0x5d   : > { %2220 = vmatpush1.bf16.msra.mxu1 %v3295_v10  ;;  %2246 = vmatprep.subr.bf16.mxu0 %v3304_v14  ;;  %v3388_v10 = vld [vmem:[%s3768_s5 + $0x854] ss:$48 sps:$4 sm:$0xff]  }
  0x5e   : > { %2221 = vmatprep.subr.bf16.mxu1 %v3301_v13  ;;  %v3391_v13 = vld [vmem:[%s3768_s5 + $0x2b4] ss:$48 sps:$4 sm:$0xff]  }
  0x5f   : > { %2156 = vmatmul.mubr.bf16.vlgmr.msra.gmra.mrb[0].mxu0 %v3861_v15  ;;  %v3394_v14 = vld [vmem:[%s3768_s5 + $0x8b4] ss:$48 sps:$4 sm:$0xff]  }
  0x60   : > { %2247 = vmatpush1.bf16.msra.mxu0 %v3302_v17  ;;  %2278 = vmatprep.mubr.bf16.mxu0 %v3705_v8  ;;  %v3392_v17 = vld [vmem:[%s3768_s5 + $0x8b0] ss:$48 sps:$4 sm:$0xff]  }
  0x61   : > { %2222 = vmatpush1.bf16.msra.mxu1 %v3299_v16  ;;  %2248 = vmatprep.subr.bf16.mxu0 %v3310_v19  ;;  %v3389_v16 = vld [vmem:[%s3768_s5 + $0x2b0] ss:$48 sps:$4 sm:$0xff]   ;;  %v3400_v19 = vld [vmem:[%s3768_s5 + $0x1c] ss:$48 sps:$4 sm:$0xff]  }
  0x62   : > { %2223 = vmatprep.subr.bf16.mxu1 %v3307_v18  ;;  %v3397_v18 = vld [vmem:[%s3768_s5 + $0x314] ss:$48 sps:$4 sm:$0xff]  }
  0x64   : > { %2249 = vmatpush1.bf16.msra.mxu0 %v3308_v21  ;;  %v3398_v21 = vld [vmem:[%s3768_s5 + $0x18] ss:$48 sps:$4 sm:$0xff]  }
  0x65   : > { %2224 = vmatpush1.bf16.msra.mxu1 %v3305_v20  ;;  %2250 = vmatprep.subr.bf16.mxu0 %v3316_v23  ;;  %v3395_v20 = vld [vmem:[%s3768_s5 + $0x310] ss:$48 sps:$4 sm:$0xff]   ;;  %v3406_v23 = vld [vmem:[%s3768_s5 + $0x7c] ss:$48 sps:$4 sm:$0xff]  }
  0x66   : > { %2225 = vmatprep.subr.bf16.mxu1 %v3313_v22  ;;  %v3403_v22 = vld [vmem:[%s3768_s5 + $0x374] ss:$48 sps:$4 sm:$0xff]  }
  0x68   : > { %2251 = vmatpush1.bf16.msra.mxu0 %v3314_v25  ;;  %v3404_v25 = vld [vmem:[%s3768_s5 + $0x78] ss:$48 sps:$4 sm:$0xff]  }
  0x69   : > { %2226 = vmatpush1.bf16.msra.mxu1 %v3311_v24  ;;  %2252 = vmatprep.subr.bf16.mxu0 %v3322_v27  ;;  %v3401_v24 = vld [vmem:[%s3768_s5 + $0x370] ss:$48 sps:$4 sm:$0xff]   ;;  %v3412_v27 = vld [vmem:[%s3768_s5 + $0xdc] ss:$48 sps:$4 sm:$0xff]  }
  0x6a   : > { %2227 = vmatprep.subr.bf16.mxu1 %v3319_v26  ;;  %v3409_v26 = vld [vmem:[%s3768_s5 + $0x3d4] ss:$48 sps:$4 sm:$0xff]  }
  0x6c   : > { %2253 = vmatpush1.bf16.msra.mxu0 %v3320_v29  ;;  %v3410_v29 = vld [vmem:[%s3768_s5 + $0xd8] ss:$48 sps:$4 sm:$0xff]  }
  0x6d   : > { %2228 = vmatpush1.bf16.msra.mxu1 %v3317_v28  ;;  %2254 = vmatprep.subr.bf16.mxu0 %v3328_v31  ;;  %v3407_v28 = vld [vmem:[%s3768_s5 + $0x3d0] ss:$48 sps:$4 sm:$0xff]   ;;  %v3418_v31 = vld [vmem:[%s3768_s5 + $0x13c] ss:$48 sps:$4 sm:$0xff]  }
  0x6e   : > { %2229 = vmatprep.subr.bf16.mxu1 %v3325_v30  ;;  %v3415_v30 = vld [vmem:[%s3768_s5 + $0x434] ss:$48 sps:$4 sm:$0xff]  }
  0x70   : > { %2255 = vmatpush1.bf16.msra.mxu0 %v3326_v33  ;;  %v3416_v33 = vld [vmem:[%s3768_s5 + $0x138] ss:$48 sps:$4 sm:$0xff]  }
  0x71   : > { %2230 = vmatpush1.bf16.msra.mxu1 %v3323_v32  ;;  %2256 = vmatprep.subr.bf16.mxu0 %v3334_v35  ;;  %v3413_v32 = vld [vmem:[%s3768_s5 + $0x430] ss:$48 sps:$4 sm:$0xff]   ;;  %v3424_v35 = vld [vmem:[%s3768_s5 + $0x19c] ss:$48 sps:$4 sm:$0xff]  }
  0x72   : > { %2231 = vmatprep.subr.bf16.mxu1 %v3331_v34  ;;  %v3421_v34 = vld [vmem:[%s3768_s5 + $0x494] ss:$48 sps:$4 sm:$0xff]  }
  0x74   : > { %2257 = vmatpush1.bf16.msra.mxu0 %v3332_v37  ;;  %v3422_v37 = vld [vmem:[%s3768_s5 + $0x198] ss:$48 sps:$4 sm:$0xff]  }
  0x75   : > { %2232 = vmatpush1.bf16.msra.mxu1 %v3329_v36  ;;  %2258 = vmatprep.subr.bf16.mxu0 %v3340_v39  ;;  %v3419_v36 = vld [vmem:[%s3768_s5 + $0x490] ss:$48 sps:$4 sm:$0xff]   ;;  %v3430_v39 = vld [vmem:[%s3768_s5 + $0x1fc] ss:$48 sps:$4 sm:$0xff]  }
  0x76   : > { %2233 = vmatprep.subr.bf16.mxu1 %v3337_v38  ;;  %v3427_v38 = vld [vmem:[%s3768_s5 + $0x4f4] ss:$48 sps:$4 sm:$0xff]  }
  0x78   : > { %2259 = vmatpush1.bf16.msra.mxu0 %v3338_v41  ;;  %v3428_v41 = vld [vmem:[%s3768_s5 + $0x1f8] ss:$48 sps:$4 sm:$0xff]  }
  0x79   : > { %2234 = vmatpush1.bf16.msra.mxu1 %v3335_v40  ;;  %2260 = vmatprep.subr.bf16.mxu0 %v3346_v44  ;;  %v3425_v40 = vld [vmem:[%s3768_s5 + $0x4f0] ss:$48 sps:$4 sm:$0xff]   ;;  %v3436_v44 = vld [vmem:[%s3768_s5 + $0x25c] ss:$48 sps:$4 sm:$0xff]  }
  0x7a   : > { %2235 = vmatprep.subr.bf16.mxu1 %v3343_v43  ;;  %v3433_v43 = vld [vmem:[%s3768_s5 + $0x554] ss:$48 sps:$4 sm:$0xff]  }
  0x7c   : > { %2261 = vmatpush1.bf16.msra.mxu0 %v3344_v46  ;;  %v3434_v46 = vld [vmem:[%s3768_s5 + $0x258] ss:$48 sps:$4 sm:$0xff]  }
  0x7d   : > { %2236 = vmatpush1.bf16.msra.mxu1 %v3341_v45  ;;  %2287 = vmatprep.subr.bf16.mxu0 %v3349_v47  ;;  %v3431_v45 = vld [vmem:[%s3768_s5 + $0x550] ss:$48 sps:$4 sm:$0xff]   ;;  %v3439_v47 = vld [vmem:[%s3768_s5 + $0x5b4] ss:$48 sps:$4 sm:$0xff]  }
  0x7e   : > { %2328 = vmatprep.subr.bf16.mxu1 %v3352_v48  ;;  %v3442_v48 = vld [vmem:[%s3768_s5 + $0x2bc] ss:$48 sps:$4 sm:$0xff]  }
  0x7f   : > { %2279 = vmatmul.mubr.bf16.vlgmr.msra.gmra.mrb[4].mxu0 %v3822_v42 }
  0x80   : > { %2238 = vmatmul.mubr.bf16.vlgmr.msra.gmra.mrb[4].mxu1 %v3861_v15  ;;  %2288 = vmatpush1.bf16.msra.mxu0 %v3347_v49  ;;  %v3437_v49 = vld [vmem:[%s3768_s5 + $0x5b0] ss:$48 sps:$4 sm:$0xff]  }
  0x81   : > { %2329 = vmatpush1.bf16.msra.mxu1 %v3350_v50  ;;  %2289 = vmatprep.subr.bf16.mxu0 %v3355_v51  ;;  %v3440_v50 = vld [vmem:[%s3768_s5 + $0x2b8] ss:$48 sps:$4 sm:$0xff]   ;;  %v3445_v51 = vld [vmem:[%s3768_s5 + $0x31c] ss:$48 sps:$4 sm:$0xff]  }
  0x82   : > { %2330 = vmatprep.subr.bf16.mxu1 %v3358_v52  ;;  %2360 = vmatprep.mubr.bf16.mxu1 %v3705_v8  ;;  %v3448_v52 = vld [vmem:[%s3768_s5 + $0x61c] ss:$48 sps:$4 sm:$0xff]  }
  0x83   : > { %2319 = vmatprep.mubr.bf16.mxu0 %v3840_v59 }
  0x84   : > { %2290 = vmatpush1.bf16.msra.mxu0 %v3353_v53  ;;  %v3443_v53 = vld [vmem:[%s3768_s5 + $0x318] ss:$48 sps:$4 sm:$0xff]  }
  0x85   : > { %2331 = vmatpush1.bf16.msra.mxu1 %v3356_v54  ;;  %2291 = vmatprep.subr.bf16.mxu0 %v3361_v55  ;;  %v3446_v54 = vld [vmem:[%s3768_s5 + $0x618] ss:$48 sps:$4 sm:$0xff]   ;;  %v3451_v55 = vld [vmem:[%s3768_s5 + $0x37c] ss:$48 sps:$4 sm:$0xff]  }
  0x86   : > { %2332 = vmatprep.subr.bf16.mxu1 %v3364_v56  ;;  %v3454_v56 = vld [vmem:[%s3768_s5 + $0x67c] ss:$48 sps:$4 sm:$0xff]  }
  0x88   : > { %2292 = vmatpush1.bf16.msra.mxu0 %v3359_v57  ;;  %v3449_v57 = vld [vmem:[%s3768_s5 + $0x378] ss:$48 sps:$4 sm:$0xff]  }
  0x89   : > { %2333 = vmatpush1.bf16.msra.mxu1 %v3362_v58  ;;  %2293 = vmatprep.subr.bf16.mxu0 %v3367_v60  ;;  %v3452_v58 = vld [vmem:[%s3768_s5 + $0x678] ss:$48 sps:$4 sm:$0xff]   ;;  %v3457_v60 = vld [vmem:[%s3768_s5 + $0x3dc] ss:$48 sps:$4 sm:$0xff]  }
  0x8a   : > { %2334 = vmatprep.subr.bf16.mxu1 %v3370_v61  ;;  %v3460_v61 = vld [vmem:[%s3768_s5 + $0x6dc] ss:$48 sps:$4 sm:$0xff]  }
  0x8c   : > { %2294 = vmatpush1.bf16.msra.mxu0 %v3365_v62  ;;  %v3455_v62 = vld [vmem:[%s3768_s5 + $0x3d8] ss:$48 sps:$4 sm:$0xff]  }
  0x8d   : > { %2335 = vmatpush1.bf16.msra.mxu1 %v3368_v63  ;;  %2295 = vmatprep.subr.bf16.mxu0 %v3373_v0  ;;  %v3458_v63 = vld [vmem:[%s3768_s5 + $0x6d8] ss:$48 sps:$4 sm:$0xff]   ;;  %v3463_v0 = vld [vmem:[%s3768_s5 + $0x43c] ss:$48 sps:$4 sm:$0xff]  }
  0x8e   : > { %2336 = vmatprep.subr.bf16.mxu1 %v3376_v1  ;;  %v3466_v1 = vld [vmem:[%s3768_s5 + $0x73c] ss:$48 sps:$4 sm:$0xff]  }
  0x90   : > { %2296 = vmatpush1.bf16.msra.mxu0 %v3371_v2  ;;  %v3461_v2 = vld [vmem:[%s3768_s5 + $0x438] ss:$48 sps:$4 sm:$0xff]  }
  0x91   : > { %2337 = vmatpush1.bf16.msra.mxu1 %v3374_v3  ;;  %2297 = vmatprep.subr.bf16.mxu0 %v3379_v4  ;;  %v3464_v3 = vld [vmem:[%s3768_s5 + $0x738] ss:$48 sps:$4 sm:$0xff]   ;;  %v3469_v4 = vld [vmem:[%s3768_s5 + $0x49c] ss:$48 sps:$4 sm:$0xff]  }
  0x92   : > { %2338 = vmatprep.subr.bf16.mxu1 %v3382_v5  ;;  %v3472_v5 = vld [vmem:[%s3768_s5 + $0x79c] ss:$48 sps:$4 sm:$0xff]  }
  0x94   : > { %2298 = vmatpush1.bf16.msra.mxu0 %v3377_v6  ;;  %v3467_v6 = vld [vmem:[%s3768_s5 + $0x498] ss:$48 sps:$4 sm:$0xff]  }
  0x95   : > { %2339 = vmatpush1.bf16.msra.mxu1 %v3380_v7  ;;  %2299 = vmatprep.subr.bf16.mxu0 %v3385_v9  ;;  %v3470_v7 = vld [vmem:[%s3768_s5 + $0x798] ss:$48 sps:$4 sm:$0xff]   ;;  %v3475_v9 = vld [vmem:[%s3768_s5 + $0x4fc] ss:$48 sps:$4 sm:$0xff]  }
  0x96   : > { %2340 = vmatprep.subr.bf16.mxu1 %v3388_v10  ;;  %v3478_v10 = vld [vmem:[%s3768_s5 + $0x7fc] ss:$48 sps:$4 sm:$0xff]  }
  0x98   : > { %2300 = vmatpush1.bf16.msra.mxu0 %v3383_v11  ;;  %v3473_v11 = vld [vmem:[%s3768_s5 + $0x4f8] ss:$48 sps:$4 sm:$0xff]  }
  0x99   : > { %2341 = vmatpush1.bf16.msra.mxu1 %v3386_v12  ;;  %2301 = vmatprep.subr.bf16.mxu0 %v3391_v13  ;;  %v3476_v12 = vld [vmem:[%s3768_s5 + $0x7f8] ss:$48 sps:$4 sm:$0xff]   ;;  %v3481_v13 = vld [vmem:[%s3768_s5 + $0x55c] ss:$48 sps:$4 sm:$0xff]  }
  0x9a   : > { %2342 = vmatprep.subr.bf16.mxu1 %v3394_v14  ;;  %v3484_v14 = vld [vmem:[%s3768_s5 + $0x85c] ss:$48 sps:$4 sm:$0xff]  }
  0x9c   : > { %2302 = vmatpush1.bf16.msra.mxu0 %v3389_v16  ;;  %v3479_v16 = vld [vmem:[%s3768_s5 + $0x558] ss:$48 sps:$4 sm:$0xff]  }
  0x9d   : > { %2343 = vmatpush1.bf16.msra.mxu1 %v3392_v17  ;;  %2303 = vmatprep.subr.bf16.mxu0 %v3397_v18  ;;  %v3482_v17 = vld [vmem:[%s3768_s5 + $0x858] ss:$48 sps:$4 sm:$0xff]   ;;  %v3487_v18 = vld [vmem:[%s3768_s5 + $0x5bc] ss:$48 sps:$4 sm:$0xff]  }
  0x9e   : > { %2369 = vmatprep.subr.bf16.mxu1 %v3400_v19  ;;  %v3490_v19 = vld [vmem:[%s3768_s5 + $0x8bc] ss:$48 sps:$4 sm:$0xff]  }
  0xa0   : > { %2361 = vmatmul.mubr.bf16.vlgmr.msra.gmra.mrb[8].mxu1 %v3822_v42  ;;  %2304 = vmatpush1.bf16.msra.mxu0 %v3395_v20  ;;  %v3485_v20 = vld [vmem:[%s3768_s5 + $0x5b8] ss:$48 sps:$4 sm:$0xff]  }
  0xa1   : > { %2370 = vmatpush1.bf16.msra.mxu1 %v3398_v21  ;;  %2305 = vmatprep.subr.bf16.mxu0 %v3403_v22  ;;  %v3488_v21 = vld [vmem:[%s3768_s5 + $0x8b8] ss:$48 sps:$4 sm:$0xff]   ;;  %v3493_v22 = vld [vmem:[%s3768_s5 + $0x24] ss:$48 sps:$4 sm:$0xff]  }
  0xa2   : > { %2371 = vmatprep.subr.bf16.mxu1 %v3406_v23  ;;  %2401 = vmatprep.mubr.bf16.mxu1 %v3840_v59  ;;  %v3496_v23 = vld [vmem:[%s3768_s5 + $0x624] ss:$48 sps:$4 sm:$0xff]  }
  0xa4   : > { %2306 = vmatpush1.bf16.msra.mxu0 %v3401_v24  ;;  %v3491_v24 = vld [vmem:[%s3768_s5 + $0x20] ss:$48 sps:$4 sm:$0xff]  }
  0xa5   : > { %2372 = vmatpush1.bf16.msra.mxu1 %v3404_v25  ;;  %2307 = vmatprep.subr.bf16.mxu0 %v3409_v26  ;;  %v3494_v25 = vld [vmem:[%s3768_s5 + $0x620] ss:$48 sps:$4 sm:$0xff]   ;;  %v3499_v26 = vld [vmem:[%s3768_s5 + $0x84] ss:$48 sps:$4 sm:$0xff]  }
  0xa6   : > { %2373 = vmatprep.subr.bf16.mxu1 %v3412_v27  ;;  %v3502_v27 = vld [vmem:[%s3768_s5 + $0x684] ss:$48 sps:$4 sm:$0xff]  }
  0xa8   : > { %2308 = vmatpush1.bf16.msra.mxu0 %v3407_v28  ;;  %v3497_v28 = vld [vmem:[%s3768_s5 + $0x80] ss:$48 sps:$4 sm:$0xff]  }
  0xa9   : > { %2374 = vmatpush1.bf16.msra.mxu1 %v3410_v29  ;;  %2309 = vmatprep.subr.bf16.mxu0 %v3415_v30  ;;  %v3500_v29 = vld [vmem:[%s3768_s5 + $0x680] ss:$48 sps:$4 sm:$0xff]   ;;  %v3505_v30 = vld [vmem:[%s3768_s5 + $0xe4] ss:$48 sps:$4 sm:$0xff]  }
  0xaa   : > { %2375 = vmatprep.subr.bf16.mxu1 %v3418_v31  ;;  %v3508_v31 = vld [vmem:[%s3768_s5 + $0x6e4] ss:$48 sps:$4 sm:$0xff]  }
  0xac   : > { %2310 = vmatpush1.bf16.msra.mxu0 %v3413_v32  ;;  %v3503_v32 = vld [vmem:[%s3768_s5 + $0xe0] ss:$48 sps:$4 sm:$0xff]  }
  0xad   : > { %2376 = vmatpush1.bf16.msra.mxu1 %v3416_v33  ;;  %2311 = vmatprep.subr.bf16.mxu0 %v3421_v34  ;;  %v3506_v33 = vld [vmem:[%s3768_s5 + $0x6e0] ss:$48 sps:$4 sm:$0xff]   ;;  %v3511_v34 = vld [vmem:[%s3768_s5 + $0x144] ss:$48 sps:$4 sm:$0xff]  }
  0xae   : > { %2377 = vmatprep.subr.bf16.mxu1 %v3424_v35  ;;  %v3514_v35 = vld [vmem:[%s3768_s5 + $0x744] ss:$48 sps:$4 sm:$0xff]  }
  0xb0   : > { %2312 = vmatpush1.bf16.msra.mxu0 %v3419_v36  ;;  %v3509_v36 = vld [vmem:[%s3768_s5 + $0x140] ss:$48 sps:$4 sm:$0xff]  }
  0xb1   : > { %2378 = vmatpush1.bf16.msra.mxu1 %v3422_v37  ;;  %2313 = vmatprep.subr.bf16.mxu0 %v3427_v38  ;;  %v3512_v37 = vld [vmem:[%s3768_s5 + $0x740] ss:$48 sps:$4 sm:$0xff]   ;;  %v3517_v38 = vld [vmem:[%s3768_s5 + $0x1a4] ss:$48 sps:$4 sm:$0xff]  }
  0xb2   : > { %2379 = vmatprep.subr.bf16.mxu1 %v3430_v39  ;;  %v3520_v39 = vld [vmem:[%s3768_s5 + $0x7a4] ss:$48 sps:$4 sm:$0xff]  }
  0xb4   : > { %2314 = vmatpush1.bf16.msra.mxu0 %v3425_v40  ;;  %v3515_v40 = vld [vmem:[%s3768_s5 + $0x1a0] ss:$48 sps:$4 sm:$0xff]  }
  0xb5   : > { %2380 = vmatpush1.bf16.msra.mxu1 %v3428_v41  ;;  %2315 = vmatprep.subr.bf16.mxu0 %v3433_v43  ;;  %v3518_v41 = vld [vmem:[%s3768_s5 + $0x7a0] ss:$48 sps:$4 sm:$0xff]   ;;  %v3523_v43 = vld [vmem:[%s3768_s5 + $0x204] ss:$48 sps:$4 sm:$0xff]  }
  0xb6   : > { %2381 = vmatprep.subr.bf16.mxu1 %v3436_v44  ;;  %v3526_v44 = vld [vmem:[%s3768_s5 + $0x804] ss:$48 sps:$4 sm:$0xff]  }
  0xb8   : > { %2316 = vmatpush1.bf16.msra.mxu0 %v3431_v45  ;;  %v3521_v45 = vld [vmem:[%s3768_s5 + $0x200] ss:$48 sps:$4 sm:$0xff]  }
  0xb9   : > { %2382 = vmatpush1.bf16.msra.mxu1 %v3434_v46  ;;  %2317 = vmatprep.subr.bf16.mxu0 %v3439_v47  ;;  %v3524_v46 = vld [vmem:[%s3768_s5 + $0x800] ss:$48 sps:$4 sm:$0xff]   ;;  %v3529_v47 = vld [vmem:[%s3768_s5 + $0x264] ss:$48 sps:$4 sm:$0xff]  }
  0xba   : > { %2383 = vmatprep.subr.bf16.mxu1 %v3442_v48  ;;  %v3532_v48 = vld [vmem:[%s3768_s5 + $0x864] ss:$48 sps:$4 sm:$0xff]  }
  0xbc   : > { %2318 = vmatpush1.bf16.msra.mxu0 %v3437_v49  ;;  %v3527_v49 = vld [vmem:[%s3768_s5 + $0x260] ss:$48 sps:$4 sm:$0xff]  }
  0xbd   : > { %2384 = vmatpush1.bf16.msra.mxu1 %v3440_v50  ;;  %2410 = vmatprep.subr.bf16.mxu0 %v3448_v52  ;;  %v3530_v50 = vld [vmem:[%s3768_s5 + $0x860] ss:$48 sps:$4 sm:$0xff]   ;;  %v3538_v52 = vld [vmem:[%s3768_s5 + $0x8c4] ss:$48 sps:$4 sm:$0xff]  }
  0xbe   : > { %2385 = vmatprep.subr.bf16.mxu1 %v3445_v51  ;;  %v3535_v51 = vld [vmem:[%s3768_s5 + $0x2c4] ss:$48 sps:$4 sm:$0xff]  }
  0xbf   : > { %2320 = vmatmul.mubr.bf16.vlgmr.msra.gmra.mrb[8].mxu0 %v3861_v15 }
  0xc0   : > { %2411 = vmatpush1.bf16.msra.mxu0 %v3446_v54  ;;  %2442 = vmatprep.mubr.bf16.mxu0 %v3705_v8  ;;  %v3536_v54 = vld [vmem:[%s3768_s5 + $0x8c0] ss:$48 sps:$4 sm:$0xff]  }
  0xc1   : > { %2386 = vmatpush1.bf16.msra.mxu1 %v3443_v53  ;;  %2412 = vmatprep.subr.bf16.mxu0 %v3454_v56  ;;  %v3533_v53 = vld [vmem:[%s3768_s5 + $0x2c0] ss:$48 sps:$4 sm:$0xff]   ;;  %v3544_v56 = vld [vmem:[%s3768_s5 + $0x2c] ss:$48 sps:$4 sm:$0xff]  }
  0xc2   : > { %2387 = vmatprep.subr.bf16.mxu1 %v3451_v55  ;;  %v3541_v55 = vld [vmem:[%s3768_s5 + $0x324] ss:$48 sps:$4 sm:$0xff]  }
  0xc4   : > { %2413 = vmatpush1.bf16.msra.mxu0 %v3452_v58  ;;  %v3542_v58 = vld [vmem:[%s3768_s5 + $0x28] ss:$48 sps:$4 sm:$0xff]  }
  0xc5   : > { %2388 = vmatpush1.bf16.msra.mxu1 %v3449_v57  ;;  %2414 = vmatprep.subr.bf16.mxu0 %v3460_v61  ;;  %v3539_v57 = vld [vmem:[%s3768_s5 + $0x320] ss:$48 sps:$4 sm:$0xff]   ;;  %v3550_v61 = vld [vmem:[%s3768_s5 + $0x8c] ss:$48 sps:$4 sm:$0xff]  }
  0xc6   : > { %2389 = vmatprep.subr.bf16.mxu1 %v3457_v60  ;;  %v3547_v60 = vld [vmem:[%s3768_s5 + $0x384] ss:$48 sps:$4 sm:$0xff]  }
  0xc8   : > { %2415 = vmatpush1.bf16.msra.mxu0 %v3458_v63  ;;  %v3548_v63 = vld [vmem:[%s3768_s5 + $0x88] ss:$48 sps:$4 sm:$0xff]  }
  0xc9   : > { %2390 = vmatpush1.bf16.msra.mxu1 %v3455_v62  ;;  %2416 = vmatprep.subr.bf16.mxu0 %v3466_v1  ;;  %v3545_v62 = vld [vmem:[%s3768_s5 + $0x380] ss:$48 sps:$4 sm:$0xff]   ;;  %v3556_v1 = vld [vmem:[%s3768_s5 + $0xec] ss:$48 sps:$4 sm:$0xff]  }
  0xca   : > { %2391 = vmatprep.subr.bf16.mxu1 %v3463_v0  ;;  %v3553_v0 = vld [vmem:[%s3768_s5 + $0x3e4] ss:$48 sps:$4 sm:$0xff]  }
  0xcc   : > { %2417 = vmatpush1.bf16.msra.mxu0 %v3464_v3  ;;  %v3554_v3 = vld [vmem:[%s3768_s5 + $0xe8] ss:$48 sps:$4 sm:$0xff]  }
  0xcd   : > { %2392 = vmatpush1.bf16.msra.mxu1 %v3461_v2  ;;  %2418 = vmatprep.subr.bf16.mxu0 %v3472_v5  ;;  %v3551_v2 = vld [vmem:[%s3768_s5 + $0x3e0] ss:$48 sps:$4 sm:$0xff]   ;;  %v3562_v5 = vld [vmem:[%s3768_s5 + $0x14c] ss:$48 sps:$4 sm:$0xff]  }
  0xce   : > { %2393 = vmatprep.subr.bf16.mxu1 %v3469_v4  ;;  %v3559_v4 = vld [vmem:[%s3768_s5 + $0x444] ss:$48 sps:$4 sm:$0xff]  }
  0xd0   : > { %2419 = vmatpush1.bf16.msra.mxu0 %v3470_v7  ;;  %v3560_v7 = vld [vmem:[%s3768_s5 + $0x148] ss:$48 sps:$4 sm:$0xff]  }
  0xd1   : > { %2394 = vmatpush1.bf16.msra.mxu1 %v3467_v6  ;;  %2420 = vmatprep.subr.bf16.mxu0 %v3478_v10  ;;  %v3557_v6 = vld [vmem:[%s3768_s5 + $0x440] ss:$48 sps:$4 sm:$0xff]  }
  0xd2   : > { %2395 = vmatprep.subr.bf16.mxu1 %v3475_v9  ;;  %v3568_v9 = vld [vmem:[%s3768_s5 + $0x1ac] ss:$48 sps:$4 sm:$0xff]   ;;  %v3563_v10 = vld [vmem:[%s3768_s5 + $0x4a0] ss:$48 sps:$4 sm:$0xff]  }
  0xd4   : > { %2421 = vmatpush1.bf16.msra.mxu0 %v3476_v12  ;;  %v3571_v12 = vld [vmem:[%s3768_s5 + $0x504] ss:$48 sps:$4 sm:$0xff]  }
  0xd5   : > { %2396 = vmatpush1.bf16.msra.mxu1 %v3473_v11  ;;  %2422 = vmatprep.subr.bf16.mxu0 %v3484_v14  ;;  %v3566_v11 = vld [vmem:[%s3768_s5 + $0x1a8] ss:$48 sps:$4 sm:$0xff]   ;;  %v3569_v14 = vld [vmem:[%s3768_s5 + $0x500] ss:$48 sps:$4 sm:$0xff]  }
  0xd6   : > { %2397 = vmatprep.subr.bf16.mxu1 %v3481_v13  ;;  %v3574_v13 = vld [vmem:[%s3768_s5 + $0x20c] ss:$48 sps:$4 sm:$0xff]  }
  0xd8   : > { %2423 = vmatpush1.bf16.msra.mxu0 %v3482_v17  ;;  %v3577_v17 = vld [vmem:[%s3768_s5 + $0x564] ss:$48 sps:$4 sm:$0xff]  }
  0xd9   : > { %2398 = vmatpush1.bf16.msra.mxu1 %v3479_v16  ;;  %2424 = vmatprep.subr.bf16.mxu0 %v3490_v19  ;;  %v3572_v16 = vld [vmem:[%s3768_s5 + $0x208] ss:$48 sps:$4 sm:$0xff]  }
  0xda   : > { %2399 = vmatprep.subr.bf16.mxu1 %v3487_v18  ;;  %v3580_v18 = vld [vmem:[%s3768_s5 + $0x26c] ss:$48 sps:$4 sm:$0xff]  }
  0xdc   : > { %2425 = vmatpush1.bf16.msra.mxu0 %v3488_v21 }
  0xdd   : > { %2400 = vmatpush1.bf16.msra.mxu1 %v3485_v20  ;;  %2451 = vmatprep.subr.bf16.mxu0 %v3493_v22  ;;  %v3575_v22 = vld [vmem:[%s3768_s5 + $0x560] ss:$48 sps:$4 sm:$0xff]  }
  0xde   : > { %2492 = vmatprep.subr.bf16.mxu1 %v3496_v23  ;;  %v3578_v23 = vld [vmem:[%s3768_s5 + $0x268] ss:$48 sps:$4 sm:$0xff]  }
  0xdf   : > { %2443 = vmatmul.mubr.bf16.vlgmr.msra.gmra.mrb[12].mxu0 %v3822_v42 }
  0xe0   : > { %2402 = vmatmul.mubr.bf16.vlgmr.msra.gmra.mrb[12].mxu1 %v3861_v15  ;;  %2452 = vmatpush1.bf16.msra.mxu0 %v3491_v24 }
  0xe1   : > { %2493 = vmatpush1.bf16.msra.mxu1 %v3494_v25  ;;  %2453 = vmatprep.subr.bf16.mxu0 %v3499_v26  ;;  %v3583_v25 = vld [vmem:[%s3768_s5 + $0x5c4] ss:$48 sps:$4 sm:$0xff]   ;;  %v3586_v26 = vld [vmem:[%s3768_s5 + $0x2cc] ss:$48 sps:$4 sm:$0xff]  }
  0xe2   : > { %2494 = vmatprep.subr.bf16.mxu1 %v3502_v27  ;;  %2524 = vmatprep.mubr.bf16.mxu1 %v3705_v8  ;;  %v3581_v27 = vld [vmem:[%s3768_s5 + $0x5c0] ss:$48 sps:$4 sm:$0xff]  }
  0xe3   : > { %2483 = vmatprep.mubr.bf16.mxu0 %v3840_v59 }
  0xe4   : > { %2454 = vmatpush1.bf16.msra.mxu0 %v3497_v28  ;;  %v3584_v28 = vld [vmem:[%s3768_s5 + $0x2c8] ss:$48 sps:$4 sm:$0xff]  }
  0xe5   : > { %2495 = vmatpush1.bf16.msra.mxu1 %v3500_v29  ;;  %2455 = vmatprep.subr.bf16.mxu0 %v3505_v30  ;;  %v3589_v29 = vld [vmem:[%s3768_s5 + $0x32c] ss:$48 sps:$4 sm:$0xff]  }
  0xe6   : > { %2496 = vmatprep.subr.bf16.mxu1 %v3508_v31  ;;  %v3592_v30 = vld [vmem:[%s3768_s5 + $0x62c] ss:$48 sps:$4 sm:$0xff]   ;;  %v3587_v31 = vld [vmem:[%s3768_s5 + $0x328] ss:$48 sps:$4 sm:$0xff]  }
  0xe8   : > { %2456 = vmatpush1.bf16.msra.mxu0 %v3503_v32  ;;  %v3590_v32 = vld [vmem:[%s3768_s5 + $0x628] ss:$48 sps:$4 sm:$0xff]  }
  0xe9   : > { %2497 = vmatpush1.bf16.msra.mxu1 %v3506_v33  ;;  %2457 = vmatprep.subr.bf16.mxu0 %v3511_v34  ;;  %v3595_v33 = vld [vmem:[%s3768_s5 + $0x38c] ss:$48 sps:$4 sm:$0xff]  }
  0xea   : > { %2498 = vmatprep.subr.bf16.mxu1 %v3514_v35  ;;  %v3598_v34 = vld [vmem:[%s3768_s5 + $0x68c] ss:$48 sps:$4 sm:$0xff]   ;;  %v3593_v35 = vld [vmem:[%s3768_s5 + $0x388] ss:$48 sps:$4 sm:$0xff]  }
  0xec   : > { %2458 = vmatpush1.bf16.msra.mxu0 %v3509_v36  ;;  %v3596_v36 = vld [vmem:[%s3768_s5 + $0x688] ss:$48 sps:$4 sm:$0xff]  }
  0xed   : > { %2499 = vmatpush1.bf16.msra.mxu1 %v3512_v37  ;;  %2459 = vmatprep.subr.bf16.mxu0 %v3517_v38  ;;  %v3601_v37 = vld [vmem:[%s3768_s5 + $0x3ec] ss:$48 sps:$4 sm:$0xff]  }
  0xee   : > { %2500 = vmatprep.subr.bf16.mxu1 %v3520_v39  ;;  %v3604_v38 = vld [vmem:[%s3768_s5 + $0x6ec] ss:$48 sps:$4 sm:$0xff]   ;;  %v3599_v39 = vld [vmem:[%s3768_s5 + $0x3e8] ss:$48 sps:$4 sm:$0xff]  }
  0xf0   : > { %2460 = vmatpush1.bf16.msra.mxu0 %v3515_v40  ;;  %v3602_v40 = vld [vmem:[%s3768_s5 + $0x6e8] ss:$48 sps:$4 sm:$0xff]  }
  0xf1   : > { %2501 = vmatpush1.bf16.msra.mxu1 %v3518_v41  ;;  %2461 = vmatprep.subr.bf16.mxu0 %v3523_v43  ;;  %v3607_v41 = vld [vmem:[%s3768_s5 + $0x44c] ss:$48 sps:$4 sm:$0xff]  }
  0xf2   : > { %2502 = vmatprep.subr.bf16.mxu1 %v3526_v44  ;;  %v3610_v43 = vld [vmem:[%s3768_s5 + $0x74c] ss:$48 sps:$4 sm:$0xff]   ;;  %v3605_v44 = vld [vmem:[%s3768_s5 + $0x448] ss:$48 sps:$4 sm:$0xff]  }
  0xf4   : > { %2462 = vmatpush1.bf16.msra.mxu0 %v3521_v45  ;;  %v3608_v45 = vld [vmem:[%s3768_s5 + $0x748] ss:$48 sps:$4 sm:$0xff]  }
  0xf5   : > { %2503 = vmatpush1.bf16.msra.mxu1 %v3524_v46  ;;  %2463 = vmatprep.subr.bf16.mxu0 %v3529_v47  ;;  %v3616_v46 = vld [vmem:[%s3768_s5 + $0x7ac] ss:$48 sps:$4 sm:$0xff]   ;;  %v3611_v47 = vld [vmem:[%s3768_s5 + $0x4a8] ss:$48 sps:$4 sm:$0xff]  }
  0xf6   : > { %2504 = vmatprep.subr.bf16.mxu1 %v3532_v48  ;;  %v3614_v48 = vld [vmem:[%s3768_s5 + $0x7a8] ss:$48 sps:$4 sm:$0xff]  }
  0xf8   : > { %2464 = vmatpush1.bf16.msra.mxu0 %v3527_v49  ;;  %v3619_v49 = vld [vmem:[%s3768_s5 + $0x50c] ss:$48 sps:$4 sm:$0xff]  }
  0xf9   : > { %2505 = vmatpush1.bf16.msra.mxu1 %v3530_v50  ;;  %2465 = vmatprep.subr.bf16.mxu0 %v3535_v51  ;;  %v3622_v50 = vld [vmem:[%s3768_s5 + $0x80c] ss:$48 sps:$4 sm:$0xff]   ;;  %v3617_v51 = vld [vmem:[%s3768_s5 + $0x508] ss:$48 sps:$4 sm:$0xff]  }
  0xfa   : > { %2506 = vmatprep.subr.bf16.mxu1 %v3538_v52  ;;  %v3620_v52 = vld [vmem:[%s3768_s5 + $0x808] ss:$48 sps:$4 sm:$0xff]  }
  0xfc   : > { %2466 = vmatpush1.bf16.msra.mxu0 %v3533_v53  ;;  %v3625_v53 = vld [vmem:[%s3768_s5 + $0x56c] ss:$48 sps:$4 sm:$0xff]  }
  0xfd   : > { %2507 = vmatpush1.bf16.msra.mxu1 %v3536_v54  ;;  %2467 = vmatprep.subr.bf16.mxu0 %v3541_v55  ;;  %v3628_v54 = vld [vmem:[%s3768_s5 + $0x86c] ss:$48 sps:$4 sm:$0xff]  }
  0xfe   : > { %2533 = vmatprep.subr.bf16.mxu1 %v3544_v56 }
 0x100   : > { %2525 = vmatmul.mubr.bf16.vlgmr.msra.gmra.mrb[16].mxu1 %v3822_v42  ;;  %2468 = vmatpush1.bf16.msra.mxu0 %v3539_v57 }
 0x101   : > { %2534 = vmatpush1.bf16.msra.mxu1 %v3542_v58  ;;  %2469 = vmatprep.subr.bf16.mxu0 %v3547_v60 }
 0x102   : > { %2535 = vmatprep.subr.bf16.mxu1 %v3550_v61  ;;  %2565 = vmatprep.mubr.bf16.mxu1 %v3840_v59  ;;  %v3565_v59 = vld [vmem:[%s3768_s5 + $0x4a4] ss:$48 sps:$4 sm:$0xff]   ;;  %v3623_v61 = vld [vmem:[%s3768_s5 + $0x568] ss:$48 sps:$4 sm:$0xff]  }
 0x104   : > { %2470 = vmatpush1.bf16.msra.mxu0 %v3545_v62  ;;  %v3626_v62 = vld [vmem:[%s3768_s5 + $0x868] ss:$48 sps:$4 sm:$0xff]  }
 0x105   : > { %2536 = vmatpush1.bf16.msra.mxu1 %v3548_v63  ;;  %2471 = vmatprep.subr.bf16.mxu0 %v3553_v0  ;;  %v3631_v0 = vld [vmem:[%s3768_s5 + $0x5cc] ss:$48 sps:$4 sm:$0xff]  }
 0x106   : > { %2537 = vmatprep.subr.bf16.mxu1 %v3556_v1  ;;  %v3634_v1 = vld [vmem:[%s3768_s5 + $0x8cc] ss:$48 sps:$4 sm:$0xff]  }
 0x108   : > { %2472 = vmatpush1.bf16.msra.mxu0 %v3551_v2  ;;  %v3629_v2 = vld [vmem:[%s3768_s5 + $0x5c8] ss:$48 sps:$4 sm:$0xff]  }
 0x109   : > { %2538 = vmatpush1.bf16.msra.mxu1 %v3554_v3  ;;  %2473 = vmatprep.subr.bf16.mxu0 %v3559_v4  ;;  %v3632_v3 = vld [vmem:[%s3768_s5 + $0x8c8] ss:$48 sps:$4 sm:$0xff]  }
 0x10a   : > { %2539 = vmatprep.subr.bf16.mxu1 %v3562_v5  ;;  %v372_v4 = vld [vmem:[%s3779_s21 + $0x8] sm:$0xff] }
 0x10b   : > { %v379_v5 = vunpack.c.l.bf16 %v372_v4 }
 0x10c   : > { %2474 = vmatpush1.bf16.msra.mxu0 %v3557_v6 }
 0x10d   : > { %2540 = vmatpush1.bf16.msra.mxu1 %v3560_v7  ;;  %2475 = vmatprep.subr.bf16.mxu0 %v3565_v59 }
 0x10e   : > { %2541 = vmatprep.subr.bf16.mxu1 %v3568_v9 }
 0x110   : > { %2476 = vmatpush1.bf16.msra.mxu0 %v3563_v10 }
 0x111   : > { %2542 = vmatpush1.bf16.msra.mxu1 %v3566_v11  ;;  %2477 = vmatprep.subr.bf16.mxu0 %v3571_v12 }
 0x112   : > { %2543 = vmatprep.subr.bf16.mxu1 %v3574_v13 }
 0x113   : > { %v4063_v19 = vpop.f32.mrb[0].mxu1 }
 0x114   : > { %v4065_v20 = vpop.f32.mrb[1].mxu1  ;;  %2478 = vmatpush1.bf16.msra.mxu0 %v3569_v14 }
 0x115   : > { %v2202_v21 = vpop.f32.mrb[2].mxu1  ;;  %2544 = vmatpush1.bf16.msra.mxu1 %v3572_v16  ;;  %2479 = vmatprep.subr.bf16.mxu0 %v3577_v17 }
 0x116   : > { %v2203_v24 = vpop.f32.mrb[3].mxu1  ;;  %2545 = vmatprep.subr.bf16.mxu1 %v3580_v18 }
 0x118   : > { %2480 = vmatpush1.bf16.msra.mxu0 %v3575_v22 }
 0x119   : > { %2546 = vmatpush1.bf16.msra.mxu1 %v3578_v23  ;;  %2481 = vmatprep.subr.bf16.mxu0 %v3583_v25 }
 0x11a   : > { %2547 = vmatprep.subr.bf16.mxu1 %v3586_v26  ;;  %v4117_v26 = vld [vmem:[%s3779_s21 + $0x10] sm:$0xff] }
 0x11c   : > { %2482 = vmatpush1.bf16.msra.mxu0 %v3581_v27  ;;  %v371_v27 = vld [vmem:[%s3779_s21] sm:$0xff] }
 0x11d   : > { %2548 = vmatpush1.bf16.msra.mxu1 %v3584_v28  ;;  %2574 = vmatprep.subr.bf16.mxu0 %v3592_v30  ;;  %v380_v28 = vunpack.c.h.bf16 %v372_v4  ;;  %v377_v30 = vunpack.c.l.bf16 %v371_v27  ;;  %v2667_v4 = vld [vmem:[#allocation3 + $0x8] sm:$0xff] }
 0x11e   : > { %2549 = vmatprep.subr.bf16.mxu1 %v3589_v29  ;;  %v381_v29 = vunpack.c.l.bf16 %v4117_v26 }
 0x11f   : > { %2484 = vmatmul.mubr.bf16.vlgmr.msra.gmra.mrb[16].mxu0 %v3861_v15 }
 0x120   : > { %2575 = vmatpush1.bf16.msra.mxu0 %v3590_v32  ;;  %2606 = vmatprep.mubr.bf16.mxu0 %v3705_v8  ;;  %v3613_v8 = vld [vmem:[%s3768_s5 + $0x4ac] ss:$48 sps:$4 sm:$0xff]  }
 0x121   : > { %2550 = vmatpush1.bf16.msra.mxu1 %v3587_v31  ;;  %2576 = vmatprep.subr.bf16.mxu0 %v3598_v34  ;;  %v378_v31 = vunpack.c.h.bf16 %v371_v27 }
 0x122   : > { %2551 = vmatprep.subr.bf16.mxu1 %v3595_v33 }
 0x124   : > { %2577 = vmatpush1.bf16.msra.mxu0 %v3596_v36 }
 0x125   : > { %2552 = vmatpush1.bf16.msra.mxu1 %v3593_v35  ;;  %2578 = vmatprep.subr.bf16.mxu0 %v3604_v38 }
 0x126   : > { %2553 = vmatprep.subr.bf16.mxu1 %v3601_v37 }
 0x128   : > { %2579 = vmatpush1.bf16.msra.mxu0 %v3602_v40  ;;  %v374_v40 = vld [vmem:[%s3779_s21 + $0x18] sm:$0xff] }
 0x129   : > { %2554 = vmatpush1.bf16.msra.mxu1 %v3599_v39  ;;  %2580 = vmatprep.subr.bf16.mxu0 %v3610_v43 }
 0x12a   : > { %2555 = vmatprep.subr.bf16.mxu1 %v3607_v41  ;;  %v383_v41 = vunpack.c.l.bf16 %v374_v40 }
 0x12c   : > { %2581 = vmatpush1.bf16.msra.mxu0 %v3608_v45  ;;  %v384_v45 = vunpack.c.h.bf16 %v374_v40 }
 0x12d   : > { %2556 = vmatpush1.bf16.msra.mxu1 %v3605_v44  ;;  %2582 = vmatprep.subr.bf16.mxu0 %v3616_v46 }
 0x12e   : > { %2557 = vmatprep.subr.bf16.mxu1 %v3613_v8 }
 0x130   : > { %2583 = vmatpush1.bf16.msra.mxu0 %v3614_v48 }
 0x131   : > { %2558 = vmatpush1.bf16.msra.mxu1 %v3611_v47  ;;  %2584 = vmatprep.subr.bf16.mxu0 %v3622_v50 }
 0x132   : > { %2559 = vmatprep.subr.bf16.mxu1 %v3619_v49  ;;  %v2157_v55 = vpop.f32.mrb[0].mxu0 }
 0x133   : > { %v2199_v56 = vadd.f32 %v4063_v19, %v2157_v55  ;;  %v2159_v57 = vpop.f32.mrb[1].mxu0 }
 0x134   : > { %v2201_v58 = vadd.f32 %v4065_v20, %v2159_v57  ;;  %v2161_v60 = vpop.f32.mrb[2].mxu0  ;;  %2585 = vmatpush1.bf16.msra.mxu0 %v3620_v52 }
 0x135   : > { %2560 = vmatpush1.bf16.msra.mxu1 %v3617_v51  ;;  %v2162_v63 = vpop.f32.mrb[3].mxu0  ;;  %2586 = vmatprep.subr.bf16.mxu0 %v3628_v54  ;;  %v2615_v34 = vadd.f32 %v2199_v56, %v377_v30 }
 0x136   : > { %2561 = vmatprep.subr.bf16.mxu1 %v3625_v53  ;;  %v2616_v35 = vadd.f32 %v2201_v58, %v378_v31 }
 0x137   : > { %v2627_v38 = vmul.f32 0.5, %v2615_v34 }
 0x138   : > { %2587 = vmatpush1.bf16.msra.mxu0 %v3626_v62  ;;  %v2628_v39 = vmul.f32 0.5, %v2616_v35 }
 0x139   : > { %2562 = vmatpush1.bf16.msra.mxu1 %v3623_v61  ;;  %2588 = vmatprep.subr.bf16.mxu0 %v3634_v1  ;;  %v2666_v1 = vld [vmem:[#allocation3] sm:$0xff] }
 0x13a   : > { %2563 = vmatprep.subr.bf16.mxu1 %v3631_v0 }
 0x13c   : > { %2589 = vmatpush1.bf16.msra.mxu0 %v3632_v3 }
 0x13d   : > { %2564 = vmatpush1.bf16.msra.mxu1 %v3629_v2 }
 0x13f   : > { %2607 = vmatmul.mubr.bf16.vlgmr.msra.gmra.mrb[20].mxu0 %v3822_v42 }
 0x140   : > { %2566 = vmatmul.mubr.bf16.vlgmr.msra.gmra.mrb[20].mxu1 %v3861_v15 }
 0x152   : > { %v2280_v7 = vpop.f32.mrb[4].mxu0 }
 0x153   : > { %v2239_v6 = vpop.f32.mrb[4].mxu1  ;;  %v2282_v10 = vpop.f32.mrb[5].mxu0 }
 0x154   : > { %v2281_v59 = vadd.f32 %v2280_v7, %v2239_v6  ;;  %v2241_v9 = vpop.f32.mrb[5].mxu1  ;;  %v2284_v13 = vpop.f32.mrb[6].mxu0 }
 0x155   : > { %v2283_v11 = vadd.f32 %v2282_v10, %v2241_v9  ;;  %v2243_v12 = vpop.f32.mrb[6].mxu1  ;;  %v2285_v17 = vpop.f32.mrb[7].mxu0 }
 0x156   : > { %v4112_v14 = vadd.f32 %v2281_v59, %v379_v5  ;;  %v2244_v16 = vpop.f32.mrb[7].mxu1 }
 0x157   : > { %v2618_v32 = vadd.f32 %v2283_v11, %v380_v28 }
 0x159   : > { %v2639_v36 = vmul.f32 0.5, %v2618_v32 }
 0x15b   : > { %3635 = vtanh.f32 %v2639_v36 }
 0x165   : > { %v3636_v55 = vpop.eup %3635 }
 0x166   : > { %v2645_v60 = vmul.f32 0.5, %v3636_v55 }
 0x168   : > { %v2648_v0 = vadd.f32 0.5, %v2645_v60 }
 0x16a   : > { %v2669_v59 = vmul.f32 %v2666_v1, %v2648_v0 }
 0x173   : > { %v2362_v18 = vpop.f32.mrb[8].mxu1 }
 0x174   : > { %v2364_v15 = vpop.f32.mrb[9].mxu1 }
 0x175   : > { %v2366_v19 = vpop.f32.mrb[10].mxu1 }
 0x176   : > { %v2367_v42 = vpop.f32.mrb[11].mxu1  ;;  %v382_v19 = vunpack.c.h.bf16 %v4117_v26 }
 0x192   : > { %v2321_v20 = vpop.f32.mrb[8].mxu0 }
 0x193   : > { %v2363_v21 = vadd.f32 %v2362_v18, %v2321_v20  ;;  %v2323_v22 = vpop.f32.mrb[9].mxu0 }
 0x194   : > { %v4114_v23 = vadd.f32 %v2364_v15, %v2323_v22  ;;  %v2325_v24 = vpop.f32.mrb[10].mxu0  ;;  %v375_v22 = vld [vmem:[%s3779_s21 + $0x20] sm:$0xff] }
 0x195   : > { %v2326_v25 = vpop.f32.mrb[11].mxu0  ;;  %v2619_v33 = vadd.f32 %v2363_v21, %v381_v29  ;;  %v2629_v21 = vmul.f32 0.5, %v4112_v14  ;;  %v385_v24 = vunpack.c.l.bf16 %v375_v22  ;;  %v386_v27 = vunpack.c.h.bf16 %v375_v22 }
 0x196   : > { %v2620_v42 = vadd.f32 %v4114_v23, %v382_v19 }
 0x197   : > { %v2640_v37 = vmul.f32 0.5, %v2619_v33 }
 0x198   : > { %v2641_v20 = vmul.f32 0.5, %v2620_v42 }
 0x199   : > { %3637 = vtanh.f32 %v2640_v37 }
 0x19a   : > { %3639 = vtanh.f32 %v2627_v38  ;;  %v2668_v38 = vld [vmem:[#allocation3 + $0x10] sm:$0xff] }
 0x19b   : > { %3641 = vtanh.f32 %v2628_v39 }
 0x1a3   : > { %v3638_v56 = vpop.eup %3637 }
 0x1a4   : > { %v3640_v57 = vpop.eup %3639  ;;  %v2646_v61 = vmul.f32 0.5, %v3638_v56 }
 0x1a5   : > { %v3642_v58 = vpop.eup %3641  ;;  %v2633_v62 = vmul.f32 0.5, %v3640_v57 }
 0x1a6   : > { %v2634_v63 = vmul.f32 0.5, %v3642_v58  ;;  %v2649_v2 = vadd.f32 0.5, %v2646_v61 }
 0x1a7   : > { %v2636_v3 = vadd.f32 0.5, %v2633_v62 }
 0x1a8   : > { %v2637_v6 = vadd.f32 0.5, %v2634_v63  ;;  %v2670_v10 = vmul.f32 %v2667_v4, %v2649_v2 }
 0x1b2   : > { %v2444_v44 = vpop.f32.mrb[12].mxu0 }
 0x1b3   : > { %v2403_v43 = vpop.f32.mrb[12].mxu1  ;;  %v2446_v47 = vpop.f32.mrb[13].mxu0 }
 0x1b4   : > { %v2445_v8 = vadd.f32 %v2444_v44, %v2403_v43  ;;  %v2405_v46 = vpop.f32.mrb[13].mxu1  ;;  %v2448_v50 = vpop.f32.mrb[14].mxu0 }
 0x1b5   : > { %v2447_v48 = vadd.f32 %v2446_v47, %v2405_v46  ;;  %v2407_v49 = vpop.f32.mrb[14].mxu1  ;;  %v2449_v53 = vpop.f32.mrb[15].mxu0 }
 0x1b6   : > { %v2621_v51 = vadd.f32 %v2445_v8, %v383_v41  ;;  %v2408_v52 = vpop.f32.mrb[15].mxu1  ;;  %v376_v49 = vld [vmem:[%s3779_s21 + $0x28] sm:$0xff] }
 0x1b7   : > { %v2622_v54 = vadd.f32 %v2447_v48, %v384_v45  ;;  %v387_v50 = vunpack.c.l.bf16 %v376_v49  ;;  %v388_v53 = vunpack.c.h.bf16 %v376_v49 }
 0x1b8   : > { %3643 = vtanh.f32 %v2621_v51 }
 0x1b9   : > { %3645 = vtanh.f32 %v2622_v54 }
 0x1ba   : > { %3647 = vtanh.f32 %v2641_v20 }
 0x1bb   : > { %3649 = vtanh.f32 %v2629_v21 }
 0x1c2   : > { %v3644_v5 = vpop.eup %3643 }
 0x1c3   : > { %v3646_v7 = vpop.eup %3645  ;;  %v2672_v9 = vmul.f32 %v3644_v5, %v2636_v3 }
 0x1c4   : > { %v2673_v11 = vmul.f32 %v3646_v7, %v2637_v6  ;;  %v3648_v35 = vpop.eup %3647 }
 0x1c5   : > { %v2675_v12 = vadd.f32 %v2672_v9, %v2669_v59  ;;  %v3650_v23 = vpop.eup %3649  ;;  %v2647_v36 = vmul.f32 0.5, %v3648_v35 }
 0x1c6   : > { %v4122_v13 = vadd.f32 %v2673_v11, %v2670_v10  ;;  %v2635_v14 = vmul.f32 0.5, %v3650_v23 }
 0x1c7   : > { %2687 = vst [vmem:[#allocation3] sm:$0xff] %v2675_v12  ;;  %v2650_v37 = vadd.f32 0.5, %v2647_v36 }
 0x1c8   : > { %2688 = vst [vmem:[#allocation3 + $0x8] sm:$0xff] %v4122_v13  ;;  %v2638_v39 = vadd.f32 0.5, %v2635_v14 }
 0x1c9   : > { %v2671_v41 = vmul.f32 %v2668_v38, %v2650_v37 }
 0x1d3   : > { %v2526_v16 = vpop.f32.mrb[16].mxu1 }
 0x1d4   : > { %v2528_v17 = vpop.f32.mrb[17].mxu1 }
 0x1d5   : > { %v2530_v18 = vpop.f32.mrb[18].mxu1 }
 0x1d6   : > { %v2531_v15 = vpop.f32.mrb[19].mxu1 }
 0x1f2   : > { %v2485_v25 = vpop.f32.mrb[16].mxu0 }
 0x1f3   : > { %v2527_v28 = vadd.f32 %v2526_v16, %v2485_v25  ;;  %v2487_v29 = vpop.f32.mrb[17].mxu0 }
 0x1f4   : > { %v2529_v30 = vadd.f32 %v2528_v17, %v2487_v29  ;;  %v2489_v31 = vpop.f32.mrb[18].mxu0 }
 0x1f5   : > { %v2623_v32 = vadd.f32 %v2527_v28, %v385_v24  ;;  %v2490_v33 = vpop.f32.mrb[19].mxu0 }
 0x1f6   : > { %v2624_v34 = vadd.f32 %v2529_v30, %v386_v27 }
 0x1f7   : > { %3651 = vtanh.f32 %v2623_v32 }
 0x1f8   : > { %v2654_v26 = vmul.f32 0.5, %v2624_v34 }
 0x1fa   : > { %3653 = vtanh.f32 %v2654_v26 }
 0x1fb   : > { %3655 = vtanh.f32 %v2675_v12 }
 0x201   : > { %v3652_v40 = vpop.eup %3651 }
 0x202   : > { %v2674_v43 = vmul.f32 %v3652_v40, %v2638_v39 }
 0x204   : > { %v3654_v44 = vpop.eup %3653  ;;  %v2677_v45 = vadd.f32 %v2674_v43, %v2671_v41 }
 0x205   : > { %v2660_v8 = vmul.f32 0.5, %v3654_v44  ;;  %v3656_v47 = vpop.eup %3655 }
 0x206   : > { %2689 = vst [vmem:[#allocation3 + $0x10] sm:$0xff] %v2677_v45 }
 0x207   : > { %v2663_v46 = vadd.f32 0.5, %v2660_v8 }
 0x209   : > { %v2681_v48 = vmul.f32 %v3656_v47, %v2663_v46 }
 0x20b   : > { %2684 = vst [vmem:[#allocation2] sm:$0xff] %v2681_v48 }
 0x212   : > { %v2608_v52 = vpop.f32.mrb[20].mxu0 }
 0x213   : > { %v2567_v51 = vpop.f32.mrb[20].mxu1  ;;  %v2610_v56 = vpop.f32.mrb[21].mxu0 }
 0x214   : > { %v2609_v54 = vadd.f32 %v2608_v52, %v2567_v51  ;;  %v2569_v55 = vpop.f32.mrb[21].mxu1  ;;  %v2612_v60 = vpop.f32.mrb[22].mxu0 }
 0x215   : > { %v2611_v57 = vadd.f32 %v2610_v56, %v2569_v55  ;;  %v2571_v58 = vpop.f32.mrb[22].mxu1  ;;  %v2613_v63 = vpop.f32.mrb[23].mxu0 }
 0x216   : > { %v2625_v61 = vadd.f32 %v2609_v54, %v387_v50  ;;  %v2572_v62 = vpop.f32.mrb[23].mxu1 }
 0x217   : > { %v2626_v0 = vadd.f32 %v2611_v57, %v388_v53 }
 0x218   : > { %v2655_v1 = vmul.f32 0.5, %v2625_v61 }
 0x219   : > { %v2656_v2 = vmul.f32 0.5, %v2626_v0 }
 0x21a   : > { %3657 = vtanh.f32 %v2655_v1 }
 0x21b   : > { %3659 = vtanh.f32 %v2656_v2 }
 0x21c   : > { %3661 = vtanh.f32 %v4122_v13 }
 0x21d   : > { %3663 = vtanh.f32 %v2677_v45 }
 0x224   : > { %v3658_v3 = vpop.eup %3657 }
 0x225   : > { %v3660_v4 = vpop.eup %3659  ;;  %v2661_v5 = vmul.f32 0.5, %v3658_v3 }
 0x226   : > { %v2662_v6 = vmul.f32 0.5, %v3660_v4  ;;  %v3662_v59 = vpop.eup %3661 }
 0x227   : > { %v2664_v7 = vadd.f32 0.5, %v2661_v5  ;;  %v3664_v10 = vpop.eup %3663 }
 0x228   : > { %v2665_v9 = vadd.f32 0.5, %v2662_v6 }
 0x229   : > { %v2682_v11 = vmul.f32 %v3662_v59, %v2664_v7 }
 0x22a   : > { %v2683_v12 = vmul.f32 %v3664_v10, %v2665_v9 }
 0x22b   : > { %2685 = vst [vmem:[#allocation2 + $0x8] sm:$0xff] %v2682_v11  ;;  %v3155_v16 = vpack.c.bf16 %v2682_v11, %v2681_v48 }
 0x22c   : > { %2686 = vst [vmem:[#allocation2 + $0x10] sm:$0xff] %v2683_v12  ;;  %v3156_v17 = vpack.c.bf16 %v2683_v12, %v2683_v12 }
 0x22d   : > { %2703 = vst [vmem:[%s3784_s6] sm:$0xff] %v3155_v16 }
 0x22e   : > { %2704 = vst [vmem:[%s3784_s6 + $0x8] sm:$0xf] %v3156_v17 }
 0x22f PF: > { %s14_s19 = sadd.s32 1, %s3703_s19   ;;  %s4156_s1 = sld [smem:[#allocation4_spill]] }
 0x230   : > { %p11_p8 = scmp.ge.s32.totalorder %s14_s19, 6   ;;  %s4157_s15 = smov %s3695_s17 }
 0x231   : > { %s4158_s16 = smov %s3699_s18  ;;  %s4159_s17 = smov %s4162_s20 }
 0x232   :  { %13 = sbr.rel (!%p11_p8) target bundleno = 3 (0x3), region = 79 }
 0x235   : > { %s4160_s18 = smov %s4156_s1 }

// kernel: st2_forward.9
= control target key start
LH: loop header
LB: loop body
LE: loop exit
PB: predicated region body
PF: predicated region fallthrough
CT: control target
= control target key end

     0   :  { %s2492_s25 = smov 64   ;;  %vm2495_vm1 = vmmov 0   ;;  %s3309_s0 = inlined_call_operand.vmem [shape: bf16[2,16,384], index: 0, kind: input, shape index: {}]   ;;  %s3310_s2 = inlined_call_operand.vmem [shape: bf16[384,384], index: 2, kind: input, shape index: {}]   ;;  %s3311_s1 = inlined_call_operand.vmem [shape: bf16[384,384], index: 1, kind: input, shape index: {}]   ;;  %s3312_s4 = inlined_call_operand.vmem [shape: bf16[384,128], index: 4, kind: input, shape index: {}]   ;;  %s3313_s3 = inlined_call_operand.vmem [shape: f32[1,384], index: 3, kind: input, shape index: {}]   ;;  %s3314_s6 = inlined_call_operand.vmem [shape: bf16[128,128], index: 6, kind: input, shape index: {}]   ;;  %s3315_s5 = inlined_call_operand.vmem [shape: f32[1,128], index: 5, kind: input, shape index: {}]   ;;  %s3316_s7 = inlined_call_operand.vmem [shape: f32[1,128], index: 7, kind: input, shape index: {}]   ;;  %s3317_s8 = inlined_call_operand.vmem [shape: f32[16,128], index: 8, kind: output, shape index: {}]  }
   0x1   :  { %v2544_v0 = vld [vmem:[%s3309_s0 + $0x18] sm:$0xff]  ;;  %v2549_v1 = vld [vmem:[%s3309_s0 + $0x24] sm:$0xff]  ;;  %v2554_v2 = vld [vmem:[%s3309_s0 + $0x20] ss:$12 sps:$4 sm:$0xff]  }
   0x2   :  { %v46_v3 = vunpack.c.h.bf16 %v2544_v0  ;;  %v49_v4 = vunpack.c.h.bf16 %v2549_v1  ;;  %v45_v5 = vunpack.c.l.bf16 %v2544_v0  ;;  %v48_v6 = vunpack.c.l.bf16 %v2549_v1  ;;  %v2260_v7 = vld [vmem:[%s3310_s2 + $0x4] ss:$12 sps:$4 sm:$0xff]   ;;  %v2262_v10 = vld [vmem:[%s3310_s2] ss:$12 sps:$4 sm:$0xff]   ;;  %v2263_v17 = vld [vmem:[%s3310_s2 + $0x1c] ss:$12 sps:$4 sm:$0xff]  }
   0x3   :  { %v47_v8 = vunpack.c.l.bf16 %v2554_v2  ;;  %v50_v9 = vunpack.c.h.bf16 %v2554_v2  ;;  %v2571_v11 = vld [vmem:[%s3309_s0] sm:$0xff]  ;;  %v2576_v12 = vld [vmem:[%s3309_s0 + $0xc] sm:$0xff]  ;;  %684 = vmatprep.subr.bf16.mxu0 %v2260_v7  ;;  %v2601_v20 = vld [vmem:[%s3309_s0 + $0x8] ss:$12 sps:$4 sm:$0xff]  }
   0x4   :  { %v2240_v13 = vpack.i.bf16 %v49_v4, %v46_v3  ;;  %v2230_v14 = vpack.i.bf16 %v48_v6, %v45_v5  ;;  %v34_v15 = vunpack.c.l.bf16 %v2571_v11  ;;  %v37_v16 = vunpack.c.l.bf16 %v2576_v12  ;;  %685 = vmatpush1.bf16.msra.mxu0 %v2262_v10  ;;  %v2265_v19 = vld [vmem:[%s3310_s2 + $0x18] ss:$12 sps:$4 sm:$0xff]   ;;  %v2266_v26 = vld [vmem:[%s3310_s2 + $0x34] ss:$12 sps:$4 sm:$0xff]   ;;  %v2268_v27 = vld [vmem:[%s3310_s2 + $0x30] ss:$12 sps:$4 sm:$0xff]  }
   0x5   :  { %v2235_v18 = vpack.i.bf16 %v50_v9, %v47_v8  ;;  %v35_v21 = vunpack.c.h.bf16 %v2571_v11  ;;  %v36_v23 = vunpack.c.l.bf16 %v2601_v20  ;;  %v39_v24 = vunpack.c.h.bf16 %v2601_v20  ;;  %686 = vmatprep.subr.bf16.mxu0 %v2263_v17  ;;  %v2269_v30 = vld [vmem:[%s3310_s2 + $0x4c] ss:$12 sps:$4 sm:$0xff]   ;;  %v2271_v31 = vld [vmem:[%s3310_s2 + $0x48] ss:$12 sps:$4 sm:$0xff]   ;;  %v2272_v32 = vld [vmem:[%s3310_s2 + $0x64] ss:$12 sps:$4 sm:$0xff]  }
   0x6   :  { %2241 = vrot.lane.b32.xlu1 %v2240_v13, %s2492_s25  ;;  %2231 = vrot.lane.b32.xlu0 %v2230_v14, %s2492_s25  ;;  %v2245_v22 = vpack.i.bf16 %v37_v16, %v34_v15  ;;  %v38_v25 = vunpack.c.h.bf16 %v2576_v12  ;;  %v2274_v33 = vld [vmem:[%s3310_s2 + $0x60] ss:$12 sps:$4 sm:$0xff]   ;;  %v2286_v34 = vld [vmem:[%s3310_s2 + $0xc8] ss:$12 sps:$4 sm:$0xff]   ;;  %v2493_v10 = vmov 0.0  }
   0x7   :  { %v2250_v28 = vpack.i.bf16 %v39_v24, %v36_v23  ;;  %v2288_v35 = vld [vmem:[%s3310_s2 + $0x8] ss:$12 sps:$4 sm:$0xff]   ;;  %2032 = vmatprep.subr.bf16.mxu1 %v2286_v34  ;;  %v2291_v37 = vld [vmem:[%s3310_s2 + $0xe0] ss:$12 sps:$4 sm:$0xff]   ;;  %v2277_v38 = vld [vmem:[%s3310_s2 + $0x78] ss:$12 sps:$4 sm:$0xff]  }
   0x8   :  { %687 = vmatpush1.bf16.msra.mxu0 %v2265_v19  ;;  %v2255_v29 = vpack.i.bf16 %v38_v25, %v35_v21  ;;  %v2275_v36 = vld [vmem:[%s3310_s2 + $0x7c] ss:$12 sps:$4 sm:$0xff]   ;;  %2033 = vmatpush3.bf16.msra.mxu1 %v2288_v35  ;;  %v2293_v39 = vld [vmem:[%s3310_s2 + $0x20] ss:$12 sps:$4 sm:$0xff]   ;;  %v2296_v41 = vld [vmem:[%s3310_s2 + $0xf8] ss:$12 sps:$4 sm:$0xff]  }
   0x9   :  { %688 = vmatprep.subr.bf16.mxu0 %v2266_v26  ;;  %2034 = vmatprep.subr.bf16.mxu1 %v2291_v37  ;;  %v2278_v40 = vld [vmem:[%s3310_s2 + $0x94] ss:$12 sps:$4 sm:$0xff]   ;;  %v2298_v42 = vld [vmem:[%s3310_s2 + $0x38] ss:$12 sps:$4 sm:$0xff]   ;;  %v2280_v43 = vld [vmem:[%s3310_s2 + $0x90] ss:$12 sps:$4 sm:$0xff]  }
   0xa   :  { %2236 = vrot.lane.b32.xlu0 %v2235_v18, %s2492_s25  ;;  %2246 = vrot.lane.b32.xlu1 %v2245_v22, %s2492_s25  ;;  %v2281_v44 = vld [vmem:[%s3310_s2 + $0xac] ss:$12 sps:$4 sm:$0xff]   ;;  %v2301_v45 = vld [vmem:[%s3310_s2 + $0x110] ss:$12 sps:$4 sm:$0xff]  }
   0xb   :  { %v2303_v46 = vld [vmem:[%s3310_s2 + $0x50] ss:$12 sps:$4 sm:$0xff]   ;;  %v2283_v47 = vld [vmem:[%s3310_s2 + $0xa8] ss:$12 sps:$4 sm:$0xff]   ;;  %v2287_v51 = vld [vmem:[%s3310_s2 + $0xc0] ss:$12 sps:$4 sm:$0xff]  }
   0xc   :  { %689 = vmatpush1.bf16.msra.mxu0 %v2268_v27  ;;  %2035 = vmatpush3.bf16.msra.mxu1 %v2293_v39  ;;  %v2306_v48 = vld [vmem:[%s3310_s2 + $0x128] ss:$12 sps:$4 sm:$0xff]   ;;  %v2284_v49 = vld [vmem:[%s3310_s2 + $0xc4] ss:$12 sps:$4 sm:$0xff]   ;;  %v2311_v52 = vld [vmem:[%s3310_s2 + $0x140] ss:$12 sps:$4 sm:$0xff]  }
   0xd   :  { %690 = vmatprep.subr.bf16.mxu0 %v2269_v30  ;;  %2036 = vmatprep.subr.bf16.mxu1 %v2296_v41  ;;  %v2308_v50 = vld [vmem:[%s3310_s2 + $0x68] ss:$12 sps:$4 sm:$0xff]   ;;  %v2313_v54 = vld [vmem:[%s3310_s2 + $0x80] ss:$12 sps:$4 sm:$0xff]   ;;  %v2316_v55 = vld [vmem:[%s3310_s2 + $0x158] ss:$12 sps:$4 sm:$0xff]  }
   0xe   :  { %2251 = vrot.lane.b32.xlu0 %v2250_v28, %s2492_s25  ;;  %2256 = vrot.lane.b32.xlu1 %v2255_v29, %s2492_s25  ;;  %v2289_v53 = vld [vmem:[%s3310_s2 + $0xdc] ss:$12 sps:$4 sm:$0xff]   ;;  %v2292_v56 = vld [vmem:[%s3310_s2 + $0xd8] ss:$12 sps:$4 sm:$0xff]   ;;  %v63_v28 = vlaneseq }
   0xf   :  { %v2294_v57 = vld [vmem:[%s3310_s2 + $0xf4] ss:$12 sps:$4 sm:$0xff]   ;;  %v2318_v58 = vld [vmem:[%s3310_s2 + $0x98] ss:$12 sps:$4 sm:$0xff]   ;;  %v2321_v59 = vld [vmem:[%s3310_s2 + $0x170] ss:$12 sps:$4 sm:$0xff]  }
  0x10   :  { %691 = vmatpush1.bf16.msra.mxu0 %v2271_v31  ;;  %2037 = vmatpush3.bf16.msra.mxu1 %v2298_v42  ;;  %v2297_v60 = vld [vmem:[%s3310_s2 + $0xf0] ss:$12 sps:$4 sm:$0xff]   ;;  %v2299_v61 = vld [vmem:[%s3310_s2 + $0x10c] ss:$12 sps:$4 sm:$0xff]   ;;  %v2302_v63 = vld [vmem:[%s3310_s2 + $0x108] ss:$12 sps:$4 sm:$0xff]  }
  0x11   :  { %692 = vmatprep.subr.bf16.mxu0 %v2272_v32  ;;  %2038 = vmatprep.subr.bf16.mxu1 %v2301_v45  ;;  %v2323_v62 = vld [vmem:[%s3310_s2 + $0xb0] ss:$12 sps:$4 sm:$0xff]   ;;  %v2307_v13 = vld [vmem:[%s3310_s2 + $0x120] ss:$12 sps:$4 sm:$0xff]   ;;  %v2312_v17 = vld [vmem:[%s3310_s2 + $0x138] ss:$12 sps:$4 sm:$0xff]  }
  0x12   :  { %v2304_v7 = vld [vmem:[%s3310_s2 + $0x124] ss:$12 sps:$4 sm:$0xff]   ;;  %v2309_v14 = vld [vmem:[%s3310_s2 + $0x13c] ss:$12 sps:$4 sm:$0xff]   ;;  %v2314_v18 = vld [vmem:[%s3310_s2 + $0x154] ss:$12 sps:$4 sm:$0xff]  }
  0x13   :  { %v2317_v19 = vld [vmem:[%s3310_s2 + $0x150] ss:$12 sps:$4 sm:$0xff]   ;;  %v2319_v22 = vld [vmem:[%s3310_s2 + $0x16c] ss:$12 sps:$4 sm:$0xff]   ;;  %v2322_v26 = vld [vmem:[%s3310_s2 + $0x168] ss:$12 sps:$4 sm:$0xff]  }
  0x14   :  { %693 = vmatpush1.bf16.msra.mxu0 %v2274_v33  ;;  %2039 = vmatpush3.bf16.msra.mxu1 %v2303_v46  ;;  %v2326_v27 = vld [vmem:[%s3310_s2 + $0x184] ss:$12 sps:$4 sm:$0xff]   ;;  %v2760_v31 = vand.u32 127, %v63_v28  ;;  %v2331_v1 = vld [vmem:[%s3310_s2 + $0x1a0] ss:$12 sps:$4 sm:$0xff]  }
  0x15   :  { %694 = vmatprep.subr.bf16.mxu0 %v2275_v36  ;;  %2040 = vmatprep.subr.bf16.mxu1 %v2306_v48  ;;  %v2324_v48 = vld [vmem:[%s3310_s2 + $0x180] ss:$12 sps:$4 sm:$0xff]   ;;  %v2328_v0 = vld [vmem:[%s3310_s2 + $0x198] ss:$12 sps:$4 sm:$0xff]   ;;  %v2433_v20 = vld [vmem:[%s3311_s1 + $0x19c] ss:$12 sps:$4 sm:$0xff]  }
  0x16   :  { %vm65_vm0 = vcmp.lt.s32.totalorder %v2760_v31, 64  ;;  %v2356_v2 = vld [vmem:[%s3311_s1] ss:$12 sps:$4 sm:$0xff]   ;;  %v2398_v12 = vld [vmem:[%s3311_s1 + $0xc4] ss:$12 sps:$4 sm:$0xff]  }
  0x17   :  { %v2396_v11 = vld [vmem:[%s3311_s1 + $0xc0] ss:$12 sps:$4 sm:$0xff]   ;;  %v2430_v31 = vld [vmem:[%s3311_s1 + $0x184] ss:$12 sps:$4 sm:$0xff]  }
  0x18   :  { %695 = vmatpush1.bf16.msra.mxu0 %v2277_v38  ;;  %2041 = vmatpush3.bf16.msra.mxu1 %v2308_v50  ;;  %v2327_v50 = vld [vmem:[%s3310_s2 + $0x188] ss:$12 sps:$4 sm:$0xff]  }
  0x19   :  { %696 = vmatprep.subr.bf16.mxu0 %v2278_v40  ;;  %2042 = vmatprep.subr.bf16.mxu1 %v2311_v52  ;;  %v2338_v52 = vld [vmem:[%s3310_s2 + $0x1cc] ss:$12 sps:$4 sm:$0xff]  }
  0x1c   :  { %697 = vmatpush1.bf16.msra.mxu0 %v2280_v43  ;;  %2043 = vmatpush3.bf16.msra.mxu1 %v2313_v54  ;;  %v2339_v54 = vld [vmem:[%s3310_s2 + $0x1d0] ss:$12 sps:$4 sm:$0xff]  }
  0x1d   :  { %698 = vmatprep.subr.bf16.mxu0 %v2281_v44  ;;  %2044 = vmatprep.subr.bf16.mxu1 %v2316_v55  ;;  %v2342_v55 = vld [vmem:[%s3310_s2 + $0x1e4] ss:$12 sps:$4 sm:$0xff]  }
  0x20   :  { %699 = vmatpush1.bf16.msra.mxu0 %v2283_v47  ;;  %2045 = vmatpush3.bf16.msra.mxu1 %v2318_v58  ;;  %v2346_v58 = vld [vmem:[%s3310_s2 + $0x1fc] ss:$12 sps:$4 sm:$0xff]  }
  0x21   :  { %700 = vmatprep.subr.bf16.mxu0 %v2284_v49  ;;  %2046 = vmatprep.subr.bf16.mxu1 %v2321_v59  ;;  %v2344_v59 = vld [vmem:[%s3310_s2 + $0x1f8] ss:$12 sps:$4 sm:$0xff]  }
  0x24   :  { %701 = vmatpush1.bf16.msra.mxu0 %v2287_v51  ;;  %2047 = vmatpush3.bf16.msra.mxu1 %v2323_v62  ;;  %v2335_v51 = vld [vmem:[%s3310_s2 + $0x1b8] ss:$12 sps:$4 sm:$0xff]   ;;  %v2350_v62 = vld [vmem:[%s3310_s2 + $0x214] ss:$12 sps:$4 sm:$0xff]  }
  0x25   :  { %702 = vmatprep.subr.bf16.mxu0 %v2289_v53  ;;  %2134 = vmatprep.subr.bf16.mxu1 %v2493_v10  ;;  %v2336_v53 = vld [vmem:[%s3310_s2 + $0x1c8] ss:$12 sps:$4 sm:$0xff]  }
  0x28   :  { %703 = vmatpush1.bf16.msra.mxu0 %v2292_v56  ;;  %v2340_v56 = vld [vmem:[%s3310_s2 + $0x1e0] ss:$12 sps:$4 sm:$0xff]  }
  0x29   :  { %704 = vmatprep.subr.bf16.mxu0 %v2294_v57  ;;  %v2343_v57 = vld [vmem:[%s3310_s2 + $0x1e8] ss:$12 sps:$4 sm:$0xff]  }
  0x2c   :  { %705 = vmatpush1.bf16.msra.mxu0 %v2297_v60  ;;  %v2347_v60 = vld [vmem:[%s3310_s2 + $0x200] ss:$12 sps:$4 sm:$0xff]  }
  0x2d   :  { %706 = vmatprep.subr.bf16.mxu0 %v2299_v61 }
  0x30   :  { %707 = vmatpush1.bf16.msra.mxu0 %v2302_v63 }
  0x31   :  { %708 = vmatprep.subr.bf16.mxu0 %v2304_v7 }
  0x34   :  { %709 = vmatpush1.bf16.msra.mxu0 %v2307_v13 }
  0x35   :  { %710 = vmatprep.subr.bf16.mxu0 %v2309_v14 }
  0x38   :  { %711 = vmatpush1.bf16.msra.mxu0 %v2312_v17 }
  0x39   :  { %712 = vmatprep.subr.bf16.mxu0 %v2314_v18  ;;  %v2348_v18 = vld [vmem:[%s3310_s2 + $0x210] ss:$12 sps:$4 sm:$0xff]  }
  0x3c   :  { %713 = vmatpush1.bf16.msra.mxu0 %v2317_v19  ;;  %v2351_v19 = vld [vmem:[%s3310_s2 + $0x218] ss:$12 sps:$4 sm:$0xff]  }
  0x3d   :  { %714 = vmatprep.subr.bf16.mxu0 %v2319_v22  ;;  %v2354_v22 = vld [vmem:[%s3310_s2 + $0x22c] ss:$12 sps:$4 sm:$0xff]  }
  0x40   :  { %715 = vmatpush1.bf16.msra.mxu0 %v2322_v26 }
  0x41   :  { %727 = vmatprep.subr.bf16.mxu0 %v2326_v27 }
  0x78   :  { %v2755_v29 = vpop.permute.xlu0 %2231  ;;  %v2757_v30 = vpop.permute.xlu1 %2241 }
  0x79   :  { %v2244_v32 = vunpack.i.h.bf16 %v2757_v30  ;;  %v2243_v33 = vunpack.i.l.bf16 %v2757_v30  ;;  %v2234_v35 = vunpack.i.h.bf16 %v2755_v29  ;;  %v2233_v36 = vunpack.i.l.bf16 %v2755_v29  ;;  %v2352_v29 = vld [vmem:[%s3310_s2 + $0x228] ss:$12 sps:$4 sm:$0xff]   ;;  %v2355_v30 = vld [vmem:[%s3310_s2 + $0x230] ss:$12 sps:$4 sm:$0xff]  }
  0x7b   :  { %v93_v26 = vsel %vm65_vm0, %v2234_v35, %v2244_v32  ;;  %v92_v27 = vsel %vm65_vm0, %v2233_v36, %v2243_v33 }
  0x7c   :  { %v2237_v34 = vpop.permute.xlu0 %2236  ;;  %v2855_v63 = vpop.permute.xlu1 %2246 }
  0x7d   :  { %v2239_v37 = vunpack.i.h.bf16 %v2237_v34  ;;  %v2238_v38 = vunpack.i.l.bf16 %v2237_v34  ;;  %v2249_v7 = vunpack.i.h.bf16 %v2855_v63  ;;  %v2248_v13 = vunpack.i.l.bf16 %v2855_v63  ;;  %v2428_v63 = vld [vmem:[%s3311_s1 + $0x180] ss:$12 sps:$4 sm:$0xff]  }
  0x7f   :  { %v91_v39 = vsel %vm65_vm0, %v2244_v32, %v2239_v37  ;;  %v90_v40 = vsel %vm65_vm0, %v2243_v33, %v2238_v38  ;;  %v94_v41 = vsel %vm65_vm0, %v2238_v38, %v2233_v36  ;;  %v95_v42 = vsel %vm65_vm0, %v2239_v37, %v2234_v35  ;;  %v2358_v36 = vld [vmem:[%s3311_s1 + $0x4] ss:$12 sps:$4 sm:$0xff]   ;;  %v2359_v37 = vld [vmem:[%s3311_s1 + $0xc8] ss:$12 sps:$4 sm:$0xff]  }
  0x80   :  { %v97_v43 = vmax.f32 %v46_v3, %v94_v41  ;;  %v100_v44 = vmax.f32 %v49_v4, %v95_v42  ;;  %v96_v45 = vmax.f32 %v45_v5, %v90_v40  ;;  %v99_v46 = vmax.f32 %v48_v6, %v91_v39  ;;  %v2330_v3 = vld [vmem:[%s3310_s2 + $0x19c] ss:$12 sps:$4 sm:$0xff]   ;;  %v2334_v4 = vld [vmem:[%s3310_s2 + $0x1b4] ss:$12 sps:$4 sm:$0xff]   ;;  %v2849_v61 = vpop.permute.xlu0 %2251  ;;  %v2361_v41 = vld [vmem:[%s3311_s1 + $0x18] ss:$12 sps:$4 sm:$0xff]  }
  0x81   :  { %v2494_v5 = vmov 0   ;;  %v2332_v6 = vld [vmem:[%s3310_s2 + $0x1b0] ss:$12 sps:$4 sm:$0xff]   ;;  %v2254_v14 = vunpack.i.h.bf16 %v2849_v61  ;;  %v2253_v17 = vunpack.i.l.bf16 %v2849_v61  ;;  %v101_v33 = vmax.f32 %v50_v9, %v93_v26  ;;  %v2365_v42 = vld [vmem:[%s3311_s1 + $0x20] ss:$12 sps:$4 sm:$0xff]  }
  0x82   :  { %v202_v47 = vpack.c.bf16 %v100_v44, %v97_v43  ;;  %v201_v49 = vpack.c.bf16 %v99_v46, %v96_v45  ;;  %v98_v35 = vmax.f32 %v47_v8, %v92_v27  ;;  %v2360_v8 = vld [vmem:[%s3311_s1 + $0x8] ss:$12 sps:$4 sm:$0xff]   ;;  %v2369_v44 = vld [vmem:[%s3311_s1 + $0xf8] ss:$12 sps:$4 sm:$0xff]   ;;  %v2366_v45 = vld [vmem:[%s3311_s1 + $0x30] ss:$12 sps:$4 sm:$0xff]  }
  0x83   :  { %v70_v34 = vsel %vm65_vm0, %v2253_v17, %v2248_v13  ;;  %v71_v32 = vsel %vm65_vm0, %v2254_v14, %v2249_v7  ;;  %v2368_v43 = vld [vmem:[%s3311_s1 + $0x34] ss:$12 sps:$4 sm:$0xff]   ;;  %v2370_v46 = vld [vmem:[%s3311_s1 + $0x38] ss:$12 sps:$4 sm:$0xff]   ;;  %v2395_v26 = vld [vmem:[%s3311_s1 + $0xb0] ss:$12 sps:$4 sm:$0xff]  }
  0x84   :  { %716 = vmatprep.mubr.bf16.mxu0 %v202_v47  ;;  %802 = vmatprep.mubr.bf16.mxu1 %v202_v47  ;;  %v73_v38 = vmax.f32 %v35_v21, %v70_v34  ;;  %v76_v9 = vmax.f32 %v38_v25, %v71_v32  ;;  %v203_v39 = vpack.c.bf16 %v101_v33, %v98_v35  ;;  %v2363_v21 = vld [vmem:[%s3311_s1 + $0x1c] ss:$12 sps:$4 sm:$0xff]   ;;  %v2364_v25 = vld [vmem:[%s3311_s1 + $0xe0] ss:$12 sps:$4 sm:$0xff]   ;;  %v2400_v34 = vld [vmem:[%s3311_s1 + $0xd8] ss:$12 sps:$4 sm:$0xff]  }
  0x85   :  { %717 = vmatmul.mubr.bf16.vlgmr.msra.gmra.mrb[0].mxu0 %v201_v49  ;;  %803 = vmatmul.mubr.bf16.vlgmr.msra.gmra.mrb[0].mxu1 %v201_v49  ;;  %v2373_v47 = vld [vmem:[%s3311_s1 + $0x4c] ss:$12 sps:$4 sm:$0xff]   ;;  %v2371_v49 = vld [vmem:[%s3311_s1 + $0x48] ss:$12 sps:$4 sm:$0xff]  }
  0x86   :  { %728 = vmatpush1.bf16.msra.mxu0 %v2324_v48  ;;  %2135 = vmatpush3.bf16.msra.mxu1 %v2327_v50  ;;  %v103_v40 = vpack.c.bf16 %v76_v9, %v73_v38  ;;  %v2374_v48 = vld [vmem:[%s3311_s1 + $0x110] ss:$12 sps:$4 sm:$0xff]   ;;  %v2403_v32 = vld [vmem:[%s3311_s1 + $0x1a0] ss:$12 sps:$4 sm:$0xff]   ;;  %v2407_v33 = vld [vmem:[%s3311_s1 + $0x1b8] ss:$12 sps:$4 sm:$0xff]  }
  0x87   :  { %729 = vmatprep.subr.bf16.mxu0 %v2330_v3  ;;  %2136 = vmatprep.subr.bf16.mxu1 %v2493_v10  ;;  %v2375_v50 = vld [vmem:[%s3311_s1 + $0x50] ss:$12 sps:$4 sm:$0xff]   ;;  %v2410_v35 = vld [vmem:[%s3311_s1 + $0x10c] ss:$12 sps:$4 sm:$0xff]  }
  0x88   :  { %759 = vmatprep.mubr.bf16.mxu0 %v2494_v5  ;;  %2150 = vmatprep.mubr.msk.bf16.mxu1 %vm2495_vm1, %v2493_v10  ;;  %v2378_v3 = vld [vmem:[%s3311_s1 + $0x64] ss:$12 sps:$4 sm:$0xff]   ;;  %v2402_v27 = vld [vmem:[%s3311_s1 + $0xdc] ss:$12 sps:$4 sm:$0xff]   ;;  %v2412_v9 = vld [vmem:[%s3311_s1 + $0x120] ss:$12 sps:$4 sm:$0xff]  }
  0x89   :  { %v2414_v38 = vld [vmem:[%s3311_s1 + $0x124] ss:$12 sps:$4 sm:$0xff]  }
  0x8a   :  { %730 = vmatpush1.bf16.msra.mxu0 %v2328_v0  ;;  %2137 = vmatpush3.bf16.msra.mxu1 %v2331_v1  ;;  %v2379_v0 = vld [vmem:[%s3311_s1 + $0x128] ss:$12 sps:$4 sm:$0xff]   ;;  %v2376_v1 = vld [vmem:[%s3311_s1 + $0x60] ss:$12 sps:$4 sm:$0xff]  }
  0x8b   :  { %731 = vmatprep.subr.bf16.mxu0 %v2334_v4  ;;  %2138 = vmatprep.subr.bf16.mxu1 %v2493_v10  ;;  %v2380_v4 = vld [vmem:[%s3311_s1 + $0x68] ss:$12 sps:$4 sm:$0xff]  }
  0x8e   :  { %732 = vmatpush1.bf16.msra.mxu0 %v2332_v6  ;;  %2139 = vmatpush3.bf16.msra.mxu1 %v2335_v51  ;;  %v2383_v6 = vld [vmem:[%s3311_s1 + $0x7c] ss:$12 sps:$4 sm:$0xff]   ;;  %v2384_v51 = vld [vmem:[%s3311_s1 + $0x140] ss:$12 sps:$4 sm:$0xff]  }
  0x8f   :  { %733 = vmatprep.subr.bf16.mxu0 %v2338_v52  ;;  %2140 = vmatprep.subr.bf16.mxu1 %v2493_v10  ;;  %v2976_v52 = vpop.permute.xlu1 %2256 }
  0x92   :  { %734 = vmatpush1.bf16.msra.mxu0 %v2336_v53  ;;  %2141 = vmatpush3.bf16.msra.mxu1 %v2339_v54  ;;  %v2381_v53 = vld [vmem:[%s3311_s1 + $0x78] ss:$12 sps:$4 sm:$0xff]   ;;  %v2385_v54 = vld [vmem:[%s3311_s1 + $0x80] ss:$12 sps:$4 sm:$0xff]  }
  0x93   :  { %735 = vmatprep.subr.bf16.mxu0 %v2342_v55  ;;  %2142 = vmatprep.subr.bf16.mxu1 %v2493_v10  ;;  %v2259_v55 = vunpack.i.h.bf16 %v2976_v52 }
  0x96   :  { %736 = vmatpush1.bf16.msra.mxu0 %v2340_v56  ;;  %2143 = vmatpush3.bf16.msra.mxu1 %v2343_v57  ;;  %v2258_v56 = vunpack.i.l.bf16 %v2976_v52  ;;  %v2388_v57 = vld [vmem:[%s3311_s1 + $0x94] ss:$12 sps:$4 sm:$0xff]  }
  0x97   :  { %737 = vmatprep.subr.bf16.mxu0 %v2346_v58  ;;  %2144 = vmatprep.subr.bf16.mxu1 %v2493_v10  ;;  %v2389_v58 = vld [vmem:[%s3311_s1 + $0x158] ss:$12 sps:$4 sm:$0xff]   ;;  %v2449_v52 = vld [vmem:[%s3311_s1 + $0x228] ss:$12 sps:$4 sm:$0xff]  }
  0x9a   :  { %738 = vmatpush1.bf16.msra.mxu0 %v2344_v59  ;;  %2145 = vmatpush3.bf16.msra.mxu1 %v2347_v60  ;;  %v2386_v59 = vld [vmem:[%s3311_s1 + $0x90] ss:$12 sps:$4 sm:$0xff]   ;;  %v67_v60 = vsel %vm65_vm0, %v2259_v55, %v2254_v14 }
  0x9b   :  { %739 = vmatprep.subr.bf16.mxu0 %v2350_v62  ;;  %2146 = vmatprep.subr.bf16.mxu1 %v2493_v10  ;;  %v66_v62 = vsel %vm65_vm0, %v2258_v56, %v2253_v17  ;;  %v2394_v14 = vld [vmem:[%s3311_s1 + $0x170] ss:$12 sps:$4 sm:$0xff]   ;;  %v75_v61 = vmax.f32 %v37_v16, %v67_v60 }
  0x9c   :  { %v72_v17 = vmax.f32 %v34_v15, %v66_v62  ;;  %v2399_v15 = vld [vmem:[%s3311_s1 + $0x188] ss:$12 sps:$4 sm:$0xff]   ;;  %v2459_v60 = vld [vmem:[%s3312_s4 + $0x18] sm:$0xff]   ;;  %v2460_v62 = vld [vmem:[%s3312_s4 + $0x60] sm:$0xff]  }
  0x9e   :  { %740 = vmatpush1.bf16.msra.mxu0 %v2348_v18  ;;  %2147 = vmatpush3.bf16.msra.mxu1 %v2351_v19  ;;  %v2390_v18 = vld [vmem:[%s3311_s1 + $0x98] ss:$12 sps:$4 sm:$0xff]   ;;  %v3029_v16 = vpack.c.bf16 %v75_v61, %v72_v17  ;;  %v2464_v17 = vld [vmem:[%s3312_s4 + $0x70] sm:$0xff]  }
  0x9f   :  { %741 = vmatprep.subr.bf16.mxu0 %v2354_v22  ;;  %2148 = vmatprep.subr.bf16.mxu1 %v2493_v10  ;;  %v2393_v19 = vld [vmem:[%s3311_s1 + $0xac] ss:$12 sps:$4 sm:$0xff]   ;;  %v2391_v22 = vld [vmem:[%s3311_s1 + $0xa8] ss:$12 sps:$4 sm:$0xff]  }
  0xa2   :  { %742 = vmatpush1.bf16.msra.mxu0 %v2352_v29  ;;  %2149 = vmatpush3.bf16.msra.mxu1 %v2355_v30  ;;  %v2406_v29 = vld [vmem:[%s3311_s1 + $0xf4] ss:$12 sps:$4 sm:$0xff]   ;;  %v2404_v30 = vld [vmem:[%s3311_s1 + $0xf0] ss:$12 sps:$4 sm:$0xff]  }
  0xa3   :  { %1236 = vmatprep.subr.bf16.mxu0 %v2358_v36  ;;  %2063 = vmatprep.subr.bf16.mxu1 %v2359_v37  ;;  %v2408_v36 = vld [vmem:[%s3311_s1 + $0x108] ss:$12 sps:$4 sm:$0xff]   ;;  %v2411_v37 = vld [vmem:[%s3311_s1 + $0x1d0] ss:$12 sps:$4 sm:$0xff]  }
  0xa5   :  { %760 = vmatmul.mubr.bf16.vlgmr.msra.gmra.mrb[0].mxu0 %v203_v39  ;;  %2151 = vmatmul.mubr.bf16.vlgmr.msra.gmra.mrb[4].mxu1 %v203_v39  ;;  %v2416_v39 = vld [vmem:[%s3311_s1 + $0x138] ss:$12 sps:$4 sm:$0xff]  }
  0xa6   :  { %1237 = vmatpush1.bf16.msra.mxu0 %v2356_v2  ;;  %2064 = vmatpush3.bf16.msra.mxu1 %v2360_v8  ;;  %v2415_v2 = vld [vmem:[%s3311_s1 + $0x1e8] ss:$12 sps:$4 sm:$0xff]  }
  0xa7   :  { %1238 = vmatprep.subr.bf16.mxu0 %v2363_v21  ;;  %2065 = vmatprep.subr.bf16.mxu1 %v2364_v25  ;;  %v2418_v8 = vld [vmem:[%s3311_s1 + $0x13c] ss:$12 sps:$4 sm:$0xff]   ;;  %v2419_v21 = vld [vmem:[%s3311_s1 + $0x200] ss:$12 sps:$4 sm:$0xff]  }
  0xa8   :  { %1354 = vmatprep.mubr.bf16.mxu1 %v103_v40  ;;  %1268 = vmatprep.mubr.bf16.mxu0 %v103_v40  ;;  %v2422_v25 = vld [vmem:[%s3311_s1 + $0x154] ss:$12 sps:$4 sm:$0xff]   ;;  %v2420_v40 = vld [vmem:[%s3311_s1 + $0x150] ss:$12 sps:$4 sm:$0xff]  }
  0xaa   :  { %1239 = vmatpush1.bf16.msra.mxu0 %v2361_v41  ;;  %2066 = vmatpush3.bf16.msra.mxu1 %v2365_v42  ;;  %v2423_v41 = vld [vmem:[%s3311_s1 + $0x218] ss:$12 sps:$4 sm:$0xff]  }
  0xab   :  { %1240 = vmatprep.subr.bf16.mxu0 %v2368_v43  ;;  %2067 = vmatprep.subr.bf16.mxu1 %v2369_v44  ;;  %v2426_v42 = vld [vmem:[%s3311_s1 + $0x16c] ss:$12 sps:$4 sm:$0xff]   ;;  %v68_v43 = vsel %vm65_vm0, %v2248_v13, %v2258_v56  ;;  %v69_v44 = vsel %vm65_vm0, %v2249_v7, %v2259_v55 }
  0xac   :  { %v74_v13 = vmax.f32 %v36_v23, %v68_v43  ;;  %v2431_v23 = vld [vmem:[%s3311_s1 + $0x198] ss:$12 sps:$4 sm:$0xff]   ;;  %v2454_v55 = vld [vmem:[%s3312_s4 + $0x48] sm:$0xff]  }
  0xad   :  { %v2455_v56 = vld [vmem:[%s3312_s4 + $0x8] sm:$0xff]  }
  0xae   :  { %1241 = vmatpush1.bf16.msra.mxu0 %v2366_v45  ;;  %2068 = vmatpush3.bf16.msra.mxu1 %v2370_v46  ;;  %v2424_v45 = vld [vmem:[%s3311_s1 + $0x168] ss:$12 sps:$4 sm:$0xff]   ;;  %v2427_v46 = vld [vmem:[%s3311_s1 + $0x230] ss:$12 sps:$4 sm:$0xff]  }
  0xaf   :  { %1242 = vmatprep.subr.bf16.mxu0 %v2373_v47  ;;  %2069 = vmatprep.subr.bf16.mxu1 %v2374_v48  ;;  %v77_v47 = vmax.f32 %v39_v24, %v69_v44  ;;  %v2436_v24 = vld [vmem:[%s3311_s1 + $0x1b4] ss:$12 sps:$4 sm:$0xff]   ;;  %v2434_v48 = vld [vmem:[%s3311_s1 + $0x1b0] ss:$12 sps:$4 sm:$0xff]  }
  0xb1   :  { %v104_v7 = vpack.c.bf16 %v77_v47, %v74_v13 }
  0xb2   :  { %1243 = vmatpush1.bf16.msra.mxu0 %v2371_v49  ;;  %2070 = vmatpush3.bf16.msra.mxu1 %v2375_v50  ;;  %v2439_v49 = vld [vmem:[%s3311_s1 + $0x1cc] ss:$12 sps:$4 sm:$0xff]   ;;  %v2442_v50 = vld [vmem:[%s3311_s1 + $0x1e4] ss:$12 sps:$4 sm:$0xff]  }
  0xb3   :  { %1244 = vmatprep.subr.bf16.mxu0 %v2378_v3  ;;  %2071 = vmatprep.subr.bf16.mxu1 %v2379_v0  ;;  %v2440_v3 = vld [vmem:[%s3311_s1 + $0x1e0] ss:$12 sps:$4 sm:$0xff]   ;;  %v2445_v0 = vld [vmem:[%s3311_s1 + $0x1fc] ss:$12 sps:$4 sm:$0xff]  }
  0xb6   :  { %1245 = vmatpush1.bf16.msra.mxu0 %v2376_v1  ;;  %2072 = vmatpush3.bf16.msra.mxu1 %v2380_v4  ;;  %v2443_v1 = vld [vmem:[%s3311_s1 + $0x1f8] ss:$12 sps:$4 sm:$0xff]   ;;  %v2448_v4 = vld [vmem:[%s3311_s1 + $0x214] ss:$12 sps:$4 sm:$0xff]  }
  0xb7   :  { %1246 = vmatprep.subr.bf16.mxu0 %v2383_v6  ;;  %2073 = vmatprep.subr.bf16.mxu1 %v2384_v51  ;;  %v2446_v6 = vld [vmem:[%s3311_s1 + $0x210] ss:$12 sps:$4 sm:$0xff]   ;;  %v2451_v51 = vld [vmem:[%s3311_s1 + $0x22c] ss:$12 sps:$4 sm:$0xff]  }
  0xba   :  { %1247 = vmatpush1.bf16.msra.mxu0 %v2381_v53  ;;  %2074 = vmatpush3.bf16.msra.mxu1 %v2385_v54  ;;  %v2452_v53 = vld [vmem:[%s3312_s4 + $0x40] sm:$0xff]  }
  0xbb   :  { %1248 = vmatprep.subr.bf16.mxu0 %v2388_v57  ;;  %2075 = vmatprep.subr.bf16.mxu1 %v2389_v58  ;;  %v2453_v54 = vld [vmem:[%s3312_s4] sm:$0xff]   ;;  %v2456_v57 = vld [vmem:[%s3312_s4 + $0x50] sm:$0xff]  }
  0xbc   :  { %v2457_v58 = vld [vmem:[%s3312_s4 + $0x10] sm:$0xff]  }
  0xbe   :  { %1249 = vmatpush1.bf16.msra.mxu0 %v2386_v59  ;;  %2076 = vmatpush3.bf16.msra.mxu1 %v2390_v18  ;;  %v2458_v59 = vld [vmem:[%s3312_s4 + $0x58] sm:$0xff]   ;;  %v2461_v18 = vld [vmem:[%s3312_s4 + $0x20] sm:$0xff]  }
  0xbf   :  { %1250 = vmatprep.subr.bf16.mxu0 %v2393_v19  ;;  %2077 = vmatprep.subr.bf16.mxu1 %v2394_v14  ;;  %v2462_v19 = vld [vmem:[%s3312_s4 + $0x68] sm:$0xff]  }
  0xc0   :  { %v2463_v14 = vld [vmem:[%s3312_s4 + $0x28] sm:$0xff]  }
  0xc2   :  { %1251 = vmatpush1.bf16.msra.mxu0 %v2391_v22  ;;  %2078 = vmatpush3.bf16.msra.mxu1 %v2395_v26  ;;  %v2465_v26 = vld [vmem:[%s3312_s4 + $0x30] sm:$0xff]  }
  0xc3   :  { %1252 = vmatprep.subr.bf16.mxu0 %v2398_v12  ;;  %2154 = vmatprep.subr.bf16.mxu1 %v2493_v10 }
  0xc5   :  { %1355 = vmatmul.mubr.bf16.vlgmr.msra.gmra.mrb[8].mxu1 %v3029_v16 }
  0xc6   :  { %1253 = vmatpush1.bf16.msra.mxu0 %v2396_v11  ;;  %2155 = vmatpush3.bf16.msra.mxu1 %v2399_v15 }
  0xc7   :  { %1254 = vmatprep.subr.bf16.mxu0 %v2402_v27  ;;  %2156 = vmatprep.subr.bf16.mxu1 %v2493_v10  ;;  %v2466_v27 = vld [vmem:[%s3312_s4 + $0x78] sm:$0xff]  }
  0xc8   :  { %2170 = vmatprep.mubr.msk.bf16.mxu1 %vm2495_vm1, %v2493_v10 }
  0xca   :  { %1255 = vmatpush1.bf16.msra.mxu0 %v2400_v34  ;;  %2157 = vmatpush3.bf16.msra.mxu1 %v2403_v32  ;;  %v2467_v34 = vld [vmem:[%s3312_s4 + $0x38] sm:$0xff]  }
  0xcb   :  { %1256 = vmatprep.subr.bf16.mxu0 %v2406_v29  ;;  %2158 = vmatprep.subr.bf16.mxu1 %v2493_v10 }
  0xce   :  { %1257 = vmatpush1.bf16.msra.mxu0 %v2404_v30  ;;  %2159 = vmatpush3.bf16.msra.mxu1 %v2407_v33 }
  0xcf   :  { %1258 = vmatprep.subr.bf16.mxu0 %v2410_v35  ;;  %2160 = vmatprep.subr.bf16.mxu1 %v2493_v10 }
  0xd2   :  { %1259 = vmatpush1.bf16.msra.mxu0 %v2408_v36  ;;  %2161 = vmatpush3.bf16.msra.mxu1 %v2411_v37 }
  0xd3   :  { %1260 = vmatprep.subr.bf16.mxu0 %v2414_v38  ;;  %2162 = vmatprep.subr.bf16.mxu1 %v2493_v10 }
  0xd6   :  { %1261 = vmatpush1.bf16.msra.mxu0 %v2412_v9  ;;  %2163 = vmatpush3.bf16.msra.mxu1 %v2415_v2 }
  0xd7   :  { %1262 = vmatprep.subr.bf16.mxu0 %v2418_v8  ;;  %2164 = vmatprep.subr.bf16.mxu1 %v2493_v10 }
  0xda   :  { %1263 = vmatpush1.bf16.msra.mxu0 %v2416_v39  ;;  %2165 = vmatpush3.bf16.msra.mxu1 %v2419_v21 }
  0xdb   :  { %1264 = vmatprep.subr.bf16.mxu0 %v2422_v25  ;;  %2166 = vmatprep.subr.bf16.mxu1 %v2493_v10 }
  0xde   :  { %1265 = vmatpush1.bf16.msra.mxu0 %v2420_v40  ;;  %2167 = vmatpush3.bf16.msra.mxu1 %v2423_v41  ;;  %v1407_v40 = vshrl.u32 %v63_v28, 7 }
  0xdf   :  { %1266 = vmatprep.subr.bf16.mxu0 %v2426_v42  ;;  %2168 = vmatprep.subr.bf16.mxu1 %v2493_v10  ;;  %v1404_v42 = vld [vmem:[%s3313_s3] sm:$0x7] }
  0xe0   :  { %v1416_v41 = vsub.s32 2, %v1407_v40 }
  0xe2   :  { %1267 = vmatpush1.bf16.msra.mxu0 %v2424_v45  ;;  %2169 = vmatpush3.bf16.msra.mxu1 %v2427_v46  ;;  %v1417_v43 = vrot.slane %v1404_v42, %v1416_v41 }
  0xe3   :  { %1279 = vmatprep.subr.bf16.mxu0 %v2430_v31  ;;  %2094 = vmatprep.subr.bf16.mxu1 %v2452_v53 }
  0xe5   :  { %1269 = vmatmul.mubr.bf16.vlgmr.msra.gmra.mrb[0].mxu0 %v3029_v16  ;;  %2171 = vmatmul.mubr.bf16.vlgmr.msra.gmra.mrb[12].mxu1 %v104_v7 }
  0xe6   :  { %1280 = vmatpush1.bf16.msra.mxu0 %v2428_v63  ;;  %1311 = vmatprep.mubr.bf16.mxu0 %v2494_v5  ;;  %v2437_v5 = vld [vmem:[%s3311_s1 + $0x1c8] ss:$12 sps:$4 sm:$0xff]  }
  0xe7   :  { %1281 = vmatprep.subr.bf16.mxu0 %v2433_v20  ;;  %2095 = vmatpush3.bf16.msra.mxu1 %v2453_v54 }
  0xe8   :  { %2096 = vmatprep.subr.bf16.mxu1 %v2454_v55 }
  0xea   :  { %1282 = vmatpush1.bf16.msra.mxu0 %v2431_v23 }
  0xeb   :  { %1283 = vmatprep.subr.bf16.mxu0 %v2436_v24  ;;  %2097 = vmatpush3.bf16.msra.mxu1 %v2455_v56 }
  0xec   :  { %2098 = vmatprep.subr.bf16.mxu1 %v2456_v57 }
  0xee   :  { %1284 = vmatpush1.bf16.msra.mxu0 %v2434_v48  ;;  %v1408_v48 = vsub.s32 0, %v1407_v40 }
  0xef   :  { %1285 = vmatprep.subr.bf16.mxu0 %v2439_v49  ;;  %2099 = vmatpush3.bf16.msra.mxu1 %v2457_v58  ;;  %v1412_v49 = vsub.s32 1, %v1407_v40 }
  0xf0   :  { %2100 = vmatprep.subr.bf16.mxu1 %v2458_v59  ;;  %v1409_v28 = vrot.slane %v1404_v42, %v1408_v48  ;;  %v2468_v59 = vld [vmem:[%s3312_s4 + $0x80] sm:$0xff]  }
  0xf2   :  { %1286 = vmatpush1.bf16.msra.mxu0 %v2437_v5  ;;  %v1413_v5 = vrot.slane %v1404_v42, %v1412_v49 }
  0xf3   :  { %1287 = vmatprep.subr.bf16.mxu0 %v2442_v50  ;;  %2101 = vmatpush3.bf16.msra.mxu1 %v2459_v60  ;;  %v2469_v60 = vld [vmem:[%s3312_s4 + $0x88] sm:$0xff]  }
  0xf4   :  { %2102 = vmatprep.subr.bf16.mxu1 %v2460_v62  ;;  %v2470_v62 = vld [vmem:[%s3312_s4 + $0x90] sm:$0xff]  }
  0xf6   :  { %1288 = vmatpush1.bf16.msra.mxu0 %v2440_v3 }
  0xf7   :  { %1289 = vmatprep.subr.bf16.mxu0 %v2445_v0  ;;  %2103 = vmatpush3.bf16.msra.mxu1 %v2461_v18  ;;  %v2471_v18 = vld [vmem:[%s3312_s4 + $0x98] sm:$0xff]  }
  0xf8   :  { %2104 = vmatprep.subr.bf16.mxu1 %v2462_v19  ;;  %v2472_v19 = vld [vmem:[%s3312_s4 + $0xa0] sm:$0xff]  }
  0xfa   :  { %1290 = vmatpush1.bf16.msra.mxu0 %v2443_v1 }
  0xfb   :  { %1291 = vmatprep.subr.bf16.mxu0 %v2448_v4  ;;  %2105 = vmatpush3.bf16.msra.mxu1 %v2463_v14  ;;  %v2473_v14 = vld [vmem:[%s3312_s4 + $0xa8] sm:$0xff]  }
  0xfc   :  { %2106 = vmatprep.subr.bf16.mxu1 %v2464_v17  ;;  %v2475_v17 = vld [vmem:[%s3312_s4 + $0xb8] sm:$0xff]  }
  0xfe   :  { %1292 = vmatpush1.bf16.msra.mxu0 %v2446_v6 }
  0xff   :  { %1293 = vmatprep.subr.bf16.mxu0 %v2451_v51  ;;  %2107 = vmatpush3.bf16.msra.mxu1 %v2465_v26  ;;  %v2477_v26 = vld [vmem:[%s3314_s6 + $0x8] sm:$0xff]  }
 0x100   :  { %2108 = vmatprep.subr.bf16.mxu1 %v2466_v27  ;;  %v2482_v27 = vld [vmem:[%s3314_s6 + $0x30] sm:$0xff]  }
 0x102   :  { %1294 = vmatpush1.bf16.msra.mxu0 %v2449_v52 }
 0x103   :  { %2194 = vmatprep.subr.bf16.mxu0 %v2493_v10  ;;  %2109 = vmatpush3.bf16.msra.mxu1 %v2467_v34  ;;  %v2483_v34 = vld [vmem:[%s3314_s6 + $0x38] sm:$0xff]  }
 0x104   :  { %2174 = vmatprep.subr.bf16.mxu1 %v2493_v10 }
 0x105   :  { %1312 = vmatmul.mubr.bf16.vlgmr.msra.gmra.mrb[0].mxu0 %v104_v7 }
 0x106   :  { %2210 = vmatprep.mubr.msk.bf16.mxu0 %vm2495_vm1, %v2493_v10 }
 0x158   :  { %v2048_v61 = vpop.f32.mrb[0].mxu1 }
 0x159   :  { %v2049_v22 = vpop.f32.mrb[1].mxu1 }
 0x15a   :  { %v2050_v12 = vadd.f32 %v2049_v22, %v2048_v61  ;;  %v2051_v16 = vpop.f32.mrb[2].mxu1  ;;  %v2474_v61 = vld [vmem:[%s3312_s4 + $0xb0] sm:$0xff]   ;;  %v2476_v22 = vld [vmem:[%s3314_s6] sm:$0xff]  }
 0x15b   :  { %v2052_v11 = vpop.f32.mrb[3].mxu1  ;;  %2195 = vmatpush3.bf16.msra.mxu0 %v2476_v22 }
 0x15c   :  { %v2053_v15 = vadd.f32 %v2052_v11, %v2051_v16  ;;  %2196 = vmatprep.subr.bf16.mxu0 %v2493_v10  ;;  %v2479_v16 = vld [vmem:[%s3314_s6 + $0x18] sm:$0xff]   ;;  %v2480_v11 = vld [vmem:[%s3314_s6 + $0x20] sm:$0xff]  }
 0x15f   :  { %2197 = vmatpush3.bf16.msra.mxu0 %v2477_v26 }
 0x160   :  { %2198 = vmatprep.subr.bf16.mxu0 %v2493_v10 }
 0x178   :  { %v845_v32 = vpop.f32.mrb[4].mxu1 }
 0x179   :  { %v846_v29 = vadd.f32 %v2050_v12, %v845_v32  ;;  %v2152_v30 = vpop.f32.mrb[5].mxu1  ;;  %v2478_v12 = vld [vmem:[%s3314_s6 + $0x10] sm:$0xff]  }
 0x17a   :  { %v848_v33 = vpop.f32.mrb[6].mxu1  ;;  %2199 = vmatpush3.bf16.msra.mxu0 %v2478_v12 }
 0x17b   :  { %v849_v35 = vadd.f32 %v2053_v15, %v848_v33  ;;  %v2153_v36 = vpop.f32.mrb[7].mxu1  ;;  %2200 = vmatprep.subr.bf16.mxu0 %v2493_v10  ;;  %v2481_v15 = vld [vmem:[%s3314_s6 + $0x28] sm:$0xff]  }
 0x17e   :  { %2201 = vmatpush3.bf16.msra.mxu0 %v2479_v16 }
 0x17f   :  { %2202 = vmatprep.subr.bf16.mxu0 %v2493_v10 }
 0x182   :  { %2203 = vmatpush3.bf16.msra.mxu0 %v2480_v11 }
 0x183   :  { %2204 = vmatprep.subr.bf16.mxu0 %v2493_v10 }
 0x186   :  { %2205 = vmatpush3.bf16.msra.mxu0 %v2481_v15 }
 0x187   :  { %2206 = vmatprep.subr.bf16.mxu0 %v2493_v10 }
 0x18a   :  { %2207 = vmatpush3.bf16.msra.mxu0 %v2482_v27 }
 0x18b   :  { %2208 = vmatprep.subr.bf16.mxu0 %v2493_v10 }
 0x18e   :  { %2209 = vmatpush3.bf16.msra.mxu0 %v2483_v34 }
 0x198   :  { %v2079_v37 = vpop.f32.mrb[8].mxu1 }
 0x199   :  { %v2080_v38 = vpop.f32.mrb[9].mxu1 }
 0x19a   :  { %v2081_v9 = vadd.f32 %v2080_v38, %v2079_v37  ;;  %v2082_v2 = vpop.f32.mrb[10].mxu1  ;;  %v1996_v37 = vld [vmem:[%s3315_s5] ss:$0 sm:$0xff] }
 0x19b   :  { %v2083_v8 = vpop.f32.mrb[11].mxu1 }
 0x19c   :  { %v2084_v39 = vadd.f32 %v2083_v8, %v2082_v2  ;;  %v1357_v21 = vadd.f32 %v2081_v9, %v846_v29 }
 0x19e   :  { %v1360_v25 = vadd.f32 %v2084_v39, %v849_v35 }
 0x1b8   :  { %v1397_v44 = vpop.f32.mrb[12].mxu1 }
 0x1b9   :  { %v1398_v45 = vadd.f32 %v1397_v44, %v1357_v21  ;;  %v2172_v46 = vpop.f32.mrb[13].mxu1 }
 0x1ba   :  { %v1400_v13 = vpop.f32.mrb[14].mxu1 }
 0x1bb   :  { %v1423_v47 = vadd.f32 %v1417_v43, %v1398_v45  ;;  %v1401_v31 = vadd.f32 %v1400_v13, %v1360_v25  ;;  %v2173_v63 = vpop.f32.mrb[15].mxu1 }
 0x1bd   :  { %v1426_v7 = vadd.f32 %v1417_v43, %v1401_v31  ;;  %v1429_v20 = vmax.f32 %v1423_v47, 0.0  ;;  %v2023_v31 = vld [vmem:[%s3316_s7] ss:$0 sm:$0xff] }
 0x1bf   :  { %v1432_v23 = vmax.f32 %v1426_v7, 0.0 }
 0x1c1   :  { %v1435_v24 = vpack.c.bf16 %v1432_v23, %v1429_v20 }
 0x1d8   :  { %v1313_v50 = vpop.f32.mrb[0].mxu0 }
 0x1d9   :  { %v1421_v3 = vadd.f32 %v1409_v28, %v1313_v50  ;;  %v1315_v0 = vpop.f32.mrb[1].mxu0 }
 0x1da   :  { %v1422_v1 = vadd.f32 %v1413_v5, %v1315_v0  ;;  %v1317_v4 = vpop.f32.mrb[2].mxu0 }
 0x1db   :  { %v1424_v6 = vadd.f32 %v1409_v28, %v1317_v4  ;;  %v1319_v51 = vpop.f32.mrb[3].mxu0  ;;  %v1427_v53 = vmax.f32 %v1421_v3, 0.0 }
 0x1dc   :  { %v1425_v52 = vadd.f32 %v1413_v5, %v1319_v51  ;;  %v1428_v55 = vmax.f32 %v1422_v1, 0.0 }
 0x1dd   :  { %v1430_v54 = vmax.f32 %v1424_v6, 0.0 }
 0x1de   :  { %v1431_v56 = vmax.f32 %v1425_v52, 0.0 }
 0x1df   :  { %v1433_v57 = vpack.c.bf16 %v1430_v54, %v1427_v53 }
 0x1e0   :  { %v1434_v58 = vpack.c.bf16 %v1431_v56, %v1428_v55 }
 0x1e2   :  { %1667 = vmatprep.mubr.bf16.mxu1 %v1434_v58 }
 0x1e3   :  { %1668 = vmatmul.mubr.bf16.vlgmr.msra.gmra.mrb[16].mxu1 %v1433_v57 }
 0x1e4   :  { %2175 = vmatpush3.bf16.msra.mxu1 %v2468_v59  ;;  %2190 = vmatprep.mubr.msk.bf16.mxu1 %vm2495_vm1, %v2493_v10 }
 0x1e5   :  { %2176 = vmatprep.subr.bf16.mxu1 %v2493_v10 }
 0x1e8   :  { %2177 = vmatpush3.bf16.msra.mxu1 %v2469_v60 }
 0x1e9   :  { %2178 = vmatprep.subr.bf16.mxu1 %v2493_v10 }
 0x1ec   :  { %2179 = vmatpush3.bf16.msra.mxu1 %v2470_v62 }
 0x1ed   :  { %2180 = vmatprep.subr.bf16.mxu1 %v2493_v10 }
 0x1f0   :  { %2181 = vmatpush3.bf16.msra.mxu1 %v2471_v18 }
 0x1f1   :  { %2182 = vmatprep.subr.bf16.mxu1 %v2493_v10 }
 0x1f4   :  { %2183 = vmatpush3.bf16.msra.mxu1 %v2472_v19 }
 0x1f5   :  { %2184 = vmatprep.subr.bf16.mxu1 %v2493_v10 }
 0x1f8   :  { %2185 = vmatpush3.bf16.msra.mxu1 %v2473_v14 }
 0x1f9   :  { %2186 = vmatprep.subr.bf16.mxu1 %v2493_v10 }
 0x1fc   :  { %2187 = vmatpush3.bf16.msra.mxu1 %v2474_v61 }
 0x1fd   :  { %2188 = vmatprep.subr.bf16.mxu1 %v2493_v10 }
 0x200   :  { %2189 = vmatpush3.bf16.msra.mxu1 %v2475_v17 }
 0x203   :  { %2191 = vmatmul.mubr.bf16.vlgmr.msra.gmra.mrb[20].mxu1 %v1435_v24 }
 0x2b6   :  { %v2110_v32 = vpop.f32.mrb[16].mxu1 }
 0x2b7   :  { %v2111_v29 = vpop.f32.mrb[17].mxu1 }
 0x2b8   :  { %v2112_v30 = vadd.f32 %v2111_v29, %v2110_v32  ;;  %v2113_v33 = vpop.f32.mrb[18].mxu1 }
 0x2b9   :  { %v2114_v35 = vpop.f32.mrb[19].mxu1 }
 0x2ba   :  { %v2115_v36 = vadd.f32 %v2114_v35, %v2113_v33  ;;  %v1670_v38 = vadd.f32 %v2112_v30, %v1996_v37 }
 0x2bc   :  { %v1673_v39 = vadd.f32 %v2115_v36, %v1996_v37 }
 0x2d6   :  { %v1710_v9 = vpop.f32.mrb[20].mxu1 }
 0x2d7   :  { %v1711_v2 = vadd.f32 %v1710_v9, %v1670_v38  ;;  %v2192_v8 = vpop.f32.mrb[21].mxu1 }
 0x2d8   :  { %v1713_v21 = vpop.f32.mrb[22].mxu1 }
 0x2d9   :  { %v2021_v25 = vmul.f32 -1.442695, %v1711_v2  ;;  %v1714_v40 = vadd.f32 %v1713_v21, %v1673_v39  ;;  %v2193_v10 = vpop.f32.mrb[23].mxu1 }
 0x2db   :  { %2484 = vpow2.f32 %v2021_v25  ;;  %v2022_v41 = vmul.f32 -1.442695, %v1714_v40 }
 0x2dd   :  { %2486 = vpow2.f32 %v2022_v41 }
 0x2e5   :  { %v2485_v42 = vpop.eup %2484 }
 0x2e6   :  { %v1723_v43 = vadd.f32 1.0, %v2485_v42 }
 0x2e7   :  { %v2487_v44 = vpop.eup %2486 }
 0x2e8   :  { %v1724_v45 = vadd.f32 1.0, %v2487_v44  ;;  %2488 = vrcp.f32 %v1723_v43 }
 0x2ea   :  { %2490 = vrcp.f32 %v1724_v45 }
 0x2f2   :  { %v2489_v46 = vpop.eup %2488 }
 0x2f4   :  { %v2491_v13 = vpop.eup %2490 }
 0x2f5   :  { %v1729_v47 = vpack.c.bf16 %v2491_v13, %v2489_v46 }
 0x2f7   :  { %2211 = vmatmul.mubr.bf16.vlgmr.msra.gmra.mrb[4].mxu0 %v1729_v47 }
 0x3ca   :  { %v1835_v63 = vpop.f32.mrb[4].mxu0 }
 0x3cb   :  { %v1836_v7 = vadd.f32 %v2023_v31, %v1835_v63  ;;  %v2212_v20 = vpop.f32.mrb[5].mxu0 }
 0x3cc   :  { %v1838_v23 = vpop.f32.mrb[6].mxu0 }
 0x3cd   :  { %1842 = vst [vmem:[%s3317_s8] sm:$0xff] %v1836_v7  ;;  %v1839_v24 = vadd.f32 %v2023_v31, %v1838_v23  ;;  %v2213_v48 = vpop.f32.mrb[7].mxu0 }
 0x3cf   :  { %1843 = vst [vmem:[%s3317_s8 + $0x8] sm:$0xff] %v1839_v24 }

// kernel: st2_forward.7
= control target key start
LH: loop header
LB: loop body
LE: loop exit
PB: predicated region body
PF: predicated region fallthrough
CT: control target
= control target key end

     0   :  { %9 = vsyncpa [#allocation3], 0  ;;  %s10811_s15 = smov [#allocation2]   ;;  %s12917_s0 = inlined_call_operand.vmem [shape: bf16[2,16,384], index: 0, kind: input, shape index: {}]   ;;  %s12918_s1 = inlined_call_operand.vmem [shape: bf16[384,3072], index: 1, kind: input, shape index: {}]   ;;  %s12919_s2 = inlined_call_operand.hbm [shape: bf16[384,3072], index: 2, kind: input, shape index: {}]   ;;  %s12920_s3 = inlined_call_operand.vmem [shape: f32[1,3072], index: 3, kind: input, shape index: {}]   ;;  %s12921_s4 = inlined_call_operand.vmem [shape: bf16[2,16,1536], index: 4, kind: output, shape index: {}]  }
   0x1   :  { %s19_s16 = sshll.u32 %s10811_s15, 4  ;;  %s10787_s19 = scalar_lea.hbm %s12919_s2, 73728  ;;  %s20_s16 = int_to_ptr.vmem [resolvable:$true] %s19_s16 }
   0x2   :  { %p10788_p0 = scmp.ne.s32.totalorder %s12919_s2, %s10787_s19  ;;  %p10791_p1 = scmp.lt.u32.totalorder %s10787_s19, %s12919_s2 }
   0x4   :  { %p10793_p2 = pnand %p10791_p1, %p10788_p0 }
   0x6   :  { %10796 = shalt.err (!%p10793_p2)
}
   0x7   :  { %s10797_s24 = scalar_lea.vmem %s20_s16, 73728  ;;  %p10802_p4 = scmp.lt.s32.totalorder %s20_s16, %s20_s16 }
   0x8   :  { %p10798_p3 = scmp.ne.s32.totalorder %s20_s16, %s10797_s24  ;;  %p10803_p5 = scmp.lt.s32.totalorder %s10797_s24, %s10797_s24 }
   0xa   :  { %p10804_p6 = por %p10803_p5, %p10802_p4 }
   0xc   :  { %p10805_p7 = pnand %p10804_p6, %p10798_p3 }
   0xe   :  { %10808 = shalt.err (!%p10805_p7)
}
   0xf   :  { %s10812_s25 = smov 1536   ;;  %s10813_s26 = smov 96  }
  0x10   :  { %25 = dma.hbm_to_vmem [thread:$0]  %s12919_s2, 73728, %s20_s16, [#allocation3], %s10812_s25, %s10812_s25, %s10813_s26  }
  0x11   :  { %10809 = dma.done.wait [#allocation3], 73728  }
  0x12   :  { %10810 = vsyncadd [#allocation3], 4294893568  ;;  %v617_v0 = vld [vmem:[#allocation2] sm:$0xff]  ;;  %v618_v2 = vld [vmem:[#allocation2 + $0x8] sm:$0xff] }
  0x13   :  { %v629_v1 = vld [vmem:[#allocation2 + $0x60] sm:$0xff]  ;;  %v630_v4 = vld [vmem:[#allocation2 + $0x68] sm:$0xff] }
  0x14   :  { %v9405_v3 = vcombine.high %v617_v0, %v629_v1  ;;  %v9404_v5 = vcombine.low %v617_v0, %v629_v1  ;;  %v641_v6 = vld [vmem:[#allocation2 + $0xc0] sm:$0xff]  ;;  %v9407_v8 = vcombine.high %v618_v2, %v630_v4  ;;  %v9406_v9 = vcombine.low %v618_v2, %v630_v4  ;;  %v642_v11 = vld [vmem:[#allocation2 + $0xc8] sm:$0xff] }
  0x15   :  { %v653_v7 = vld [vmem:[#allocation2 + $0x120] sm:$0xff]  ;;  %v654_v12 = vld [vmem:[#allocation2 + $0x128] sm:$0xff] }
  0x16   :  { %v9429_v10 = vcombine.high %v641_v6, %v653_v7  ;;  %v665_v13 = vld [vmem:[#allocation2 + $0x180] sm:$0xff]  ;;  %4089 = vmatprep.subr.bf16.mxu0 %v9405_v3  ;;  %v9431_v14 = vcombine.high %v642_v11, %v654_v12  ;;  %v666_v16 = vld [vmem:[#allocation2 + $0x188] sm:$0xff]  ;;  %4175 = vmatprep.subr.bf16.mxu1 %v9407_v8  ;;  %v9428_v18 = vcombine.low %v641_v6, %v653_v7 }
  0x17   :  { %v677_v15 = vld [vmem:[#allocation2 + $0x1e0] sm:$0xff]  ;;  %v678_v17 = vld [vmem:[#allocation2 + $0x1e8] sm:$0xff]  ;;  %4090 = vmatpush1.bf16.msra.mxu0 %v9404_v5  ;;  %4176 = vmatpush1.bf16.msra.mxu1 %v9406_v9  ;;  %v9430_v19 = vcombine.low %v642_v11, %v654_v12 }
  0x18   :  { %4091 = vmatprep.subr.bf16.mxu0 %v9429_v10  ;;  %v9453_v20 = vcombine.high %v665_v13, %v677_v15  ;;  %4177 = vmatprep.subr.bf16.mxu1 %v9431_v14  ;;  %v9455_v21 = vcombine.high %v666_v16, %v678_v17  ;;  %v689_v22 = vld [vmem:[#allocation2 + $0x240] sm:$0xff]  ;;  %v690_v24 = vld [vmem:[#allocation2 + $0x248] sm:$0xff]  ;;  %v9452_v26 = vcombine.low %v665_v13, %v677_v15 }
  0x19   :  { %v701_v23 = vld [vmem:[#allocation2 + $0x2a0] sm:$0xff]  ;;  %v702_v25 = vld [vmem:[#allocation2 + $0x2a8] sm:$0xff]  ;;  %v9454_v27 = vcombine.low %v666_v16, %v678_v17 }
  0x1a   :  { %v9477_v28 = vcombine.high %v689_v22, %v701_v23  ;;  %v9479_v29 = vcombine.high %v690_v24, %v702_v25  ;;  %v713_v30 = vld [vmem:[#allocation2 + $0x300] sm:$0xff]  ;;  %v714_v32 = vld [vmem:[#allocation2 + $0x308] sm:$0xff]  ;;  %v9476_v34 = vcombine.low %v689_v22, %v701_v23  ;;  %v9478_v35 = vcombine.low %v690_v24, %v702_v25 }
  0x1b   :  { %4092 = vmatpush1.bf16.msra.mxu0 %v9428_v18  ;;  %4178 = vmatpush1.bf16.msra.mxu1 %v9430_v19  ;;  %v725_v31 = vld [vmem:[#allocation2 + $0x360] sm:$0xff]  ;;  %v726_v33 = vld [vmem:[#allocation2 + $0x368] sm:$0xff] }
  0x1c   :  { %4093 = vmatprep.subr.bf16.mxu0 %v9453_v20  ;;  %4179 = vmatprep.subr.bf16.mxu1 %v9455_v21  ;;  %v9501_v36 = vcombine.high %v713_v30, %v725_v31  ;;  %v9503_v37 = vcombine.high %v714_v32, %v726_v33  ;;  %v737_v38 = vld [vmem:[#allocation2 + $0x3c0] sm:$0xff]  ;;  %v738_v40 = vld [vmem:[#allocation2 + $0x3c8] sm:$0xff]  ;;  %v9500_v42 = vcombine.low %v713_v30, %v725_v31 }
  0x1d   :  { %v749_v39 = vld [vmem:[#allocation2 + $0x420] sm:$0xff]  ;;  %v750_v41 = vld [vmem:[#allocation2 + $0x428] sm:$0xff]  ;;  %v9502_v43 = vcombine.low %v714_v32, %v726_v33 }
  0x1e   :  { %v9525_v44 = vcombine.high %v737_v38, %v749_v39  ;;  %v9527_v45 = vcombine.high %v738_v40, %v750_v41  ;;  %v761_v46 = vld [vmem:[#allocation2 + $0x480] sm:$0xff]  ;;  %v762_v48 = vld [vmem:[#allocation2 + $0x488] sm:$0xff]  ;;  %v9524_v50 = vcombine.low %v737_v38, %v749_v39  ;;  %v9526_v51 = vcombine.low %v738_v40, %v750_v41 }
  0x1f   :  { %4094 = vmatpush1.bf16.msra.mxu0 %v9452_v26  ;;  %4180 = vmatpush1.bf16.msra.mxu1 %v9454_v27  ;;  %v773_v47 = vld [vmem:[#allocation2 + $0x4e0] sm:$0xff]  ;;  %v774_v49 = vld [vmem:[#allocation2 + $0x4e8] sm:$0xff] }
  0x20   :  { %4095 = vmatprep.subr.bf16.mxu0 %v9477_v28  ;;  %4181 = vmatprep.subr.bf16.mxu1 %v9479_v29  ;;  %v9549_v52 = vcombine.high %v761_v46, %v773_v47  ;;  %v9551_v53 = vcombine.high %v762_v48, %v774_v49  ;;  %v785_v54 = vld [vmem:[#allocation2 + $0x540] sm:$0xff]  ;;  %v10855_v56 = vld [vmem:[%s12917_s0 + $0x1c] ss:$12 sps:$4 sm:$0xff]   ;;  %v9548_v59 = vcombine.low %v761_v46, %v773_v47 }
  0x21   :  { %v797_v55 = vld [vmem:[#allocation2 + $0x5a0] sm:$0xff]  ;;  %v786_v57 = vld [vmem:[#allocation2 + $0x548] sm:$0xff]  ;;  %4121 = vmatprep.mubr.bf16.mxu0 %v10855_v56  ;;  %v9550_v60 = vcombine.low %v762_v48, %v774_v49  ;;  %4207 = vmatprep.mubr.bf16.mxu1 %v10855_v56 }
  0x22   :  { %v798_v58 = vld [vmem:[#allocation2 + $0x5a8] sm:$0xff]  ;;  %v9573_v61 = vcombine.high %v785_v54, %v797_v55  ;;  %v809_v63 = vld [vmem:[#allocation2 + $0x600] sm:$0xff]  ;;  %v9572_v3 = vcombine.low %v785_v54, %v797_v55 }
  0x23   :  { %4096 = vmatpush1.bf16.msra.mxu0 %v9476_v34  ;;  %4182 = vmatpush1.bf16.msra.mxu1 %v9478_v35  ;;  %v9575_v62 = vcombine.high %v786_v57, %v798_v58  ;;  %v821_v0 = vld [vmem:[#allocation2 + $0x660] sm:$0xff]  ;;  %v810_v1 = vld [vmem:[#allocation2 + $0x608] sm:$0xff]  ;;  %v9574_v4 = vcombine.low %v786_v57, %v798_v58 }
  0x24   :  { %4097 = vmatprep.subr.bf16.mxu0 %v9501_v36  ;;  %4183 = vmatprep.subr.bf16.mxu1 %v9503_v37  ;;  %v822_v2 = vld [vmem:[#allocation2 + $0x668] sm:$0xff]  ;;  %v9597_v5 = vcombine.high %v809_v63, %v821_v0  ;;  %v833_v7 = vld [vmem:[#allocation2 + $0x6c0] sm:$0xff]  ;;  %v9596_v11 = vcombine.low %v809_v63, %v821_v0 }
  0x25   :  { %v9599_v6 = vcombine.high %v810_v1, %v822_v2  ;;  %v845_v8 = vld [vmem:[#allocation2 + $0x720] sm:$0xff]  ;;  %v834_v9 = vld [vmem:[#allocation2 + $0x6c8] sm:$0xff]  ;;  %v9598_v12 = vcombine.low %v810_v1, %v822_v2 }
  0x26   :  { %v846_v10 = vld [vmem:[#allocation2 + $0x728] sm:$0xff]  ;;  %v9621_v13 = vcombine.high %v833_v7, %v845_v8  ;;  %v857_v15 = vld [vmem:[#allocation2 + $0x780] sm:$0xff]  ;;  %v9620_v19 = vcombine.low %v833_v7, %v845_v8 }
  0x27   :  { %4098 = vmatpush1.bf16.msra.mxu0 %v9500_v42  ;;  %4184 = vmatpush1.bf16.msra.mxu1 %v9502_v43  ;;  %v9623_v14 = vcombine.high %v834_v9, %v846_v10  ;;  %v869_v16 = vld [vmem:[#allocation2 + $0x7e0] sm:$0xff]  ;;  %v858_v17 = vld [vmem:[#allocation2 + $0x788] sm:$0xff]  ;;  %v9622_v20 = vcombine.low %v834_v9, %v846_v10 }
  0x28   :  { %4099 = vmatprep.subr.bf16.mxu0 %v9525_v44  ;;  %4185 = vmatprep.subr.bf16.mxu1 %v9527_v45  ;;  %v870_v18 = vld [vmem:[#allocation2 + $0x7e8] sm:$0xff]  ;;  %v9645_v21 = vcombine.high %v857_v15, %v869_v16  ;;  %v881_v23 = vld [vmem:[#allocation2 + $0x840] sm:$0xff]  ;;  %v9644_v27 = vcombine.low %v857_v15, %v869_v16 }
  0x29   :  { %v9647_v22 = vcombine.high %v858_v17, %v870_v18  ;;  %v893_v24 = vld [vmem:[#allocation2 + $0x8a0] sm:$0xff]  ;;  %v882_v25 = vld [vmem:[#allocation2 + $0x848] sm:$0xff]  ;;  %v9646_v28 = vcombine.low %v858_v17, %v870_v18 }
  0x2a   :  { %v894_v26 = vld [vmem:[#allocation2 + $0x8a8] sm:$0xff]  ;;  %v9669_v29 = vcombine.high %v881_v23, %v893_v24  ;;  %v905_v31 = vld [vmem:[#allocation2 + $0x900] sm:$0xff]  ;;  %v9668_v35 = vcombine.low %v881_v23, %v893_v24 }
  0x2b   :  { %4100 = vmatpush1.bf16.msra.mxu0 %v9524_v50  ;;  %4186 = vmatpush1.bf16.msra.mxu1 %v9526_v51  ;;  %v9671_v30 = vcombine.high %v882_v25, %v894_v26  ;;  %v917_v32 = vld [vmem:[#allocation2 + $0x960] sm:$0xff]  ;;  %v906_v33 = vld [vmem:[#allocation2 + $0x908] sm:$0xff]  ;;  %v9670_v36 = vcombine.low %v882_v25, %v894_v26 }
  0x2c   :  { %4101 = vmatprep.subr.bf16.mxu0 %v9549_v52  ;;  %4187 = vmatprep.subr.bf16.mxu1 %v9551_v53  ;;  %v918_v34 = vld [vmem:[#allocation2 + $0x968] sm:$0xff]  ;;  %v9693_v37 = vcombine.high %v905_v31, %v917_v32  ;;  %v929_v39 = vld [vmem:[#allocation2 + $0x9c0] sm:$0xff]  ;;  %v9692_v43 = vcombine.low %v905_v31, %v917_v32 }
  0x2d   :  { %v9695_v38 = vcombine.high %v906_v33, %v918_v34  ;;  %v941_v40 = vld [vmem:[#allocation2 + $0xa20] sm:$0xff]  ;;  %v930_v41 = vld [vmem:[#allocation2 + $0x9c8] sm:$0xff]  ;;  %v9694_v44 = vcombine.low %v906_v33, %v918_v34 }
  0x2e   :  { %v942_v42 = vld [vmem:[#allocation2 + $0xa28] sm:$0xff]  ;;  %v9717_v45 = vcombine.high %v929_v39, %v941_v40  ;;  %v953_v47 = vld [vmem:[#allocation2 + $0xa80] sm:$0xff]  ;;  %v9716_v51 = vcombine.low %v929_v39, %v941_v40 }
  0x2f   :  { %4102 = vmatpush1.bf16.msra.mxu0 %v9548_v59  ;;  %4188 = vmatpush1.bf16.msra.mxu1 %v9550_v60  ;;  %v9719_v46 = vcombine.high %v930_v41, %v942_v42  ;;  %v965_v48 = vld [vmem:[#allocation2 + $0xae0] sm:$0xff]  ;;  %v954_v49 = vld [vmem:[#allocation2 + $0xa88] sm:$0xff]  ;;  %v9718_v52 = vcombine.low %v930_v41, %v942_v42 }
  0x30   :  { %4103 = vmatprep.subr.bf16.mxu0 %v9573_v61  ;;  %4189 = vmatprep.subr.bf16.mxu1 %v9575_v62  ;;  %v966_v50 = vld [vmem:[#allocation2 + $0xae8] sm:$0xff]  ;;  %v9741_v53 = vcombine.high %v953_v47, %v965_v48  ;;  %v977_v55 = vld [vmem:[#allocation2 + $0xb40] sm:$0xff]  ;;  %v9740_v60 = vcombine.low %v953_v47, %v965_v48 }
  0x31   :  { %v9743_v54 = vcombine.high %v954_v49, %v966_v50  ;;  %v989_v57 = vld [vmem:[#allocation2 + $0xba0] sm:$0xff]  ;;  %v978_v58 = vld [vmem:[#allocation2 + $0xb48] sm:$0xff]  ;;  %v9742_v61 = vcombine.low %v954_v49, %v966_v50 }
  0x32   :  { %v990_v59 = vld [vmem:[#allocation2 + $0xba8] sm:$0xff]  ;;  %v9765_v62 = vcombine.high %v977_v55, %v989_v57  ;;  %v1001_v0 = vld [vmem:[#allocation2 + $0xc00] sm:$0xff] }
  0x33   :  { %4104 = vmatpush1.bf16.msra.mxu0 %v9572_v3  ;;  %4190 = vmatpush1.bf16.msra.mxu1 %v9574_v4  ;;  %v9767_v63 = vcombine.high %v978_v58, %v990_v59  ;;  %v1013_v1 = vld [vmem:[#allocation2 + $0xc60] sm:$0xff]  ;;  %v1002_v2 = vld [vmem:[#allocation2 + $0xc08] sm:$0xff]  ;;  %v9764_v4 = vcombine.low %v977_v55, %v989_v57 }
  0x34   :  { %4105 = vmatprep.subr.bf16.mxu0 %v9597_v5  ;;  %4191 = vmatprep.subr.bf16.mxu1 %v9599_v6  ;;  %v1014_v3 = vld [vmem:[#allocation2 + $0xc68] sm:$0xff]  ;;  %v9766_v5 = vcombine.low %v978_v58, %v990_v59  ;;  %v9789_v6 = vcombine.high %v1001_v0, %v1013_v1  ;;  %v1025_v8 = vld [vmem:[#allocation2 + $0xcc0] sm:$0xff] }
  0x35   :  { %v9791_v7 = vcombine.high %v1002_v2, %v1014_v3  ;;  %v1037_v9 = vld [vmem:[#allocation2 + $0xd20] sm:$0xff] }
  0x36   :  { %v10862_v10 = vld [vmem:[%s12917_s0 + $0x18] ss:$12 sps:$4 sm:$0xff]   ;;  %v9813_v15 = vcombine.high %v1025_v8, %v1037_v9 }
  0x37   :  { %4106 = vmatpush1.bf16.msra.mxu0 %v9596_v11  ;;  %4192 = vmatpush1.bf16.msra.mxu1 %v9598_v12  ;;  %v1026_v11 = vld [vmem:[#allocation2 + $0xcc8] sm:$0xff]  ;;  %v1049_v17 = vld [vmem:[#allocation2 + $0xd80] sm:$0xff] }
  0x38   :  { %4107 = vmatprep.subr.bf16.mxu0 %v9621_v13  ;;  %4193 = vmatprep.subr.bf16.mxu1 %v9623_v14  ;;  %v1038_v12 = vld [vmem:[#allocation2 + $0xd28] sm:$0xff]  ;;  %v9788_v13 = vcombine.low %v1001_v0, %v1013_v1  ;;  %v9790_v14 = vcombine.low %v1002_v2, %v1014_v3  ;;  %v1061_v18 = vld [vmem:[#allocation2 + $0xde0] sm:$0xff]  ;;  %v619_v3 = vld [vmem:[#allocation2 + $0x10] sm:$0xff] }
  0x39   :  { %v9815_v16 = vcombine.high %v1026_v11, %v1038_v12  ;;  %v9837_v23 = vcombine.high %v1049_v17, %v1061_v18  ;;  %v1073_v25 = vld [vmem:[#allocation2 + $0xe40] sm:$0xff] }
  0x3a   :  { %v1085_v26 = vld [vmem:[#allocation2 + $0xea0] sm:$0xff] }
  0x3b   :  { %4108 = vmatpush1.bf16.msra.mxu0 %v9620_v19  ;;  %4194 = vmatpush1.bf16.msra.mxu1 %v9622_v20  ;;  %v1050_v19 = vld [vmem:[#allocation2 + $0xd88] sm:$0xff]  ;;  %v9861_v32 = vcombine.high %v1073_v25, %v1085_v26  ;;  %v1097_v34 = vld [vmem:[#allocation2 + $0xf00] sm:$0xff] }
  0x3c   :  { %4109 = vmatprep.subr.bf16.mxu0 %v9645_v21  ;;  %4195 = vmatprep.subr.bf16.mxu1 %v9647_v22  ;;  %v1062_v20 = vld [vmem:[#allocation2 + $0xde8] sm:$0xff]  ;;  %v9812_v21 = vcombine.low %v1025_v8, %v1037_v9  ;;  %v9814_v22 = vcombine.low %v1026_v11, %v1038_v12  ;;  %v1121_v42 = vld [vmem:[#allocation2 + $0xfc0] sm:$0xff]  ;;  %v643_v12 = vld [vmem:[#allocation2 + $0xd0] sm:$0xff] }
  0x3d   :  { %v9839_v24 = vcombine.high %v1050_v19, %v1062_v20  ;;  %v9838_v31 = vcombine.low %v1050_v19, %v1062_v20  ;;  %v1145_v50 = vld [vmem:[#allocation2 + $0x1080] sm:$0xff] }
  0x3e   :  { %v1169_v59 = vld [vmem:[#allocation2 + $0x1140] sm:$0xff] }
  0x3f   :  { %4110 = vmatpush1.bf16.msra.mxu0 %v9644_v27  ;;  %4196 = vmatpush1.bf16.msra.mxu1 %v9646_v28  ;;  %v10814_v27 = vmov 0   ;;  %v1074_v28 = vld [vmem:[#allocation2 + $0xe48] sm:$0xff] }
  0x40   :  { %4111 = vmatprep.subr.bf16.mxu0 %v9669_v29  ;;  %4197 = vmatprep.subr.bf16.mxu1 %v9671_v30  ;;  %v1086_v29 = vld [vmem:[#allocation2 + $0xea8] sm:$0xff]  ;;  %v9836_v30 = vcombine.low %v1049_v17, %v1061_v18 }
  0x41   :  { %v9863_v33 = vcombine.high %v1074_v28, %v1086_v29  ;;  %v9862_v39 = vcombine.low %v1074_v28, %v1086_v29 }
  0x43   :  { %4112 = vmatpush1.bf16.msra.mxu0 %v9668_v35  ;;  %4198 = vmatpush1.bf16.msra.mxu1 %v9670_v36  ;;  %v1109_v35 = vld [vmem:[#allocation2 + $0xf60] sm:$0xff]  ;;  %v1098_v36 = vld [vmem:[#allocation2 + $0xf08] sm:$0xff] }
  0x44   :  { %4113 = vmatprep.subr.bf16.mxu0 %v9693_v37  ;;  %4199 = vmatprep.subr.bf16.mxu1 %v9695_v38  ;;  %v1110_v37 = vld [vmem:[#allocation2 + $0xf68] sm:$0xff]  ;;  %v9860_v38 = vcombine.low %v1073_v25, %v1085_v26  ;;  %v9885_v40 = vcombine.high %v1097_v34, %v1109_v35 }
  0x45   :  { %v9887_v41 = vcombine.high %v1098_v36, %v1110_v37  ;;  %v9886_v47 = vcombine.low %v1098_v36, %v1110_v37 }
  0x47   :  { %4114 = vmatpush1.bf16.msra.mxu0 %v9692_v43  ;;  %4200 = vmatpush1.bf16.msra.mxu1 %v9694_v44  ;;  %v1133_v43 = vld [vmem:[#allocation2 + $0x1020] sm:$0xff]  ;;  %v1122_v44 = vld [vmem:[#allocation2 + $0xfc8] sm:$0xff] }
  0x48   :  { %4115 = vmatprep.subr.bf16.mxu0 %v9717_v45  ;;  %4201 = vmatprep.subr.bf16.mxu1 %v9719_v46  ;;  %v1134_v45 = vld [vmem:[#allocation2 + $0x1028] sm:$0xff]  ;;  %v9884_v46 = vcombine.low %v1097_v34, %v1109_v35  ;;  %v9909_v48 = vcombine.high %v1121_v42, %v1133_v43 }
  0x49   :  { %v9911_v49 = vcombine.high %v1122_v44, %v1134_v45  ;;  %v9910_v55 = vcombine.low %v1122_v44, %v1134_v45  ;;  %v739_v45 = vld [vmem:[#allocation2 + $0x3d0] sm:$0xff] }
  0x4b   :  { %4116 = vmatpush1.bf16.msra.mxu0 %v9716_v51  ;;  %4202 = vmatpush1.bf16.msra.mxu1 %v9718_v52  ;;  %v1157_v51 = vld [vmem:[#allocation2 + $0x10e0] sm:$0xff]  ;;  %v1146_v52 = vld [vmem:[#allocation2 + $0x1088] sm:$0xff] }
  0x4c   :  { %4117 = vmatprep.subr.bf16.mxu0 %v9741_v53  ;;  %4203 = vmatprep.subr.bf16.mxu1 %v9743_v54  ;;  %v1158_v53 = vld [vmem:[#allocation2 + $0x10e8] sm:$0xff]  ;;  %v9908_v54 = vcombine.low %v1121_v42, %v1133_v43  ;;  %v9933_v57 = vcombine.high %v1145_v50, %v1157_v51 }
  0x4d   :  { %v9935_v58 = vcombine.high %v1146_v52, %v1158_v53  ;;  %v9934_v0 = vcombine.low %v1146_v52, %v1158_v53  ;;  %v763_v53 = vld [vmem:[#allocation2 + $0x490] sm:$0xff] }
  0x4f   :  { %4118 = vmatpush1.bf16.msra.mxu0 %v9740_v60  ;;  %4204 = vmatpush1.bf16.msra.mxu1 %v9742_v61  ;;  %v1181_v60 = vld [vmem:[#allocation2 + $0x11a0] sm:$0xff]  ;;  %v1170_v61 = vld [vmem:[#allocation2 + $0x1148] sm:$0xff] }
  0x50   :  { %4119 = vmatprep.subr.bf16.mxu0 %v9765_v62  ;;  %4205 = vmatprep.subr.bf16.mxu1 %v9767_v63  ;;  %v1182_v62 = vld [vmem:[#allocation2 + $0x11a8] sm:$0xff]  ;;  %v9932_v63 = vcombine.low %v1145_v50, %v1157_v51  ;;  %v9957_v1 = vcombine.high %v1169_v59, %v1181_v60 }
  0x51   :  { %v9959_v2 = vcombine.high %v1170_v61, %v1182_v62  ;;  %v9958_v8 = vcombine.low %v1170_v61, %v1182_v62  ;;  %v787_v62 = vld [vmem:[#allocation2 + $0x550] sm:$0xff] }
  0x53   :  { %4120 = vmatpush1.bf16.msra.mxu0 %v9764_v4  ;;  %4206 = vmatpush1.bf16.msra.mxu1 %v9766_v5  ;;  %v631_v4 = vld [vmem:[#allocation2 + $0x70] sm:$0xff]  ;;  %v620_v5 = vld [vmem:[#allocation2 + $0x18] sm:$0xff] }
  0x54   :  { %4132 = vmatprep.subr.bf16.mxu0 %v9789_v6  ;;  %4218 = vmatprep.subr.bf16.mxu1 %v9791_v7  ;;  %v632_v6 = vld [vmem:[#allocation2 + $0x78] sm:$0xff]  ;;  %v9956_v7 = vcombine.low %v1169_v59, %v1181_v60  ;;  %v9409_v9 = vcombine.high %v619_v3, %v631_v4  ;;  %v9408_v17 = vcombine.low %v619_v3, %v631_v4 }
  0x55   :  { %v9411_v11 = vcombine.high %v620_v5, %v632_v6  ;;  %v9410_v18 = vcombine.low %v620_v5, %v632_v6  ;;  %v811_v6 = vld [vmem:[#allocation2 + $0x610] sm:$0xff] }
  0x56   :  { %4122 = vmatmul.mubr.bf16.vlgmr.msra.gmra.mrb[0].mxu0 %v10862_v10  ;;  %4208 = vmatmul.mubr.bf16.vlgmr.msra.gmra.mrb[0].mxu1 %v10862_v10 }
  0x57   :  { %4133 = vmatpush1.bf16.msra.mxu0 %v9788_v13  ;;  %4219 = vmatpush1.bf16.msra.mxu1 %v9790_v14  ;;  %v655_v13 = vld [vmem:[#allocation2 + $0x130] sm:$0xff]  ;;  %v10871_v14 = vld [vmem:[%s12917_s0 + $0x20] ss:$12 sps:$4 sm:$0xff]  }
  0x58   :  { %4134 = vmatprep.subr.bf16.mxu0 %v9813_v15  ;;  %4220 = vmatprep.subr.bf16.mxu1 %v9815_v16  ;;  %v644_v15 = vld [vmem:[#allocation2 + $0xd8] sm:$0xff]  ;;  %v9433_v19 = vcombine.high %v643_v12, %v655_v13  ;;  %v9432_v25 = vcombine.low %v643_v12, %v655_v13 }
  0x59   :  { %4164 = vmatprep.mubr.bf16.mxu0 %v10814_v27  ;;  %4250 = vmatprep.mubr.bf16.mxu1 %v10814_v27  ;;  %v656_v16 = vld [vmem:[#allocation2 + $0x138] sm:$0xff] }
  0x5a   :  { %v9435_v20 = vcombine.high %v644_v15, %v656_v16  ;;  %v9434_v26 = vcombine.low %v644_v15, %v656_v16  ;;  %v835_v16 = vld [vmem:[#allocation2 + $0x6d0] sm:$0xff] }
  0x5b   :  { %4135 = vmatpush1.bf16.msra.mxu0 %v9812_v21  ;;  %4221 = vmatpush1.bf16.msra.mxu1 %v9814_v22  ;;  %v667_v21 = vld [vmem:[#allocation2 + $0x190] sm:$0xff] }
  0x5c   :  { %4136 = vmatprep.subr.bf16.mxu0 %v9837_v23  ;;  %4222 = vmatprep.subr.bf16.mxu1 %v9839_v24  ;;  %v679_v22 = vld [vmem:[#allocation2 + $0x1f0] sm:$0xff]  ;;  %v668_v23 = vld [vmem:[#allocation2 + $0x198] sm:$0xff] }
  0x5d   :  { %v680_v24 = vld [vmem:[#allocation2 + $0x1f8] sm:$0xff]  ;;  %v9457_v28 = vcombine.high %v667_v21, %v679_v22  ;;  %v9456_v34 = vcombine.low %v667_v21, %v679_v22 }
  0x5e   :  { %v9459_v29 = vcombine.high %v668_v23, %v680_v24  ;;  %v9458_v35 = vcombine.low %v668_v23, %v680_v24  ;;  %v859_v24 = vld [vmem:[#allocation2 + $0x790] sm:$0xff] }
  0x5f   :  { %4137 = vmatpush1.bf16.msra.mxu0 %v9836_v30  ;;  %4223 = vmatpush1.bf16.msra.mxu1 %v9838_v31  ;;  %v691_v30 = vld [vmem:[#allocation2 + $0x250] sm:$0xff] }
  0x60   :  { %4138 = vmatprep.subr.bf16.mxu0 %v9861_v32  ;;  %4224 = vmatprep.subr.bf16.mxu1 %v9863_v33  ;;  %v703_v31 = vld [vmem:[#allocation2 + $0x2b0] sm:$0xff]  ;;  %v692_v32 = vld [vmem:[#allocation2 + $0x258] sm:$0xff] }
  0x61   :  { %v704_v33 = vld [vmem:[#allocation2 + $0x2b8] sm:$0xff]  ;;  %v9481_v36 = vcombine.high %v691_v30, %v703_v31  ;;  %v9480_v42 = vcombine.low %v691_v30, %v703_v31 }
  0x62   :  { %v9483_v37 = vcombine.high %v692_v32, %v704_v33  ;;  %v9482_v43 = vcombine.low %v692_v32, %v704_v33  ;;  %v883_v33 = vld [vmem:[#allocation2 + $0x850] sm:$0xff] }
  0x63   :  { %4139 = vmatpush1.bf16.msra.mxu0 %v9860_v38  ;;  %4225 = vmatpush1.bf16.msra.mxu1 %v9862_v39  ;;  %v715_v38 = vld [vmem:[#allocation2 + $0x310] sm:$0xff] }
  0x64   :  { %4140 = vmatprep.subr.bf16.mxu0 %v9885_v40  ;;  %4226 = vmatprep.subr.bf16.mxu1 %v9887_v41  ;;  %v727_v39 = vld [vmem:[#allocation2 + $0x370] sm:$0xff]  ;;  %v716_v40 = vld [vmem:[#allocation2 + $0x318] sm:$0xff] }
  0x65   :  { %v728_v41 = vld [vmem:[#allocation2 + $0x378] sm:$0xff]  ;;  %v9505_v44 = vcombine.high %v715_v38, %v727_v39 }
  0x66   :  { %v9506_v50 = vcombine.low %v716_v40, %v728_v41 }
  0x67   :  { %4141 = vmatpush1.bf16.msra.mxu0 %v9884_v46  ;;  %4227 = vmatpush1.bf16.msra.mxu1 %v9886_v47  ;;  %v751_v46 = vld [vmem:[#allocation2 + $0x430] sm:$0xff]  ;;  %v740_v47 = vld [vmem:[#allocation2 + $0x3d8] sm:$0xff] }
  0x68   :  { %4142 = vmatprep.subr.bf16.mxu0 %v9909_v48  ;;  %4228 = vmatprep.subr.bf16.mxu1 %v9911_v49  ;;  %v752_v48 = vld [vmem:[#allocation2 + $0x438] sm:$0xff]  ;;  %v9504_v49 = vcombine.low %v715_v38, %v727_v39  ;;  %v9529_v51 = vcombine.high %v739_v45, %v751_v46 }
  0x69   :  { %v9531_v52 = vcombine.high %v740_v47, %v752_v48  ;;  %v9530_v59 = vcombine.low %v740_v47, %v752_v48  ;;  %v931_v48 = vld [vmem:[#allocation2 + $0x9d0] sm:$0xff] }
  0x6b   :  { %4143 = vmatpush1.bf16.msra.mxu0 %v9908_v54  ;;  %4229 = vmatpush1.bf16.msra.mxu1 %v9910_v55  ;;  %v775_v54 = vld [vmem:[#allocation2 + $0x4f0] sm:$0xff]  ;;  %v764_v55 = vld [vmem:[#allocation2 + $0x498] sm:$0xff] }
  0x6c   :  { %4144 = vmatprep.subr.bf16.mxu0 %v9933_v57  ;;  %4230 = vmatprep.subr.bf16.mxu1 %v9935_v58  ;;  %v776_v57 = vld [vmem:[#allocation2 + $0x4f8] sm:$0xff]  ;;  %v9528_v58 = vcombine.low %v739_v45, %v751_v46  ;;  %v9553_v60 = vcombine.high %v763_v53, %v775_v54 }
  0x6d   :  { %v9555_v61 = vcombine.high %v764_v55, %v776_v57  ;;  %v9554_v3 = vcombine.low %v764_v55, %v776_v57  ;;  %v955_v57 = vld [vmem:[#allocation2 + $0xa90] sm:$0xff] }
  0x6f   :  { %4145 = vmatpush1.bf16.msra.mxu0 %v9932_v63  ;;  %4231 = vmatpush1.bf16.msra.mxu1 %v9934_v0  ;;  %v799_v63 = vld [vmem:[#allocation2 + $0x5b0] sm:$0xff]  ;;  %v788_v0 = vld [vmem:[#allocation2 + $0x558] sm:$0xff] }
  0x70   :  { %4146 = vmatprep.subr.bf16.mxu0 %v9957_v1  ;;  %4232 = vmatprep.subr.bf16.mxu1 %v9959_v2  ;;  %v800_v1 = vld [vmem:[#allocation2 + $0x5b8] sm:$0xff]  ;;  %v9552_v2 = vcombine.low %v763_v53, %v775_v54  ;;  %v9577_v4 = vcombine.high %v787_v62, %v799_v63 }
  0x71   :  { %v9579_v5 = vcombine.high %v788_v0, %v800_v1  ;;  %v9578_v12 = vcombine.low %v788_v0, %v800_v1  ;;  %v979_v1 = vld [vmem:[#allocation2 + $0xb50] sm:$0xff] }
  0x73   :  { %4147 = vmatpush1.bf16.msra.mxu0 %v9956_v7  ;;  %4233 = vmatpush1.bf16.msra.mxu1 %v9958_v8  ;;  %v823_v7 = vld [vmem:[#allocation2 + $0x670] sm:$0xff]  ;;  %v812_v8 = vld [vmem:[#allocation2 + $0x618] sm:$0xff] }
  0x74   :  { %4261 = vmatprep.subr.bf16.mxu0 %v9409_v9  ;;  %4347 = vmatprep.subr.bf16.mxu1 %v9411_v11  ;;  %v824_v9 = vld [vmem:[#allocation2 + $0x678] sm:$0xff]  ;;  %v9576_v11 = vcombine.low %v787_v62, %v799_v63  ;;  %v9601_v13 = vcombine.high %v811_v6, %v823_v7 }
  0x75   :  { %v9603_v15 = vcombine.high %v812_v8, %v824_v9  ;;  %v9602_v21 = vcombine.low %v812_v8, %v824_v9  ;;  %v1003_v9 = vld [vmem:[#allocation2 + $0xc10] sm:$0xff] }
  0x76   :  { %4165 = vmatmul.mubr.bf16.vlgmr.msra.gmra.mrb[0].mxu0 %v10871_v14  ;;  %4251 = vmatmul.mubr.bf16.vlgmr.msra.gmra.mrb[0].mxu1 %v10871_v14 }
  0x77   :  { %4262 = vmatpush1.bf16.msra.mxu0 %v9408_v17  ;;  %4348 = vmatpush1.bf16.msra.mxu1 %v9410_v18  ;;  %v847_v17 = vld [vmem:[#allocation2 + $0x730] sm:$0xff]  ;;  %v836_v18 = vld [vmem:[#allocation2 + $0x6d8] sm:$0xff] }
  0x78   :  { %4263 = vmatprep.subr.bf16.mxu0 %v9433_v19  ;;  %4349 = vmatprep.subr.bf16.mxu1 %v9435_v20  ;;  %v848_v19 = vld [vmem:[#allocation2 + $0x738] sm:$0xff]  ;;  %v9600_v20 = vcombine.low %v811_v6, %v823_v7  ;;  %v9625_v22 = vcombine.high %v835_v16, %v847_v17 }
  0x79   :  { %4293 = vmatprep.mubr.bf16.mxu0 %v10855_v56  ;;  %4379 = vmatprep.mubr.bf16.mxu1 %v10855_v56  ;;  %v9507_v56 = vcombine.high %v716_v40, %v728_v41  ;;  %v9627_v23 = vcombine.high %v836_v18, %v848_v19  ;;  %v9626_v30 = vcombine.low %v836_v18, %v848_v19  ;;  %v907_v41 = vld [vmem:[#allocation2 + $0x910] sm:$0xff] }
  0x7a   :  { %v1027_v19 = vld [vmem:[#allocation2 + $0xcd0] sm:$0xff] }
  0x7b   :  { %4264 = vmatpush1.bf16.msra.mxu0 %v9432_v25  ;;  %4350 = vmatpush1.bf16.msra.mxu1 %v9434_v26  ;;  %v871_v25 = vld [vmem:[#allocation2 + $0x7f0] sm:$0xff]  ;;  %v860_v26 = vld [vmem:[#allocation2 + $0x798] sm:$0xff] }
  0x7c   :  { %4265 = vmatprep.subr.bf16.mxu0 %v9457_v28  ;;  %4351 = vmatprep.subr.bf16.mxu1 %v9459_v29  ;;  %v872_v28 = vld [vmem:[#allocation2 + $0x7f8] sm:$0xff]  ;;  %v9624_v29 = vcombine.low %v835_v16, %v847_v17  ;;  %v9649_v31 = vcombine.high %v859_v24, %v871_v25 }
  0x7d   :  { %v9651_v32 = vcombine.high %v860_v26, %v872_v28  ;;  %v9650_v38 = vcombine.low %v860_v26, %v872_v28  ;;  %v1051_v28 = vld [vmem:[#allocation2 + $0xd90] sm:$0xff] }
  0x7f   :  { %4266 = vmatpush1.bf16.msra.mxu0 %v9456_v34  ;;  %4352 = vmatpush1.bf16.msra.mxu1 %v9458_v35  ;;  %v895_v34 = vld [vmem:[#allocation2 + $0x8b0] sm:$0xff]  ;;  %v884_v35 = vld [vmem:[#allocation2 + $0x858] sm:$0xff] }
  0x80   :  { %4267 = vmatprep.subr.bf16.mxu0 %v9481_v36  ;;  %4353 = vmatprep.subr.bf16.mxu1 %v9483_v37  ;;  %v896_v36 = vld [vmem:[#allocation2 + $0x8b8] sm:$0xff]  ;;  %v9648_v37 = vcombine.low %v859_v24, %v871_v25  ;;  %v9673_v39 = vcombine.high %v883_v33, %v895_v34 }
  0x81   :  { %v9675_v40 = vcombine.high %v884_v35, %v896_v36  ;;  %v9674_v45 = vcombine.low %v884_v35, %v896_v36  ;;  %v1075_v36 = vld [vmem:[#allocation2 + $0xe50] sm:$0xff] }
  0x83   :  { %4268 = vmatpush1.bf16.msra.mxu0 %v9480_v42  ;;  %4354 = vmatpush1.bf16.msra.mxu1 %v9482_v43  ;;  %v919_v42 = vld [vmem:[#allocation2 + $0x970] sm:$0xff]  ;;  %v908_v43 = vld [vmem:[#allocation2 + $0x918] sm:$0xff] }
  0x84   :  { %4269 = vmatprep.subr.bf16.mxu0 %v9505_v44  ;;  %4355 = vmatprep.subr.bf16.mxu1 %v9507_v56  ;;  %v920_v44 = vld [vmem:[#allocation2 + $0x978] sm:$0xff]  ;;  %v9672_v56 = vcombine.low %v883_v33, %v895_v34  ;;  %v9697_v46 = vcombine.high %v907_v41, %v919_v42 }
  0x85   :  { %v9699_v47 = vcombine.high %v908_v43, %v920_v44  ;;  %v9698_v53 = vcombine.low %v908_v43, %v920_v44  ;;  %v1099_v43 = vld [vmem:[#allocation2 + $0xf10] sm:$0xff] }
  0x86   :  { %v1111_v44 = vld [vmem:[#allocation2 + $0xf70] sm:$0xff] }
  0x87   :  { %4270 = vmatpush1.bf16.msra.mxu0 %v9504_v49  ;;  %4356 = vmatpush1.bf16.msra.mxu1 %v9506_v50  ;;  %v943_v49 = vld [vmem:[#allocation2 + $0xa30] sm:$0xff]  ;;  %v932_v50 = vld [vmem:[#allocation2 + $0x9d8] sm:$0xff] }
  0x88   :  { %4271 = vmatprep.subr.bf16.mxu0 %v9529_v51  ;;  %4357 = vmatprep.subr.bf16.mxu1 %v9531_v52  ;;  %v944_v51 = vld [vmem:[#allocation2 + $0xa38] sm:$0xff]  ;;  %v9696_v52 = vcombine.low %v907_v41, %v919_v42  ;;  %v9721_v54 = vcombine.high %v931_v48, %v943_v49 }
  0x89   :  { %v9723_v55 = vcombine.high %v932_v50, %v944_v51  ;;  %v9722_v62 = vcombine.low %v932_v50, %v944_v51  ;;  %v1123_v50 = vld [vmem:[#allocation2 + $0xfd0] sm:$0xff] }
  0x8a   :  { %v1135_v51 = vld [vmem:[#allocation2 + $0x1030] sm:$0xff] }
  0x8b   :  { %4272 = vmatpush1.bf16.msra.mxu0 %v9528_v58  ;;  %4358 = vmatpush1.bf16.msra.mxu1 %v9530_v59  ;;  %v967_v58 = vld [vmem:[#allocation2 + $0xaf0] sm:$0xff]  ;;  %v956_v59 = vld [vmem:[#allocation2 + $0xa98] sm:$0xff] }
  0x8c   :  { %4273 = vmatprep.subr.bf16.mxu0 %v9553_v60  ;;  %4359 = vmatprep.subr.bf16.mxu1 %v9555_v61  ;;  %v968_v60 = vld [vmem:[#allocation2 + $0xaf8] sm:$0xff]  ;;  %v9720_v61 = vcombine.low %v931_v48, %v943_v49  ;;  %v9745_v63 = vcombine.high %v955_v57, %v967_v58  ;;  %v9889_v48 = vcombine.high %v1099_v43, %v1111_v44 }
  0x8d   :  { %v9747_v0 = vcombine.high %v956_v59, %v968_v60  ;;  %v9746_v6 = vcombine.low %v956_v59, %v968_v60  ;;  %v1147_v59 = vld [vmem:[#allocation2 + $0x1090] sm:$0xff] }
  0x8e   :  { %v1159_v60 = vld [vmem:[#allocation2 + $0x10f0] sm:$0xff] }
  0x8f   :  { %4274 = vmatpush1.bf16.msra.mxu0 %v9552_v2  ;;  %4360 = vmatpush1.bf16.msra.mxu1 %v9554_v3  ;;  %v991_v2 = vld [vmem:[#allocation2 + $0xbb0] sm:$0xff]  ;;  %v980_v3 = vld [vmem:[#allocation2 + $0xb58] sm:$0xff] }
  0x90   :  { %4275 = vmatprep.subr.bf16.mxu0 %v9577_v4  ;;  %4361 = vmatprep.subr.bf16.mxu1 %v9579_v5  ;;  %v992_v4 = vld [vmem:[#allocation2 + $0xbb8] sm:$0xff]  ;;  %v9744_v5 = vcombine.low %v955_v57, %v967_v58  ;;  %v9769_v7 = vcombine.high %v979_v1, %v991_v2  ;;  %v9913_v57 = vcombine.high %v1123_v50, %v1135_v51 }
  0x91   :  { %v9771_v8 = vcombine.high %v980_v3, %v992_v4  ;;  %v9770_v16 = vcombine.low %v980_v3, %v992_v4  ;;  %v1171_v3 = vld [vmem:[#allocation2 + $0x1150] sm:$0xff] }
  0x92   :  { %v1183_v4 = vld [vmem:[#allocation2 + $0x11b0] sm:$0xff] }
  0x93   :  { %4276 = vmatpush1.bf16.msra.mxu0 %v9576_v11  ;;  %4362 = vmatpush1.bf16.msra.mxu1 %v9578_v12  ;;  %v1015_v11 = vld [vmem:[#allocation2 + $0xc70] sm:$0xff]  ;;  %v1004_v12 = vld [vmem:[#allocation2 + $0xc18] sm:$0xff] }
  0x94   :  { %4277 = vmatprep.subr.bf16.mxu0 %v9601_v13  ;;  %4363 = vmatprep.subr.bf16.mxu1 %v9603_v15  ;;  %v1016_v13 = vld [vmem:[#allocation2 + $0xc78] sm:$0xff]  ;;  %v9768_v15 = vcombine.low %v979_v1, %v991_v2  ;;  %v9793_v17 = vcombine.high %v1003_v9, %v1015_v11  ;;  %v9937_v1 = vcombine.high %v1147_v59, %v1159_v60 }
  0x95   :  { %v9795_v18 = vcombine.high %v1004_v12, %v1016_v13  ;;  %v9794_v24 = vcombine.low %v1004_v12, %v1016_v13  ;;  %v621_v12 = vld [vmem:[#allocation2 + $0x20] sm:$0xff] }
  0x96   :  { %v633_v13 = vld [vmem:[#allocation2 + $0x80] sm:$0xff] }
  0x97   :  { %4278 = vmatpush1.bf16.msra.mxu0 %v9600_v20  ;;  %4364 = vmatpush1.bf16.msra.mxu1 %v9602_v21  ;;  %v1039_v20 = vld [vmem:[#allocation2 + $0xd30] sm:$0xff]  ;;  %v1028_v21 = vld [vmem:[#allocation2 + $0xcd8] sm:$0xff] }
  0x98   :  { %4279 = vmatprep.subr.bf16.mxu0 %v9625_v22  ;;  %4365 = vmatprep.subr.bf16.mxu1 %v9627_v23  ;;  %v1040_v22 = vld [vmem:[#allocation2 + $0xd38] sm:$0xff]  ;;  %v9792_v23 = vcombine.low %v1003_v9, %v1015_v11  ;;  %v9817_v25 = vcombine.high %v1027_v19, %v1039_v20  ;;  %v9961_v9 = vcombine.high %v1171_v3, %v1183_v4 }
  0x99   :  { %v9819_v26 = vcombine.high %v1028_v21, %v1040_v22  ;;  %v9818_v33 = vcombine.low %v1028_v21, %v1040_v22  ;;  %v645_v21 = vld [vmem:[#allocation2 + $0xe0] sm:$0xff] }
  0x9a   :  { %v657_v22 = vld [vmem:[#allocation2 + $0x140] sm:$0xff] }
  0x9b   :  { %4280 = vmatpush1.bf16.msra.mxu0 %v9624_v29  ;;  %4366 = vmatpush1.bf16.msra.mxu1 %v9626_v30  ;;  %v1063_v29 = vld [vmem:[#allocation2 + $0xdf0] sm:$0xff]  ;;  %v1052_v30 = vld [vmem:[#allocation2 + $0xd98] sm:$0xff] }
  0x9c   :  { %4281 = vmatprep.subr.bf16.mxu0 %v9649_v31  ;;  %4367 = vmatprep.subr.bf16.mxu1 %v9651_v32  ;;  %v1064_v31 = vld [vmem:[#allocation2 + $0xdf8] sm:$0xff]  ;;  %v9816_v32 = vcombine.low %v1027_v19, %v1039_v20  ;;  %v9841_v34 = vcombine.high %v1051_v28, %v1063_v29  ;;  %v9413_v19 = vcombine.high %v621_v12, %v633_v13 }
  0x9d   :  { %v9843_v35 = vcombine.high %v1052_v30, %v1064_v31 }
  0x9f   :  { %4282 = vmatpush1.bf16.msra.mxu0 %v9648_v37  ;;  %4368 = vmatpush1.bf16.msra.mxu1 %v9650_v38  ;;  %v1087_v37 = vld [vmem:[#allocation2 + $0xeb0] sm:$0xff]  ;;  %v1076_v38 = vld [vmem:[#allocation2 + $0xe58] sm:$0xff] }
  0xa0   :  { %4283 = vmatprep.subr.bf16.mxu0 %v9673_v39  ;;  %4369 = vmatprep.subr.bf16.mxu1 %v9675_v40  ;;  %v1088_v39 = vld [vmem:[#allocation2 + $0xeb8] sm:$0xff]  ;;  %v9840_v40 = vcombine.low %v1051_v28, %v1063_v29  ;;  %v9865_v41 = vcombine.high %v1075_v36, %v1087_v37  ;;  %v9437_v28 = vcombine.high %v645_v21, %v657_v22 }
  0xa1   :  { %v9867_v42 = vcombine.high %v1076_v38, %v1088_v39 }
  0xa3   :  { %4284 = vmatpush1.bf16.msra.mxu0 %v9672_v56  ;;  %4370 = vmatpush1.bf16.msra.mxu1 %v9674_v45  ;;  %v1100_v56 = vld [vmem:[#allocation2 + $0xf18] sm:$0xff] }
  0xa4   :  { %4285 = vmatprep.subr.bf16.mxu0 %v9697_v46  ;;  %4371 = vmatprep.subr.bf16.mxu1 %v9699_v47  ;;  %v1112_v45 = vld [vmem:[#allocation2 + $0xf78] sm:$0xff]  ;;  %v9864_v46 = vcombine.low %v1075_v36, %v1087_v37  ;;  %v9866_v47 = vcombine.low %v1076_v38, %v1088_v39  ;;  %v693_v38 = vld [vmem:[#allocation2 + $0x260] sm:$0xff] }
  0xa5   :  { %v9891_v49 = vcombine.high %v1100_v56, %v1112_v45  ;;  %v705_v39 = vld [vmem:[#allocation2 + $0x2c0] sm:$0xff] }
  0xa7   :  { %4286 = vmatpush1.bf16.msra.mxu0 %v9696_v52  ;;  %4372 = vmatpush1.bf16.msra.mxu1 %v9698_v53  ;;  %v1124_v52 = vld [vmem:[#allocation2 + $0xfd8] sm:$0xff] }
  0xa8   :  { %4287 = vmatprep.subr.bf16.mxu0 %v9721_v54  ;;  %4373 = vmatprep.subr.bf16.mxu1 %v9723_v55  ;;  %v1136_v53 = vld [vmem:[#allocation2 + $0x1038] sm:$0xff]  ;;  %v9888_v54 = vcombine.low %v1099_v43, %v1111_v44  ;;  %v9890_v55 = vcombine.low %v1100_v56, %v1112_v45  ;;  %v9485_v43 = vcombine.high %v693_v38, %v705_v39  ;;  %v717_v56 = vld [vmem:[#allocation2 + $0x320] sm:$0xff] }
  0xa9   :  { %v9915_v58 = vcombine.high %v1124_v52, %v1136_v53  ;;  %v729_v45 = vld [vmem:[#allocation2 + $0x380] sm:$0xff] }
  0xab   :  { %4288 = vmatpush1.bf16.msra.mxu0 %v9720_v61  ;;  %4374 = vmatpush1.bf16.msra.mxu1 %v9722_v62  ;;  %v1148_v61 = vld [vmem:[#allocation2 + $0x1098] sm:$0xff] }
  0xac   :  { %4289 = vmatprep.subr.bf16.mxu0 %v9745_v63  ;;  %4375 = vmatprep.subr.bf16.mxu1 %v9747_v0  ;;  %v1160_v62 = vld [vmem:[#allocation2 + $0x10f8] sm:$0xff]  ;;  %v9912_v63 = vcombine.low %v1123_v50, %v1135_v51  ;;  %v9914_v0 = vcombine.low %v1124_v52, %v1136_v53  ;;  %v9509_v50 = vcombine.high %v717_v56, %v729_v45  ;;  %v741_v52 = vld [vmem:[#allocation2 + $0x3e0] sm:$0xff] }
  0xad   :  { %v9939_v2 = vcombine.high %v1148_v61, %v1160_v62  ;;  %v753_v53 = vld [vmem:[#allocation2 + $0x440] sm:$0xff] }
  0xaf   :  { %4290 = vmatpush1.bf16.msra.mxu0 %v9744_v5  ;;  %4376 = vmatpush1.bf16.msra.mxu1 %v9746_v6  ;;  %v1172_v5 = vld [vmem:[#allocation2 + $0x1158] sm:$0xff] }
  0xb0   :  { %4291 = vmatprep.subr.bf16.mxu0 %v9769_v7  ;;  %4377 = vmatprep.subr.bf16.mxu1 %v9771_v8  ;;  %v1184_v6 = vld [vmem:[#allocation2 + $0x11b8] sm:$0xff]  ;;  %v9936_v7 = vcombine.low %v1147_v59, %v1159_v60  ;;  %v9938_v8 = vcombine.low %v1148_v61, %v1160_v62  ;;  %v9533_v59 = vcombine.high %v741_v52, %v753_v53  ;;  %v765_v61 = vld [vmem:[#allocation2 + $0x4a0] sm:$0xff] }
  0xb1   :  { %v9963_v11 = vcombine.high %v1172_v5, %v1184_v6  ;;  %v777_v62 = vld [vmem:[#allocation2 + $0x500] sm:$0xff] }
  0xb3   :  { %4292 = vmatpush1.bf16.msra.mxu0 %v9768_v15  ;;  %4378 = vmatpush1.bf16.msra.mxu1 %v9770_v16  ;;  %v622_v15 = vld [vmem:[#allocation2 + $0x28] sm:$0xff] }
  0xb4   :  { %4304 = vmatprep.subr.bf16.mxu0 %v9793_v17  ;;  %4390 = vmatprep.subr.bf16.mxu1 %v9795_v18  ;;  %v634_v16 = vld [vmem:[#allocation2 + $0x88] sm:$0xff]  ;;  %v9960_v17 = vcombine.low %v1171_v3, %v1183_v4  ;;  %v9962_v18 = vcombine.low %v1172_v5, %v1184_v6  ;;  %v9557_v3 = vcombine.high %v765_v61, %v777_v62  ;;  %v789_v5 = vld [vmem:[#allocation2 + $0x560] sm:$0xff] }
  0xb5   :  { %v9415_v20 = vcombine.high %v622_v15, %v634_v16  ;;  %v801_v6 = vld [vmem:[#allocation2 + $0x5c0] sm:$0xff] }
  0xb6   :  { %4294 = vmatmul.mubr.bf16.vlgmr.msra.gmra.mrb[4].mxu0 %v10862_v10  ;;  %4380 = vmatmul.mubr.bf16.vlgmr.msra.gmra.mrb[4].mxu1 %v10862_v10  ;;  %v9842_v10 = vcombine.low %v1052_v30, %v1064_v31  ;;  %v669_v30 = vld [vmem:[#allocation2 + $0x1a0] sm:$0xff] }
  0xb7   :  { %4305 = vmatpush1.bf16.msra.mxu0 %v9792_v23  ;;  %4391 = vmatpush1.bf16.msra.mxu1 %v9794_v24  ;;  %v646_v23 = vld [vmem:[#allocation2 + $0xe8] sm:$0xff]  ;;  %v681_v31 = vld [vmem:[#allocation2 + $0x200] sm:$0xff] }
  0xb8   :  { %4306 = vmatprep.subr.bf16.mxu0 %v9817_v25  ;;  %4392 = vmatprep.subr.bf16.mxu1 %v9819_v26  ;;  %v658_v24 = vld [vmem:[#allocation2 + $0x148] sm:$0xff]  ;;  %v9412_v25 = vcombine.low %v621_v12, %v633_v13  ;;  %v9414_v26 = vcombine.low %v622_v15, %v634_v16  ;;  %v9461_v36 = vcombine.high %v669_v30, %v681_v31  ;;  %v813_v15 = vld [vmem:[#allocation2 + $0x620] sm:$0xff] }
  0xb9   :  { %4336 = vmatprep.mubr.bf16.mxu0 %v10814_v27  ;;  %4422 = vmatprep.mubr.bf16.mxu1 %v10814_v27  ;;  %v9439_v29 = vcombine.high %v646_v23, %v658_v24  ;;  %v9581_v12 = vcombine.high %v789_v5, %v801_v6  ;;  %v825_v16 = vld [vmem:[#allocation2 + $0x680] sm:$0xff] }
  0xbb   :  { %4307 = vmatpush1.bf16.msra.mxu0 %v9816_v32  ;;  %4393 = vmatpush1.bf16.msra.mxu1 %v9818_v33  ;;  %v670_v32 = vld [vmem:[#allocation2 + $0x1a8] sm:$0xff] }
  0xbc   :  { %4308 = vmatprep.subr.bf16.mxu0 %v9841_v34  ;;  %4394 = vmatprep.subr.bf16.mxu1 %v9843_v35  ;;  %v682_v33 = vld [vmem:[#allocation2 + $0x208] sm:$0xff]  ;;  %v9436_v34 = vcombine.low %v645_v21, %v657_v22  ;;  %v9438_v35 = vcombine.low %v646_v23, %v658_v24  ;;  %v9605_v21 = vcombine.high %v813_v15, %v825_v16  ;;  %v837_v23 = vld [vmem:[#allocation2 + $0x6e0] sm:$0xff] }
  0xbd   :  { %v9463_v37 = vcombine.high %v670_v32, %v682_v33  ;;  %v849_v24 = vld [vmem:[#allocation2 + $0x740] sm:$0xff] }
  0xbf   :  { %4309 = vmatpush1.bf16.msra.mxu0 %v9840_v40  ;;  %4395 = vmatpush1.bf16.msra.mxu1 %v9842_v10  ;;  %v10886_v40 = vld [vmem:[%s12917_s0 + $0x1c] ss:$12 sps:$4 sm:$0xff]  }
  0xc0   :  { %4310 = vmatprep.subr.bf16.mxu0 %v9865_v41  ;;  %4396 = vmatprep.subr.bf16.mxu1 %v9867_v42  ;;  %v694_v10 = vld [vmem:[#allocation2 + $0x268] sm:$0xff]  ;;  %v9462_v42 = vcombine.low %v670_v32, %v682_v33  ;;  %v861_v32 = vld [vmem:[#allocation2 + $0x7a0] sm:$0xff] }
  0xc1   :  { %v706_v41 = vld [vmem:[#allocation2 + $0x2c8] sm:$0xff]  ;;  %v873_v33 = vld [vmem:[#allocation2 + $0x800] sm:$0xff] }
  0xc2   :  { %v9487_v44 = vcombine.high %v694_v10, %v706_v41 }
  0xc3   :  { %4311 = vmatpush1.bf16.msra.mxu0 %v9864_v46  ;;  %4397 = vmatpush1.bf16.msra.mxu1 %v9866_v47  ;;  %v718_v46 = vld [vmem:[#allocation2 + $0x328] sm:$0xff] }
  0xc4   :  { %4312 = vmatprep.subr.bf16.mxu0 %v9889_v48  ;;  %4398 = vmatprep.subr.bf16.mxu1 %v9891_v49  ;;  %v730_v47 = vld [vmem:[#allocation2 + $0x388] sm:$0xff]  ;;  %v9484_v48 = vcombine.low %v693_v38, %v705_v39  ;;  %v9486_v49 = vcombine.low %v694_v10, %v706_v41  ;;  %v9653_v38 = vcombine.high %v861_v32, %v873_v33  ;;  %v885_v10 = vld [vmem:[#allocation2 + $0x860] sm:$0xff] }
  0xc5   :  { %v9511_v51 = vcombine.high %v718_v46, %v730_v47  ;;  %v897_v41 = vld [vmem:[#allocation2 + $0x8c0] sm:$0xff] }
  0xc7   :  { %4313 = vmatpush1.bf16.msra.mxu0 %v9888_v54  ;;  %4399 = vmatpush1.bf16.msra.mxu1 %v9890_v55  ;;  %v742_v54 = vld [vmem:[#allocation2 + $0x3e8] sm:$0xff] }
  0xc8   :  { %4314 = vmatprep.subr.bf16.mxu0 %v9913_v57  ;;  %4400 = vmatprep.subr.bf16.mxu1 %v9915_v58  ;;  %v754_v55 = vld [vmem:[#allocation2 + $0x448] sm:$0xff]  ;;  %v9508_v57 = vcombine.low %v717_v56, %v729_v45  ;;  %v9510_v58 = vcombine.low %v718_v46, %v730_v47  ;;  %v9677_v56 = vcombine.high %v885_v10, %v897_v41  ;;  %v909_v46 = vld [vmem:[#allocation2 + $0x920] sm:$0xff] }
  0xc9   :  { %v9535_v60 = vcombine.high %v742_v54, %v754_v55  ;;  %v921_v47 = vld [vmem:[#allocation2 + $0x980] sm:$0xff] }
  0xcb   :  { %4315 = vmatpush1.bf16.msra.mxu0 %v9912_v63  ;;  %4401 = vmatpush1.bf16.msra.mxu1 %v9914_v0  ;;  %v766_v63 = vld [vmem:[#allocation2 + $0x4a8] sm:$0xff] }
  0xcc   :  { %4316 = vmatprep.subr.bf16.mxu0 %v9937_v1  ;;  %4402 = vmatprep.subr.bf16.mxu1 %v9939_v2  ;;  %v778_v0 = vld [vmem:[#allocation2 + $0x508] sm:$0xff]  ;;  %v9532_v1 = vcombine.low %v741_v52, %v753_v53  ;;  %v9534_v2 = vcombine.low %v742_v54, %v754_v55  ;;  %v9701_v52 = vcombine.high %v909_v46, %v921_v47  ;;  %v933_v54 = vld [vmem:[#allocation2 + $0x9e0] sm:$0xff] }
  0xcd   :  { %v9559_v4 = vcombine.high %v766_v63, %v778_v0  ;;  %v945_v55 = vld [vmem:[#allocation2 + $0xa40] sm:$0xff] }
  0xcf   :  { %4317 = vmatpush1.bf16.msra.mxu0 %v9936_v7  ;;  %4403 = vmatpush1.bf16.msra.mxu1 %v9938_v8  ;;  %v790_v7 = vld [vmem:[#allocation2 + $0x568] sm:$0xff] }
  0xd0   :  { %4318 = vmatprep.subr.bf16.mxu0 %v9961_v9  ;;  %4404 = vmatprep.subr.bf16.mxu1 %v9963_v11  ;;  %v802_v8 = vld [vmem:[#allocation2 + $0x5c8] sm:$0xff]  ;;  %v9556_v9 = vcombine.low %v765_v61, %v777_v62  ;;  %v9558_v11 = vcombine.low %v766_v63, %v778_v0  ;;  %v9725_v61 = vcombine.high %v933_v54, %v945_v55  ;;  %v957_v63 = vld [vmem:[#allocation2 + $0xaa0] sm:$0xff] }
  0xd1   :  { %v9583_v13 = vcombine.high %v790_v7, %v802_v8  ;;  %v969_v0 = vld [vmem:[#allocation2 + $0xb00] sm:$0xff] }
  0xd3   :  { %4319 = vmatpush1.bf16.msra.mxu0 %v9960_v17  ;;  %4405 = vmatpush1.bf16.msra.mxu1 %v9962_v18  ;;  %v814_v17 = vld [vmem:[#allocation2 + $0x628] sm:$0xff] }
  0xd4   :  { %4433 = vmatprep.subr.bf16.mxu0 %v9413_v19  ;;  %4519 = vmatprep.subr.bf16.mxu1 %v9415_v20  ;;  %v826_v18 = vld [vmem:[#allocation2 + $0x688] sm:$0xff]  ;;  %v9580_v19 = vcombine.low %v789_v5, %v801_v6  ;;  %v9582_v20 = vcombine.low %v790_v7, %v802_v8  ;;  %v9749_v5 = vcombine.high %v957_v63, %v969_v0  ;;  %v981_v7 = vld [vmem:[#allocation2 + $0xb60] sm:$0xff] }
  0xd5   :  { %v9607_v22 = vcombine.high %v814_v17, %v826_v18  ;;  %v993_v8 = vld [vmem:[#allocation2 + $0xbc0] sm:$0xff] }
  0xd6   :  { %4337 = vmatmul.mubr.bf16.vlgmr.msra.gmra.mrb[4].mxu0 %v10871_v14  ;;  %4423 = vmatmul.mubr.bf16.vlgmr.msra.gmra.mrb[4].mxu1 %v10871_v14  ;;  %v9460_v14 = vcombine.low %v669_v30, %v681_v31  ;;  %v9629_v30 = vcombine.high %v837_v23, %v849_v24 }
  0xd7   :  { %4434 = vmatpush1.bf16.msra.mxu0 %v9412_v25  ;;  %4520 = vmatpush1.bf16.msra.mxu1 %v9414_v26  ;;  %v838_v25 = vld [vmem:[#allocation2 + $0x6e8] sm:$0xff] }
  0xd8   :  { %4435 = vmatprep.subr.bf16.mxu0 %v9437_v28  ;;  %4521 = vmatprep.subr.bf16.mxu1 %v9439_v29  ;;  %v850_v26 = vld [vmem:[#allocation2 + $0x748] sm:$0xff]  ;;  %v9604_v28 = vcombine.low %v813_v15, %v825_v16  ;;  %v9606_v29 = vcombine.low %v814_v17, %v826_v18  ;;  %v9773_v15 = vcombine.high %v981_v7, %v993_v8  ;;  %v1005_v17 = vld [vmem:[#allocation2 + $0xc20] sm:$0xff] }
  0xd9   :  { %4465 = vmatprep.mubr.bf16.mxu0 %v10886_v40  ;;  %4551 = vmatprep.mubr.bf16.mxu1 %v10886_v40  ;;  %v9631_v31 = vcombine.high %v838_v25, %v850_v26  ;;  %v1017_v18 = vld [vmem:[#allocation2 + $0xc80] sm:$0xff] }
  0xdb   :  { %4436 = vmatpush1.bf16.msra.mxu0 %v9436_v34  ;;  %4522 = vmatpush1.bf16.msra.mxu1 %v9438_v35  ;;  %v862_v34 = vld [vmem:[#allocation2 + $0x7a8] sm:$0xff] }
  0xdc   :  { %4437 = vmatprep.subr.bf16.mxu0 %v9461_v36  ;;  %4523 = vmatprep.subr.bf16.mxu1 %v9463_v37  ;;  %v874_v35 = vld [vmem:[#allocation2 + $0x808] sm:$0xff]  ;;  %v9628_v36 = vcombine.low %v837_v23, %v849_v24  ;;  %v9630_v37 = vcombine.low %v838_v25, %v850_v26  ;;  %v9797_v23 = vcombine.high %v1005_v17, %v1017_v18  ;;  %v1029_v25 = vld [vmem:[#allocation2 + $0xce0] sm:$0xff] }
  0xdd   :  { %v9655_v39 = vcombine.high %v862_v34, %v874_v35  ;;  %v1041_v26 = vld [vmem:[#allocation2 + $0xd40] sm:$0xff] }
  0xdf   :  { %4438 = vmatpush1.bf16.msra.mxu0 %v9460_v14  ;;  %4524 = vmatpush1.bf16.msra.mxu1 %v9462_v42  ;;  %v886_v14 = vld [vmem:[#allocation2 + $0x868] sm:$0xff] }
  0xe0   :  { %4439 = vmatprep.subr.bf16.mxu0 %v9485_v43  ;;  %4525 = vmatprep.subr.bf16.mxu1 %v9487_v44  ;;  %v898_v42 = vld [vmem:[#allocation2 + $0x8c8] sm:$0xff]  ;;  %v9652_v43 = vcombine.low %v861_v32, %v873_v33  ;;  %v9654_v44 = vcombine.low %v862_v34, %v874_v35  ;;  %v9821_v32 = vcombine.high %v1029_v25, %v1041_v26  ;;  %v1053_v34 = vld [vmem:[#allocation2 + $0xda0] sm:$0xff] }
  0xe1   :  { %v9679_v45 = vcombine.high %v886_v14, %v898_v42  ;;  %v1065_v35 = vld [vmem:[#allocation2 + $0xe00] sm:$0xff] }
  0xe3   :  { %4440 = vmatpush1.bf16.msra.mxu0 %v9484_v48  ;;  %4526 = vmatpush1.bf16.msra.mxu1 %v9486_v49  ;;  %v910_v48 = vld [vmem:[#allocation2 + $0x928] sm:$0xff] }
  0xe4   :  { %4441 = vmatprep.subr.bf16.mxu0 %v9509_v50  ;;  %4527 = vmatprep.subr.bf16.mxu1 %v9511_v51  ;;  %v922_v49 = vld [vmem:[#allocation2 + $0x988] sm:$0xff]  ;;  %v9676_v50 = vcombine.low %v885_v10, %v897_v41  ;;  %v9678_v51 = vcombine.low %v886_v14, %v898_v42  ;;  %v9845_v41 = vcombine.high %v1053_v34, %v1065_v35  ;;  %v1077_v42 = vld [vmem:[#allocation2 + $0xe60] sm:$0xff] }
  0xe5   :  { %v9703_v53 = vcombine.high %v910_v48, %v922_v49 }
  0xe7   :  { %4442 = vmatpush1.bf16.msra.mxu0 %v9508_v57  ;;  %4528 = vmatpush1.bf16.msra.mxu1 %v9510_v58  ;;  %v934_v57 = vld [vmem:[#allocation2 + $0x9e8] sm:$0xff] }
  0xe8   :  { %4443 = vmatprep.subr.bf16.mxu0 %v9533_v59  ;;  %4529 = vmatprep.subr.bf16.mxu1 %v9535_v60  ;;  %v946_v58 = vld [vmem:[#allocation2 + $0xa48] sm:$0xff]  ;;  %v9700_v59 = vcombine.low %v909_v46, %v921_v47  ;;  %v9702_v60 = vcombine.low %v910_v48, %v922_v49  ;;  %v1101_v49 = vld [vmem:[#allocation2 + $0xf20] sm:$0xff] }
  0xe9   :  { %v9727_v62 = vcombine.high %v934_v57, %v946_v58 }
  0xeb   :  { %4444 = vmatpush1.bf16.msra.mxu0 %v9532_v1  ;;  %4530 = vmatpush1.bf16.msra.mxu1 %v9534_v2  ;;  %v958_v1 = vld [vmem:[#allocation2 + $0xaa8] sm:$0xff] }
  0xec   :  { %4445 = vmatprep.subr.bf16.mxu0 %v9557_v3  ;;  %4531 = vmatprep.subr.bf16.mxu1 %v9559_v4  ;;  %v970_v2 = vld [vmem:[#allocation2 + $0xb08] sm:$0xff]  ;;  %v9724_v3 = vcombine.low %v933_v54, %v945_v55  ;;  %v9726_v4 = vcombine.low %v934_v57, %v946_v58  ;;  %v1125_v58 = vld [vmem:[#allocation2 + $0xfe0] sm:$0xff] }
  0xed   :  { %v9751_v6 = vcombine.high %v958_v1, %v970_v2 }
  0xef   :  { %4446 = vmatpush1.bf16.msra.mxu0 %v9556_v9  ;;  %4532 = vmatpush1.bf16.msra.mxu1 %v9558_v11  ;;  %v982_v9 = vld [vmem:[#allocation2 + $0xb68] sm:$0xff] }
  0xf0   :  { %4447 = vmatprep.subr.bf16.mxu0 %v9581_v12  ;;  %4533 = vmatprep.subr.bf16.mxu1 %v9583_v13  ;;  %v994_v11 = vld [vmem:[#allocation2 + $0xbc8] sm:$0xff]  ;;  %v9748_v12 = vcombine.low %v957_v63, %v969_v0  ;;  %v9750_v13 = vcombine.low %v958_v1, %v970_v2  ;;  %v1149_v2 = vld [vmem:[#allocation2 + $0x10a0] sm:$0xff] }
  0xf1   :  { %v9775_v16 = vcombine.high %v982_v9, %v994_v11 }
  0xf3   :  { %4448 = vmatpush1.bf16.msra.mxu0 %v9580_v19  ;;  %4534 = vmatpush1.bf16.msra.mxu1 %v9582_v20  ;;  %v1006_v19 = vld [vmem:[#allocation2 + $0xc28] sm:$0xff] }
  0xf4   :  { %4449 = vmatprep.subr.bf16.mxu0 %v9605_v21  ;;  %4535 = vmatprep.subr.bf16.mxu1 %v9607_v22  ;;  %v1018_v20 = vld [vmem:[#allocation2 + $0xc88] sm:$0xff]  ;;  %v9772_v21 = vcombine.low %v981_v7, %v993_v8  ;;  %v9774_v22 = vcombine.low %v982_v9, %v994_v11  ;;  %v1173_v11 = vld [vmem:[#allocation2 + $0x1160] sm:$0xff] }
  0xf5   :  { %v9799_v24 = vcombine.high %v1006_v19, %v1018_v20 }
  0xf7   :  { %4450 = vmatpush1.bf16.msra.mxu0 %v9604_v28  ;;  %4536 = vmatpush1.bf16.msra.mxu1 %v9606_v29  ;;  %v1030_v28 = vld [vmem:[#allocation2 + $0xce8] sm:$0xff] }
  0xf8   :  { %4451 = vmatprep.subr.bf16.mxu0 %v9629_v30  ;;  %4537 = vmatprep.subr.bf16.mxu1 %v9631_v31  ;;  %v1042_v29 = vld [vmem:[#allocation2 + $0xd48] sm:$0xff]  ;;  %v9796_v30 = vcombine.low %v1005_v17, %v1017_v18  ;;  %v9798_v31 = vcombine.low %v1006_v19, %v1018_v20  ;;  %v623_v20 = vld [vmem:[#allocation2 + $0x30] sm:$0xff] }
  0xf9   :  { %v9823_v33 = vcombine.high %v1030_v28, %v1042_v29  ;;  %v9822_v10 = vcombine.low %v1030_v28, %v1042_v29  ;;  %v647_v29 = vld [vmem:[#allocation2 + $0xf0] sm:$0xff] }
  0xfb   :  { %4452 = vmatpush1.bf16.msra.mxu0 %v9628_v36  ;;  %4538 = vmatpush1.bf16.msra.mxu1 %v9630_v37  ;;  %v10893_v36 = vld [vmem:[%s12917_s0 + $0x18] ss:$12 sps:$4 sm:$0xff]   ;;  %v1054_v37 = vld [vmem:[#allocation2 + $0xda8] sm:$0xff] }
  0xfc   :  { %4453 = vmatprep.subr.bf16.mxu0 %v9653_v38  ;;  %4539 = vmatprep.subr.bf16.mxu1 %v9655_v39  ;;  %v1066_v38 = vld [vmem:[#allocation2 + $0xe08] sm:$0xff]  ;;  %v9820_v39 = vcombine.low %v1029_v25, %v1041_v26 }
  0xfd   :  { %v9847_v14 = vcombine.high %v1054_v37, %v1066_v38  ;;  %v9846_v46 = vcombine.low %v1054_v37, %v1066_v38  ;;  %v671_v38 = vld [vmem:[#allocation2 + $0x1b0] sm:$0xff] }
  0xff   :  { %4454 = vmatpush1.bf16.msra.mxu0 %v9652_v43  ;;  %4540 = vmatpush1.bf16.msra.mxu1 %v9654_v44  ;;  %v1089_v43 = vld [vmem:[#allocation2 + $0xec0] sm:$0xff]  ;;  %v1078_v44 = vld [vmem:[#allocation2 + $0xe68] sm:$0xff] }
 0x100   :  { %4455 = vmatprep.subr.bf16.mxu0 %v9677_v56  ;;  %4541 = vmatprep.subr.bf16.mxu1 %v9679_v45  ;;  %v1090_v56 = vld [vmem:[#allocation2 + $0xec8] sm:$0xff]  ;;  %v9844_v45 = vcombine.low %v1053_v34, %v1065_v35  ;;  %v9869_v47 = vcombine.high %v1077_v42, %v1089_v43 }
 0x101   :  { %v9871_v48 = vcombine.high %v1078_v44, %v1090_v56  ;;  %v9870_v54 = vcombine.low %v1078_v44, %v1090_v56 }
 0x103   :  { %4456 = vmatpush1.bf16.msra.mxu0 %v9676_v50  ;;  %4542 = vmatpush1.bf16.msra.mxu1 %v9678_v51  ;;  %v1113_v50 = vld [vmem:[#allocation2 + $0xf80] sm:$0xff]  ;;  %v1102_v51 = vld [vmem:[#allocation2 + $0xf28] sm:$0xff] }
 0x104   :  { %4457 = vmatprep.subr.bf16.mxu0 %v9701_v52  ;;  %4543 = vmatprep.subr.bf16.mxu1 %v9703_v53  ;;  %v1114_v52 = vld [vmem:[#allocation2 + $0xf88] sm:$0xff]  ;;  %v9868_v53 = vcombine.low %v1077_v42, %v1089_v43  ;;  %v9893_v55 = vcombine.high %v1101_v49, %v1113_v50 }
 0x105   :  { %v9895_v57 = vcombine.high %v1102_v51, %v1114_v52  ;;  %v9894_v63 = vcombine.low %v1102_v51, %v1114_v52 }
 0x107   :  { %4458 = vmatpush1.bf16.msra.mxu0 %v9700_v59  ;;  %4544 = vmatpush1.bf16.msra.mxu1 %v9702_v60  ;;  %v1137_v59 = vld [vmem:[#allocation2 + $0x1040] sm:$0xff]  ;;  %v1126_v60 = vld [vmem:[#allocation2 + $0xfe8] sm:$0xff] }
 0x108   :  { %4459 = vmatprep.subr.bf16.mxu0 %v9725_v61  ;;  %4545 = vmatprep.subr.bf16.mxu1 %v9727_v62  ;;  %v1138_v61 = vld [vmem:[#allocation2 + $0x1048] sm:$0xff]  ;;  %v9892_v62 = vcombine.low %v1101_v49, %v1113_v50  ;;  %v9917_v0 = vcombine.high %v1125_v58, %v1137_v59 }
 0x109   :  { %v9919_v1 = vcombine.high %v1126_v60, %v1138_v61  ;;  %v9918_v7 = vcombine.low %v1126_v60, %v1138_v61  ;;  %v743_v61 = vld [vmem:[#allocation2 + $0x3f0] sm:$0xff] }
 0x10b   :  { %4460 = vmatpush1.bf16.msra.mxu0 %v9724_v3  ;;  %4546 = vmatpush1.bf16.msra.mxu1 %v9726_v4  ;;  %v1161_v3 = vld [vmem:[#allocation2 + $0x1100] sm:$0xff]  ;;  %v1150_v4 = vld [vmem:[#allocation2 + $0x10a8] sm:$0xff] }
 0x10c   :  { %4461 = vmatprep.subr.bf16.mxu0 %v9749_v5  ;;  %4547 = vmatprep.subr.bf16.mxu1 %v9751_v6  ;;  %v1162_v5 = vld [vmem:[#allocation2 + $0x1108] sm:$0xff]  ;;  %v9916_v6 = vcombine.low %v1125_v58, %v1137_v59  ;;  %v9941_v8 = vcombine.high %v1149_v2, %v1161_v3 }
 0x10d   :  { %v9943_v9 = vcombine.high %v1150_v4, %v1162_v5  ;;  %v9942_v17 = vcombine.low %v1150_v4, %v1162_v5  ;;  %v767_v5 = vld [vmem:[#allocation2 + $0x4b0] sm:$0xff] }
 0x10f   :  { %4462 = vmatpush1.bf16.msra.mxu0 %v9748_v12  ;;  %4548 = vmatpush1.bf16.msra.mxu1 %v9750_v13  ;;  %v1185_v12 = vld [vmem:[#allocation2 + $0x11c0] sm:$0xff]  ;;  %v1174_v13 = vld [vmem:[#allocation2 + $0x1168] sm:$0xff] }
 0x110   :  { %4463 = vmatprep.subr.bf16.mxu0 %v9773_v15  ;;  %4549 = vmatprep.subr.bf16.mxu1 %v9775_v16  ;;  %v1186_v15 = vld [vmem:[#allocation2 + $0x11c8] sm:$0xff]  ;;  %v9940_v16 = vcombine.low %v1149_v2, %v1161_v3  ;;  %v9965_v18 = vcombine.high %v1173_v11, %v1185_v12 }
 0x111   :  { %v9967_v19 = vcombine.high %v1174_v13, %v1186_v15  ;;  %v9966_v25 = vcombine.low %v1174_v13, %v1186_v15  ;;  %v791_v15 = vld [vmem:[#allocation2 + $0x570] sm:$0xff] }
 0x113   :  { %4464 = vmatpush1.bf16.msra.mxu0 %v9772_v21  ;;  %4550 = vmatpush1.bf16.msra.mxu1 %v9774_v22  ;;  %v635_v21 = vld [vmem:[#allocation2 + $0x90] sm:$0xff]  ;;  %v624_v22 = vld [vmem:[#allocation2 + $0x38] sm:$0xff] }
 0x114   :  { %4476 = vmatprep.subr.bf16.mxu0 %v9797_v23  ;;  %4562 = vmatprep.subr.bf16.mxu1 %v9799_v24  ;;  %v636_v23 = vld [vmem:[#allocation2 + $0x98] sm:$0xff]  ;;  %v9964_v24 = vcombine.low %v1173_v11, %v1185_v12  ;;  %v9417_v26 = vcombine.high %v623_v20, %v635_v21 }
 0x115   :  { %v9419_v28 = vcombine.high %v624_v22, %v636_v23  ;;  %v9418_v34 = vcombine.low %v624_v22, %v636_v23  ;;  %v815_v23 = vld [vmem:[#allocation2 + $0x630] sm:$0xff] }
 0x116   :  { %4466 = vmatmul.mubr.bf16.vlgmr.msra.gmra.mrb[8].mxu0 %v10893_v36  ;;  %4552 = vmatmul.mubr.bf16.vlgmr.msra.gmra.mrb[8].mxu1 %v10893_v36 }
 0x117   :  { %4477 = vmatpush1.bf16.msra.mxu0 %v9796_v30  ;;  %4563 = vmatpush1.bf16.msra.mxu1 %v9798_v31  ;;  %v659_v30 = vld [vmem:[#allocation2 + $0x150] sm:$0xff]  ;;  %v648_v31 = vld [vmem:[#allocation2 + $0xf8] sm:$0xff] }
 0x118   :  { %4478 = vmatprep.subr.bf16.mxu0 %v9821_v32  ;;  %4564 = vmatprep.subr.bf16.mxu1 %v9823_v33  ;;  %v660_v32 = vld [vmem:[#allocation2 + $0x158] sm:$0xff]  ;;  %v9416_v33 = vcombine.low %v623_v20, %v635_v21  ;;  %v9441_v35 = vcombine.high %v647_v29, %v659_v30  ;;  %v9440_v42 = vcombine.low %v647_v29, %v659_v30 }
 0x119   :  { %4508 = vmatprep.mubr.bf16.mxu0 %v10814_v27  ;;  %4594 = vmatprep.mubr.bf16.mxu1 %v10814_v27  ;;  %v9443_v37 = vcombine.high %v648_v31, %v660_v32  ;;  %v9442_v43 = vcombine.low %v648_v31, %v660_v32  ;;  %v839_v32 = vld [vmem:[#allocation2 + $0x6f0] sm:$0xff] }
 0x11b   :  { %4479 = vmatpush1.bf16.msra.mxu0 %v9820_v39  ;;  %4565 = vmatpush1.bf16.msra.mxu1 %v9822_v10  ;;  %v683_v39 = vld [vmem:[#allocation2 + $0x210] sm:$0xff]  ;;  %v10902_v10 = vld [vmem:[%s12917_s0 + $0x20] ss:$12 sps:$4 sm:$0xff]  }
 0x11c   :  { %4480 = vmatprep.subr.bf16.mxu0 %v9845_v41  ;;  %4566 = vmatprep.subr.bf16.mxu1 %v9847_v14  ;;  %v672_v41 = vld [vmem:[#allocation2 + $0x1b8] sm:$0xff]  ;;  %v9465_v44 = vcombine.high %v671_v38, %v683_v39  ;;  %v9464_v49 = vcombine.low %v671_v38, %v683_v39 }
 0x11d   :  { %v684_v14 = vld [vmem:[#allocation2 + $0x218] sm:$0xff] }
 0x11e   :  { %v9467_v56 = vcombine.high %v672_v41, %v684_v14  ;;  %v9466_v50 = vcombine.low %v672_v41, %v684_v14  ;;  %v863_v14 = vld [vmem:[#allocation2 + $0x7b0] sm:$0xff] }
 0x11f   :  { %4481 = vmatpush1.bf16.msra.mxu0 %v9844_v45  ;;  %4567 = vmatpush1.bf16.msra.mxu1 %v9846_v46  ;;  %v695_v45 = vld [vmem:[#allocation2 + $0x270] sm:$0xff] }
 0x120   :  { %4482 = vmatprep.subr.bf16.mxu0 %v9869_v47  ;;  %4568 = vmatprep.subr.bf16.mxu1 %v9871_v48  ;;  %v707_v46 = vld [vmem:[#allocation2 + $0x2d0] sm:$0xff]  ;;  %v696_v47 = vld [vmem:[#allocation2 + $0x278] sm:$0xff] }
 0x121   :  { %v708_v48 = vld [vmem:[#allocation2 + $0x2d8] sm:$0xff]  ;;  %v9489_v51 = vcombine.high %v695_v45, %v707_v46  ;;  %v9488_v58 = vcombine.low %v695_v45, %v707_v46 }
 0x122   :  { %v9491_v52 = vcombine.high %v696_v47, %v708_v48  ;;  %v9490_v59 = vcombine.low %v696_v47, %v708_v48  ;;  %v887_v48 = vld [vmem:[#allocation2 + $0x870] sm:$0xff] }
 0x123   :  { %4483 = vmatpush1.bf16.msra.mxu0 %v9868_v53  ;;  %4569 = vmatpush1.bf16.msra.mxu1 %v9870_v54  ;;  %v719_v53 = vld [vmem:[#allocation2 + $0x330] sm:$0xff] }
 0x124   :  { %4484 = vmatprep.subr.bf16.mxu0 %v9893_v55  ;;  %4570 = vmatprep.subr.bf16.mxu1 %v9895_v57  ;;  %v731_v54 = vld [vmem:[#allocation2 + $0x390] sm:$0xff]  ;;  %v720_v55 = vld [vmem:[#allocation2 + $0x338] sm:$0xff] }
 0x125   :  { %v732_v57 = vld [vmem:[#allocation2 + $0x398] sm:$0xff]  ;;  %v9513_v60 = vcombine.high %v719_v53, %v731_v54 }
 0x126   :  { %v9514_v2 = vcombine.low %v720_v55, %v732_v57 }
 0x127   :  { %4485 = vmatpush1.bf16.msra.mxu0 %v9892_v62  ;;  %4571 = vmatpush1.bf16.msra.mxu1 %v9894_v63  ;;  %v755_v62 = vld [vmem:[#allocation2 + $0x450] sm:$0xff]  ;;  %v744_v63 = vld [vmem:[#allocation2 + $0x3f8] sm:$0xff] }
 0x128   :  { %4486 = vmatprep.subr.bf16.mxu0 %v9917_v0  ;;  %4572 = vmatprep.subr.bf16.mxu1 %v9919_v1  ;;  %v756_v0 = vld [vmem:[#allocation2 + $0x458] sm:$0xff]  ;;  %v9512_v1 = vcombine.low %v719_v53, %v731_v54  ;;  %v9537_v3 = vcombine.high %v743_v61, %v755_v62 }
 0x129   :  { %v9539_v4 = vcombine.high %v744_v63, %v756_v0  ;;  %v9538_v11 = vcombine.low %v744_v63, %v756_v0  ;;  %v935_v0 = vld [vmem:[#allocation2 + $0x9f0] sm:$0xff] }
 0x12b   :  { %4487 = vmatpush1.bf16.msra.mxu0 %v9916_v6  ;;  %4573 = vmatpush1.bf16.msra.mxu1 %v9918_v7  ;;  %v779_v6 = vld [vmem:[#allocation2 + $0x510] sm:$0xff]  ;;  %v768_v7 = vld [vmem:[#allocation2 + $0x4b8] sm:$0xff] }
 0x12c   :  { %4488 = vmatprep.subr.bf16.mxu0 %v9941_v8  ;;  %4574 = vmatprep.subr.bf16.mxu1 %v9943_v9  ;;  %v780_v8 = vld [vmem:[#allocation2 + $0x518] sm:$0xff]  ;;  %v9536_v9 = vcombine.low %v743_v61, %v755_v62  ;;  %v9561_v12 = vcombine.high %v767_v5, %v779_v6 }
 0x12d   :  { %v9563_v13 = vcombine.high %v768_v7, %v780_v8  ;;  %v9562_v20 = vcombine.low %v768_v7, %v780_v8  ;;  %v959_v8 = vld [vmem:[#allocation2 + $0xab0] sm:$0xff] }
 0x12f   :  { %4489 = vmatpush1.bf16.msra.mxu0 %v9940_v16  ;;  %4575 = vmatpush1.bf16.msra.mxu1 %v9942_v17  ;;  %v803_v16 = vld [vmem:[#allocation2 + $0x5d0] sm:$0xff]  ;;  %v792_v17 = vld [vmem:[#allocation2 + $0x578] sm:$0xff] }
 0x130   :  { %4490 = vmatprep.subr.bf16.mxu0 %v9965_v18  ;;  %4576 = vmatprep.subr.bf16.mxu1 %v9967_v19  ;;  %v804_v18 = vld [vmem:[#allocation2 + $0x5d8] sm:$0xff]  ;;  %v9560_v19 = vcombine.low %v767_v5, %v779_v6  ;;  %v9585_v21 = vcombine.high %v791_v15, %v803_v16 }
 0x131   :  { %v9587_v22 = vcombine.high %v792_v17, %v804_v18  ;;  %v9586_v29 = vcombine.low %v792_v17, %v804_v18  ;;  %v983_v18 = vld [vmem:[#allocation2 + $0xb70] sm:$0xff] }
 0x133   :  { %4491 = vmatpush1.bf16.msra.mxu0 %v9964_v24  ;;  %4577 = vmatpush1.bf16.msra.mxu1 %v9966_v25  ;;  %v827_v24 = vld [vmem:[#allocation2 + $0x690] sm:$0xff]  ;;  %v816_v25 = vld [vmem:[#allocation2 + $0x638] sm:$0xff] }
 0x134   :  { %4605 = vmatprep.subr.bf16.mxu0 %v9417_v26  ;;  %4691 = vmatprep.subr.bf16.mxu1 %v9419_v28  ;;  %v828_v26 = vld [vmem:[#allocation2 + $0x698] sm:$0xff]  ;;  %v9584_v28 = vcombine.low %v791_v15, %v803_v16  ;;  %v9609_v30 = vcombine.high %v815_v23, %v827_v24 }
 0x135   :  { %v9611_v31 = vcombine.high %v816_v25, %v828_v26  ;;  %v9610_v38 = vcombine.low %v816_v25, %v828_v26  ;;  %v1007_v26 = vld [vmem:[#allocation2 + $0xc30] sm:$0xff] }
 0x136   :  { %4509 = vmatmul.mubr.bf16.vlgmr.msra.gmra.mrb[8].mxu0 %v10902_v10  ;;  %4595 = vmatmul.mubr.bf16.vlgmr.msra.gmra.mrb[8].mxu1 %v10902_v10 }
 0x137   :  { %4606 = vmatpush1.bf16.msra.mxu0 %v9416_v33  ;;  %4692 = vmatpush1.bf16.msra.mxu1 %v9418_v34  ;;  %v851_v33 = vld [vmem:[#allocation2 + $0x750] sm:$0xff]  ;;  %v840_v34 = vld [vmem:[#allocation2 + $0x6f8] sm:$0xff] }
 0x138   :  { %4607 = vmatprep.subr.bf16.mxu0 %v9441_v35  ;;  %4693 = vmatprep.subr.bf16.mxu1 %v9443_v37  ;;  %v852_v35 = vld [vmem:[#allocation2 + $0x758] sm:$0xff]  ;;  %v9608_v37 = vcombine.low %v815_v23, %v827_v24  ;;  %v9633_v39 = vcombine.high %v839_v32, %v851_v33 }
 0x139   :  { %4637 = vmatprep.mubr.bf16.mxu0 %v10886_v40  ;;  %4723 = vmatprep.mubr.bf16.mxu1 %v10886_v40  ;;  %v9515_v40 = vcombine.high %v720_v55, %v732_v57  ;;  %v9635_v41 = vcombine.high %v840_v34, %v852_v35  ;;  %v9634_v45 = vcombine.low %v840_v34, %v852_v35  ;;  %v911_v57 = vld [vmem:[#allocation2 + $0x930] sm:$0xff] }
 0x13a   :  { %v1031_v35 = vld [vmem:[#allocation2 + $0xcf0] sm:$0xff] }
 0x13b   :  { %4608 = vmatpush1.bf16.msra.mxu0 %v9440_v42  ;;  %4694 = vmatpush1.bf16.msra.mxu1 %v9442_v43  ;;  %v875_v42 = vld [vmem:[#allocation2 + $0x810] sm:$0xff]  ;;  %v864_v43 = vld [vmem:[#allocation2 + $0x7b8] sm:$0xff] }
 0x13c   :  { %4609 = vmatprep.subr.bf16.mxu0 %v9465_v44  ;;  %4695 = vmatprep.subr.bf16.mxu1 %v9467_v56  ;;  %v876_v44 = vld [vmem:[#allocation2 + $0x818] sm:$0xff]  ;;  %v9632_v56 = vcombine.low %v839_v32, %v851_v33  ;;  %v9657_v46 = vcombine.high %v863_v14, %v875_v42 }
 0x13d   :  { %v9659_v47 = vcombine.high %v864_v43, %v876_v44  ;;  %v9658_v53 = vcombine.low %v864_v43, %v876_v44  ;;  %v1055_v44 = vld [vmem:[#allocation2 + $0xdb0] sm:$0xff] }
 0x13f   :  { %4610 = vmatpush1.bf16.msra.mxu0 %v9464_v49  ;;  %4696 = vmatpush1.bf16.msra.mxu1 %v9466_v50  ;;  %v899_v49 = vld [vmem:[#allocation2 + $0x8d0] sm:$0xff]  ;;  %v888_v50 = vld [vmem:[#allocation2 + $0x878] sm:$0xff] }
 0x140   :  { %4611 = vmatprep.subr.bf16.mxu0 %v9489_v51  ;;  %4697 = vmatprep.subr.bf16.mxu1 %v9491_v52  ;;  %v900_v51 = vld [vmem:[#allocation2 + $0x8d8] sm:$0xff]  ;;  %v9656_v52 = vcombine.low %v863_v14, %v875_v42  ;;  %v9681_v54 = vcombine.high %v887_v48, %v899_v49 }
 0x141   :  { %v9683_v55 = vcombine.high %v888_v50, %v900_v51  ;;  %v9682_v61 = vcombine.low %v888_v50, %v900_v51  ;;  %v1079_v51 = vld [vmem:[#allocation2 + $0xe70] sm:$0xff] }
 0x143   :  { %4612 = vmatpush1.bf16.msra.mxu0 %v9488_v58  ;;  %4698 = vmatpush1.bf16.msra.mxu1 %v9490_v59  ;;  %v923_v58 = vld [vmem:[#allocation2 + $0x990] sm:$0xff]  ;;  %v912_v59 = vld [vmem:[#allocation2 + $0x938] sm:$0xff] }
 0x144   :  { %4613 = vmatprep.subr.bf16.mxu0 %v9513_v60  ;;  %4699 = vmatprep.subr.bf16.mxu1 %v9515_v40  ;;  %v924_v60 = vld [vmem:[#allocation2 + $0x998] sm:$0xff]  ;;  %v9680_v40 = vcombine.low %v887_v48, %v899_v49  ;;  %v9705_v62 = vcombine.high %v911_v57, %v923_v58 }
 0x145   :  { %v9707_v63 = vcombine.high %v912_v59, %v924_v60  ;;  %v9706_v5 = vcombine.low %v912_v59, %v924_v60  ;;  %v1103_v59 = vld [vmem:[#allocation2 + $0xf30] sm:$0xff] }
 0x146   :  { %v1115_v60 = vld [vmem:[#allocation2 + $0xf90] sm:$0xff] }
 0x147   :  { %4614 = vmatpush1.bf16.msra.mxu0 %v9512_v1  ;;  %4700 = vmatpush1.bf16.msra.mxu1 %v9514_v2  ;;  %v947_v1 = vld [vmem:[#allocation2 + $0xa50] sm:$0xff]  ;;  %v936_v2 = vld [vmem:[#allocation2 + $0x9f8] sm:$0xff] }
 0x148   :  { %4615 = vmatprep.subr.bf16.mxu0 %v9537_v3  ;;  %4701 = vmatprep.subr.bf16.mxu1 %v9539_v4  ;;  %v948_v3 = vld [vmem:[#allocation2 + $0xa58] sm:$0xff]  ;;  %v9704_v4 = vcombine.low %v911_v57, %v923_v58  ;;  %v9729_v6 = vcombine.high %v935_v0, %v947_v1 }
 0x149   :  { %v9731_v7 = vcombine.high %v936_v2, %v948_v3  ;;  %v9730_v15 = vcombine.low %v936_v2, %v948_v3  ;;  %v1127_v2 = vld [vmem:[#allocation2 + $0xff0] sm:$0xff] }
 0x14a   :  { %v1139_v3 = vld [vmem:[#allocation2 + $0x1050] sm:$0xff] }
 0x14b   :  { %4616 = vmatpush1.bf16.msra.mxu0 %v9536_v9  ;;  %4702 = vmatpush1.bf16.msra.mxu1 %v9538_v11  ;;  %v971_v9 = vld [vmem:[#allocation2 + $0xb10] sm:$0xff]  ;;  %v960_v11 = vld [vmem:[#allocation2 + $0xab8] sm:$0xff] }
 0x14c   :  { %4617 = vmatprep.subr.bf16.mxu0 %v9561_v12  ;;  %4703 = vmatprep.subr.bf16.mxu1 %v9563_v13  ;;  %v972_v12 = vld [vmem:[#allocation2 + $0xb18] sm:$0xff]  ;;  %v9728_v13 = vcombine.low %v935_v0, %v947_v1  ;;  %v9753_v16 = vcombine.high %v959_v8, %v971_v9  ;;  %v9897_v0 = vcombine.high %v1103_v59, %v1115_v60 }
 0x14d   :  { %v9755_v17 = vcombine.high %v960_v11, %v972_v12  ;;  %v9754_v23 = vcombine.low %v960_v11, %v972_v12  ;;  %v1151_v11 = vld [vmem:[#allocation2 + $0x10b0] sm:$0xff] }
 0x14e   :  { %v1163_v12 = vld [vmem:[#allocation2 + $0x1110] sm:$0xff] }
 0x14f   :  { %4618 = vmatpush1.bf16.msra.mxu0 %v9560_v19  ;;  %4704 = vmatpush1.bf16.msra.mxu1 %v9562_v20  ;;  %v995_v19 = vld [vmem:[#allocation2 + $0xbd0] sm:$0xff]  ;;  %v984_v20 = vld [vmem:[#allocation2 + $0xb78] sm:$0xff] }
 0x150   :  { %4619 = vmatprep.subr.bf16.mxu0 %v9585_v21  ;;  %4705 = vmatprep.subr.bf16.mxu1 %v9587_v22  ;;  %v996_v21 = vld [vmem:[#allocation2 + $0xbd8] sm:$0xff]  ;;  %v9752_v22 = vcombine.low %v959_v8, %v971_v9  ;;  %v9777_v24 = vcombine.high %v983_v18, %v995_v19  ;;  %v9921_v8 = vcombine.high %v1127_v2, %v1139_v3 }
 0x151   :  { %v9779_v25 = vcombine.high %v984_v20, %v996_v21  ;;  %v9778_v32 = vcombine.low %v984_v20, %v996_v21  ;;  %v1175_v20 = vld [vmem:[#allocation2 + $0x1170] sm:$0xff] }
 0x152   :  { %v1187_v21 = vld [vmem:[#allocation2 + $0x11d0] sm:$0xff] }
 0x153   :  { %4620 = vmatpush1.bf16.msra.mxu0 %v9584_v28  ;;  %4706 = vmatpush1.bf16.msra.mxu1 %v9586_v29  ;;  %v1019_v28 = vld [vmem:[#allocation2 + $0xc90] sm:$0xff]  ;;  %v1008_v29 = vld [vmem:[#allocation2 + $0xc38] sm:$0xff] }
 0x154   :  { %4621 = vmatprep.subr.bf16.mxu0 %v9609_v30  ;;  %4707 = vmatprep.subr.bf16.mxu1 %v9611_v31  ;;  %v1020_v30 = vld [vmem:[#allocation2 + $0xc98] sm:$0xff]  ;;  %v9776_v31 = vcombine.low %v983_v18, %v995_v19  ;;  %v9801_v33 = vcombine.high %v1007_v26, %v1019_v28  ;;  %v9945_v18 = vcombine.high %v1151_v11, %v1163_v12 }
 0x155   :  { %v9803_v34 = vcombine.high %v1008_v29, %v1020_v30  ;;  %v9802_v14 = vcombine.low %v1008_v29, %v1020_v30  ;;  %v625_v29 = vld [vmem:[#allocation2 + $0x40] sm:$0xff] }
 0x156   :  { %v637_v30 = vld [vmem:[#allocation2 + $0xa0] sm:$0xff] }
 0x157   :  { %4622 = vmatpush1.bf16.msra.mxu0 %v9608_v37  ;;  %4708 = vmatpush1.bf16.msra.mxu1 %v9610_v38  ;;  %v1043_v37 = vld [vmem:[#allocation2 + $0xd50] sm:$0xff]  ;;  %v1032_v38 = vld [vmem:[#allocation2 + $0xcf8] sm:$0xff] }
 0x158   :  { %4623 = vmatprep.subr.bf16.mxu0 %v9633_v39  ;;  %4709 = vmatprep.subr.bf16.mxu1 %v9635_v41  ;;  %v1044_v39 = vld [vmem:[#allocation2 + $0xd58] sm:$0xff]  ;;  %v9800_v41 = vcombine.low %v1007_v26, %v1019_v28  ;;  %v9825_v42 = vcombine.high %v1031_v35, %v1043_v37  ;;  %v9969_v26 = vcombine.high %v1175_v20, %v1187_v21 }
 0x159   :  { %v9827_v43 = vcombine.high %v1032_v38, %v1044_v39  ;;  %v9826_v48 = vcombine.low %v1032_v38, %v1044_v39  ;;  %v649_v38 = vld [vmem:[#allocation2 + $0x100] sm:$0xff] }
 0x15a   :  { %v661_v39 = vld [vmem:[#allocation2 + $0x160] sm:$0xff] }
 0x15b   :  { %4624 = vmatpush1.bf16.msra.mxu0 %v9632_v56  ;;  %4710 = vmatpush1.bf16.msra.mxu1 %v9634_v45  ;;  %v1067_v56 = vld [vmem:[#allocation2 + $0xe10] sm:$0xff]  ;;  %v1056_v45 = vld [vmem:[#allocation2 + $0xdb8] sm:$0xff] }
 0x15c   :  { %4625 = vmatprep.subr.bf16.mxu0 %v9657_v46  ;;  %4711 = vmatprep.subr.bf16.mxu1 %v9659_v47  ;;  %v1068_v46 = vld [vmem:[#allocation2 + $0xe18] sm:$0xff]  ;;  %v9824_v47 = vcombine.low %v1031_v35, %v1043_v37  ;;  %v9849_v49 = vcombine.high %v1055_v44, %v1067_v56  ;;  %v9421_v35 = vcombine.high %v625_v29, %v637_v30 }
 0x15d   :  { %v9851_v50 = vcombine.high %v1056_v45, %v1068_v46 }
 0x15f   :  { %4626 = vmatpush1.bf16.msra.mxu0 %v9656_v52  ;;  %4712 = vmatpush1.bf16.msra.mxu1 %v9658_v53  ;;  %v1091_v52 = vld [vmem:[#allocation2 + $0xed0] sm:$0xff]  ;;  %v1080_v53 = vld [vmem:[#allocation2 + $0xe78] sm:$0xff] }
 0x160   :  { %4627 = vmatprep.subr.bf16.mxu0 %v9681_v54  ;;  %4713 = vmatprep.subr.bf16.mxu1 %v9683_v55  ;;  %v1092_v54 = vld [vmem:[#allocation2 + $0xed8] sm:$0xff]  ;;  %v9848_v55 = vcombine.low %v1055_v44, %v1067_v56  ;;  %v9873_v57 = vcombine.high %v1079_v51, %v1091_v52  ;;  %v9445_v44 = vcombine.high %v649_v38, %v661_v39 }
 0x161   :  { %v9875_v58 = vcombine.high %v1080_v53, %v1092_v54 }
 0x163   :  { %4628 = vmatpush1.bf16.msra.mxu0 %v9680_v40  ;;  %4714 = vmatpush1.bf16.msra.mxu1 %v9682_v61  ;;  %v1104_v40 = vld [vmem:[#allocation2 + $0xf38] sm:$0xff] }
 0x164   :  { %4629 = vmatprep.subr.bf16.mxu0 %v9705_v62  ;;  %4715 = vmatprep.subr.bf16.mxu1 %v9707_v63  ;;  %v1116_v61 = vld [vmem:[#allocation2 + $0xf98] sm:$0xff]  ;;  %v9872_v62 = vcombine.low %v1079_v51, %v1091_v52  ;;  %v9874_v63 = vcombine.low %v1080_v53, %v1092_v54  ;;  %v697_v53 = vld [vmem:[#allocation2 + $0x280] sm:$0xff] }
 0x165   :  { %v9899_v1 = vcombine.high %v1104_v40, %v1116_v61  ;;  %v709_v54 = vld [vmem:[#allocation2 + $0x2e0] sm:$0xff] }
 0x167   :  { %4630 = vmatpush1.bf16.msra.mxu0 %v9704_v4  ;;  %4716 = vmatpush1.bf16.msra.mxu1 %v9706_v5  ;;  %v1128_v4 = vld [vmem:[#allocation2 + $0xff8] sm:$0xff] }
 0x168   :  { %4631 = vmatprep.subr.bf16.mxu0 %v9729_v6  ;;  %4717 = vmatprep.subr.bf16.mxu1 %v9731_v7  ;;  %v1140_v5 = vld [vmem:[#allocation2 + $0x1058] sm:$0xff]  ;;  %v9896_v6 = vcombine.low %v1103_v59, %v1115_v60  ;;  %v9898_v7 = vcombine.low %v1104_v40, %v1116_v61  ;;  %v9493_v59 = vcombine.high %v697_v53, %v709_v54  ;;  %v721_v40 = vld [vmem:[#allocation2 + $0x340] sm:$0xff] }
 0x169   :  { %v9923_v9 = vcombine.high %v1128_v4, %v1140_v5  ;;  %v733_v61 = vld [vmem:[#allocation2 + $0x3a0] sm:$0xff] }
 0x16b   :  { %4632 = vmatpush1.bf16.msra.mxu0 %v9728_v13  ;;  %4718 = vmatpush1.bf16.msra.mxu1 %v9730_v15  ;;  %v1152_v13 = vld [vmem:[#allocation2 + $0x10b8] sm:$0xff] }
 0x16c   :  { %4633 = vmatprep.subr.bf16.mxu0 %v9753_v16  ;;  %4719 = vmatprep.subr.bf16.mxu1 %v9755_v17  ;;  %v1164_v15 = vld [vmem:[#allocation2 + $0x1118] sm:$0xff]  ;;  %v9920_v16 = vcombine.low %v1127_v2, %v1139_v3  ;;  %v9922_v17 = vcombine.low %v1128_v4, %v1140_v5  ;;  %v9517_v2 = vcombine.high %v721_v40, %v733_v61  ;;  %v745_v4 = vld [vmem:[#allocation2 + $0x400] sm:$0xff] }
 0x16d   :  { %v9947_v19 = vcombine.high %v1152_v13, %v1164_v15  ;;  %v757_v5 = vld [vmem:[#allocation2 + $0x460] sm:$0xff] }
 0x16f   :  { %4634 = vmatpush1.bf16.msra.mxu0 %v9752_v22  ;;  %4720 = vmatpush1.bf16.msra.mxu1 %v9754_v23  ;;  %v1176_v22 = vld [vmem:[#allocation2 + $0x1178] sm:$0xff] }
 0x170   :  { %4635 = vmatprep.subr.bf16.mxu0 %v9777_v24  ;;  %4721 = vmatprep.subr.bf16.mxu1 %v9779_v25  ;;  %v1188_v23 = vld [vmem:[#allocation2 + $0x11d8] sm:$0xff]  ;;  %v9944_v24 = vcombine.low %v1151_v11, %v1163_v12  ;;  %v9946_v25 = vcombine.low %v1152_v13, %v1164_v15  ;;  %v9541_v11 = vcombine.high %v745_v4, %v757_v5  ;;  %v769_v13 = vld [vmem:[#allocation2 + $0x4c0] sm:$0xff] }
 0x171   :  { %v9971_v28 = vcombine.high %v1176_v22, %v1188_v23  ;;  %v781_v15 = vld [vmem:[#allocation2 + $0x520] sm:$0xff] }
 0x173   :  { %4636 = vmatpush1.bf16.msra.mxu0 %v9776_v31  ;;  %4722 = vmatpush1.bf16.msra.mxu1 %v9778_v32  ;;  %v626_v31 = vld [vmem:[#allocation2 + $0x48] sm:$0xff] }
 0x174   :  { %4648 = vmatprep.subr.bf16.mxu0 %v9801_v33  ;;  %4734 = vmatprep.subr.bf16.mxu1 %v9803_v34  ;;  %v638_v32 = vld [vmem:[#allocation2 + $0xa8] sm:$0xff]  ;;  %v9968_v33 = vcombine.low %v1175_v20, %v1187_v21  ;;  %v9970_v34 = vcombine.low %v1176_v22, %v1188_v23  ;;  %v9565_v20 = vcombine.high %v769_v13, %v781_v15  ;;  %v793_v22 = vld [vmem:[#allocation2 + $0x580] sm:$0xff] }
 0x175   :  { %v9423_v37 = vcombine.high %v626_v31, %v638_v32  ;;  %v805_v23 = vld [vmem:[#allocation2 + $0x5e0] sm:$0xff] }
 0x176   :  { %4638 = vmatmul.mubr.bf16.vlgmr.msra.gmra.mrb[12].mxu0 %v10893_v36  ;;  %4724 = vmatmul.mubr.bf16.vlgmr.msra.gmra.mrb[12].mxu1 %v10893_v36  ;;  %v9850_v36 = vcombine.low %v1056_v45, %v1068_v46  ;;  %v673_v45 = vld [vmem:[#allocation2 + $0x1c0] sm:$0xff] }
 0x177   :  { %4649 = vmatpush1.bf16.msra.mxu0 %v9800_v41  ;;  %4735 = vmatpush1.bf16.msra.mxu1 %v9802_v14  ;;  %v650_v41 = vld [vmem:[#allocation2 + $0x108] sm:$0xff]  ;;  %v685_v46 = vld [vmem:[#allocation2 + $0x220] sm:$0xff] }
 0x178   :  { %4650 = vmatprep.subr.bf16.mxu0 %v9825_v42  ;;  %4736 = vmatprep.subr.bf16.mxu1 %v9827_v43  ;;  %v662_v14 = vld [vmem:[#allocation2 + $0x168] sm:$0xff]  ;;  %v9420_v42 = vcombine.low %v625_v29, %v637_v30  ;;  %v9422_v43 = vcombine.low %v626_v31, %v638_v32  ;;  %v9469_v51 = vcombine.high %v673_v45, %v685_v46  ;;  %v817_v31 = vld [vmem:[#allocation2 + $0x640] sm:$0xff] }
 0x179   :  { %4680 = vmatprep.mubr.bf16.mxu0 %v10814_v27  ;;  %4766 = vmatprep.mubr.bf16.mxu1 %v10814_v27  ;;  %v9447_v56 = vcombine.high %v650_v41, %v662_v14  ;;  %v9589_v29 = vcombine.high %v793_v22, %v805_v23  ;;  %v829_v32 = vld [vmem:[#allocation2 + $0x6a0] sm:$0xff] }
 0x17b   :  { %4651 = vmatpush1.bf16.msra.mxu0 %v9824_v47  ;;  %4737 = vmatpush1.bf16.msra.mxu1 %v9826_v48  ;;  %v674_v47 = vld [vmem:[#allocation2 + $0x1c8] sm:$0xff] }
 0x17c   :  { %4652 = vmatprep.subr.bf16.mxu0 %v9849_v49  ;;  %4738 = vmatprep.subr.bf16.mxu1 %v9851_v50  ;;  %v686_v48 = vld [vmem:[#allocation2 + $0x228] sm:$0xff]  ;;  %v9444_v49 = vcombine.low %v649_v38, %v661_v39  ;;  %v9446_v50 = vcombine.low %v650_v41, %v662_v14  ;;  %v9613_v38 = vcombine.high %v817_v31, %v829_v32  ;;  %v841_v41 = vld [vmem:[#allocation2 + $0x700] sm:$0xff] }
 0x17d   :  { %v9471_v52 = vcombine.high %v674_v47, %v686_v48  ;;  %v853_v14 = vld [vmem:[#allocation2 + $0x760] sm:$0xff] }
 0x17f   :  { %4653 = vmatpush1.bf16.msra.mxu0 %v9848_v55  ;;  %4739 = vmatpush1.bf16.msra.mxu1 %v9850_v36  ;;  %v10917_v55 = vld [vmem:[%s12917_s0 + $0x1c] ss:$12 sps:$4 sm:$0xff]  }
 0x180   :  { %4654 = vmatprep.subr.bf16.mxu0 %v9873_v57  ;;  %4740 = vmatprep.subr.bf16.mxu1 %v9875_v58  ;;  %v698_v36 = vld [vmem:[#allocation2 + $0x288] sm:$0xff]  ;;  %v9470_v58 = vcombine.low %v674_v47, %v686_v48  ;;  %v865_v47 = vld [vmem:[#allocation2 + $0x7c0] sm:$0xff] }
 0x181   :  { %v710_v57 = vld [vmem:[#allocation2 + $0x2e8] sm:$0xff]  ;;  %v877_v48 = vld [vmem:[#allocation2 + $0x820] sm:$0xff] }
 0x182   :  { %v9495_v60 = vcombine.high %v698_v36, %v710_v57 }
 0x183   :  { %4655 = vmatpush1.bf16.msra.mxu0 %v9872_v62  ;;  %4741 = vmatpush1.bf16.msra.mxu1 %v9874_v63  ;;  %v722_v62 = vld [vmem:[#allocation2 + $0x348] sm:$0xff] }
 0x184   :  { %4656 = vmatprep.subr.bf16.mxu0 %v9897_v0  ;;  %4742 = vmatprep.subr.bf16.mxu1 %v9899_v1  ;;  %v734_v63 = vld [vmem:[#allocation2 + $0x3a8] sm:$0xff]  ;;  %v9492_v0 = vcombine.low %v697_v53, %v709_v54  ;;  %v9494_v1 = vcombine.low %v698_v36, %v710_v57  ;;  %v9661_v53 = vcombine.high %v865_v47, %v877_v48  ;;  %v889_v36 = vld [vmem:[#allocation2 + $0x880] sm:$0xff] }
 0x185   :  { %v9519_v3 = vcombine.high %v722_v62, %v734_v63  ;;  %v901_v57 = vld [vmem:[#allocation2 + $0x8e0] sm:$0xff] }
 0x187   :  { %4657 = vmatpush1.bf16.msra.mxu0 %v9896_v6  ;;  %4743 = vmatpush1.bf16.msra.mxu1 %v9898_v7  ;;  %v746_v6 = vld [vmem:[#allocation2 + $0x408] sm:$0xff] }
 0x188   :  { %4658 = vmatprep.subr.bf16.mxu0 %v9921_v8  ;;  %4744 = vmatprep.subr.bf16.mxu1 %v9923_v9  ;;  %v758_v7 = vld [vmem:[#allocation2 + $0x468] sm:$0xff]  ;;  %v9516_v8 = vcombine.low %v721_v40, %v733_v61  ;;  %v9518_v9 = vcombine.low %v722_v62, %v734_v63  ;;  %v9685_v40 = vcombine.high %v889_v36, %v901_v57  ;;  %v913_v62 = vld [vmem:[#allocation2 + $0x940] sm:$0xff] }
 0x189   :  { %v9543_v12 = vcombine.high %v746_v6, %v758_v7  ;;  %v925_v63 = vld [vmem:[#allocation2 + $0x9a0] sm:$0xff] }
 0x18b   :  { %4659 = vmatpush1.bf16.msra.mxu0 %v9920_v16  ;;  %4745 = vmatpush1.bf16.msra.mxu1 %v9922_v17  ;;  %v770_v16 = vld [vmem:[#allocation2 + $0x4c8] sm:$0xff] }
 0x18c   :  { %4660 = vmatprep.subr.bf16.mxu0 %v9945_v18  ;;  %4746 = vmatprep.subr.bf16.mxu1 %v9947_v19  ;;  %v782_v17 = vld [vmem:[#allocation2 + $0x528] sm:$0xff]  ;;  %v9540_v18 = vcombine.low %v745_v4, %v757_v5  ;;  %v9542_v19 = vcombine.low %v746_v6, %v758_v7  ;;  %v9709_v4 = vcombine.high %v913_v62, %v925_v63  ;;  %v937_v6 = vld [vmem:[#allocation2 + $0xa00] sm:$0xff] }
 0x18d   :  { %v9567_v21 = vcombine.high %v770_v16, %v782_v17  ;;  %v949_v7 = vld [vmem:[#allocation2 + $0xa60] sm:$0xff] }
 0x18f   :  { %4661 = vmatpush1.bf16.msra.mxu0 %v9944_v24  ;;  %4747 = vmatpush1.bf16.msra.mxu1 %v9946_v25  ;;  %v794_v24 = vld [vmem:[#allocation2 + $0x588] sm:$0xff] }
 0x190   :  { %4662 = vmatprep.subr.bf16.mxu0 %v9969_v26  ;;  %4748 = vmatprep.subr.bf16.mxu1 %v9971_v28  ;;  %v806_v25 = vld [vmem:[#allocation2 + $0x5e8] sm:$0xff]  ;;  %v9564_v26 = vcombine.low %v769_v13, %v781_v15  ;;  %v9566_v28 = vcombine.low %v770_v16, %v782_v17  ;;  %v9733_v13 = vcombine.high %v937_v6, %v949_v7  ;;  %v961_v16 = vld [vmem:[#allocation2 + $0xac0] sm:$0xff] }
 0x191   :  { %v9591_v30 = vcombine.high %v794_v24, %v806_v25  ;;  %v973_v17 = vld [vmem:[#allocation2 + $0xb20] sm:$0xff] }
 0x193   :  { %4663 = vmatpush1.bf16.msra.mxu0 %v9968_v33  ;;  %4749 = vmatpush1.bf16.msra.mxu1 %v9970_v34  ;;  %v818_v33 = vld [vmem:[#allocation2 + $0x648] sm:$0xff] }
 0x194   :  { %4777 = vmatprep.subr.bf16.mxu0 %v9421_v35  ;;  %4863 = vmatprep.subr.bf16.mxu1 %v9423_v37  ;;  %v830_v34 = vld [vmem:[#allocation2 + $0x6a8] sm:$0xff]  ;;  %v9588_v35 = vcombine.low %v793_v22, %v805_v23  ;;  %v9590_v37 = vcombine.low %v794_v24, %v806_v25  ;;  %v9757_v22 = vcombine.high %v961_v16, %v973_v17  ;;  %v985_v24 = vld [vmem:[#allocation2 + $0xb80] sm:$0xff] }
 0x195   :  { %v9615_v39 = vcombine.high %v818_v33, %v830_v34  ;;  %v997_v25 = vld [vmem:[#allocation2 + $0xbe0] sm:$0xff] }
 0x196   :  { %4681 = vmatmul.mubr.bf16.vlgmr.msra.gmra.mrb[12].mxu0 %v10902_v10  ;;  %4767 = vmatmul.mubr.bf16.vlgmr.msra.gmra.mrb[12].mxu1 %v10902_v10  ;;  %v9468_v10 = vcombine.low %v673_v45, %v685_v46  ;;  %v9637_v45 = vcombine.high %v841_v41, %v853_v14 }
 0x197   :  { %4778 = vmatpush1.bf16.msra.mxu0 %v9420_v42  ;;  %4864 = vmatpush1.bf16.msra.mxu1 %v9422_v43  ;;  %v842_v42 = vld [vmem:[#allocation2 + $0x708] sm:$0xff] }
 0x198   :  { %4779 = vmatprep.subr.bf16.mxu0 %v9445_v44  ;;  %4865 = vmatprep.subr.bf16.mxu1 %v9447_v56  ;;  %v854_v43 = vld [vmem:[#allocation2 + $0x768] sm:$0xff]  ;;  %v9612_v44 = vcombine.low %v817_v31, %v829_v32  ;;  %v9614_v56 = vcombine.low %v818_v33, %v830_v34  ;;  %v9781_v31 = vcombine.high %v985_v24, %v997_v25  ;;  %v1009_v33 = vld [vmem:[#allocation2 + $0xc40] sm:$0xff] }
 0x199   :  { %4809 = vmatprep.mubr.bf16.mxu0 %v10917_v55  ;;  %4895 = vmatprep.mubr.bf16.mxu1 %v10917_v55  ;;  %v9639_v46 = vcombine.high %v842_v42, %v854_v43  ;;  %v1021_v34 = vld [vmem:[#allocation2 + $0xca0] sm:$0xff] }
 0x19b   :  { %4780 = vmatpush1.bf16.msra.mxu0 %v9444_v49  ;;  %4866 = vmatpush1.bf16.msra.mxu1 %v9446_v50  ;;  %v866_v49 = vld [vmem:[#allocation2 + $0x7c8] sm:$0xff] }
 0x19c   :  { %4781 = vmatprep.subr.bf16.mxu0 %v9469_v51  ;;  %4867 = vmatprep.subr.bf16.mxu1 %v9471_v52  ;;  %v878_v50 = vld [vmem:[#allocation2 + $0x828] sm:$0xff]  ;;  %v9636_v51 = vcombine.low %v841_v41, %v853_v14  ;;  %v9638_v52 = vcombine.low %v842_v42, %v854_v43  ;;  %v9805_v41 = vcombine.high %v1009_v33, %v1021_v34  ;;  %v1033_v42 = vld [vmem:[#allocation2 + $0xd00] sm:$0xff] }
 0x19d   :  { %v9663_v54 = vcombine.high %v866_v49, %v878_v50  ;;  %v1045_v43 = vld [vmem:[#allocation2 + $0xd60] sm:$0xff] }
 0x19f   :  { %4782 = vmatpush1.bf16.msra.mxu0 %v9468_v10  ;;  %4868 = vmatpush1.bf16.msra.mxu1 %v9470_v58  ;;  %v890_v10 = vld [vmem:[#allocation2 + $0x888] sm:$0xff] }
 0x1a0   :  { %4783 = vmatprep.subr.bf16.mxu0 %v9493_v59  ;;  %4869 = vmatprep.subr.bf16.mxu1 %v9495_v60  ;;  %v902_v58 = vld [vmem:[#allocation2 + $0x8e8] sm:$0xff]  ;;  %v9660_v59 = vcombine.low %v865_v47, %v877_v48  ;;  %v9662_v60 = vcombine.low %v866_v49, %v878_v50  ;;  %v9829_v47 = vcombine.high %v1033_v42, %v1045_v43  ;;  %v1057_v49 = vld [vmem:[#allocation2 + $0xdc0] sm:$0xff] }
 0x1a1   :  { %v9687_v61 = vcombine.high %v890_v10, %v902_v58  ;;  %v1069_v50 = vld [vmem:[#allocation2 + $0xe20] sm:$0xff] }
 0x1a3   :  { %4784 = vmatpush1.bf16.msra.mxu0 %v9492_v0  ;;  %4870 = vmatpush1.bf16.msra.mxu1 %v9494_v1  ;;  %v914_v0 = vld [vmem:[#allocation2 + $0x948] sm:$0xff] }
 0x1a4   :  { %4785 = vmatprep.subr.bf16.mxu0 %v9517_v2  ;;  %4871 = vmatprep.subr.bf16.mxu1 %v9519_v3  ;;  %v926_v1 = vld [vmem:[#allocation2 + $0x9a8] sm:$0xff]  ;;  %v9684_v2 = vcombine.low %v889_v36, %v901_v57  ;;  %v9686_v3 = vcombine.low %v890_v10, %v902_v58  ;;  %v9853_v57 = vcombine.high %v1057_v49, %v1069_v50  ;;  %v1081_v58 = vld [vmem:[#allocation2 + $0xe80] sm:$0xff] }
 0x1a5   :  { %v9711_v5 = vcombine.high %v914_v0, %v926_v1 }
 0x1a7   :  { %4786 = vmatpush1.bf16.msra.mxu0 %v9516_v8  ;;  %4872 = vmatpush1.bf16.msra.mxu1 %v9518_v9  ;;  %v938_v8 = vld [vmem:[#allocation2 + $0xa08] sm:$0xff] }
 0x1a8   :  { %4787 = vmatprep.subr.bf16.mxu0 %v9541_v11  ;;  %4873 = vmatprep.subr.bf16.mxu1 %v9543_v12  ;;  %v950_v9 = vld [vmem:[#allocation2 + $0xa68] sm:$0xff]  ;;  %v9708_v11 = vcombine.low %v913_v62, %v925_v63  ;;  %v9710_v12 = vcombine.low %v914_v0, %v926_v1  ;;  %v1105_v1 = vld [vmem:[#allocation2 + $0xf40] sm:$0xff] }
 0x1a9   :  { %v9735_v15 = vcombine.high %v938_v8, %v950_v9 }
 0x1ab   :  { %4788 = vmatpush1.bf16.msra.mxu0 %v9540_v18  ;;  %4874 = vmatpush1.bf16.msra.mxu1 %v9542_v19  ;;  %v962_v18 = vld [vmem:[#allocation2 + $0xac8] sm:$0xff] }
 0x1ac   :  { %4789 = vmatprep.subr.bf16.mxu0 %v9565_v20  ;;  %4875 = vmatprep.subr.bf16.mxu1 %v9567_v21  ;;  %v974_v19 = vld [vmem:[#allocation2 + $0xb28] sm:$0xff]  ;;  %v9732_v20 = vcombine.low %v937_v6, %v949_v7  ;;  %v9734_v21 = vcombine.low %v938_v8, %v950_v9  ;;  %v1129_v9 = vld [vmem:[#allocation2 + $0x1000] sm:$0xff] }
 0x1ad   :  { %v9759_v23 = vcombine.high %v962_v18, %v974_v19 }
 0x1af   :  { %4790 = vmatpush1.bf16.msra.mxu0 %v9564_v26  ;;  %4876 = vmatpush1.bf16.msra.mxu1 %v9566_v28  ;;  %v986_v26 = vld [vmem:[#allocation2 + $0xb88] sm:$0xff] }
 0x1b0   :  { %4791 = vmatprep.subr.bf16.mxu0 %v9589_v29  ;;  %4877 = vmatprep.subr.bf16.mxu1 %v9591_v30  ;;  %v998_v28 = vld [vmem:[#allocation2 + $0xbe8] sm:$0xff]  ;;  %v9756_v29 = vcombine.low %v961_v16, %v973_v17  ;;  %v9758_v30 = vcombine.low %v962_v18, %v974_v19  ;;  %v1153_v19 = vld [vmem:[#allocation2 + $0x10c0] sm:$0xff] }
 0x1b1   :  { %v9783_v32 = vcombine.high %v986_v26, %v998_v28 }
 0x1b3   :  { %4792 = vmatpush1.bf16.msra.mxu0 %v9588_v35  ;;  %4878 = vmatpush1.bf16.msra.mxu1 %v9590_v37  ;;  %v1010_v35 = vld [vmem:[#allocation2 + $0xc48] sm:$0xff] }
 0x1b4   :  { %4793 = vmatprep.subr.bf16.mxu0 %v9613_v38  ;;  %4879 = vmatprep.subr.bf16.mxu1 %v9615_v39  ;;  %v1022_v37 = vld [vmem:[#allocation2 + $0xca8] sm:$0xff]  ;;  %v9780_v38 = vcombine.low %v985_v24, %v997_v25  ;;  %v9782_v39 = vcombine.low %v986_v26, %v998_v28  ;;  %v1177_v28 = vld [vmem:[#allocation2 + $0x1180] sm:$0xff] }
 0x1b5   :  { %v9807_v14 = vcombine.high %v1010_v35, %v1022_v37 }
 0x1b7   :  { %4794 = vmatpush1.bf16.msra.mxu0 %v9612_v44  ;;  %4880 = vmatpush1.bf16.msra.mxu1 %v9614_v56  ;;  %v1034_v44 = vld [vmem:[#allocation2 + $0xd08] sm:$0xff] }
 0x1b8   :  { %4795 = vmatprep.subr.bf16.mxu0 %v9637_v45  ;;  %4881 = vmatprep.subr.bf16.mxu1 %v9639_v46  ;;  %v1046_v56 = vld [vmem:[#allocation2 + $0xd68] sm:$0xff]  ;;  %v9804_v45 = vcombine.low %v1009_v33, %v1021_v34  ;;  %v9806_v46 = vcombine.low %v1010_v35, %v1022_v37  ;;  %v627_v37 = vld [vmem:[#allocation2 + $0x50] sm:$0xff] }
 0x1b9   :  { %v9831_v48 = vcombine.high %v1034_v44, %v1046_v56  ;;  %v9830_v36 = vcombine.low %v1034_v44, %v1046_v56  ;;  %v651_v56 = vld [vmem:[#allocation2 + $0x110] sm:$0xff] }
 0x1bb   :  { %4796 = vmatpush1.bf16.msra.mxu0 %v9636_v51  ;;  %4882 = vmatpush1.bf16.msra.mxu1 %v9638_v52  ;;  %v10924_v51 = vld [vmem:[%s12917_s0 + $0x18] ss:$12 sps:$4 sm:$0xff]   ;;  %v1058_v52 = vld [vmem:[#allocation2 + $0xdc8] sm:$0xff] }
 0x1bc   :  { %4797 = vmatprep.subr.bf16.mxu0 %v9661_v53  ;;  %4883 = vmatprep.subr.bf16.mxu1 %v9663_v54  ;;  %v1070_v53 = vld [vmem:[#allocation2 + $0xe28] sm:$0xff]  ;;  %v9828_v54 = vcombine.low %v1033_v42, %v1045_v43 }
 0x1bd   :  { %v9855_v10 = vcombine.high %v1058_v52, %v1070_v53  ;;  %v9854_v62 = vcombine.low %v1058_v52, %v1070_v53  ;;  %v675_v53 = vld [vmem:[#allocation2 + $0x1d0] sm:$0xff] }
 0x1bf   :  { %4798 = vmatpush1.bf16.msra.mxu0 %v9660_v59  ;;  %4884 = vmatpush1.bf16.msra.mxu1 %v9662_v60  ;;  %v1093_v59 = vld [vmem:[#allocation2 + $0xee0] sm:$0xff]  ;;  %v1082_v60 = vld [vmem:[#allocation2 + $0xe88] sm:$0xff] }
 0x1c0   :  { %4799 = vmatprep.subr.bf16.mxu0 %v9685_v40  ;;  %4885 = vmatprep.subr.bf16.mxu1 %v9687_v61  ;;  %v1094_v40 = vld [vmem:[#allocation2 + $0xee8] sm:$0xff]  ;;  %v9852_v61 = vcombine.low %v1057_v49, %v1069_v50  ;;  %v9877_v63 = vcombine.high %v1081_v58, %v1093_v59 }
 0x1c1   :  { %v9879_v0 = vcombine.high %v1082_v60, %v1094_v40  ;;  %v9878_v6 = vcombine.low %v1082_v60, %v1094_v40 }
 0x1c3   :  { %4800 = vmatpush1.bf16.msra.mxu0 %v9684_v2  ;;  %4886 = vmatpush1.bf16.msra.mxu1 %v9686_v3  ;;  %v1117_v2 = vld [vmem:[#allocation2 + $0xfa0] sm:$0xff]  ;;  %v1106_v3 = vld [vmem:[#allocation2 + $0xf48] sm:$0xff] }
 0x1c4   :  { %4801 = vmatprep.subr.bf16.mxu0 %v9709_v4  ;;  %4887 = vmatprep.subr.bf16.mxu1 %v9711_v5  ;;  %v1118_v4 = vld [vmem:[#allocation2 + $0xfa8] sm:$0xff]  ;;  %v9876_v5 = vcombine.low %v1081_v58, %v1093_v59  ;;  %v9901_v7 = vcombine.high %v1105_v1, %v1117_v2 }
 0x1c5   :  { %v9903_v8 = vcombine.high %v1106_v3, %v1118_v4  ;;  %v9902_v16 = vcombine.low %v1106_v3, %v1118_v4 }
 0x1c7   :  { %4802 = vmatpush1.bf16.msra.mxu0 %v9708_v11  ;;  %4888 = vmatpush1.bf16.msra.mxu1 %v9710_v12  ;;  %v1141_v11 = vld [vmem:[#allocation2 + $0x1060] sm:$0xff]  ;;  %v1130_v12 = vld [vmem:[#allocation2 + $0x1008] sm:$0xff] }
 0x1c8   :  { %4803 = vmatprep.subr.bf16.mxu0 %v9733_v13  ;;  %4889 = vmatprep.subr.bf16.mxu1 %v9735_v15  ;;  %v1142_v13 = vld [vmem:[#allocation2 + $0x1068] sm:$0xff]  ;;  %v9900_v15 = vcombine.low %v1105_v1, %v1117_v2  ;;  %v9925_v17 = vcombine.high %v1129_v9, %v1141_v11 }
 0x1c9   :  { %v9927_v18 = vcombine.high %v1130_v12, %v1142_v13  ;;  %v9926_v24 = vcombine.low %v1130_v12, %v1142_v13  ;;  %v747_v13 = vld [vmem:[#allocation2 + $0x410] sm:$0xff] }
 0x1cb   :  { %4804 = vmatpush1.bf16.msra.mxu0 %v9732_v20  ;;  %4890 = vmatpush1.bf16.msra.mxu1 %v9734_v21  ;;  %v1165_v20 = vld [vmem:[#allocation2 + $0x1120] sm:$0xff]  ;;  %v1154_v21 = vld [vmem:[#allocation2 + $0x10c8] sm:$0xff] }
 0x1cc   :  { %4805 = vmatprep.subr.bf16.mxu0 %v9757_v22  ;;  %4891 = vmatprep.subr.bf16.mxu1 %v9759_v23  ;;  %v1166_v22 = vld [vmem:[#allocation2 + $0x1128] sm:$0xff]  ;;  %v9924_v23 = vcombine.low %v1129_v9, %v1141_v11  ;;  %v9949_v25 = vcombine.high %v1153_v19, %v1165_v20 }
 0x1cd   :  { %v9951_v26 = vcombine.high %v1154_v21, %v1166_v22  ;;  %v9950_v33 = vcombine.low %v1154_v21, %v1166_v22  ;;  %v771_v22 = vld [vmem:[#allocation2 + $0x4d0] sm:$0xff] }
 0x1cf   :  { %4806 = vmatpush1.bf16.msra.mxu0 %v9756_v29  ;;  %4892 = vmatpush1.bf16.msra.mxu1 %v9758_v30  ;;  %v1189_v29 = vld [vmem:[#allocation2 + $0x11e0] sm:$0xff]  ;;  %v1178_v30 = vld [vmem:[#allocation2 + $0x1188] sm:$0xff] }
 0x1d0   :  { %4807 = vmatprep.subr.bf16.mxu0 %v9781_v31  ;;  %4893 = vmatprep.subr.bf16.mxu1 %v9783_v32  ;;  %v1190_v31 = vld [vmem:[#allocation2 + $0x11e8] sm:$0xff]  ;;  %v9948_v32 = vcombine.low %v1153_v19, %v1165_v20  ;;  %v9973_v34 = vcombine.high %v1177_v28, %v1189_v29 }
 0x1d1   :  { %v9975_v35 = vcombine.high %v1178_v30, %v1190_v31  ;;  %v9974_v42 = vcombine.low %v1178_v30, %v1190_v31  ;;  %v795_v31 = vld [vmem:[#allocation2 + $0x590] sm:$0xff] }
 0x1d3   :  { %4808 = vmatpush1.bf16.msra.mxu0 %v9780_v38  ;;  %4894 = vmatpush1.bf16.msra.mxu1 %v9782_v39  ;;  %v639_v38 = vld [vmem:[#allocation2 + $0xb0] sm:$0xff]  ;;  %v628_v39 = vld [vmem:[#allocation2 + $0x58] sm:$0xff] }
 0x1d4   :  { %4820 = vmatprep.subr.bf16.mxu0 %v9805_v41  ;;  %4906 = vmatprep.subr.bf16.mxu1 %v9807_v14  ;;  %v640_v41 = vld [vmem:[#allocation2 + $0xb8] sm:$0xff]  ;;  %v9972_v14 = vcombine.low %v1177_v28, %v1189_v29  ;;  %v9425_v43 = vcombine.high %v627_v37, %v639_v38 }
 0x1d5   :  { %v9427_v44 = vcombine.high %v628_v39, %v640_v41  ;;  %v9426_v49 = vcombine.low %v628_v39, %v640_v41  ;;  %v819_v41 = vld [vmem:[#allocation2 + $0x650] sm:$0xff] }
 0x1d6   :  { %4810 = vmatmul.mubr.bf16.vlgmr.msra.gmra.mrb[16].mxu0 %v10924_v51  ;;  %4896 = vmatmul.mubr.bf16.vlgmr.msra.gmra.mrb[16].mxu1 %v10924_v51 }
 0x1d7   :  { %4821 = vmatpush1.bf16.msra.mxu0 %v9804_v45  ;;  %4907 = vmatpush1.bf16.msra.mxu1 %v9806_v46  ;;  %v663_v45 = vld [vmem:[#allocation2 + $0x170] sm:$0xff]  ;;  %v652_v46 = vld [vmem:[#allocation2 + $0x118] sm:$0xff] }
 0x1d8   :  { %4822 = vmatprep.subr.bf16.mxu0 %v9829_v47  ;;  %4908 = vmatprep.subr.bf16.mxu1 %v9831_v48  ;;  %v664_v47 = vld [vmem:[#allocation2 + $0x178] sm:$0xff]  ;;  %v9424_v48 = vcombine.low %v627_v37, %v639_v38  ;;  %v9449_v50 = vcombine.high %v651_v56, %v663_v45  ;;  %v9448_v58 = vcombine.low %v651_v56, %v663_v45 }
 0x1d9   :  { %4852 = vmatprep.mubr.bf16.mxu0 %v10814_v27  ;;  %4938 = vmatprep.mubr.bf16.mxu1 %v10814_v27  ;;  %v9451_v52 = vcombine.high %v652_v46, %v664_v47  ;;  %v9450_v59 = vcombine.low %v652_v46, %v664_v47  ;;  %v843_v47 = vld [vmem:[#allocation2 + $0x710] sm:$0xff] }
 0x1db   :  { %4823 = vmatpush1.bf16.msra.mxu0 %v9828_v54  ;;  %4909 = vmatpush1.bf16.msra.mxu1 %v9830_v36  ;;  %v687_v54 = vld [vmem:[#allocation2 + $0x230] sm:$0xff]  ;;  %v10933_v36 = vld [vmem:[%s12917_s0 + $0x20] ss:$12 sps:$4 sm:$0xff]  }
 0x1dc   :  { %4824 = vmatprep.subr.bf16.mxu0 %v9853_v57  ;;  %4910 = vmatprep.subr.bf16.mxu1 %v9855_v10  ;;  %v676_v57 = vld [vmem:[#allocation2 + $0x1d8] sm:$0xff]  ;;  %v9473_v60 = vcombine.high %v675_v53, %v687_v54  ;;  %v9472_v1 = vcombine.low %v675_v53, %v687_v54 }
 0x1dd   :  { %v688_v10 = vld [vmem:[#allocation2 + $0x238] sm:$0xff] }
 0x1de   :  { %v9475_v40 = vcombine.high %v676_v57, %v688_v10  ;;  %v9474_v2 = vcombine.low %v676_v57, %v688_v10  ;;  %v867_v10 = vld [vmem:[#allocation2 + $0x7d0] sm:$0xff] }
 0x1df   :  { %4825 = vmatpush1.bf16.msra.mxu0 %v9852_v61  ;;  %4911 = vmatpush1.bf16.msra.mxu1 %v9854_v62  ;;  %v699_v61 = vld [vmem:[#allocation2 + $0x290] sm:$0xff] }
 0x1e0   :  { %4826 = vmatprep.subr.bf16.mxu0 %v9877_v63  ;;  %4912 = vmatprep.subr.bf16.mxu1 %v9879_v0  ;;  %v711_v62 = vld [vmem:[#allocation2 + $0x2f0] sm:$0xff]  ;;  %v700_v63 = vld [vmem:[#allocation2 + $0x298] sm:$0xff] }
 0x1e1   :  { %v712_v0 = vld [vmem:[#allocation2 + $0x2f8] sm:$0xff]  ;;  %v9497_v3 = vcombine.high %v699_v61, %v711_v62  ;;  %v9496_v9 = vcombine.low %v699_v61, %v711_v62 }
 0x1e2   :  { %v9499_v4 = vcombine.high %v700_v63, %v712_v0  ;;  %v9498_v11 = vcombine.low %v700_v63, %v712_v0  ;;  %v891_v0 = vld [vmem:[#allocation2 + $0x890] sm:$0xff] }
 0x1e3   :  { %4827 = vmatpush1.bf16.msra.mxu0 %v9876_v5  ;;  %4913 = vmatpush1.bf16.msra.mxu1 %v9878_v6  ;;  %v723_v5 = vld [vmem:[#allocation2 + $0x350] sm:$0xff] }
 0x1e4   :  { %4828 = vmatprep.subr.bf16.mxu0 %v9901_v7  ;;  %4914 = vmatprep.subr.bf16.mxu1 %v9903_v8  ;;  %v735_v6 = vld [vmem:[#allocation2 + $0x3b0] sm:$0xff]  ;;  %v724_v7 = vld [vmem:[#allocation2 + $0x358] sm:$0xff] }
 0x1e5   :  { %v736_v8 = vld [vmem:[#allocation2 + $0x3b8] sm:$0xff]  ;;  %v9521_v12 = vcombine.high %v723_v5, %v735_v6 }
 0x1e6   :  { %v9522_v19 = vcombine.low %v724_v7, %v736_v8 }
 0x1e7   :  { %4829 = vmatpush1.bf16.msra.mxu0 %v9900_v15  ;;  %4915 = vmatpush1.bf16.msra.mxu1 %v9902_v16  ;;  %v759_v15 = vld [vmem:[#allocation2 + $0x470] sm:$0xff]  ;;  %v748_v16 = vld [vmem:[#allocation2 + $0x418] sm:$0xff] }
 0x1e8   :  { %4830 = vmatprep.subr.bf16.mxu0 %v9925_v17  ;;  %4916 = vmatprep.subr.bf16.mxu1 %v9927_v18  ;;  %v760_v17 = vld [vmem:[#allocation2 + $0x478] sm:$0xff]  ;;  %v9520_v18 = vcombine.low %v723_v5, %v735_v6  ;;  %v9545_v20 = vcombine.high %v747_v13, %v759_v15 }
 0x1e9   :  { %v9547_v21 = vcombine.high %v748_v16, %v760_v17  ;;  %v9546_v28 = vcombine.low %v748_v16, %v760_v17  ;;  %v939_v17 = vld [vmem:[#allocation2 + $0xa10] sm:$0xff] }
 0x1eb   :  { %4831 = vmatpush1.bf16.msra.mxu0 %v9924_v23  ;;  %4917 = vmatpush1.bf16.msra.mxu1 %v9926_v24  ;;  %v783_v23 = vld [vmem:[#allocation2 + $0x530] sm:$0xff]  ;;  %v772_v24 = vld [vmem:[#allocation2 + $0x4d8] sm:$0xff] }
 0x1ec   :  { %4832 = vmatprep.subr.bf16.mxu0 %v9949_v25  ;;  %4918 = vmatprep.subr.bf16.mxu1 %v9951_v26  ;;  %v784_v25 = vld [vmem:[#allocation2 + $0x538] sm:$0xff]  ;;  %v9544_v26 = vcombine.low %v747_v13, %v759_v15  ;;  %v9569_v29 = vcombine.high %v771_v22, %v783_v23 }
 0x1ed   :  { %v9571_v30 = vcombine.high %v772_v24, %v784_v25  ;;  %v9570_v37 = vcombine.low %v772_v24, %v784_v25  ;;  %v963_v25 = vld [vmem:[#allocation2 + $0xad0] sm:$0xff] }
 0x1ef   :  { %4833 = vmatpush1.bf16.msra.mxu0 %v9948_v32  ;;  %4919 = vmatpush1.bf16.msra.mxu1 %v9950_v33  ;;  %v807_v32 = vld [vmem:[#allocation2 + $0x5f0] sm:$0xff]  ;;  %v796_v33 = vld [vmem:[#allocation2 + $0x598] sm:$0xff] }
 0x1f0   :  { %4834 = vmatprep.subr.bf16.mxu0 %v9973_v34  ;;  %4920 = vmatprep.subr.bf16.mxu1 %v9975_v35  ;;  %v808_v34 = vld [vmem:[#allocation2 + $0x5f8] sm:$0xff]  ;;  %v9568_v35 = vcombine.low %v771_v22, %v783_v23  ;;  %v9593_v38 = vcombine.high %v795_v31, %v807_v32 }
 0x1f1   :  { %v9595_v39 = vcombine.high %v796_v33, %v808_v34  ;;  %v9594_v56 = vcombine.low %v796_v33, %v808_v34  ;;  %v987_v34 = vld [vmem:[#allocation2 + $0xb90] sm:$0xff] }
 0x1f3   :  { %4835 = vmatpush1.bf16.msra.mxu0 %v9972_v14  ;;  %4921 = vmatpush1.bf16.msra.mxu1 %v9974_v42  ;;  %v831_v14 = vld [vmem:[#allocation2 + $0x6b0] sm:$0xff]  ;;  %v820_v42 = vld [vmem:[#allocation2 + $0x658] sm:$0xff] }
 0x1f4   :  { %4949 = vmatprep.subr.bf16.mxu0 %v9425_v43  ;;  %5035 = vmatprep.subr.bf16.mxu1 %v9427_v44  ;;  %v832_v43 = vld [vmem:[#allocation2 + $0x6b8] sm:$0xff]  ;;  %v9592_v44 = vcombine.low %v795_v31, %v807_v32  ;;  %v9617_v45 = vcombine.high %v819_v41, %v831_v14 }
 0x1f5   :  { %v9619_v46 = vcombine.high %v820_v42, %v832_v43  ;;  %v9618_v53 = vcombine.low %v820_v42, %v832_v43  ;;  %v1011_v43 = vld [vmem:[#allocation2 + $0xc50] sm:$0xff] }
 0x1f6   :  { %4853 = vmatmul.mubr.bf16.vlgmr.msra.gmra.mrb[16].mxu0 %v10933_v36  ;;  %4939 = vmatmul.mubr.bf16.vlgmr.msra.gmra.mrb[16].mxu1 %v10933_v36 }
 0x1f7   :  { %4950 = vmatpush1.bf16.msra.mxu0 %v9424_v48  ;;  %5036 = vmatpush1.bf16.msra.mxu1 %v9426_v49  ;;  %v855_v48 = vld [vmem:[#allocation2 + $0x770] sm:$0xff]  ;;  %v844_v49 = vld [vmem:[#allocation2 + $0x718] sm:$0xff] }
 0x1f8   :  { %4951 = vmatprep.subr.bf16.mxu0 %v9449_v50  ;;  %5037 = vmatprep.subr.bf16.mxu1 %v9451_v52  ;;  %v856_v50 = vld [vmem:[#allocation2 + $0x778] sm:$0xff]  ;;  %v9616_v52 = vcombine.low %v819_v41, %v831_v14  ;;  %v9641_v54 = vcombine.high %v843_v47, %v855_v48 }
 0x1f9   :  { %4981 = vmatprep.mubr.bf16.mxu0 %v10917_v55  ;;  %5067 = vmatprep.mubr.bf16.mxu1 %v10917_v55  ;;  %v9523_v55 = vcombine.high %v724_v7, %v736_v8  ;;  %v9643_v57 = vcombine.high %v844_v49, %v856_v50  ;;  %v9642_v61 = vcombine.low %v844_v49, %v856_v50  ;;  %v915_v8 = vld [vmem:[#allocation2 + $0x950] sm:$0xff] }
 0x1fa   :  { %v1035_v50 = vld [vmem:[#allocation2 + $0xd10] sm:$0xff] }
 0x1fb   :  { %4952 = vmatpush1.bf16.msra.mxu0 %v9448_v58  ;;  %5038 = vmatpush1.bf16.msra.mxu1 %v9450_v59  ;;  %v879_v58 = vld [vmem:[#allocation2 + $0x830] sm:$0xff]  ;;  %v868_v59 = vld [vmem:[#allocation2 + $0x7d8] sm:$0xff] }
 0x1fc   :  { %4953 = vmatprep.subr.bf16.mxu0 %v9473_v60  ;;  %5039 = vmatprep.subr.bf16.mxu1 %v9475_v40  ;;  %v880_v60 = vld [vmem:[#allocation2 + $0x838] sm:$0xff]  ;;  %v9640_v40 = vcombine.low %v843_v47, %v855_v48  ;;  %v9665_v62 = vcombine.high %v867_v10, %v879_v58 }
 0x1fd   :  { %v9667_v63 = vcombine.high %v868_v59, %v880_v60  ;;  %v9666_v5 = vcombine.low %v868_v59, %v880_v60  ;;  %v1059_v60 = vld [vmem:[#allocation2 + $0xdd0] sm:$0xff] }
 0x1ff   :  { %4954 = vmatpush1.bf16.msra.mxu0 %v9472_v1  ;;  %5040 = vmatpush1.bf16.msra.mxu1 %v9474_v2  ;;  %v903_v1 = vld [vmem:[#allocation2 + $0x8f0] sm:$0xff]  ;;  %v892_v2 = vld [vmem:[#allocation2 + $0x898] sm:$0xff] }
 0x200   :  { %4955 = vmatprep.subr.bf16.mxu0 %v9497_v3  ;;  %5041 = vmatprep.subr.bf16.mxu1 %v9499_v4  ;;  %v904_v3 = vld [vmem:[#allocation2 + $0x8f8] sm:$0xff]  ;;  %v9664_v4 = vcombine.low %v867_v10, %v879_v58  ;;  %v9689_v6 = vcombine.high %v891_v0, %v903_v1 }
 0x201   :  { %v9691_v7 = vcombine.high %v892_v2, %v904_v3  ;;  %v9690_v13 = vcombine.low %v892_v2, %v904_v3  ;;  %v1083_v3 = vld [vmem:[#allocation2 + $0xe90] sm:$0xff] }
 0x203   :  { %4956 = vmatpush1.bf16.msra.mxu0 %v9496_v9  ;;  %5042 = vmatpush1.bf16.msra.mxu1 %v9498_v11  ;;  %v927_v9 = vld [vmem:[#allocation2 + $0x9b0] sm:$0xff]  ;;  %v916_v11 = vld [vmem:[#allocation2 + $0x958] sm:$0xff] }
 0x204   :  { %4957 = vmatprep.subr.bf16.mxu0 %v9521_v12  ;;  %5043 = vmatprep.subr.bf16.mxu1 %v9523_v55  ;;  %v928_v12 = vld [vmem:[#allocation2 + $0x9b8] sm:$0xff]  ;;  %v9688_v55 = vcombine.low %v891_v0, %v903_v1  ;;  %v9713_v15 = vcombine.high %v915_v8, %v927_v9 }
 0x205   :  { %v9715_v16 = vcombine.high %v916_v11, %v928_v12  ;;  %v9714_v22 = vcombine.low %v916_v11, %v928_v12  ;;  %v1107_v11 = vld [vmem:[#allocation2 + $0xf50] sm:$0xff] }
 0x206   :  { %v1119_v12 = vld [vmem:[#allocation2 + $0xfb0] sm:$0xff] }
 0x207   :  { %4958 = vmatpush1.bf16.msra.mxu0 %v9520_v18  ;;  %5044 = vmatpush1.bf16.msra.mxu1 %v9522_v19  ;;  %v951_v18 = vld [vmem:[#allocation2 + $0xa70] sm:$0xff]  ;;  %v940_v19 = vld [vmem:[#allocation2 + $0xa18] sm:$0xff] }
 0x208   :  { %4959 = vmatprep.subr.bf16.mxu0 %v9545_v20  ;;  %5045 = vmatprep.subr.bf16.mxu1 %v9547_v21  ;;  %v952_v20 = vld [vmem:[#allocation2 + $0xa78] sm:$0xff]  ;;  %v9712_v21 = vcombine.low %v915_v8, %v927_v9  ;;  %v9737_v23 = vcombine.high %v939_v17, %v951_v18 }
 0x209   :  { %v9739_v24 = vcombine.high %v940_v19, %v952_v20  ;;  %v9738_v31 = vcombine.low %v940_v19, %v952_v20  ;;  %v1131_v19 = vld [vmem:[#allocation2 + $0x1010] sm:$0xff] }
 0x20a   :  { %v1143_v20 = vld [vmem:[#allocation2 + $0x1070] sm:$0xff] }
 0x20b   :  { %4960 = vmatpush1.bf16.msra.mxu0 %v9544_v26  ;;  %5046 = vmatpush1.bf16.msra.mxu1 %v9546_v28  ;;  %v975_v26 = vld [vmem:[#allocation2 + $0xb30] sm:$0xff]  ;;  %v964_v28 = vld [vmem:[#allocation2 + $0xad8] sm:$0xff] }
 0x20c   :  { %4961 = vmatprep.subr.bf16.mxu0 %v9569_v29  ;;  %5047 = vmatprep.subr.bf16.mxu1 %v9571_v30  ;;  %v976_v29 = vld [vmem:[#allocation2 + $0xb38] sm:$0xff]  ;;  %v9736_v30 = vcombine.low %v939_v17, %v951_v18  ;;  %v9761_v32 = vcombine.high %v963_v25, %v975_v26  ;;  %v9905_v17 = vcombine.high %v1107_v11, %v1119_v12 }
 0x20d   :  { %v9763_v33 = vcombine.high %v964_v28, %v976_v29  ;;  %v9762_v41 = vcombine.low %v964_v28, %v976_v29  ;;  %v1155_v28 = vld [vmem:[#allocation2 + $0x10d0] sm:$0xff] }
 0x20e   :  { %v1167_v29 = vld [vmem:[#allocation2 + $0x1130] sm:$0xff] }
 0x20f   :  { %4962 = vmatpush1.bf16.msra.mxu0 %v9568_v35  ;;  %5048 = vmatpush1.bf16.msra.mxu1 %v9570_v37  ;;  %v999_v35 = vld [vmem:[#allocation2 + $0xbf0] sm:$0xff]  ;;  %v988_v37 = vld [vmem:[#allocation2 + $0xb98] sm:$0xff] }
 0x210   :  { %4963 = vmatprep.subr.bf16.mxu0 %v9593_v38  ;;  %5049 = vmatprep.subr.bf16.mxu1 %v9595_v39  ;;  %v1000_v38 = vld [vmem:[#allocation2 + $0xbf8] sm:$0xff]  ;;  %v9760_v39 = vcombine.low %v963_v25, %v975_v26  ;;  %v9785_v14 = vcombine.high %v987_v34, %v999_v35  ;;  %v9929_v25 = vcombine.high %v1131_v19, %v1143_v20 }
 0x211   :  { %v9787_v42 = vcombine.high %v988_v37, %v1000_v38  ;;  %v9786_v47 = vcombine.low %v988_v37, %v1000_v38  ;;  %v1179_v37 = vld [vmem:[#allocation2 + $0x1190] sm:$0xff] }
 0x212   :  { %v1191_v38 = vld [vmem:[#allocation2 + $0x11f0] sm:$0xff] }
 0x213   :  { %4964 = vmatpush1.bf16.msra.mxu0 %v9592_v44  ;;  %5050 = vmatpush1.bf16.msra.mxu1 %v9594_v56  ;;  %v1023_v44 = vld [vmem:[#allocation2 + $0xcb0] sm:$0xff]  ;;  %v1012_v56 = vld [vmem:[#allocation2 + $0xc58] sm:$0xff] }
 0x214   :  { %4965 = vmatprep.subr.bf16.mxu0 %v9617_v45  ;;  %5051 = vmatprep.subr.bf16.mxu1 %v9619_v46  ;;  %v1024_v45 = vld [vmem:[#allocation2 + $0xcb8] sm:$0xff]  ;;  %v9784_v46 = vcombine.low %v987_v34, %v999_v35  ;;  %v9809_v48 = vcombine.high %v1011_v43, %v1023_v44  ;;  %v9953_v34 = vcombine.high %v1155_v28, %v1167_v29 }
 0x215   :  { %v9811_v49 = vcombine.high %v1012_v56, %v1024_v45  ;;  %v9810_v10 = vcombine.low %v1012_v56, %v1024_v45  ;;  %v36_v56 = vld [vmem:[%s12918_s1] sm:$0xff] }
 0x216   :  { %v48_v45 = vld [vmem:[%s12918_s1 + $0x60] sm:$0xff] }
 0x217   :  { %4966 = vmatpush1.bf16.msra.mxu0 %v9616_v52  ;;  %5052 = vmatpush1.bf16.msra.mxu1 %v9618_v53  ;;  %v1047_v52 = vld [vmem:[#allocation2 + $0xd70] sm:$0xff]  ;;  %v1036_v53 = vld [vmem:[#allocation2 + $0xd18] sm:$0xff] }
 0x218   :  { %4967 = vmatprep.subr.bf16.mxu0 %v9641_v54  ;;  %5053 = vmatprep.subr.bf16.mxu1 %v9643_v57  ;;  %v1048_v54 = vld [vmem:[#allocation2 + $0xd78] sm:$0xff]  ;;  %v9808_v57 = vcombine.low %v1011_v43, %v1023_v44  ;;  %v9833_v58 = vcombine.high %v1035_v50, %v1047_v52  ;;  %v9977_v43 = vcombine.high %v1179_v37, %v1191_v38 }
 0x219   :  { %v9835_v59 = vcombine.high %v1036_v53, %v1048_v54  ;;  %v9834_v0 = vcombine.low %v1036_v53, %v1048_v54  ;;  %v60_v53 = vld [vmem:[%s12918_s1 + $0xc0] sm:$0xff] }
 0x21a   :  { %v72_v54 = vld [vmem:[%s12918_s1 + $0x120] sm:$0xff] }
 0x21b   :  { %4968 = vmatpush1.bf16.msra.mxu0 %v9640_v40  ;;  %5054 = vmatpush1.bf16.msra.mxu1 %v9642_v61  ;;  %v1071_v40 = vld [vmem:[#allocation2 + $0xe30] sm:$0xff]  ;;  %v1060_v61 = vld [vmem:[#allocation2 + $0xdd8] sm:$0xff] }
 0x21c   :  { %4969 = vmatprep.subr.bf16.mxu0 %v9665_v62  ;;  %5055 = vmatprep.subr.bf16.mxu1 %v9667_v63  ;;  %v1072_v62 = vld [vmem:[#allocation2 + $0xe38] sm:$0xff]  ;;  %v9832_v63 = vcombine.low %v1035_v50, %v1047_v52  ;;  %v9857_v1 = vcombine.high %v1059_v60, %v1071_v40  ;;  %v9984_v50 = vcombine.high %v36_v56, %v48_v45 }
 0x21d   :  { %v9859_v2 = vcombine.high %v1060_v61, %v1072_v62 }
 0x21f   :  { %4970 = vmatpush1.bf16.msra.mxu0 %v9664_v4  ;;  %5056 = vmatpush1.bf16.msra.mxu1 %v9666_v5  ;;  %v1095_v4 = vld [vmem:[#allocation2 + $0xef0] sm:$0xff]  ;;  %v1084_v5 = vld [vmem:[#allocation2 + $0xe98] sm:$0xff] }
 0x220   :  { %4971 = vmatprep.subr.bf16.mxu0 %v9689_v6  ;;  %5057 = vmatprep.subr.bf16.mxu1 %v9691_v7  ;;  %v1096_v6 = vld [vmem:[#allocation2 + $0xef8] sm:$0xff]  ;;  %v9856_v7 = vcombine.low %v1059_v60, %v1071_v40  ;;  %v9881_v8 = vcombine.high %v1083_v3, %v1095_v4  ;;  %v10008_v60 = vcombine.high %v60_v53, %v72_v54 }
 0x221   :  { %v9883_v9 = vcombine.high %v1084_v5, %v1096_v6 }
 0x223   :  { %4972 = vmatpush1.bf16.msra.mxu0 %v9688_v55  ;;  %5058 = vmatpush1.bf16.msra.mxu1 %v9690_v13  ;;  %v1108_v55 = vld [vmem:[#allocation2 + $0xf58] sm:$0xff] }
 0x224   :  { %4973 = vmatprep.subr.bf16.mxu0 %v9713_v15  ;;  %5059 = vmatprep.subr.bf16.mxu1 %v9715_v16  ;;  %v1120_v13 = vld [vmem:[#allocation2 + $0xfb8] sm:$0xff]  ;;  %v9880_v15 = vcombine.low %v1083_v3, %v1095_v4  ;;  %v9882_v16 = vcombine.low %v1084_v5, %v1096_v6  ;;  %v108_v6 = vld [vmem:[%s12918_s1 + $0x240] sm:$0xff] }
 0x225   :  { %v9907_v18 = vcombine.high %v1108_v55, %v1120_v13 }
 0x227   :  { %4974 = vmatpush1.bf16.msra.mxu0 %v9712_v21  ;;  %5060 = vmatpush1.bf16.msra.mxu1 %v9714_v22  ;;  %v1132_v21 = vld [vmem:[#allocation2 + $0x1018] sm:$0xff] }
 0x228   :  { %4975 = vmatprep.subr.bf16.mxu0 %v9737_v23  ;;  %5061 = vmatprep.subr.bf16.mxu1 %v9739_v24  ;;  %v1144_v22 = vld [vmem:[#allocation2 + $0x1078] sm:$0xff]  ;;  %v9904_v23 = vcombine.low %v1107_v11, %v1119_v12  ;;  %v9906_v24 = vcombine.low %v1108_v55, %v1120_v13  ;;  %v132_v55 = vld [vmem:[%s12918_s1 + $0x300] sm:$0xff] }
 0x229   :  { %v9931_v26 = vcombine.high %v1132_v21, %v1144_v22  ;;  %v144_v13 = vld [vmem:[%s12918_s1 + $0x360] sm:$0xff] }
 0x22b   :  { %4976 = vmatpush1.bf16.msra.mxu0 %v9736_v30  ;;  %5062 = vmatpush1.bf16.msra.mxu1 %v9738_v31  ;;  %v1156_v30 = vld [vmem:[#allocation2 + $0x10d8] sm:$0xff] }
 0x22c   :  { %4977 = vmatprep.subr.bf16.mxu0 %v9761_v32  ;;  %5063 = vmatprep.subr.bf16.mxu1 %v9763_v33  ;;  %v1168_v31 = vld [vmem:[#allocation2 + $0x1138] sm:$0xff]  ;;  %v9928_v32 = vcombine.low %v1131_v19, %v1143_v20  ;;  %v9930_v33 = vcombine.low %v1132_v21, %v1144_v22  ;;  %v10080_v19 = vcombine.high %v132_v55, %v144_v13  ;;  %v156_v21 = vld [vmem:[%s12918_s1 + $0x3c0] sm:$0xff] }
 0x22d   :  { %v9955_v35 = vcombine.high %v1156_v30, %v1168_v31  ;;  %v168_v22 = vld [vmem:[%s12918_s1 + $0x420] sm:$0xff] }
 0x22f   :  { %4978 = vmatpush1.bf16.msra.mxu0 %v9760_v39  ;;  %5064 = vmatpush1.bf16.msra.mxu1 %v9762_v41  ;;  %v1180_v39 = vld [vmem:[#allocation2 + $0x1198] sm:$0xff] }
 0x230   :  { %4979 = vmatprep.subr.bf16.mxu0 %v9785_v14  ;;  %5065 = vmatprep.subr.bf16.mxu1 %v9787_v42  ;;  %v1192_v41 = vld [vmem:[#allocation2 + $0x11f8] sm:$0xff]  ;;  %v9952_v14 = vcombine.low %v1155_v28, %v1167_v29  ;;  %v9954_v42 = vcombine.low %v1156_v30, %v1168_v31  ;;  %v10104_v28 = vcombine.high %v156_v21, %v168_v22  ;;  %v180_v30 = vld [vmem:[%s12918_s1 + $0x480] sm:$0xff] }
 0x231   :  { %v9979_v44 = vcombine.high %v1180_v39, %v1192_v41  ;;  %v192_v31 = vld [vmem:[%s12918_s1 + $0x4e0] sm:$0xff] }
 0x233   :  { %4980 = vmatpush1.bf16.msra.mxu0 %v9784_v46  ;;  %5066 = vmatpush1.bf16.msra.mxu1 %v9786_v47  ;;  %v37_v46 = vld [vmem:[%s12918_s1 + $0x8] sm:$0xff] }
 0x234   :  { %4992 = vmatprep.subr.bf16.mxu0 %v9809_v48  ;;  %5078 = vmatprep.subr.bf16.mxu1 %v9811_v49  ;;  %v49_v47 = vld [vmem:[%s12918_s1 + $0x68] sm:$0xff]  ;;  %v9976_v48 = vcombine.low %v1179_v37, %v1191_v38  ;;  %v9978_v49 = vcombine.low %v1180_v39, %v1192_v41  ;;  %v10128_v37 = vcombine.high %v180_v30, %v192_v31  ;;  %v204_v39 = vld [vmem:[%s12918_s1 + $0x540] sm:$0xff] }
 0x235   :  { %v9986_v52 = vcombine.high %v37_v46, %v49_v47  ;;  %v216_v41 = vld [vmem:[%s12918_s1 + $0x5a0] sm:$0xff] }
 0x236   :  { %4982 = vmatmul.mubr.bf16.vlgmr.msra.gmra.mrb[20].mxu0 %v10924_v51  ;;  %5068 = vmatmul.mubr.bf16.vlgmr.msra.gmra.mrb[20].mxu1 %v10924_v51  ;;  %v9858_v51 = vcombine.low %v1060_v61, %v1072_v62  ;;  %v84_v61 = vld [vmem:[%s12918_s1 + $0x180] sm:$0xff] }
 0x237   :  { %4993 = vmatpush1.bf16.msra.mxu0 %v9808_v57  ;;  %5079 = vmatpush1.bf16.msra.mxu1 %v9810_v10  ;;  %v61_v57 = vld [vmem:[%s12918_s1 + $0xc8] sm:$0xff]  ;;  %v96_v62 = vld [vmem:[%s12918_s1 + $0x1e0] sm:$0xff] }
 0x238   :  { %4994 = vmatprep.subr.bf16.mxu0 %v9833_v58  ;;  %5080 = vmatprep.subr.bf16.mxu1 %v9835_v59  ;;  %v73_v10 = vld [vmem:[%s12918_s1 + $0x128] sm:$0xff]  ;;  %v9983_v58 = vcombine.low %v36_v56, %v48_v45  ;;  %v9985_v59 = vcombine.low %v37_v46, %v49_v47  ;;  %v10032_v4 = vcombine.high %v84_v61, %v96_v62  ;;  %v228_v46 = vld [vmem:[%s12918_s1 + $0x600] sm:$0xff] }
 0x239   :  { %5024 = vmatprep.mubr.bf16.mxu0 %v10814_v27  ;;  %5110 = vmatprep.mubr.bf16.mxu1 %v10814_v27  ;;  %v10010_v40 = vcombine.high %v61_v57, %v73_v10  ;;  %v10009_v3 = vcombine.low %v61_v57, %v73_v10  ;;  %v10152_v56 = vcombine.high %v204_v39, %v216_v41  ;;  %v240_v47 = vld [vmem:[%s12918_s1 + $0x660] sm:$0xff] }
 0x23a   :  { %v252_v57 = vld [vmem:[%s12918_s1 + $0x6c0] sm:$0xff] }
 0x23b   :  { %4995 = vmatpush1.bf16.msra.mxu0 %v9832_v63  ;;  %5081 = vmatpush1.bf16.msra.mxu1 %v9834_v0  ;;  %v10976_v63 = vld [vmem:[%s12917_s0 + $0x4] ss:$12 sps:$4 sm:$0xff]   ;;  %v85_v0 = vld [vmem:[%s12918_s1 + $0x188] sm:$0xff] }
 0x23c   :  { %4996 = vmatprep.subr.bf16.mxu0 %v9857_v1  ;;  %5082 = vmatprep.subr.bf16.mxu1 %v9859_v2  ;;  %v97_v1 = vld [vmem:[%s12918_s1 + $0x1e8] sm:$0xff]  ;;  %v10007_v2 = vcombine.low %v60_v53, %v72_v54  ;;  %v10176_v53 = vcombine.high %v228_v46, %v240_v47  ;;  %v264_v10 = vld [vmem:[%s12918_s1 + $0x720] sm:$0xff] }
 0x23d   :  { %v10034_v5 = vcombine.high %v85_v0, %v97_v1 }
 0x23f   :  { %4997 = vmatpush1.bf16.msra.mxu0 %v9856_v7  ;;  %5083 = vmatpush1.bf16.msra.mxu1 %v9858_v51  ;;  %v120_v7 = vld [vmem:[%s12918_s1 + $0x2a0] sm:$0xff]  ;;  %v121_v51 = vld [vmem:[%s12918_s1 + $0x2a8] sm:$0xff] }
 0x240   :  { %4998 = vmatprep.subr.bf16.mxu0 %v9881_v8  ;;  %5084 = vmatprep.subr.bf16.mxu1 %v9883_v9  ;;  %v10031_v8 = vcombine.low %v84_v61, %v96_v62  ;;  %v10033_v9 = vcombine.low %v85_v0, %v97_v1  ;;  %v10056_v11 = vcombine.high %v108_v6, %v120_v7  ;;  %v276_v0 = vld [vmem:[%s12918_s1 + $0x780] sm:$0xff] }
 0x241   :  { %v10200_v61 = vcombine.high %v252_v57, %v264_v10  ;;  %v288_v1 = vld [vmem:[%s12918_s1 + $0x7e0] sm:$0xff] }
 0x243   :  { %4999 = vmatpush1.bf16.msra.mxu0 %v9880_v15  ;;  %5085 = vmatpush1.bf16.msra.mxu1 %v9882_v16  ;;  %v133_v15 = vld [vmem:[%s12918_s1 + $0x308] sm:$0xff] }
 0x244   :  { %5000 = vmatprep.subr.bf16.mxu0 %v9905_v17  ;;  %5086 = vmatprep.subr.bf16.mxu1 %v9907_v18  ;;  %v145_v16 = vld [vmem:[%s12918_s1 + $0x368] sm:$0xff]  ;;  %v10055_v17 = vcombine.low %v108_v6, %v120_v7  ;;  %v10224_v6 = vcombine.high %v276_v0, %v288_v1 }
 0x245   :  { %v10082_v20 = vcombine.high %v133_v15, %v145_v16 }
 0x247   :  { %5001 = vmatpush1.bf16.msra.mxu0 %v9904_v23  ;;  %5087 = vmatpush1.bf16.msra.mxu1 %v9906_v24  ;;  %v157_v23 = vld [vmem:[%s12918_s1 + $0x3c8] sm:$0xff] }
 0x248   :  { %5002 = vmatprep.subr.bf16.mxu0 %v9929_v25  ;;  %5088 = vmatprep.subr.bf16.mxu1 %v9931_v26  ;;  %v169_v24 = vld [vmem:[%s12918_s1 + $0x428] sm:$0xff]  ;;  %v10079_v25 = vcombine.low %v132_v55, %v144_v13  ;;  %v10081_v26 = vcombine.low %v133_v15, %v145_v16  ;;  %v324_v15 = vld [vmem:[%s12918_s1 + $0x900] sm:$0xff] }
 0x249   :  { %v10106_v29 = vcombine.high %v157_v23, %v169_v24  ;;  %v336_v16 = vld [vmem:[%s12918_s1 + $0x960] sm:$0xff] }
 0x24b   :  { %5003 = vmatpush1.bf16.msra.mxu0 %v9928_v32  ;;  %5089 = vmatpush1.bf16.msra.mxu1 %v9930_v33  ;;  %v181_v32 = vld [vmem:[%s12918_s1 + $0x488] sm:$0xff] }
 0x24c   :  { %5004 = vmatprep.subr.bf16.mxu0 %v9953_v34  ;;  %5090 = vmatprep.subr.bf16.mxu1 %v9955_v35  ;;  %v193_v33 = vld [vmem:[%s12918_s1 + $0x4e8] sm:$0xff]  ;;  %v10103_v34 = vcombine.low %v156_v21, %v168_v22  ;;  %v10105_v35 = vcombine.low %v157_v23, %v169_v24  ;;  %v10272_v21 = vcombine.high %v324_v15, %v336_v16  ;;  %v348_v23 = vld [vmem:[%s12918_s1 + $0x9c0] sm:$0xff] }
 0x24d   :  { %v10130_v38 = vcombine.high %v181_v32, %v193_v33  ;;  %v360_v24 = vld [vmem:[%s12918_s1 + $0xa20] sm:$0xff] }
 0x24f   :  { %5005 = vmatpush1.bf16.msra.mxu0 %v9952_v14  ;;  %5091 = vmatpush1.bf16.msra.mxu1 %v9954_v42  ;;  %v205_v14 = vld [vmem:[%s12918_s1 + $0x548] sm:$0xff] }
 0x250   :  { %5006 = vmatprep.subr.bf16.mxu0 %v9977_v43  ;;  %5092 = vmatprep.subr.bf16.mxu1 %v9979_v44  ;;  %v217_v42 = vld [vmem:[%s12918_s1 + $0x5a8] sm:$0xff]  ;;  %v10127_v43 = vcombine.low %v180_v30, %v192_v31  ;;  %v10129_v44 = vcombine.low %v181_v32, %v193_v33  ;;  %v10296_v30 = vcombine.high %v348_v23, %v360_v24  ;;  %v372_v32 = vld [vmem:[%s12918_s1 + $0xa80] sm:$0xff] }
 0x251   :  { %v10154_v45 = vcombine.high %v205_v14, %v217_v42  ;;  %v384_v33 = vld [vmem:[%s12918_s1 + $0xae0] sm:$0xff] }
 0x253   :  { %5007 = vmatpush1.bf16.msra.mxu0 %v9976_v48  ;;  %5093 = vmatpush1.bf16.msra.mxu1 %v9978_v49  ;;  %v229_v48 = vld [vmem:[%s12918_s1 + $0x608] sm:$0xff] }
 0x254   :  { %8017 = vmatprep.subr.bf16.mxu0 %v9984_v50  ;;  %8103 = vmatprep.subr.bf16.mxu1 %v9986_v52  ;;  %v241_v49 = vld [vmem:[%s12918_s1 + $0x668] sm:$0xff]  ;;  %v10151_v50 = vcombine.low %v204_v39, %v216_v41  ;;  %v10153_v52 = vcombine.low %v205_v14, %v217_v42  ;;  %v10320_v39 = vcombine.high %v372_v32, %v384_v33  ;;  %v396_v14 = vld [vmem:[%s12918_s1 + $0xb40] sm:$0xff] }
 0x255   :  { %v10178_v54 = vcombine.high %v229_v48, %v241_v49  ;;  %v408_v42 = vld [vmem:[%s12918_s1 + $0xba0] sm:$0xff] }
 0x256   :  { %5025 = vmatmul.mubr.bf16.vlgmr.msra.gmra.mrb[20].mxu0 %v10933_v36  ;;  %5111 = vmatmul.mubr.bf16.vlgmr.msra.gmra.mrb[20].mxu1 %v10933_v36  ;;  %v109_v36 = vld [vmem:[%s12918_s1 + $0x248] sm:$0xff] }
 0x257   :  { %8018 = vmatpush1.bf16.msra.mxu0 %v9983_v58  ;;  %8104 = vmatpush1.bf16.msra.mxu1 %v9985_v59  ;;  %v10058_v12 = vcombine.high %v109_v36, %v121_v51  ;;  %v10057_v18 = vcombine.low %v109_v36, %v121_v51  ;;  %v253_v58 = vld [vmem:[%s12918_s1 + $0x6c8] sm:$0xff]  ;;  %v300_v36 = vld [vmem:[%s12918_s1 + $0x840] sm:$0xff] }
 0x258   :  { %8019 = vmatprep.subr.bf16.mxu0 %v10008_v60  ;;  %8105 = vmatprep.subr.bf16.mxu1 %v10010_v40  ;;  %v265_v59 = vld [vmem:[%s12918_s1 + $0x728] sm:$0xff]  ;;  %v10175_v60 = vcombine.low %v228_v46, %v240_v47  ;;  %v10177_v40 = vcombine.low %v229_v48, %v241_v49  ;;  %v312_v51 = vld [vmem:[%s12918_s1 + $0x8a0] sm:$0xff]  ;;  %v10344_v46 = vcombine.high %v396_v14, %v408_v42 }
 0x259   :  { %8049 = vmatprep.mubr.bf16.mxu0 %v10976_v63  ;;  %8135 = vmatprep.mubr.bf16.mxu1 %v10976_v63  ;;  %v10202_v62 = vcombine.high %v253_v58, %v265_v59  ;;  %v10248_v55 = vcombine.high %v300_v36, %v312_v51  ;;  %v420_v48 = vld [vmem:[%s12918_s1 + $0xc00] sm:$0xff] }
 0x25a   :  { %v432_v49 = vld [vmem:[%s12918_s1 + $0xc60] sm:$0xff] }
 0x25b   :  { %8020 = vmatpush1.bf16.msra.mxu0 %v10007_v2  ;;  %8106 = vmatpush1.bf16.msra.mxu1 %v10009_v3  ;;  %v277_v2 = vld [vmem:[%s12918_s1 + $0x788] sm:$0xff] }
 0x25c   :  { %8021 = vmatprep.subr.bf16.mxu0 %v10032_v4  ;;  %8107 = vmatprep.subr.bf16.mxu1 %v10034_v5  ;;  %v289_v3 = vld [vmem:[%s12918_s1 + $0x7e8] sm:$0xff]  ;;  %v10199_v4 = vcombine.low %v252_v57, %v264_v10  ;;  %v10201_v5 = vcombine.low %v253_v58, %v265_v59  ;;  %v10368_v57 = vcombine.high %v420_v48, %v432_v49  ;;  %v444_v58 = vld [vmem:[%s12918_s1 + $0xcc0] sm:$0xff] }
 0x25d   :  { %v10226_v7 = vcombine.high %v277_v2, %v289_v3  ;;  %v456_v59 = vld [vmem:[%s12918_s1 + $0xd20] sm:$0xff] }
 0x25f   :  { %8022 = vmatpush1.bf16.msra.mxu0 %v10031_v8  ;;  %8108 = vmatpush1.bf16.msra.mxu1 %v10033_v9  ;;  %v301_v8 = vld [vmem:[%s12918_s1 + $0x848] sm:$0xff] }
 0x260   :  { %8023 = vmatprep.subr.bf16.mxu0 %v10056_v11  ;;  %8109 = vmatprep.subr.bf16.mxu1 %v10058_v12  ;;  %v313_v9 = vld [vmem:[%s12918_s1 + $0x8a8] sm:$0xff]  ;;  %v10223_v11 = vcombine.low %v276_v0, %v288_v1  ;;  %v10225_v12 = vcombine.low %v277_v2, %v289_v3  ;;  %v10392_v1 = vcombine.high %v444_v58, %v456_v59  ;;  %v468_v3 = vld [vmem:[%s12918_s1 + $0xd80] sm:$0xff] }
 0x261   :  { %v10250_v13 = vcombine.high %v301_v8, %v313_v9 }
 0x263   :  { %8024 = vmatpush1.bf16.msra.mxu0 %v10055_v17  ;;  %8110 = vmatpush1.bf16.msra.mxu1 %v10057_v18  ;;  %v325_v17 = vld [vmem:[%s12918_s1 + $0x908] sm:$0xff] }
 0x264   :  { %8025 = vmatprep.subr.bf16.mxu0 %v10080_v19  ;;  %8111 = vmatprep.subr.bf16.mxu1 %v10082_v20  ;;  %v337_v18 = vld [vmem:[%s12918_s1 + $0x968] sm:$0xff]  ;;  %v10247_v19 = vcombine.low %v300_v36, %v312_v51  ;;  %v10249_v20 = vcombine.low %v301_v8, %v313_v9  ;;  %v492_v9 = vld [vmem:[%s12918_s1 + $0xe40] sm:$0xff] }
 0x265   :  { %v10274_v22 = vcombine.high %v325_v17, %v337_v18 }
 0x267   :  { %8026 = vmatpush1.bf16.msra.mxu0 %v10079_v25  ;;  %8112 = vmatpush1.bf16.msra.mxu1 %v10081_v26  ;;  %v349_v25 = vld [vmem:[%s12918_s1 + $0x9c8] sm:$0xff] }
 0x268   :  { %8027 = vmatprep.subr.bf16.mxu0 %v10104_v28  ;;  %8113 = vmatprep.subr.bf16.mxu1 %v10106_v29  ;;  %v361_v26 = vld [vmem:[%s12918_s1 + $0xa28] sm:$0xff]  ;;  %v10271_v28 = vcombine.low %v324_v15, %v336_v16  ;;  %v10273_v29 = vcombine.low %v325_v17, %v337_v18  ;;  %v516_v18 = vld [vmem:[%s12918_s1 + $0xf00] sm:$0xff] }
 0x269   :  { %v10298_v31 = vcombine.high %v349_v25, %v361_v26 }
 0x26b   :  { %8028 = vmatpush1.bf16.msra.mxu0 %v10103_v34  ;;  %8114 = vmatpush1.bf16.msra.mxu1 %v10105_v35  ;;  %v373_v34 = vld [vmem:[%s12918_s1 + $0xa88] sm:$0xff] }
 0x26c   :  { %8029 = vmatprep.subr.bf16.mxu0 %v10128_v37  ;;  %8115 = vmatprep.subr.bf16.mxu1 %v10130_v38  ;;  %v385_v35 = vld [vmem:[%s12918_s1 + $0xae8] sm:$0xff]  ;;  %v10295_v37 = vcombine.low %v348_v23, %v360_v24  ;;  %v10297_v38 = vcombine.low %v349_v25, %v361_v26  ;;  %v540_v26 = vld [vmem:[%s12918_s1 + $0xfc0] sm:$0xff] }
 0x26d   :  { %v10322_v41 = vcombine.high %v373_v34, %v385_v35 }
 0x26f   :  { %8030 = vmatpush1.bf16.msra.mxu0 %v10127_v43  ;;  %8116 = vmatpush1.bf16.msra.mxu1 %v10129_v44  ;;  %v397_v43 = vld [vmem:[%s12918_s1 + $0xb48] sm:$0xff] }
 0x270   :  { %8031 = vmatprep.subr.bf16.mxu0 %v10152_v56  ;;  %8117 = vmatprep.subr.bf16.mxu1 %v10154_v45  ;;  %v409_v44 = vld [vmem:[%s12918_s1 + $0xba8] sm:$0xff]  ;;  %v10319_v56 = vcombine.low %v372_v32, %v384_v33  ;;  %v10321_v45 = vcombine.low %v373_v34, %v385_v35  ;;  %v564_v35 = vld [vmem:[%s12918_s1 + $0x1080] sm:$0xff] }
 0x271   :  { %v10346_v47 = vcombine.high %v397_v43, %v409_v44 }
 0x273   :  { %8032 = vmatpush1.bf16.msra.mxu0 %v10151_v50  ;;  %8118 = vmatpush1.bf16.msra.mxu1 %v10153_v52  ;;  %v421_v50 = vld [vmem:[%s12918_s1 + $0xc08] sm:$0xff] }
 0x274   :  { %8033 = vmatprep.subr.bf16.mxu0 %v10176_v53  ;;  %8119 = vmatprep.subr.bf16.mxu1 %v10178_v54  ;;  %v433_v52 = vld [vmem:[%s12918_s1 + $0xc68] sm:$0xff]  ;;  %v10343_v53 = vcombine.low %v396_v14, %v408_v42  ;;  %v10345_v54 = vcombine.low %v397_v43, %v409_v44  ;;  %v588_v44 = vld [vmem:[%s12918_s1 + $0x1140] sm:$0xff] }
 0x275   :  { %v10370_v10 = vcombine.high %v421_v50, %v433_v52  ;;  %v10369_v0 = vcombine.low %v421_v50, %v433_v52  ;;  %v38_v52 = vld [vmem:[%s12918_s1 + $0x10] sm:$0xff] }
 0x277   :  { %8034 = vmatpush1.bf16.msra.mxu0 %v10175_v60  ;;  %8120 = vmatpush1.bf16.msra.mxu1 %v10177_v40  ;;  %v11165_v60 = vld [vmem:[%s12917_s0] ss:$12 sps:$4 sm:$0xff]  }
 0x278   :  { %8035 = vmatprep.subr.bf16.mxu0 %v10200_v61  ;;  %8121 = vmatprep.subr.bf16.mxu1 %v10202_v62  ;;  %v445_v40 = vld [vmem:[%s12918_s1 + $0xcc8] sm:$0xff]  ;;  %v10367_v62 = vcombine.low %v420_v48, %v432_v49 }
 0x279   :  { %v457_v61 = vld [vmem:[%s12918_s1 + $0xd28] sm:$0xff] }
 0x27a   :  { %v10394_v2 = vcombine.high %v445_v40, %v457_v61  ;;  %v10393_v36 = vcombine.low %v445_v40, %v457_v61  ;;  %v62_v61 = vld [vmem:[%s12918_s1 + $0xd0] sm:$0xff] }
 0x27b   :  { %8036 = vmatpush1.bf16.msra.mxu0 %v10199_v4  ;;  %8122 = vmatpush1.bf16.msra.mxu1 %v10201_v5  ;;  %v480_v4 = vld [vmem:[%s12918_s1 + $0xde0] sm:$0xff]  ;;  %v469_v5 = vld [vmem:[%s12918_s1 + $0xd88] sm:$0xff] }
 0x27c   :  { %8037 = vmatprep.subr.bf16.mxu0 %v10224_v6  ;;  %8123 = vmatprep.subr.bf16.mxu1 %v10226_v7  ;;  %v481_v6 = vld [vmem:[%s12918_s1 + $0xde8] sm:$0xff]  ;;  %v10391_v7 = vcombine.low %v444_v58, %v456_v59  ;;  %v10416_v51 = vcombine.high %v468_v3, %v480_v4 }
 0x27d   :  { %v10418_v8 = vcombine.high %v469_v5, %v481_v6  ;;  %v10417_v15 = vcombine.low %v469_v5, %v481_v6 }
 0x27f   :  { %8038 = vmatpush1.bf16.msra.mxu0 %v10223_v11  ;;  %8124 = vmatpush1.bf16.msra.mxu1 %v10225_v12  ;;  %v504_v11 = vld [vmem:[%s12918_s1 + $0xea0] sm:$0xff]  ;;  %v493_v12 = vld [vmem:[%s12918_s1 + $0xe48] sm:$0xff] }
 0x280   :  { %8039 = vmatprep.subr.bf16.mxu0 %v10248_v55  ;;  %8125 = vmatprep.subr.bf16.mxu1 %v10250_v13  ;;  %v505_v55 = vld [vmem:[%s12918_s1 + $0xea8] sm:$0xff]  ;;  %v10415_v13 = vcombine.low %v468_v3, %v480_v4  ;;  %v10440_v16 = vcombine.high %v492_v9, %v504_v11 }
 0x281   :  { %v10442_v17 = vcombine.high %v493_v12, %v505_v55  ;;  %v10441_v23 = vcombine.low %v493_v12, %v505_v55 }
 0x283   :  { %8040 = vmatpush1.bf16.msra.mxu0 %v10247_v19  ;;  %8126 = vmatpush1.bf16.msra.mxu1 %v10249_v20  ;;  %v528_v19 = vld [vmem:[%s12918_s1 + $0xf60] sm:$0xff]  ;;  %v517_v20 = vld [vmem:[%s12918_s1 + $0xf08] sm:$0xff] }
 0x284   :  { %8041 = vmatprep.subr.bf16.mxu0 %v10272_v21  ;;  %8127 = vmatprep.subr.bf16.mxu1 %v10274_v22  ;;  %v529_v21 = vld [vmem:[%s12918_s1 + $0xf68] sm:$0xff]  ;;  %v10439_v22 = vcombine.low %v492_v9, %v504_v11  ;;  %v10464_v24 = vcombine.high %v516_v18, %v528_v19 }
 0x285   :  { %v10466_v25 = vcombine.high %v517_v20, %v529_v21  ;;  %v10465_v32 = vcombine.low %v517_v20, %v529_v21 }
 0x287   :  { %8042 = vmatpush1.bf16.msra.mxu0 %v10271_v28  ;;  %8128 = vmatpush1.bf16.msra.mxu1 %v10273_v29  ;;  %v552_v28 = vld [vmem:[%s12918_s1 + $0x1020] sm:$0xff]  ;;  %v541_v29 = vld [vmem:[%s12918_s1 + $0xfc8] sm:$0xff] }
 0x288   :  { %8043 = vmatprep.subr.bf16.mxu0 %v10296_v30  ;;  %8129 = vmatprep.subr.bf16.mxu1 %v10298_v31  ;;  %v553_v30 = vld [vmem:[%s12918_s1 + $0x1028] sm:$0xff]  ;;  %v10463_v31 = vcombine.low %v516_v18, %v528_v19  ;;  %v10488_v33 = vcombine.high %v540_v26, %v552_v28 }
 0x289   :  { %v10490_v34 = vcombine.high %v541_v29, %v553_v30  ;;  %v10489_v14 = vcombine.low %v541_v29, %v553_v30  ;;  %v158_v30 = vld [vmem:[%s12918_s1 + $0x3d0] sm:$0xff] }
 0x28b   :  { %8044 = vmatpush1.bf16.msra.mxu0 %v10295_v37  ;;  %8130 = vmatpush1.bf16.msra.mxu1 %v10297_v38  ;;  %v576_v37 = vld [vmem:[%s12918_s1 + $0x10e0] sm:$0xff]  ;;  %v565_v38 = vld [vmem:[%s12918_s1 + $0x1088] sm:$0xff] }
 0x28c   :  { %8045 = vmatprep.subr.bf16.mxu0 %v10320_v39  ;;  %8131 = vmatprep.subr.bf16.mxu1 %v10322_v41  ;;  %v577_v39 = vld [vmem:[%s12918_s1 + $0x10e8] sm:$0xff]  ;;  %v10487_v41 = vcombine.low %v540_v26, %v552_v28  ;;  %v10512_v42 = vcombine.high %v564_v35, %v576_v37 }
 0x28d   :  { %v10514_v43 = vcombine.high %v565_v38, %v577_v39  ;;  %v10513_v48 = vcombine.low %v565_v38, %v577_v39  ;;  %v182_v39 = vld [vmem:[%s12918_s1 + $0x490] sm:$0xff] }
 0x28f   :  { %8046 = vmatpush1.bf16.msra.mxu0 %v10319_v56  ;;  %8132 = vmatpush1.bf16.msra.mxu1 %v10321_v45  ;;  %v600_v56 = vld [vmem:[%s12918_s1 + $0x11a0] sm:$0xff]  ;;  %v589_v45 = vld [vmem:[%s12918_s1 + $0x1148] sm:$0xff] }
 0x290   :  { %8047 = vmatprep.subr.bf16.mxu0 %v10344_v46  ;;  %8133 = vmatprep.subr.bf16.mxu1 %v10346_v47  ;;  %v601_v46 = vld [vmem:[%s12918_s1 + $0x11a8] sm:$0xff]  ;;  %v10511_v47 = vcombine.low %v564_v35, %v576_v37  ;;  %v10536_v49 = vcombine.high %v588_v44, %v600_v56 }
 0x291   :  { %v10538_v50 = vcombine.high %v589_v45, %v601_v46  ;;  %v10537_v58 = vcombine.low %v589_v45, %v601_v46  ;;  %v206_v46 = vld [vmem:[%s12918_s1 + $0x550] sm:$0xff] }
 0x293   :  { %8048 = vmatpush1.bf16.msra.mxu0 %v10343_v53  ;;  %8134 = vmatpush1.bf16.msra.mxu1 %v10345_v54  ;;  %v50_v53 = vld [vmem:[%s12918_s1 + $0x70] sm:$0xff]  ;;  %v39_v54 = vld [vmem:[%s12918_s1 + $0x18] sm:$0xff] }
 0x294   :  { %8060 = vmatprep.subr.bf16.mxu0 %v10368_v57  ;;  %8146 = vmatprep.subr.bf16.mxu1 %v10370_v10  ;;  %v51_v57 = vld [vmem:[%s12918_s1 + $0x78] sm:$0xff]  ;;  %v10535_v10 = vcombine.low %v588_v44, %v600_v56  ;;  %v9988_v59 = vcombine.high %v38_v52, %v50_v53  ;;  %v9987_v3 = vcombine.low %v38_v52, %v50_v53 }
 0x295   :  { %v9990_v40 = vcombine.high %v39_v54, %v51_v57  ;;  %v9989_v4 = vcombine.low %v39_v54, %v51_v57  ;;  %v230_v57 = vld [vmem:[%s12918_s1 + $0x610] sm:$0xff] }
 0x296   :  { %8050 = vmatmul.mubr.bf16.vlgmr.msra.gmra.mrb[0].mxu0 %v11165_v60  ;;  %8136 = vmatmul.mubr.bf16.vlgmr.msra.gmra.mrb[0].mxu1 %v11165_v60 }
 0x297   :  { %8061 = vmatpush1.bf16.msra.mxu0 %v10367_v62  ;;  %8147 = vmatpush1.bf16.msra.mxu1 %v10369_v0  ;;  %v74_v62 = vld [vmem:[%s12918_s1 + $0x130] sm:$0xff] }
 0x298   :  { %8062 = vmatprep.subr.bf16.mxu0 %v10392_v1  ;;  %8148 = vmatprep.subr.bf16.mxu1 %v10394_v2  ;;  %v11270_v0 = vld [vmem:[%s12917_s0 + $0x8] ss:$12 sps:$4 sm:$0xff]   ;;  %v63_v1 = vld [vmem:[%s12918_s1 + $0xd8] sm:$0xff]  ;;  %v10012_v5 = vcombine.high %v62_v61, %v74_v62  ;;  %v10011_v9 = vcombine.low %v62_v61, %v74_v62 }
 0x299   :  { %8092 = vmatprep.mubr.bf16.mxu0 %v10814_v27  ;;  %8178 = vmatprep.mubr.bf16.mxu1 %v10814_v27  ;;  %v75_v2 = vld [vmem:[%s12918_s1 + $0x138] sm:$0xff] }
 0x29a   :  { %v10014_v6 = vcombine.high %v63_v1, %v75_v2  ;;  %v10013_v11 = vcombine.low %v63_v1, %v75_v2  ;;  %v254_v2 = vld [vmem:[%s12918_s1 + $0x6d0] sm:$0xff] }
 0x29b   :  { %8063 = vmatpush1.bf16.msra.mxu0 %v10391_v7  ;;  %8149 = vmatpush1.bf16.msra.mxu1 %v10393_v36  ;;  %v86_v7 = vld [vmem:[%s12918_s1 + $0x190] sm:$0xff] }
 0x29c   :  { %8064 = vmatprep.subr.bf16.mxu0 %v10416_v51  ;;  %8150 = vmatprep.subr.bf16.mxu1 %v10418_v8  ;;  %v98_v36 = vld [vmem:[%s12918_s1 + $0x1f0] sm:$0xff]  ;;  %v87_v51 = vld [vmem:[%s12918_s1 + $0x198] sm:$0xff] }
 0x29d   :  { %v99_v8 = vld [vmem:[%s12918_s1 + $0x1f8] sm:$0xff]  ;;  %v10036_v12 = vcombine.high %v86_v7, %v98_v36  ;;  %v10035_v18 = vcombine.low %v86_v7, %v98_v36 }
 0x29e   :  { %v10038_v55 = vcombine.high %v87_v51, %v99_v8  ;;  %v10037_v19 = vcombine.low %v87_v51, %v99_v8  ;;  %v278_v8 = vld [vmem:[%s12918_s1 + $0x790] sm:$0xff] }
 0x29f   :  { %8065 = vmatpush1.bf16.msra.mxu0 %v10415_v13  ;;  %8151 = vmatpush1.bf16.msra.mxu1 %v10417_v15  ;;  %v110_v13 = vld [vmem:[%s12918_s1 + $0x250] sm:$0xff] }
 0x2a0   :  { %8066 = vmatprep.subr.bf16.mxu0 %v10440_v16  ;;  %8152 = vmatprep.subr.bf16.mxu1 %v10442_v17  ;;  %v122_v15 = vld [vmem:[%s12918_s1 + $0x2b0] sm:$0xff]  ;;  %v111_v16 = vld [vmem:[%s12918_s1 + $0x258] sm:$0xff] }
 0x2a1   :  { %v123_v17 = vld [vmem:[%s12918_s1 + $0x2b8] sm:$0xff]  ;;  %v10060_v20 = vcombine.high %v110_v13, %v122_v15 }
 0x2a2   :  { %v10062_v21 = vcombine.high %v111_v16, %v123_v17  ;;  %v10061_v26 = vcombine.low %v111_v16, %v123_v17  ;;  %v302_v17 = vld [vmem:[%s12918_s1 + $0x850] sm:$0xff] }
 0x2a3   :  { %8067 = vmatpush1.bf16.msra.mxu0 %v10439_v22  ;;  %8153 = vmatpush1.bf16.msra.mxu1 %v10441_v23  ;;  %v134_v22 = vld [vmem:[%s12918_s1 + $0x310] sm:$0xff] }
 0x2a4   :  { %8068 = vmatprep.subr.bf16.mxu0 %v10464_v24  ;;  %8154 = vmatprep.subr.bf16.mxu1 %v10466_v25  ;;  %v146_v23 = vld [vmem:[%s12918_s1 + $0x370] sm:$0xff]  ;;  %v147_v24 = vld [vmem:[%s12918_s1 + $0x378] sm:$0xff]  ;;  %v10059_v25 = vcombine.low %v110_v13, %v122_v15 }
 0x2a5   :  { %v10084_v28 = vcombine.high %v134_v22, %v146_v23 }
 0x2a7   :  { %8069 = vmatpush1.bf16.msra.mxu0 %v10463_v31  ;;  %8155 = vmatpush1.bf16.msra.mxu1 %v10465_v32  ;;  %v170_v31 = vld [vmem:[%s12918_s1 + $0x430] sm:$0xff]  ;;  %v159_v32 = vld [vmem:[%s12918_s1 + $0x3d8] sm:$0xff] }
 0x2a8   :  { %8070 = vmatprep.subr.bf16.mxu0 %v10488_v33  ;;  %8156 = vmatprep.subr.bf16.mxu1 %v10490_v34  ;;  %v171_v33 = vld [vmem:[%s12918_s1 + $0x438] sm:$0xff]  ;;  %v10083_v34 = vcombine.low %v134_v22, %v146_v23  ;;  %v10108_v37 = vcombine.high %v158_v30, %v170_v31 }
 0x2a9   :  { %v10110_v38 = vcombine.high %v159_v32, %v171_v33  ;;  %v10109_v44 = vcombine.low %v159_v32, %v171_v33  ;;  %v350_v33 = vld [vmem:[%s12918_s1 + $0x9d0] sm:$0xff] }
 0x2ab   :  { %8071 = vmatpush1.bf16.msra.mxu0 %v10487_v41  ;;  %8157 = vmatpush1.bf16.msra.mxu1 %v10489_v14  ;;  %v194_v41 = vld [vmem:[%s12918_s1 + $0x4f0] sm:$0xff]  ;;  %v183_v14 = vld [vmem:[%s12918_s1 + $0x498] sm:$0xff] }
 0x2ac   :  { %8072 = vmatprep.subr.bf16.mxu0 %v10512_v42  ;;  %8158 = vmatprep.subr.bf16.mxu1 %v10514_v43  ;;  %v195_v42 = vld [vmem:[%s12918_s1 + $0x4f8] sm:$0xff]  ;;  %v10107_v43 = vcombine.low %v158_v30, %v170_v31  ;;  %v10132_v56 = vcombine.high %v182_v39, %v194_v41 }
 0x2ad   :  { %v10134_v45 = vcombine.high %v183_v14, %v195_v42  ;;  %v10133_v52 = vcombine.low %v183_v14, %v195_v42  ;;  %v374_v42 = vld [vmem:[%s12918_s1 + $0xa90] sm:$0xff] }
 0x2af   :  { %8073 = vmatpush1.bf16.msra.mxu0 %v10511_v47  ;;  %8159 = vmatpush1.bf16.msra.mxu1 %v10513_v48  ;;  %v218_v47 = vld [vmem:[%s12918_s1 + $0x5b0] sm:$0xff]  ;;  %v207_v48 = vld [vmem:[%s12918_s1 + $0x558] sm:$0xff] }
 0x2b0   :  { %8074 = vmatprep.subr.bf16.mxu0 %v10536_v49  ;;  %8160 = vmatprep.subr.bf16.mxu1 %v10538_v50  ;;  %v219_v49 = vld [vmem:[%s12918_s1 + $0x5b8] sm:$0xff]  ;;  %v10131_v50 = vcombine.low %v182_v39, %v194_v41  ;;  %v10156_v53 = vcombine.high %v206_v46, %v218_v47 }
 0x2b1   :  { %v10158_v54 = vcombine.high %v207_v48, %v219_v49  ;;  %v10157_v61 = vcombine.low %v207_v48, %v219_v49  ;;  %v398_v49 = vld [vmem:[%s12918_s1 + $0xb50] sm:$0xff] }
 0x2b3   :  { %8075 = vmatpush1.bf16.msra.mxu0 %v10535_v10  ;;  %8161 = vmatpush1.bf16.msra.mxu1 %v10537_v58  ;;  %v242_v10 = vld [vmem:[%s12918_s1 + $0x670] sm:$0xff]  ;;  %v231_v58 = vld [vmem:[%s12918_s1 + $0x618] sm:$0xff] }
 0x2b4   :  { %8189 = vmatprep.subr.bf16.mxu0 %v9988_v59  ;;  %8275 = vmatprep.subr.bf16.mxu1 %v9990_v40  ;;  %v243_v59 = vld [vmem:[%s12918_s1 + $0x678] sm:$0xff]  ;;  %v10155_v40 = vcombine.low %v206_v46, %v218_v47  ;;  %v10180_v62 = vcombine.high %v230_v57, %v242_v10 }
 0x2b5   :  { %v10182_v1 = vcombine.high %v231_v58, %v243_v59  ;;  %v10181_v7 = vcombine.low %v231_v58, %v243_v59  ;;  %v422_v59 = vld [vmem:[%s12918_s1 + $0xc10] sm:$0xff] }
 0x2b6   :  { %8093 = vmatmul.mubr.bf16.vlgmr.msra.gmra.mrb[0].mxu0 %v11270_v0  ;;  %8179 = vmatmul.mubr.bf16.vlgmr.msra.gmra.mrb[0].mxu1 %v11270_v0 }
 0x2b7   :  { %8190 = vmatpush1.bf16.msra.mxu0 %v9987_v3  ;;  %8276 = vmatpush1.bf16.msra.mxu1 %v9989_v4  ;;  %v266_v3 = vld [vmem:[%s12918_s1 + $0x730] sm:$0xff]  ;;  %v255_v4 = vld [vmem:[%s12918_s1 + $0x6d8] sm:$0xff] }
 0x2b8   :  { %8191 = vmatprep.subr.bf16.mxu0 %v10012_v5  ;;  %8277 = vmatprep.subr.bf16.mxu1 %v10014_v6  ;;  %v267_v5 = vld [vmem:[%s12918_s1 + $0x738] sm:$0xff]  ;;  %v10179_v6 = vcombine.low %v230_v57, %v242_v10  ;;  %v10204_v36 = vcombine.high %v254_v2, %v266_v3 }
 0x2b9   :  { %8221 = vmatprep.mubr.bf16.mxu0 %v10976_v63  ;;  %8307 = vmatprep.mubr.bf16.mxu1 %v10976_v63  ;;  %v135_v63 = vld [vmem:[%s12918_s1 + $0x318] sm:$0xff]  ;;  %v10206_v51 = vcombine.high %v255_v4, %v267_v5  ;;  %v10205_v13 = vcombine.low %v255_v4, %v267_v5  ;;  %v446_v5 = vld [vmem:[%s12918_s1 + $0xcd0] sm:$0xff] }
 0x2ba   :  { %v10086_v29 = vcombine.high %v135_v63, %v147_v24  ;;  %v10085_v35 = vcombine.low %v135_v63, %v147_v24  ;;  %v326_v24 = vld [vmem:[%s12918_s1 + $0x910] sm:$0xff] }
 0x2bb   :  { %8192 = vmatpush1.bf16.msra.mxu0 %v10011_v9  ;;  %8278 = vmatpush1.bf16.msra.mxu1 %v10013_v11  ;;  %v290_v9 = vld [vmem:[%s12918_s1 + $0x7f0] sm:$0xff]  ;;  %v279_v11 = vld [vmem:[%s12918_s1 + $0x798] sm:$0xff] }
 0x2bc   :  { %8193 = vmatprep.subr.bf16.mxu0 %v10036_v12  ;;  %8279 = vmatprep.subr.bf16.mxu1 %v10038_v55  ;;  %v291_v12 = vld [vmem:[%s12918_s1 + $0x7f8] sm:$0xff]  ;;  %v10203_v55 = vcombine.low %v254_v2, %v266_v3  ;;  %v10228_v15 = vcombine.high %v278_v8, %v290_v9 }
 0x2bd   :  { %v10230_v16 = vcombine.high %v279_v11, %v291_v12  ;;  %v10229_v22 = vcombine.low %v279_v11, %v291_v12  ;;  %v470_v12 = vld [vmem:[%s12918_s1 + $0xd90] sm:$0xff] }
 0x2bf   :  { %8194 = vmatpush1.bf16.msra.mxu0 %v10035_v18  ;;  %8280 = vmatpush1.bf16.msra.mxu1 %v10037_v19  ;;  %v314_v18 = vld [vmem:[%s12918_s1 + $0x8b0] sm:$0xff]  ;;  %v303_v19 = vld [vmem:[%s12918_s1 + $0x858] sm:$0xff] }
 0x2c0   :  { %8195 = vmatprep.subr.bf16.mxu0 %v10060_v20  ;;  %8281 = vmatprep.subr.bf16.mxu1 %v10062_v21  ;;  %v315_v20 = vld [vmem:[%s12918_s1 + $0x8b8] sm:$0xff]  ;;  %v10227_v21 = vcombine.low %v278_v8, %v290_v9  ;;  %v10252_v23 = vcombine.high %v302_v17, %v314_v18 }
 0x2c1   :  { %v10254_v63 = vcombine.high %v303_v19, %v315_v20  ;;  %v10253_v30 = vcombine.low %v303_v19, %v315_v20  ;;  %v494_v20 = vld [vmem:[%s12918_s1 + $0xe50] sm:$0xff] }
 0x2c3   :  { %8196 = vmatpush1.bf16.msra.mxu0 %v10059_v25  ;;  %8282 = vmatpush1.bf16.msra.mxu1 %v10061_v26  ;;  %v338_v25 = vld [vmem:[%s12918_s1 + $0x970] sm:$0xff]  ;;  %v327_v26 = vld [vmem:[%s12918_s1 + $0x918] sm:$0xff] }
 0x2c4   :  { %8197 = vmatprep.subr.bf16.mxu0 %v10084_v28  ;;  %8283 = vmatprep.subr.bf16.mxu1 %v10086_v29  ;;  %v339_v28 = vld [vmem:[%s12918_s1 + $0x978] sm:$0xff]  ;;  %v10251_v29 = vcombine.low %v302_v17, %v314_v18  ;;  %v10276_v31 = vcombine.high %v326_v24, %v338_v25 }
 0x2c5   :  { %v10278_v32 = vcombine.high %v327_v26, %v339_v28  ;;  %v10277_v39 = vcombine.low %v327_v26, %v339_v28  ;;  %v518_v26 = vld [vmem:[%s12918_s1 + $0xf10] sm:$0xff] }
 0x2c6   :  { %v530_v28 = vld [vmem:[%s12918_s1 + $0xf70] sm:$0xff] }
 0x2c7   :  { %8198 = vmatpush1.bf16.msra.mxu0 %v10083_v34  ;;  %8284 = vmatpush1.bf16.msra.mxu1 %v10085_v35  ;;  %v362_v34 = vld [vmem:[%s12918_s1 + $0xa30] sm:$0xff]  ;;  %v351_v35 = vld [vmem:[%s12918_s1 + $0x9d8] sm:$0xff] }
 0x2c8   :  { %8199 = vmatprep.subr.bf16.mxu0 %v10108_v37  ;;  %8285 = vmatprep.subr.bf16.mxu1 %v10110_v38  ;;  %v363_v37 = vld [vmem:[%s12918_s1 + $0xa38] sm:$0xff]  ;;  %v10275_v38 = vcombine.low %v326_v24, %v338_v25  ;;  %v10300_v41 = vcombine.high %v350_v33, %v362_v34 }
 0x2c9   :  { %v10302_v14 = vcombine.high %v351_v35, %v363_v37  ;;  %v10301_v46 = vcombine.low %v351_v35, %v363_v37  ;;  %v542_v35 = vld [vmem:[%s12918_s1 + $0xfd0] sm:$0xff] }
 0x2ca   :  { %v554_v37 = vld [vmem:[%s12918_s1 + $0x1030] sm:$0xff] }
 0x2cb   :  { %8200 = vmatpush1.bf16.msra.mxu0 %v10107_v43  ;;  %8286 = vmatpush1.bf16.msra.mxu1 %v10109_v44  ;;  %v386_v43 = vld [vmem:[%s12918_s1 + $0xaf0] sm:$0xff]  ;;  %v375_v44 = vld [vmem:[%s12918_s1 + $0xa98] sm:$0xff] }
 0x2cc   :  { %8201 = vmatprep.subr.bf16.mxu0 %v10132_v56  ;;  %8287 = vmatprep.subr.bf16.mxu1 %v10134_v45  ;;  %v387_v56 = vld [vmem:[%s12918_s1 + $0xaf8] sm:$0xff]  ;;  %v10299_v45 = vcombine.low %v350_v33, %v362_v34  ;;  %v10324_v47 = vcombine.high %v374_v42, %v386_v43  ;;  %v10468_v33 = vcombine.high %v518_v26, %v530_v28 }
 0x2cd   :  { %v10326_v48 = vcombine.high %v375_v44, %v387_v56  ;;  %v10325_v57 = vcombine.low %v375_v44, %v387_v56  ;;  %v566_v44 = vld [vmem:[%s12918_s1 + $0x1090] sm:$0xff] }
 0x2ce   :  { %v578_v56 = vld [vmem:[%s12918_s1 + $0x10f0] sm:$0xff] }
 0x2cf   :  { %8202 = vmatpush1.bf16.msra.mxu0 %v10131_v50  ;;  %8288 = vmatpush1.bf16.msra.mxu1 %v10133_v52  ;;  %v410_v50 = vld [vmem:[%s12918_s1 + $0xbb0] sm:$0xff]  ;;  %v399_v52 = vld [vmem:[%s12918_s1 + $0xb58] sm:$0xff] }
 0x2d0   :  { %8203 = vmatprep.subr.bf16.mxu0 %v10156_v53  ;;  %8289 = vmatprep.subr.bf16.mxu1 %v10158_v54  ;;  %v411_v53 = vld [vmem:[%s12918_s1 + $0xbb8] sm:$0xff]  ;;  %v10323_v54 = vcombine.low %v374_v42, %v386_v43  ;;  %v10348_v10 = vcombine.high %v398_v49, %v410_v50  ;;  %v10492_v42 = vcombine.high %v542_v35, %v554_v37 }
 0x2d1   :  { %v10350_v58 = vcombine.high %v399_v52, %v411_v53  ;;  %v10349_v2 = vcombine.low %v399_v52, %v411_v53  ;;  %v590_v52 = vld [vmem:[%s12918_s1 + $0x1150] sm:$0xff] }
 0x2d2   :  { %v602_v53 = vld [vmem:[%s12918_s1 + $0x11b0] sm:$0xff] }
 0x2d3   :  { %8204 = vmatpush1.bf16.msra.mxu0 %v10155_v40  ;;  %8290 = vmatpush1.bf16.msra.mxu1 %v10157_v61  ;;  %v434_v40 = vld [vmem:[%s12918_s1 + $0xc70] sm:$0xff]  ;;  %v423_v61 = vld [vmem:[%s12918_s1 + $0xc18] sm:$0xff] }
 0x2d4   :  { %8205 = vmatprep.subr.bf16.mxu0 %v10180_v62  ;;  %8291 = vmatprep.subr.bf16.mxu1 %v10182_v1  ;;  %v435_v62 = vld [vmem:[%s12918_s1 + $0xc78] sm:$0xff]  ;;  %v10347_v1 = vcombine.low %v398_v49, %v410_v50  ;;  %v10372_v3 = vcombine.high %v422_v59, %v434_v40  ;;  %v10516_v49 = vcombine.high %v566_v44, %v578_v56 }
 0x2d5   :  { %v10374_v4 = vcombine.high %v423_v61, %v435_v62  ;;  %v10373_v8 = vcombine.low %v423_v61, %v435_v62  ;;  %v40_v61 = vld [vmem:[%s12918_s1 + $0x20] sm:$0xff] }
 0x2d6   :  { %v52_v62 = vld [vmem:[%s12918_s1 + $0x80] sm:$0xff] }
 0x2d7   :  { %8206 = vmatpush1.bf16.msra.mxu0 %v10179_v6  ;;  %8292 = vmatpush1.bf16.msra.mxu1 %v10181_v7  ;;  %v458_v6 = vld [vmem:[%s12918_s1 + $0xd30] sm:$0xff]  ;;  %v447_v7 = vld [vmem:[%s12918_s1 + $0xcd8] sm:$0xff] }
 0x2d8   :  { %8207 = vmatprep.subr.bf16.mxu0 %v10204_v36  ;;  %8293 = vmatprep.subr.bf16.mxu1 %v10206_v51  ;;  %v459_v36 = vld [vmem:[%s12918_s1 + $0xd38] sm:$0xff]  ;;  %v10371_v51 = vcombine.low %v422_v59, %v434_v40  ;;  %v10396_v9 = vcombine.high %v446_v5, %v458_v6  ;;  %v10540_v59 = vcombine.high %v590_v52, %v602_v53 }
 0x2d9   :  { %v10398_v11 = vcombine.high %v447_v7, %v459_v36  ;;  %v10397_v17 = vcombine.low %v447_v7, %v459_v36  ;;  %v64_v7 = vld [vmem:[%s12918_s1 + $0xe0] sm:$0xff] }
 0x2da   :  { %v76_v36 = vld [vmem:[%s12918_s1 + $0x140] sm:$0xff] }
 0x2db   :  { %8208 = vmatpush1.bf16.msra.mxu0 %v10203_v55  ;;  %8294 = vmatpush1.bf16.msra.mxu1 %v10205_v13  ;;  %v482_v55 = vld [vmem:[%s12918_s1 + $0xdf0] sm:$0xff]  ;;  %v471_v13 = vld [vmem:[%s12918_s1 + $0xd98] sm:$0xff] }
 0x2dc   :  { %8209 = vmatprep.subr.bf16.mxu0 %v10228_v15  ;;  %8295 = vmatprep.subr.bf16.mxu1 %v10230_v16  ;;  %v483_v15 = vld [vmem:[%s12918_s1 + $0xdf8] sm:$0xff]  ;;  %v10395_v16 = vcombine.low %v446_v5, %v458_v6  ;;  %v10420_v18 = vcombine.high %v470_v12, %v482_v55  ;;  %v9992_v5 = vcombine.high %v40_v61, %v52_v62 }
 0x2dd   :  { %v10422_v19 = vcombine.high %v471_v13, %v483_v15 }
 0x2df   :  { %8210 = vmatpush1.bf16.msra.mxu0 %v10227_v21  ;;  %8296 = vmatpush1.bf16.msra.mxu1 %v10229_v22  ;;  %v506_v21 = vld [vmem:[%s12918_s1 + $0xeb0] sm:$0xff]  ;;  %v507_v22 = vld [vmem:[%s12918_s1 + $0xeb8] sm:$0xff] }
 0x2e0   :  { %8211 = vmatprep.subr.bf16.mxu0 %v10252_v23  ;;  %8297 = vmatprep.subr.bf16.mxu1 %v10254_v63  ;;  %v10419_v23 = vcombine.low %v470_v12, %v482_v55  ;;  %v10421_v63 = vcombine.low %v471_v13, %v483_v15  ;;  %v10444_v24 = vcombine.high %v494_v20, %v506_v21  ;;  %v88_v13 = vld [vmem:[%s12918_s1 + $0x1a0] sm:$0xff] }
 0x2e1   :  { %v10016_v12 = vcombine.high %v64_v7, %v76_v36  ;;  %v100_v15 = vld [vmem:[%s12918_s1 + $0x200] sm:$0xff] }
 0x2e3   :  { %8212 = vmatpush1.bf16.msra.mxu0 %v10251_v29  ;;  %8298 = vmatpush1.bf16.msra.mxu1 %v10253_v30  ;;  %v519_v29 = vld [vmem:[%s12918_s1 + $0xf18] sm:$0xff] }
 0x2e4   :  { %8213 = vmatprep.subr.bf16.mxu0 %v10276_v31  ;;  %8299 = vmatprep.subr.bf16.mxu1 %v10278_v32  ;;  %v531_v30 = vld [vmem:[%s12918_s1 + $0xf78] sm:$0xff]  ;;  %v10443_v31 = vcombine.low %v494_v20, %v506_v21  ;;  %v10040_v20 = vcombine.high %v88_v13, %v100_v15 }
 0x2e5   :  { %v10470_v34 = vcombine.high %v519_v29, %v531_v30 }
 0x2e7   :  { %8214 = vmatpush1.bf16.msra.mxu0 %v10275_v38  ;;  %8300 = vmatpush1.bf16.msra.mxu1 %v10277_v39  ;;  %v543_v38 = vld [vmem:[%s12918_s1 + $0xfd8] sm:$0xff] }
 0x2e8   :  { %8215 = vmatprep.subr.bf16.mxu0 %v10300_v41  ;;  %8301 = vmatprep.subr.bf16.mxu1 %v10302_v14  ;;  %v555_v39 = vld [vmem:[%s12918_s1 + $0x1038] sm:$0xff]  ;;  %v10467_v41 = vcombine.low %v518_v26, %v530_v28  ;;  %v10469_v14 = vcombine.low %v519_v29, %v531_v30  ;;  %v136_v29 = vld [vmem:[%s12918_s1 + $0x320] sm:$0xff] }
 0x2e9   :  { %v10494_v43 = vcombine.high %v543_v38, %v555_v39  ;;  %v148_v30 = vld [vmem:[%s12918_s1 + $0x380] sm:$0xff] }
 0x2eb   :  { %8216 = vmatpush1.bf16.msra.mxu0 %v10299_v45  ;;  %8302 = vmatpush1.bf16.msra.mxu1 %v10301_v46  ;;  %v567_v45 = vld [vmem:[%s12918_s1 + $0x1098] sm:$0xff] }
 0x2ec   :  { %8217 = vmatprep.subr.bf16.mxu0 %v10324_v47  ;;  %8303 = vmatprep.subr.bf16.mxu1 %v10326_v48  ;;  %v579_v46 = vld [vmem:[%s12918_s1 + $0x10f8] sm:$0xff]  ;;  %v10491_v47 = vcombine.low %v542_v35, %v554_v37  ;;  %v10493_v48 = vcombine.low %v543_v38, %v555_v39  ;;  %v10088_v35 = vcombine.high %v136_v29, %v148_v30  ;;  %v160_v38 = vld [vmem:[%s12918_s1 + $0x3e0] sm:$0xff] }
 0x2ed   :  { %v10518_v50 = vcombine.high %v567_v45, %v579_v46  ;;  %v172_v39 = vld [vmem:[%s12918_s1 + $0x440] sm:$0xff] }
 0x2ef   :  { %8218 = vmatpush1.bf16.msra.mxu0 %v10323_v54  ;;  %8304 = vmatpush1.bf16.msra.mxu1 %v10325_v57  ;;  %v591_v54 = vld [vmem:[%s12918_s1 + $0x1158] sm:$0xff] }
 0x2f0   :  { %8219 = vmatprep.subr.bf16.mxu0 %v10348_v10  ;;  %8305 = vmatprep.subr.bf16.mxu1 %v10350_v58  ;;  %v603_v57 = vld [vmem:[%s12918_s1 + $0x11b8] sm:$0xff]  ;;  %v10515_v10 = vcombine.low %v566_v44, %v578_v56  ;;  %v10517_v58 = vcombine.low %v567_v45, %v579_v46  ;;  %v10112_v44 = vcombine.high %v160_v38, %v172_v39  ;;  %v184_v45 = vld [vmem:[%s12918_s1 + $0x4a0] sm:$0xff] }
 0x2f1   :  { %v10542_v40 = vcombine.high %v591_v54, %v603_v57  ;;  %v196_v46 = vld [vmem:[%s12918_s1 + $0x500] sm:$0xff] }
 0x2f3   :  { %8220 = vmatpush1.bf16.msra.mxu0 %v10347_v1  ;;  %8306 = vmatpush1.bf16.msra.mxu1 %v10349_v2  ;;  %v41_v1 = vld [vmem:[%s12918_s1 + $0x28] sm:$0xff] }
 0x2f4   :  { %8232 = vmatprep.subr.bf16.mxu0 %v10372_v3  ;;  %8318 = vmatprep.subr.bf16.mxu1 %v10374_v4  ;;  %v53_v2 = vld [vmem:[%s12918_s1 + $0x88] sm:$0xff]  ;;  %v10539_v3 = vcombine.low %v590_v52, %v602_v53  ;;  %v10541_v4 = vcombine.low %v591_v54, %v603_v57  ;;  %v10136_v52 = vcombine.high %v184_v45, %v196_v46  ;;  %v208_v54 = vld [vmem:[%s12918_s1 + $0x560] sm:$0xff] }
 0x2f5   :  { %v9994_v6 = vcombine.high %v41_v1, %v53_v2  ;;  %v220_v57 = vld [vmem:[%s12918_s1 + $0x5c0] sm:$0xff] }
 0x2f6   :  { %8222 = vmatmul.mubr.bf16.vlgmr.msra.gmra.mrb[4].mxu0 %v11165_v60  ;;  %8308 = vmatmul.mubr.bf16.vlgmr.msra.gmra.mrb[4].mxu1 %v11165_v60  ;;  %v495_v60 = vld [vmem:[%s12918_s1 + $0xe58] sm:$0xff] }
 0x2f7   :  { %8233 = vmatpush1.bf16.msra.mxu0 %v10371_v51  ;;  %8319 = vmatpush1.bf16.msra.mxu1 %v10373_v8  ;;  %v10446_v25 = vcombine.high %v495_v60, %v507_v22  ;;  %v10445_v32 = vcombine.low %v495_v60, %v507_v22  ;;  %v65_v51 = vld [vmem:[%s12918_s1 + $0xe8] sm:$0xff]  ;;  %v112_v60 = vld [vmem:[%s12918_s1 + $0x260] sm:$0xff] }
 0x2f8   :  { %8234 = vmatprep.subr.bf16.mxu0 %v10396_v9  ;;  %8320 = vmatprep.subr.bf16.mxu1 %v10398_v11  ;;  %v77_v8 = vld [vmem:[%s12918_s1 + $0x148] sm:$0xff]  ;;  %v9991_v9 = vcombine.low %v40_v61, %v52_v62  ;;  %v9993_v11 = vcombine.low %v41_v1, %v53_v2  ;;  %v124_v22 = vld [vmem:[%s12918_s1 + $0x2c0] sm:$0xff]  ;;  %v10160_v61 = vcombine.high %v208_v54, %v220_v57 }
 0x2f9   :  { %8264 = vmatprep.mubr.bf16.mxu0 %v10814_v27  ;;  %8350 = vmatprep.mubr.bf16.mxu1 %v10814_v27  ;;  %v10018_v55 = vcombine.high %v65_v51, %v77_v8  ;;  %v10064_v26 = vcombine.high %v112_v60, %v124_v22  ;;  %v232_v1 = vld [vmem:[%s12918_s1 + $0x620] sm:$0xff] }
 0x2fa   :  { %v244_v2 = vld [vmem:[%s12918_s1 + $0x680] sm:$0xff] }
 0x2fb   :  { %8235 = vmatpush1.bf16.msra.mxu0 %v10395_v16  ;;  %8321 = vmatpush1.bf16.msra.mxu1 %v10397_v17  ;;  %v89_v16 = vld [vmem:[%s12918_s1 + $0x1a8] sm:$0xff] }
 0x2fc   :  { %8236 = vmatprep.subr.bf16.mxu0 %v10420_v18  ;;  %8322 = vmatprep.subr.bf16.mxu1 %v10422_v19  ;;  %v101_v17 = vld [vmem:[%s12918_s1 + $0x208] sm:$0xff]  ;;  %v10015_v18 = vcombine.low %v64_v7, %v76_v36  ;;  %v10017_v19 = vcombine.low %v65_v51, %v77_v8  ;;  %v10184_v7 = vcombine.high %v232_v1, %v244_v2  ;;  %v256_v51 = vld [vmem:[%s12918_s1 + $0x6e0] sm:$0xff] }
 0x2fd   :  { %v10042_v21 = vcombine.high %v89_v16, %v101_v17  ;;  %v268_v8 = vld [vmem:[%s12918_s1 + $0x740] sm:$0xff] }
 0x2ff   :  { %8237 = vmatpush1.bf16.msra.mxu0 %v10419_v23  ;;  %8323 = vmatpush1.bf16.msra.mxu1 %v10421_v63  ;;  %v113_v23 = vld [vmem:[%s12918_s1 + $0x268] sm:$0xff] }
 0x300   :  { %8238 = vmatprep.subr.bf16.mxu0 %v10444_v24  ;;  %8324 = vmatprep.subr.bf16.mxu1 %v10446_v25  ;;  %v125_v63 = vld [vmem:[%s12918_s1 + $0x2c8] sm:$0xff]  ;;  %v10039_v24 = vcombine.low %v88_v13, %v100_v15  ;;  %v10041_v25 = vcombine.low %v89_v16, %v101_v17  ;;  %v10208_v13 = vcombine.high %v256_v51, %v268_v8  ;;  %v280_v16 = vld [vmem:[%s12918_s1 + $0x7a0] sm:$0xff] }
 0x301   :  { %v10066_v28 = vcombine.high %v113_v23, %v125_v63  ;;  %v292_v17 = vld [vmem:[%s12918_s1 + $0x800] sm:$0xff] }
 0x303   :  { %8239 = vmatpush1.bf16.msra.mxu0 %v10443_v31  ;;  %8325 = vmatpush1.bf16.msra.mxu1 %v10445_v32  ;;  %v137_v31 = vld [vmem:[%s12918_s1 + $0x328] sm:$0xff] }
 0x304   :  { %8240 = vmatprep.subr.bf16.mxu0 %v10468_v33  ;;  %8326 = vmatprep.subr.bf16.mxu1 %v10470_v34  ;;  %v149_v32 = vld [vmem:[%s12918_s1 + $0x388] sm:$0xff]  ;;  %v10063_v33 = vcombine.low %v112_v60, %v124_v22  ;;  %v10065_v34 = vcombine.low %v113_v23, %v125_v63  ;;  %v10232_v60 = vcombine.high %v280_v16, %v292_v17  ;;  %v304_v23 = vld [vmem:[%s12918_s1 + $0x860] sm:$0xff] }
 0x305   :  { %v10090_v37 = vcombine.high %v137_v31, %v149_v32  ;;  %v316_v63 = vld [vmem:[%s12918_s1 + $0x8c0] sm:$0xff] }
 0x307   :  { %8241 = vmatpush1.bf16.msra.mxu0 %v10467_v41  ;;  %8327 = vmatpush1.bf16.msra.mxu1 %v10469_v14  ;;  %v161_v41 = vld [vmem:[%s12918_s1 + $0x3e8] sm:$0xff] }
 0x308   :  { %8242 = vmatprep.subr.bf16.mxu0 %v10492_v42  ;;  %8328 = vmatprep.subr.bf16.mxu1 %v10494_v43  ;;  %v173_v14 = vld [vmem:[%s12918_s1 + $0x448] sm:$0xff]  ;;  %v10087_v42 = vcombine.low %v136_v29, %v148_v30  ;;  %v10089_v43 = vcombine.low %v137_v31, %v149_v32  ;;  %v10256_v29 = vcombine.high %v304_v23, %v316_v63  ;;  %v328_v31 = vld [vmem:[%s12918_s1 + $0x920] sm:$0xff] }
 0x309   :  { %v10114_v56 = vcombine.high %v161_v41, %v173_v14  ;;  %v340_v32 = vld [vmem:[%s12918_s1 + $0x980] sm:$0xff] }
 0x30b   :  { %8243 = vmatpush1.bf16.msra.mxu0 %v10491_v47  ;;  %8329 = vmatpush1.bf16.msra.mxu1 %v10493_v48  ;;  %v185_v47 = vld [vmem:[%s12918_s1 + $0x4a8] sm:$0xff] }
 0x30c   :  { %8244 = vmatprep.subr.bf16.mxu0 %v10516_v49  ;;  %8330 = vmatprep.subr.bf16.mxu1 %v10518_v50  ;;  %v197_v48 = vld [vmem:[%s12918_s1 + $0x508] sm:$0xff]  ;;  %v10111_v49 = vcombine.low %v160_v38, %v172_v39  ;;  %v10113_v50 = vcombine.low %v161_v41, %v173_v14  ;;  %v10280_v38 = vcombine.high %v328_v31, %v340_v32  ;;  %v352_v41 = vld [vmem:[%s12918_s1 + $0x9e0] sm:$0xff] }
 0x30d   :  { %v10138_v53 = vcombine.high %v185_v47, %v197_v48  ;;  %v364_v14 = vld [vmem:[%s12918_s1 + $0xa40] sm:$0xff] }
 0x30f   :  { %8245 = vmatpush1.bf16.msra.mxu0 %v10515_v10  ;;  %8331 = vmatpush1.bf16.msra.mxu1 %v10517_v58  ;;  %v209_v10 = vld [vmem:[%s12918_s1 + $0x568] sm:$0xff] }
 0x310   :  { %8246 = vmatprep.subr.bf16.mxu0 %v10540_v59  ;;  %8332 = vmatprep.subr.bf16.mxu1 %v10542_v40  ;;  %v221_v58 = vld [vmem:[%s12918_s1 + $0x5c8] sm:$0xff]  ;;  %v10135_v59 = vcombine.low %v184_v45, %v196_v46  ;;  %v10137_v40 = vcombine.low %v185_v47, %v197_v48  ;;  %v10304_v45 = vcombine.high %v352_v41, %v364_v14  ;;  %v376_v47 = vld [vmem:[%s12918_s1 + $0xaa0] sm:$0xff] }
 0x311   :  { %v10162_v62 = vcombine.high %v209_v10, %v221_v58  ;;  %v388_v48 = vld [vmem:[%s12918_s1 + $0xb00] sm:$0xff] }
 0x313   :  { %8247 = vmatpush1.bf16.msra.mxu0 %v10539_v3  ;;  %8333 = vmatpush1.bf16.msra.mxu1 %v10541_v4  ;;  %v233_v3 = vld [vmem:[%s12918_s1 + $0x628] sm:$0xff] }
 0x314   :  { %8361 = vmatprep.subr.bf16.mxu0 %v9992_v5  ;;  %8447 = vmatprep.subr.bf16.mxu1 %v9994_v6  ;;  %v245_v4 = vld [vmem:[%s12918_s1 + $0x688] sm:$0xff]  ;;  %v10159_v5 = vcombine.low %v208_v54, %v220_v57  ;;  %v10161_v6 = vcombine.low %v209_v10, %v221_v58  ;;  %v10328_v54 = vcombine.high %v376_v47, %v388_v48  ;;  %v400_v10 = vld [vmem:[%s12918_s1 + $0xb60] sm:$0xff] }
 0x315   :  { %v10186_v36 = vcombine.high %v233_v3, %v245_v4  ;;  %v412_v58 = vld [vmem:[%s12918_s1 + $0xbc0] sm:$0xff] }
 0x316   :  { %8265 = vmatmul.mubr.bf16.vlgmr.msra.gmra.mrb[4].mxu0 %v11270_v0  ;;  %8351 = vmatmul.mubr.bf16.vlgmr.msra.gmra.mrb[4].mxu1 %v11270_v0  ;;  %v11597_v0 = vld [vmem:[%s12917_s0 + $0x4] ss:$12 sps:$4 sm:$0xff]  }
 0x317   :  { %8362 = vmatpush1.bf16.msra.mxu0 %v9991_v9  ;;  %8448 = vmatpush1.bf16.msra.mxu1 %v9993_v11  ;;  %v257_v9 = vld [vmem:[%s12918_s1 + $0x6e8] sm:$0xff] }
 0x318   :  { %8363 = vmatprep.subr.bf16.mxu0 %v10016_v12  ;;  %8449 = vmatprep.subr.bf16.mxu1 %v10018_v55  ;;  %v269_v11 = vld [vmem:[%s12918_s1 + $0x748] sm:$0xff]  ;;  %v10183_v12 = vcombine.low %v232_v1, %v244_v2  ;;  %v10185_v55 = vcombine.low %v233_v3, %v245_v4  ;;  %v10352_v1 = vcombine.high %v400_v10, %v412_v58  ;;  %v424_v3 = vld [vmem:[%s12918_s1 + $0xc20] sm:$0xff] }
 0x319   :  { %8393 = vmatprep.mubr.bf16.mxu0 %v11597_v0  ;;  %8479 = vmatprep.mubr.bf16.mxu1 %v11597_v0  ;;  %v10210_v15 = vcombine.high %v257_v9, %v269_v11  ;;  %v436_v4 = vld [vmem:[%s12918_s1 + $0xc80] sm:$0xff] }
 0x31b   :  { %8364 = vmatpush1.bf16.msra.mxu0 %v10015_v18  ;;  %8450 = vmatpush1.bf16.msra.mxu1 %v10017_v19  ;;  %v281_v18 = vld [vmem:[%s12918_s1 + $0x7a8] sm:$0xff] }
 0x31c   :  { %8365 = vmatprep.subr.bf16.mxu0 %v10040_v20  ;;  %8451 = vmatprep.subr.bf16.mxu1 %v10042_v21  ;;  %v293_v19 = vld [vmem:[%s12918_s1 + $0x808] sm:$0xff]  ;;  %v10207_v20 = vcombine.low %v256_v51, %v268_v8  ;;  %v10209_v21 = vcombine.low %v257_v9, %v269_v11  ;;  %v10376_v51 = vcombine.high %v424_v3, %v436_v4  ;;  %v448_v9 = vld [vmem:[%s12918_s1 + $0xce0] sm:$0xff] }
 0x31d   :  { %v10234_v22 = vcombine.high %v281_v18, %v293_v19  ;;  %v460_v11 = vld [vmem:[%s12918_s1 + $0xd40] sm:$0xff] }
 0x31f   :  { %8366 = vmatpush1.bf16.msra.mxu0 %v10039_v24  ;;  %8452 = vmatpush1.bf16.msra.mxu1 %v10041_v25  ;;  %v305_v24 = vld [vmem:[%s12918_s1 + $0x868] sm:$0xff] }
 0x320   :  { %8367 = vmatprep.subr.bf16.mxu0 %v10064_v26  ;;  %8453 = vmatprep.subr.bf16.mxu1 %v10066_v28  ;;  %v317_v25 = vld [vmem:[%s12918_s1 + $0x8c8] sm:$0xff]  ;;  %v10231_v26 = vcombine.low %v280_v16, %v292_v17  ;;  %v10233_v28 = vcombine.low %v281_v18, %v293_v19  ;;  %v10400_v16 = vcombine.high %v448_v9, %v460_v11  ;;  %v472_v18 = vld [vmem:[%s12918_s1 + $0xda0] sm:$0xff] }
 0x321   :  { %v10258_v30 = vcombine.high %v305_v24, %v317_v25  ;;  %v484_v19 = vld [vmem:[%s12918_s1 + $0xe00] sm:$0xff] }
 0x323   :  { %8368 = vmatpush1.bf16.msra.mxu0 %v10063_v33  ;;  %8454 = vmatpush1.bf16.msra.mxu1 %v10065_v34  ;;  %v329_v33 = vld [vmem:[%s12918_s1 + $0x928] sm:$0xff] }
 0x324   :  { %8369 = vmatprep.subr.bf16.mxu0 %v10088_v35  ;;  %8455 = vmatprep.subr.bf16.mxu1 %v10090_v37  ;;  %v341_v34 = vld [vmem:[%s12918_s1 + $0x988] sm:$0xff]  ;;  %v10255_v35 = vcombine.low %v304_v23, %v316_v63  ;;  %v10257_v37 = vcombine.low %v305_v24, %v317_v25  ;;  %v10424_v63 = vcombine.high %v472_v18, %v484_v19  ;;  %v496_v25 = vld [vmem:[%s12918_s1 + $0xe60] sm:$0xff] }
 0x325   :  { %v10282_v39 = vcombine.high %v329_v33, %v341_v34 }
 0x327   :  { %8370 = vmatpush1.bf16.msra.mxu0 %v10087_v42  ;;  %8456 = vmatpush1.bf16.msra.mxu1 %v10089_v43  ;;  %v353_v42 = vld [vmem:[%s12918_s1 + $0x9e8] sm:$0xff] }
 0x328   :  { %8371 = vmatprep.subr.bf16.mxu0 %v10112_v44  ;;  %8457 = vmatprep.subr.bf16.mxu1 %v10114_v56  ;;  %v365_v43 = vld [vmem:[%s12918_s1 + $0xa48] sm:$0xff]  ;;  %v10279_v44 = vcombine.low %v328_v31, %v340_v32  ;;  %v10281_v56 = vcombine.low %v329_v33, %v341_v34  ;;  %v520_v34 = vld [vmem:[%s12918_s1 + $0xf20] sm:$0xff] }
 0x329   :  { %v10306_v46 = vcombine.high %v353_v42, %v365_v43 }
 0x32b   :  { %8372 = vmatpush1.bf16.msra.mxu0 %v10111_v49  ;;  %8458 = vmatpush1.bf16.msra.mxu1 %v10113_v50  ;;  %v377_v49 = vld [vmem:[%s12918_s1 + $0xaa8] sm:$0xff] }
 0x32c   :  { %8373 = vmatprep.subr.bf16.mxu0 %v10136_v52  ;;  %8459 = vmatprep.subr.bf16.mxu1 %v10138_v53  ;;  %v389_v50 = vld [vmem:[%s12918_s1 + $0xb08] sm:$0xff]  ;;  %v10303_v52 = vcombine.low %v352_v41, %v364_v14  ;;  %v10305_v53 = vcombine.low %v353_v42, %v365_v43  ;;  %v544_v43 = vld [vmem:[%s12918_s1 + $0xfe0] sm:$0xff] }
 0x32d   :  { %v10330_v57 = vcombine.high %v377_v49, %v389_v50 }
 0x32f   :  { %8374 = vmatpush1.bf16.msra.mxu0 %v10135_v59  ;;  %8460 = vmatpush1.bf16.msra.mxu1 %v10137_v40  ;;  %v401_v59 = vld [vmem:[%s12918_s1 + $0xb68] sm:$0xff] }
 0x330   :  { %8375 = vmatprep.subr.bf16.mxu0 %v10160_v61  ;;  %8461 = vmatprep.subr.bf16.mxu1 %v10162_v62  ;;  %v413_v40 = vld [vmem:[%s12918_s1 + $0xbc8] sm:$0xff]  ;;  %v10327_v61 = vcombine.low %v376_v47, %v388_v48  ;;  %v10329_v62 = vcombine.low %v377_v49, %v389_v50  ;;  %v568_v50 = vld [vmem:[%s12918_s1 + $0x10a0] sm:$0xff] }
 0x331   :  { %v10354_v2 = vcombine.high %v401_v59, %v413_v40 }
 0x333   :  { %8376 = vmatpush1.bf16.msra.mxu0 %v10159_v5  ;;  %8462 = vmatpush1.bf16.msra.mxu1 %v10161_v6  ;;  %v425_v5 = vld [vmem:[%s12918_s1 + $0xc28] sm:$0xff] }
 0x334   :  { %8377 = vmatprep.subr.bf16.mxu0 %v10184_v7  ;;  %8463 = vmatprep.subr.bf16.mxu1 %v10186_v36  ;;  %v437_v6 = vld [vmem:[%s12918_s1 + $0xc88] sm:$0xff]  ;;  %v10351_v7 = vcombine.low %v400_v10, %v412_v58  ;;  %v10353_v36 = vcombine.low %v401_v59, %v413_v40  ;;  %v592_v40 = vld [vmem:[%s12918_s1 + $0x1160] sm:$0xff] }
 0x335   :  { %v10378_v8 = vcombine.high %v425_v5, %v437_v6 }
 0x337   :  { %8378 = vmatpush1.bf16.msra.mxu0 %v10183_v12  ;;  %8464 = vmatpush1.bf16.msra.mxu1 %v10185_v55  ;;  %v449_v12 = vld [vmem:[%s12918_s1 + $0xce8] sm:$0xff] }
 0x338   :  { %8379 = vmatprep.subr.bf16.mxu0 %v10208_v13  ;;  %8465 = vmatprep.subr.bf16.mxu1 %v10210_v15  ;;  %v461_v55 = vld [vmem:[%s12918_s1 + $0xd48] sm:$0xff]  ;;  %v10375_v13 = vcombine.low %v424_v3, %v436_v4  ;;  %v10377_v15 = vcombine.low %v425_v5, %v437_v6  ;;  %v42_v6 = vld [vmem:[%s12918_s1 + $0x30] sm:$0xff] }
 0x339   :  { %v10402_v17 = vcombine.high %v449_v12, %v461_v55  ;;  %v10401_v23 = vcombine.low %v449_v12, %v461_v55  ;;  %v66_v55 = vld [vmem:[%s12918_s1 + $0xf0] sm:$0xff] }
 0x33b   :  { %8380 = vmatpush1.bf16.msra.mxu0 %v10207_v20  ;;  %8466 = vmatpush1.bf16.msra.mxu1 %v10209_v21  ;;  %v11784_v20 = vld [vmem:[%s12917_s0] ss:$12 sps:$4 sm:$0xff]  }
 0x33c   :  { %8381 = vmatprep.subr.bf16.mxu0 %v10232_v60  ;;  %8467 = vmatprep.subr.bf16.mxu1 %v10234_v22  ;;  %v473_v21 = vld [vmem:[%s12918_s1 + $0xda8] sm:$0xff]  ;;  %v10399_v22 = vcombine.low %v448_v9, %v460_v11 }
 0x33d   :  { %v485_v60 = vld [vmem:[%s12918_s1 + $0xe08] sm:$0xff] }
 0x33e   :  { %v10426_v24 = vcombine.high %v473_v21, %v485_v60  ;;  %v10425_v31 = vcombine.low %v473_v21, %v485_v60  ;;  %v90_v60 = vld [vmem:[%s12918_s1 + $0x1b0] sm:$0xff] }
 0x33f   :  { %8382 = vmatpush1.bf16.msra.mxu0 %v10231_v26  ;;  %8468 = vmatpush1.bf16.msra.mxu1 %v10233_v28  ;;  %v508_v26 = vld [vmem:[%s12918_s1 + $0xec0] sm:$0xff]  ;;  %v497_v28 = vld [vmem:[%s12918_s1 + $0xe68] sm:$0xff] }
 0x340   :  { %8383 = vmatprep.subr.bf16.mxu0 %v10256_v29  ;;  %8469 = vmatprep.subr.bf16.mxu1 %v10258_v30  ;;  %v509_v29 = vld [vmem:[%s12918_s1 + $0xec8] sm:$0xff]  ;;  %v10423_v30 = vcombine.low %v472_v18, %v484_v19  ;;  %v10448_v32 = vcombine.high %v496_v25, %v508_v26 }
 0x341   :  { %v10450_v33 = vcombine.high %v497_v28, %v509_v29  ;;  %v10449_v41 = vcombine.low %v497_v28, %v509_v29 }
 0x343   :  { %8384 = vmatpush1.bf16.msra.mxu0 %v10255_v35  ;;  %8470 = vmatpush1.bf16.msra.mxu1 %v10257_v37  ;;  %v532_v35 = vld [vmem:[%s12918_s1 + $0xf80] sm:$0xff]  ;;  %v521_v37 = vld [vmem:[%s12918_s1 + $0xf28] sm:$0xff] }
 0x344   :  { %8385 = vmatprep.subr.bf16.mxu0 %v10280_v38  ;;  %8471 = vmatprep.subr.bf16.mxu1 %v10282_v39  ;;  %v533_v38 = vld [vmem:[%s12918_s1 + $0xf88] sm:$0xff]  ;;  %v10447_v39 = vcombine.low %v496_v25, %v508_v26  ;;  %v10472_v14 = vcombine.high %v520_v34, %v532_v35 }
 0x345   :  { %v10474_v42 = vcombine.high %v521_v37, %v533_v38  ;;  %v10473_v47 = vcombine.low %v521_v37, %v533_v38 }
 0x347   :  { %8386 = vmatpush1.bf16.msra.mxu0 %v10279_v44  ;;  %8472 = vmatpush1.bf16.msra.mxu1 %v10281_v56  ;;  %v556_v44 = vld [vmem:[%s12918_s1 + $0x1040] sm:$0xff]  ;;  %v545_v56 = vld [vmem:[%s12918_s1 + $0xfe8] sm:$0xff] }
 0x348   :  { %8387 = vmatprep.subr.bf16.mxu0 %v10304_v45  ;;  %8473 = vmatprep.subr.bf16.mxu1 %v10306_v46  ;;  %v557_v45 = vld [vmem:[%s12918_s1 + $0x1048] sm:$0xff]  ;;  %v10471_v46 = vcombine.low %v520_v34, %v532_v35  ;;  %v10496_v48 = vcombine.high %v544_v43, %v556_v44  ;;  %v9055_v34 = vlaneseq }
 0x349   :  { %v10498_v49 = vcombine.high %v545_v56, %v557_v45  ;;  %v10497_v10 = vcombine.low %v545_v56, %v557_v45 }
 0x34b   :  { %8388 = vmatpush1.bf16.msra.mxu0 %v10303_v52  ;;  %8474 = vmatpush1.bf16.msra.mxu1 %v10305_v53  ;;  %v580_v52 = vld [vmem:[%s12918_s1 + $0x1100] sm:$0xff]  ;;  %v569_v53 = vld [vmem:[%s12918_s1 + $0x10a8] sm:$0xff] }
 0x34c   :  { %8389 = vmatprep.subr.bf16.mxu0 %v10328_v54  ;;  %8475 = vmatprep.subr.bf16.mxu1 %v10330_v57  ;;  %v581_v54 = vld [vmem:[%s12918_s1 + $0x1108] sm:$0xff]  ;;  %v10495_v57 = vcombine.low %v544_v43, %v556_v44  ;;  %v10520_v58 = vcombine.high %v568_v50, %v580_v52  ;;  %v11925_v43 = vshrl.u32 %v9055_v34, 7 }
 0x34d   :  { %v10522_v59 = vcombine.high %v569_v53, %v581_v54  ;;  %v10521_v3 = vcombine.low %v569_v53, %v581_v54  ;;  %v11945_v54 = vld [vmem:[%s12920_s3] sm:$0xff] }
 0x34f   :  { %8390 = vmatpush1.bf16.msra.mxu0 %v10327_v61  ;;  %8476 = vmatpush1.bf16.msra.mxu1 %v10329_v62  ;;  %v604_v61 = vld [vmem:[%s12918_s1 + $0x11c0] sm:$0xff]  ;;  %v593_v62 = vld [vmem:[%s12918_s1 + $0x1168] sm:$0xff] }
 0x350   :  { %8391 = vmatprep.subr.bf16.mxu0 %v10352_v1  ;;  %8477 = vmatprep.subr.bf16.mxu1 %v10354_v2  ;;  %v605_v1 = vld [vmem:[%s12918_s1 + $0x11c8] sm:$0xff]  ;;  %v10519_v2 = vcombine.low %v568_v50, %v580_v52  ;;  %v10544_v4 = vcombine.high %v592_v40, %v604_v61  ;;  %v163_v50 = vld [vmem:[%s12918_s1 + $0x3f8] sm:$0xff] }
 0x351   :  { %v10546_v5 = vcombine.high %v593_v62, %v605_v1  ;;  %v10545_v9 = vcombine.low %v593_v62, %v605_v1  ;;  %v175_v52 = vld [vmem:[%s12918_s1 + $0x458] sm:$0xff]  ;;  %v186_v62 = vld [vmem:[%s12918_s1 + $0x4b0] sm:$0xff] }
 0x352   :  { %v198_v1 = vld [vmem:[%s12918_s1 + $0x510] sm:$0xff] }
 0x353   :  { %8392 = vmatpush1.bf16.msra.mxu0 %v10351_v7  ;;  %8478 = vmatpush1.bf16.msra.mxu1 %v10353_v36  ;;  %v54_v7 = vld [vmem:[%s12918_s1 + $0x90] sm:$0xff]  ;;  %v43_v36 = vld [vmem:[%s12918_s1 + $0x38] sm:$0xff] }
 0x354   :  { %8404 = vmatprep.subr.bf16.mxu0 %v10376_v51  ;;  %8490 = vmatprep.subr.bf16.mxu1 %v10378_v8  ;;  %v55_v51 = vld [vmem:[%s12918_s1 + $0x98] sm:$0xff]  ;;  %v10543_v8 = vcombine.low %v592_v40, %v604_v61  ;;  %v9996_v11 = vcombine.high %v42_v6, %v54_v7  ;;  %v10118_v61 = vcombine.high %v163_v50, %v175_v52 }
 0x355   :  { %v9998_v12 = vcombine.high %v43_v36, %v55_v51  ;;  %v9997_v18 = vcombine.low %v43_v36, %v55_v51  ;;  %v10117_v51 = vcombine.low %v163_v50, %v175_v52  ;;  %v270_v50 = vld [vmem:[%s12918_s1 + $0x750] sm:$0xff]  ;;  %v259_v52 = vld [vmem:[%s12918_s1 + $0x6f8] sm:$0xff] }
 0x356   :  { %8394 = vmatmul.mubr.bf16.vlgmr.msra.gmra.mrb[8].mxu0 %v11784_v20  ;;  %8480 = vmatmul.mubr.bf16.vlgmr.msra.gmra.mrb[8].mxu1 %v11784_v20 }
 0x357   :  { %8405 = vmatpush1.bf16.msra.mxu0 %v10375_v13  ;;  %8491 = vmatpush1.bf16.msra.mxu1 %v10377_v15  ;;  %v78_v13 = vld [vmem:[%s12918_s1 + $0x150] sm:$0xff]  ;;  %v67_v15 = vld [vmem:[%s12918_s1 + $0xf8] sm:$0xff] }
 0x358   :  { %8406 = vmatprep.subr.bf16.mxu0 %v10400_v16  ;;  %8492 = vmatprep.subr.bf16.mxu1 %v10402_v17  ;;  %v79_v16 = vld [vmem:[%s12918_s1 + $0x158] sm:$0xff]  ;;  %v9995_v17 = vcombine.low %v42_v6, %v54_v7  ;;  %v10020_v19 = vcombine.high %v66_v55, %v78_v13  ;;  %v10019_v25 = vcombine.low %v66_v55, %v78_v13  ;;  %v222_v55 = vld [vmem:[%s12918_s1 + $0x5d0] sm:$0xff] }
 0x359   :  { %8436 = vmatprep.mubr.bf16.mxu0 %v10814_v27  ;;  %8522 = vmatprep.mubr.bf16.mxu1 %v10814_v27  ;;  %v10022_v21 = vcombine.high %v67_v15, %v79_v16  ;;  %v10021_v26 = vcombine.low %v67_v15, %v79_v16 }
 0x35b   :  { %8407 = vmatpush1.bf16.msra.mxu0 %v10399_v22  ;;  %8493 = vmatpush1.bf16.msra.mxu1 %v10401_v23  ;;  %v102_v22 = vld [vmem:[%s12918_s1 + $0x210] sm:$0xff] }
 0x35c   :  { %8408 = vmatprep.subr.bf16.mxu0 %v10424_v63  ;;  %8494 = vmatprep.subr.bf16.mxu1 %v10426_v24  ;;  %v11889_v23 = vld [vmem:[%s12917_s0 + $0x8] ss:$12 sps:$4 sm:$0xff]   ;;  %v91_v63 = vld [vmem:[%s12918_s1 + $0x1b8] sm:$0xff]  ;;  %v10044_v28 = vcombine.high %v90_v60, %v102_v22  ;;  %v10043_v35 = vcombine.low %v90_v60, %v102_v22 }
 0x35d   :  { %v103_v24 = vld [vmem:[%s12918_s1 + $0x218] sm:$0xff] }
 0x35e   :  { %v10046_v29 = vcombine.high %v91_v63, %v103_v24  ;;  %v10045_v37 = vcombine.low %v91_v63, %v103_v24  ;;  %v10139_v63 = vcombine.low %v186_v62, %v198_v1 }
 0x35f   :  { %8409 = vmatpush1.bf16.msra.mxu0 %v10423_v30  ;;  %8495 = vmatpush1.bf16.msra.mxu1 %v10425_v31  ;;  %v114_v30 = vld [vmem:[%s12918_s1 + $0x270] sm:$0xff] }
 0x360   :  { %8410 = vmatprep.subr.bf16.mxu0 %v10448_v32  ;;  %8496 = vmatprep.subr.bf16.mxu1 %v10450_v33  ;;  %v126_v31 = vld [vmem:[%s12918_s1 + $0x2d0] sm:$0xff]  ;;  %v115_v32 = vld [vmem:[%s12918_s1 + $0x278] sm:$0xff] }
 0x361   :  { %v127_v33 = vld [vmem:[%s12918_s1 + $0x2d8] sm:$0xff]  ;;  %v10068_v38 = vcombine.high %v114_v30, %v126_v31  ;;  %v10067_v44 = vcombine.low %v114_v30, %v126_v31 }
 0x362   :  { %v10069_v56 = vcombine.low %v115_v32, %v127_v33 }
 0x363   :  { %8411 = vmatpush1.bf16.msra.mxu0 %v10447_v39  ;;  %8497 = vmatpush1.bf16.msra.mxu1 %v10449_v41  ;;  %v10070_v39 = vcombine.high %v115_v32, %v127_v33  ;;  %v138_v41 = vld [vmem:[%s12918_s1 + $0x330] sm:$0xff] }
 0x364   :  { %8412 = vmatprep.subr.bf16.mxu0 %v10472_v14  ;;  %8498 = vmatprep.subr.bf16.mxu1 %v10474_v42  ;;  %v150_v14 = vld [vmem:[%s12918_s1 + $0x390] sm:$0xff]  ;;  %v151_v42 = vld [vmem:[%s12918_s1 + $0x398] sm:$0xff] }
 0x365   :  { %v10092_v45 = vcombine.high %v138_v41, %v150_v14  ;;  %v10091_v53 = vcombine.low %v138_v41, %v150_v14  ;;  %v235_v14 = vld [vmem:[%s12918_s1 + $0x638] sm:$0xff] }
 0x367   :  { %8413 = vmatpush1.bf16.msra.mxu0 %v10471_v46  ;;  %8499 = vmatpush1.bf16.msra.mxu1 %v10473_v47  ;;  %v162_v47 = vld [vmem:[%s12918_s1 + $0x3f0] sm:$0xff] }
 0x368   :  { %8414 = vmatprep.subr.bf16.mxu0 %v10496_v48  ;;  %8500 = vmatprep.subr.bf16.mxu1 %v10498_v49  ;;  %v174_v48 = vld [vmem:[%s12918_s1 + $0x450] sm:$0xff]  ;;  %v11934_v49 = vsub.s32 0, %v11925_v43 }
 0x369   :  { %v10116_v40 = vcombine.high %v162_v47, %v174_v48  ;;  %v10115_v7 = vcombine.low %v162_v47, %v174_v48  ;;  %v258_v48 = vld [vmem:[%s12918_s1 + $0x6f0] sm:$0xff] }
 0x36b   :  { %8415 = vmatpush1.bf16.msra.mxu0 %v10495_v57  ;;  %8501 = vmatpush1.bf16.msra.mxu1 %v10497_v10  ;;  %v11948_v57 = vsub.s32 2, %v11925_v43  ;;  %v11951_v10 = vsub.s32 1, %v11925_v43 }
 0x36c   :  { %8416 = vmatprep.subr.bf16.mxu0 %v10520_v58  ;;  %8502 = vmatprep.subr.bf16.mxu1 %v10522_v59  ;;  %v11954_v59 = vsub.s32 3, %v11925_v43 }
 0x36d   :  { %v9062_v6 = vrot.slane %v11945_v54, %v11951_v10 }
 0x36e   :  { %v9070_v36 = vrot.slane %v11945_v54, %v11954_v59 }
 0x36f   :  { %8417 = vmatpush1.bf16.msra.mxu0 %v10519_v2  ;;  %8503 = vmatpush1.bf16.msra.mxu1 %v10521_v3  ;;  %v9058_v2 = vrot.slane %v11945_v54, %v11934_v49  ;;  %v187_v3 = vld [vmem:[%s12918_s1 + $0x4b8] sm:$0xff] }
 0x370   :  { %8418 = vmatprep.subr.bf16.mxu0 %v10544_v4  ;;  %8504 = vmatprep.subr.bf16.mxu1 %v10546_v5  ;;  %v199_v4 = vld [vmem:[%s12918_s1 + $0x518] sm:$0xff]  ;;  %v9066_v5 = vrot.slane %v11945_v54, %v11948_v57 }
 0x371   :  { %v10141_v24 = vcombine.low %v187_v3, %v199_v4 }
 0x373   :  { %8419 = vmatpush1.bf16.msra.mxu0 %v10543_v8  ;;  %8505 = vmatpush1.bf16.msra.mxu1 %v10545_v9  ;;  %v10140_v8 = vcombine.high %v186_v62, %v198_v1  ;;  %v282_v1 = vld [vmem:[%s12918_s1 + $0x7b0] sm:$0xff] }
 0x374   :  { %8533 = vmatprep.subr.bf16.mxu0 %v9996_v11  ;;  %8619 = vmatprep.subr.bf16.mxu1 %v9998_v12  ;;  %v10142_v11 = vcombine.high %v187_v3, %v199_v4  ;;  %v210_v12 = vld [vmem:[%s12918_s1 + $0x570] sm:$0xff]  ;;  %v283_v3 = vld [vmem:[%s12918_s1 + $0x7b8] sm:$0xff] }
 0x375   :  { %v10164_v30 = vcombine.high %v210_v12, %v222_v55  ;;  %v295_v4 = vld [vmem:[%s12918_s1 + $0x818] sm:$0xff] }
 0x376   :  { %8437 = vmatmul.mubr.bf16.vlgmr.msra.gmra.mrb[8].mxu0 %v11889_v23  ;;  %8523 = vmatmul.mubr.bf16.vlgmr.msra.gmra.mrb[8].mxu1 %v11889_v23 }
 0x377   :  { %8534 = vmatpush1.bf16.msra.mxu0 %v9995_v17  ;;  %8620 = vmatpush1.bf16.msra.mxu1 %v9997_v18  ;;  %v211_v17 = vld [vmem:[%s12918_s1 + $0x578] sm:$0xff] }
 0x378   :  { %8535 = vmatprep.subr.bf16.mxu0 %v10020_v19  ;;  %8621 = vmatprep.subr.bf16.mxu1 %v10022_v21  ;;  %v223_v18 = vld [vmem:[%s12918_s1 + $0x5d8] sm:$0xff] }
 0x379   :  { %8565 = vmatprep.mubr.bf16.mxu0 %v11597_v0  ;;  %8651 = vmatprep.mubr.bf16.mxu1 %v11597_v0  ;;  %v139_v0 = vld [vmem:[%s12918_s1 + $0x338] sm:$0xff] }
 0x37a   :  { %v10094_v46 = vcombine.high %v139_v0, %v151_v42  ;;  %v10093_v58 = vcombine.low %v139_v0, %v151_v42  ;;  %v247_v0 = vld [vmem:[%s12918_s1 + $0x698] sm:$0xff] }
 0x37b   :  { %8536 = vmatpush1.bf16.msra.mxu0 %v10019_v25  ;;  %8622 = vmatpush1.bf16.msra.mxu1 %v10021_v26  ;;  %v10190_v47 = vcombine.high %v235_v14, %v247_v0 }
 0x37c   :  { %8537 = vmatprep.subr.bf16.mxu0 %v10044_v28  ;;  %8623 = vmatprep.subr.bf16.mxu1 %v10046_v29 }
 0x37f   :  { %8538 = vmatpush1.bf16.msra.mxu0 %v10043_v35  ;;  %8624 = vmatpush1.bf16.msra.mxu1 %v10045_v37  ;;  %v10166_v35 = vcombine.high %v211_v17, %v223_v18  ;;  %v234_v37 = vld [vmem:[%s12918_s1 + $0x630] sm:$0xff] }
 0x380   :  { %8539 = vmatprep.subr.bf16.mxu0 %v10068_v38  ;;  %8625 = vmatprep.subr.bf16.mxu1 %v10070_v39  ;;  %v246_v38 = vld [vmem:[%s12918_s1 + $0x690] sm:$0xff] }
 0x383   :  { %8540 = vmatpush1.bf16.msra.mxu0 %v10067_v44  ;;  %8626 = vmatpush1.bf16.msra.mxu1 %v10069_v56  ;;  %v10163_v44 = vcombine.low %v210_v12, %v222_v55  ;;  %v10237_v55 = vcombine.low %v283_v3, %v295_v4 }
 0x384   :  { %8541 = vmatprep.subr.bf16.mxu0 %v10092_v45  ;;  %8627 = vmatprep.subr.bf16.mxu1 %v10094_v46  ;;  %v10165_v45 = vcombine.low %v211_v17, %v223_v18  ;;  %v10188_v46 = vcombine.high %v234_v37, %v246_v38  ;;  %v342_v17 = vld [vmem:[%s12918_s1 + $0x990] sm:$0xff]  ;;  %v331_v18 = vld [vmem:[%s12918_s1 + $0x938] sm:$0xff] }
 0x387   :  { %8542 = vmatpush1.bf16.msra.mxu0 %v10091_v53  ;;  %8628 = vmatpush1.bf16.msra.mxu1 %v10093_v58  ;;  %v271_v53 = vld [vmem:[%s12918_s1 + $0x758] sm:$0xff]  ;;  %v10187_v58 = vcombine.low %v234_v37, %v246_v38 }
 0x388   :  { %8543 = vmatprep.subr.bf16.mxu0 %v10116_v40  ;;  %8629 = vmatprep.subr.bf16.mxu1 %v10118_v61  ;;  %v10189_v40 = vcombine.low %v235_v14, %v247_v0  ;;  %v10212_v61 = vcombine.high %v258_v48, %v270_v50  ;;  %v10214_v62 = vcombine.high %v259_v52, %v271_v53  ;;  %v391_v37 = vld [vmem:[%s12918_s1 + $0xb18] sm:$0xff]  ;;  %v402_v0 = vld [vmem:[%s12918_s1 + $0xb70] sm:$0xff] }
 0x389   :  { %v8094_v9 = vpop.f32.mrb[0].mxu0  ;;  %v8180_v15 = vpop.f32.mrb[0].mxu1 }
 0x38a   :  { %v9175_v13 = vadd.f32 %v9058_v2, %v8094_v9  ;;  %v8096_v16 = vpop.f32.mrb[1].mxu0  ;;  %v9177_v19 = vadd.f32 %v9066_v5, %v8180_v15  ;;  %v8182_v60 = vpop.f32.mrb[1].mxu1  ;;  %v307_v9 = vld [vmem:[%s12918_s1 + $0x878] sm:$0xff] }
 0x38b   :  { %v9176_v21 = vadd.f32 %v9062_v6, %v8096_v16  ;;  %v8098_v22 = vpop.f32.mrb[2].mxu0  ;;  %8544 = vmatpush1.bf16.msra.mxu0 %v10115_v7  ;;  %v9178_v25 = vadd.f32 %v9070_v36, %v8182_v60  ;;  %v8184_v28 = vpop.f32.mrb[2].mxu1  ;;  %8630 = vmatpush1.bf16.msra.mxu1 %v10117_v51  ;;  %v306_v51 = vld [vmem:[%s12918_s1 + $0x870] sm:$0xff] }
 0x38c   :  { %v9199_v26 = vadd.f32 %v9058_v2, %v8098_v22  ;;  %v8100_v29 = vpop.f32.mrb[3].mxu0  ;;  %8545 = vmatprep.subr.bf16.mxu0 %v10140_v8  ;;  %v9201_v32 = vadd.f32 %v9066_v5, %v8184_v28  ;;  %v8186_v34 = vpop.f32.mrb[3].mxu1  ;;  %8631 = vmatprep.subr.bf16.mxu1 %v10142_v11  ;;  %v294_v2 = vld [vmem:[%s12918_s1 + $0x810] sm:$0xff]  ;;  %v10211_v5 = vcombine.low %v258_v48, %v270_v50  ;;  %v319_v11 = vld [vmem:[%s12918_s1 + $0x8d8] sm:$0xff] }
 0x38d   :  { %v10595_v31 = vpack.c.bf16 %v9176_v21, %v9175_v13  ;;  %v9200_v33 = vadd.f32 %v9062_v6, %v8100_v29  ;;  %v10596_v39 = vpack.c.bf16 %v9178_v25, %v9177_v19  ;;  %v9202_v41 = vadd.f32 %v9070_v36, %v8186_v34  ;;  %v318_v8 = vld [vmem:[%s12918_s1 + $0x8d0] sm:$0xff]  ;;  %v343_v19 = vld [vmem:[%s12918_s1 + $0x998] sm:$0xff] }
 0x38e   :  { %v10213_v6 = vcombine.low %v259_v52, %v271_v53  ;;  %v10236_v7 = vcombine.high %v282_v1, %v294_v2  ;;  %v10238_v36 = vcombine.high %v283_v3, %v295_v4  ;;  %v10235_v12 = vcombine.low %v282_v1, %v294_v2  ;;  %v330_v16 = vld [vmem:[%s12918_s1 + $0x930] sm:$0xff]  ;;  %v367_v28 = vld [vmem:[%s12918_s1 + $0xa58] sm:$0xff] }
 0x38f   :  { %9307 = vst [vmem:[%s12921_s4] sm:$0xff] %v10595_v31  ;;  %v10601_v42 = vpack.c.bf16 %v9200_v33, %v9199_v26  ;;  %8546 = vmatpush1.bf16.msra.mxu0 %v10139_v63  ;;  %9308 = vst [vmem:[%s12921_s4 + $0x8] sm:$0xff] %v10596_v39  ;;  %v10602_v56 = vpack.c.bf16 %v9202_v41, %v9201_v32  ;;  %8632 = vmatpush1.bf16.msra.mxu1 %v10141_v24  ;;  %v354_v24 = vld [vmem:[%s12918_s1 + $0x9f0] sm:$0xff]  ;;  %v355_v26 = vld [vmem:[%s12918_s1 + $0x9f8] sm:$0xff] }
 0x390   :  { %8547 = vmatprep.subr.bf16.mxu0 %v10164_v30  ;;  %8633 = vmatprep.subr.bf16.mxu1 %v10166_v35  ;;  %v10260_v13 = vcombine.high %v306_v51, %v318_v8  ;;  %v10262_v15 = vcombine.high %v307_v9, %v319_v11  ;;  %v10259_v21 = vcombine.low %v306_v51, %v318_v8  ;;  %v366_v25 = vld [vmem:[%s12918_s1 + $0xa50] sm:$0xff]  ;;  %v379_v35 = vld [vmem:[%s12918_s1 + $0xab8] sm:$0xff] }
 0x391   :  { %9313 = vst [vmem:[%s12921_s4 + $0x30] sm:$0xff] %v10601_v42  ;;  %9314 = vst [vmem:[%s12921_s4 + $0x38] sm:$0xff] %v10602_v56  ;;  %v10261_v60 = vcombine.low %v307_v9, %v319_v11  ;;  %v10284_v22 = vcombine.high %v330_v16, %v342_v17  ;;  %v10286_v63 = vcombine.high %v331_v18, %v343_v19  ;;  %v378_v33 = vld [vmem:[%s12918_s1 + $0xab0] sm:$0xff]  ;;  %v415_v56 = vld [vmem:[%s12918_s1 + $0xbd8] sm:$0xff] }
 0x392   :  { %v10283_v29 = vcombine.low %v330_v16, %v342_v17  ;;  %v10285_v30 = vcombine.low %v331_v18, %v343_v19  ;;  %v10308_v31 = vcombine.high %v354_v24, %v366_v25  ;;  %v10310_v32 = vcombine.high %v355_v26, %v367_v28  ;;  %v390_v34 = vld [vmem:[%s12918_s1 + $0xb10] sm:$0xff]  ;;  %v427_v53 = vld [vmem:[%s12918_s1 + $0xc38] sm:$0xff] }
 0x393   :  { %8548 = vmatpush1.bf16.msra.mxu0 %v10163_v44  ;;  %8634 = vmatpush1.bf16.msra.mxu1 %v10165_v45  ;;  %v10307_v38 = vcombine.low %v354_v24, %v366_v25  ;;  %v10309_v39 = vcombine.low %v355_v26, %v367_v28  ;;  %v10332_v41 = vcombine.high %v378_v33, %v390_v34  ;;  %v414_v42 = vld [vmem:[%s12918_s1 + $0xbd0] sm:$0xff]  ;;  %v403_v44 = vld [vmem:[%s12918_s1 + $0xb78] sm:$0xff] }
 0x394   :  { %8549 = vmatprep.subr.bf16.mxu0 %v10188_v46  ;;  %8635 = vmatprep.subr.bf16.mxu1 %v10190_v47  ;;  %v10334_v14 = vcombine.high %v379_v35, %v391_v37  ;;  %v10331_v45 = vcombine.low %v378_v33, %v390_v34  ;;  %v10333_v46 = vcombine.low %v379_v35, %v391_v37  ;;  %v426_v50 = vld [vmem:[%s12918_s1 + $0xc30] sm:$0xff]  ;;  %v451_v4 = vld [vmem:[%s12918_s1 + $0xcf8] sm:$0xff] }
 0x395   :  { %v10356_v47 = vcombine.high %v402_v0, %v414_v42  ;;  %v10358_v48 = vcombine.high %v403_v44, %v415_v56  ;;  %v438_v52 = vld [vmem:[%s12918_s1 + $0xc90] sm:$0xff]  ;;  %v475_v11 = vld [vmem:[%s12918_s1 + $0xdb8] sm:$0xff] }
 0x396   :  { %v450_v2 = vld [vmem:[%s12918_s1 + $0xcf0] sm:$0xff]  ;;  %v511_v19 = vld [vmem:[%s12918_s1 + $0xed8] sm:$0xff] }
 0x397   :  { %8550 = vmatpush1.bf16.msra.mxu0 %v10187_v58  ;;  %8636 = vmatpush1.bf16.msra.mxu1 %v10189_v40  ;;  %v439_v58 = vld [vmem:[%s12918_s1 + $0xc98] sm:$0xff]  ;;  %v10355_v40 = vcombine.low %v402_v0, %v414_v42  ;;  %v462_v3 = vld [vmem:[%s12918_s1 + $0xd50] sm:$0xff] }
 0x398   :  { %8551 = vmatprep.subr.bf16.mxu0 %v10212_v61  ;;  %8637 = vmatprep.subr.bf16.mxu1 %v10214_v62  ;;  %v10357_v61 = vcombine.low %v403_v44, %v415_v56  ;;  %v10380_v62 = vcombine.high %v426_v50, %v438_v52  ;;  %v10382_v1 = vcombine.high %v427_v53, %v439_v58  ;;  %v474_v8 = vld [vmem:[%s12918_s1 + $0xdb0] sm:$0xff]  ;;  %v523_v26 = vld [vmem:[%s12918_s1 + $0xf38] sm:$0xff] }
 0x399   :  { %v486_v9 = vld [vmem:[%s12918_s1 + $0xe10] sm:$0xff]  ;;  %v535_v28 = vld [vmem:[%s12918_s1 + $0xf98] sm:$0xff] }
 0x39a   :  { %v498_v17 = vld [vmem:[%s12918_s1 + $0xe70] sm:$0xff]  ;;  %v547_v35 = vld [vmem:[%s12918_s1 + $0xff8] sm:$0xff] }
 0x39b   :  { %8552 = vmatpush1.bf16.msra.mxu0 %v10211_v5  ;;  %8638 = vmatpush1.bf16.msra.mxu1 %v10213_v6  ;;  %v463_v5 = vld [vmem:[%s12918_s1 + $0xd58] sm:$0xff]  ;;  %v10379_v6 = vcombine.low %v426_v50, %v438_v52  ;;  %v510_v18 = vld [vmem:[%s12918_s1 + $0xed0] sm:$0xff] }
 0x39c   :  { %8553 = vmatprep.subr.bf16.mxu0 %v10236_v7  ;;  %8639 = vmatprep.subr.bf16.mxu1 %v10238_v36  ;;  %v10381_v7 = vcombine.low %v427_v53, %v439_v58  ;;  %v10404_v36 = vcombine.high %v450_v2, %v462_v3  ;;  %v10406_v51 = vcombine.high %v451_v4, %v463_v5  ;;  %v522_v24 = vld [vmem:[%s12918_s1 + $0xf30] sm:$0xff]  ;;  %v559_v37 = vld [vmem:[%s12918_s1 + $0x1058] sm:$0xff] }
 0x39d   :  { %v534_v25 = vld [vmem:[%s12918_s1 + $0xf90] sm:$0xff]  ;;  %v571_v44 = vld [vmem:[%s12918_s1 + $0x10b8] sm:$0xff] }
 0x39e   :  { %v546_v33 = vld [vmem:[%s12918_s1 + $0xff0] sm:$0xff]  ;;  %v583_v56 = vld [vmem:[%s12918_s1 + $0x1118] sm:$0xff] }
 0x39f   :  { %8554 = vmatpush1.bf16.msra.mxu0 %v10235_v12  ;;  %8640 = vmatpush1.bf16.msra.mxu1 %v10237_v55  ;;  %v487_v12 = vld [vmem:[%s12918_s1 + $0xe18] sm:$0xff]  ;;  %v10403_v55 = vcombine.low %v450_v2, %v462_v3  ;;  %v558_v34 = vld [vmem:[%s12918_s1 + $0x1050] sm:$0xff]  ;;  %v44_v2 = vld [vmem:[%s12918_s1 + $0x40] sm:$0xff] }
 0x3a0   :  { %8555 = vmatprep.subr.bf16.mxu0 %v10260_v13  ;;  %8641 = vmatprep.subr.bf16.mxu1 %v10262_v15  ;;  %v10405_v13 = vcombine.low %v451_v4, %v463_v5  ;;  %v10428_v15 = vcombine.high %v474_v8, %v486_v9  ;;  %v10430_v16 = vcombine.high %v475_v11, %v487_v12  ;;  %v570_v0 = vld [vmem:[%s12918_s1 + $0x10b0] sm:$0xff]  ;;  %v595_v53 = vld [vmem:[%s12918_s1 + $0x1178] sm:$0xff]  ;;  %v56_v3 = vld [vmem:[%s12918_s1 + $0xa0] sm:$0xff] }
 0x3a1   :  { %v582_v42 = vld [vmem:[%s12918_s1 + $0x1110] sm:$0xff]  ;;  %v607_v58 = vld [vmem:[%s12918_s1 + $0x11d8] sm:$0xff]  ;;  %v45_v4 = vld [vmem:[%s12918_s1 + $0x48] sm:$0xff] }
 0x3a2   :  { %v594_v50 = vld [vmem:[%s12918_s1 + $0x1170] sm:$0xff]  ;;  %v57_v5 = vld [vmem:[%s12918_s1 + $0xa8] sm:$0xff] }
 0x3a3   :  { %8556 = vmatpush1.bf16.msra.mxu0 %v10259_v21  ;;  %8642 = vmatpush1.bf16.msra.mxu1 %v10261_v60  ;;  %v10427_v21 = vcombine.low %v474_v8, %v486_v9  ;;  %v10429_v60 = vcombine.low %v475_v11, %v487_v12  ;;  %v606_v52 = vld [vmem:[%s12918_s1 + $0x11d0] sm:$0xff]  ;;  %v68_v8 = vld [vmem:[%s12918_s1 + $0x100] sm:$0xff]  ;;  %v69_v11 = vld [vmem:[%s12918_s1 + $0x108] sm:$0xff] }
 0x3a4   :  { %8557 = vmatprep.subr.bf16.mxu0 %v10284_v22  ;;  %8643 = vmatprep.subr.bf16.mxu1 %v10286_v63  ;;  %v10452_v22 = vcombine.high %v498_v17, %v510_v18  ;;  %v80_v9 = vld [vmem:[%s12918_s1 + $0x160] sm:$0xff]  ;;  %v81_v12 = vld [vmem:[%s12918_s1 + $0x168] sm:$0xff] }
 0x3a7   :  { %8558 = vmatpush1.bf16.msra.mxu0 %v10283_v29  ;;  %8644 = vmatpush1.bf16.msra.mxu1 %v10285_v30  ;;  %v10451_v29 = vcombine.low %v498_v17, %v510_v18  ;;  %v92_v17 = vld [vmem:[%s12918_s1 + $0x1c0] sm:$0xff] }
 0x3a8   :  { %8559 = vmatprep.subr.bf16.mxu0 %v10308_v31  ;;  %8645 = vmatprep.subr.bf16.mxu1 %v10310_v32  ;;  %v10476_v31 = vcombine.high %v522_v24, %v534_v25  ;;  %v10478_v32 = vcombine.high %v523_v26, %v535_v28  ;;  %v104_v18 = vld [vmem:[%s12918_s1 + $0x220] sm:$0xff] }
 0x3ab   :  { %8560 = vmatpush1.bf16.msra.mxu0 %v10307_v38  ;;  %8646 = vmatpush1.bf16.msra.mxu1 %v10309_v39  ;;  %v10475_v38 = vcombine.low %v522_v24, %v534_v25  ;;  %v10477_v39 = vcombine.low %v523_v26, %v535_v28  ;;  %v116_v24 = vld [vmem:[%s12918_s1 + $0x280] sm:$0xff]  ;;  %v117_v26 = vld [vmem:[%s12918_s1 + $0x288] sm:$0xff] }
 0x3ac   :  { %8561 = vmatprep.subr.bf16.mxu0 %v10332_v41  ;;  %8647 = vmatprep.subr.bf16.mxu1 %v10334_v14  ;;  %v10500_v41 = vcombine.high %v546_v33, %v558_v34  ;;  %v10502_v14 = vcombine.high %v547_v35, %v559_v37  ;;  %v128_v25 = vld [vmem:[%s12918_s1 + $0x2e0] sm:$0xff]  ;;  %v129_v28 = vld [vmem:[%s12918_s1 + $0x2e8] sm:$0xff] }
 0x3af   :  { %8562 = vmatpush1.bf16.msra.mxu0 %v10331_v45  ;;  %8648 = vmatpush1.bf16.msra.mxu1 %v10333_v46  ;;  %v10499_v45 = vcombine.low %v546_v33, %v558_v34  ;;  %v10501_v46 = vcombine.low %v547_v35, %v559_v37  ;;  %v140_v33 = vld [vmem:[%s12918_s1 + $0x340] sm:$0xff]  ;;  %v141_v35 = vld [vmem:[%s12918_s1 + $0x348] sm:$0xff] }
 0x3b0   :  { %8563 = vmatprep.subr.bf16.mxu0 %v10356_v47  ;;  %8649 = vmatprep.subr.bf16.mxu1 %v10358_v48  ;;  %v10524_v47 = vcombine.high %v570_v0, %v582_v42  ;;  %v10526_v48 = vcombine.high %v571_v44, %v583_v56  ;;  %v152_v34 = vld [vmem:[%s12918_s1 + $0x3a0] sm:$0xff]  ;;  %v153_v37 = vld [vmem:[%s12918_s1 + $0x3a8] sm:$0xff] }
 0x3b3   :  { %8564 = vmatpush1.bf16.msra.mxu0 %v10355_v40  ;;  %8650 = vmatpush1.bf16.msra.mxu1 %v10357_v61  ;;  %v10523_v40 = vcombine.low %v570_v0, %v582_v42  ;;  %v10525_v61 = vcombine.low %v571_v44, %v583_v56  ;;  %v164_v0 = vld [vmem:[%s12918_s1 + $0x400] sm:$0xff]  ;;  %v12272_v44 = vsub.s32 4, %v11925_v43  ;;  %v165_v56 = vld [vmem:[%s12918_s1 + $0x408] sm:$0xff] }
 0x3b4   :  { %8576 = vmatprep.subr.bf16.mxu0 %v10380_v62  ;;  %8662 = vmatprep.subr.bf16.mxu1 %v10382_v1  ;;  %v10548_v62 = vcombine.high %v594_v50, %v606_v52  ;;  %v10550_v1 = vcombine.high %v595_v53, %v607_v58  ;;  %v176_v42 = vld [vmem:[%s12918_s1 + $0x460] sm:$0xff] }
 0x3b6   :  { %8566 = vmatmul.mubr.bf16.vlgmr.msra.gmra.mrb[12].mxu0 %v11784_v20  ;;  %8652 = vmatmul.mubr.bf16.vlgmr.msra.gmra.mrb[12].mxu1 %v11784_v20  ;;  %v499_v20 = vld [vmem:[%s12918_s1 + $0xe78] sm:$0xff] }
 0x3b7   :  { %8577 = vmatpush1.bf16.msra.mxu0 %v10379_v6  ;;  %8663 = vmatpush1.bf16.msra.mxu1 %v10381_v7  ;;  %v10454_v63 = vcombine.high %v499_v20, %v511_v19  ;;  %v10453_v30 = vcombine.low %v499_v20, %v511_v19  ;;  %v10547_v6 = vcombine.low %v594_v50, %v606_v52  ;;  %v93_v20 = vld [vmem:[%s12918_s1 + $0x1c8] sm:$0xff]  ;;  %v12287_v52 = vsub.s32 7, %v11925_v43 }
 0x3b8   :  { %8578 = vmatprep.subr.bf16.mxu0 %v10404_v36  ;;  %8664 = vmatprep.subr.bf16.mxu1 %v10406_v51  ;;  %v10549_v7 = vcombine.low %v595_v53, %v607_v58  ;;  %v10000_v36 = vcombine.high %v44_v2, %v56_v3  ;;  %v10002_v51 = vcombine.high %v45_v4, %v57_v5  ;;  %v105_v19 = vld [vmem:[%s12918_s1 + $0x228] sm:$0xff] }
 0x3b9   :  { %8608 = vmatprep.mubr.bf16.mxu0 %v10814_v27  ;;  %8694 = vmatprep.mubr.bf16.mxu1 %v10814_v27  ;;  %v10097_v50 = vcombine.low %v141_v35, %v153_v37  ;;  %v10120_v53 = vcombine.high %v164_v0, %v176_v42 }
 0x3bb   :  { %8579 = vmatpush1.bf16.msra.mxu0 %v10403_v55  ;;  %8665 = vmatpush1.bf16.msra.mxu1 %v10405_v13  ;;  %v9999_v55 = vcombine.low %v44_v2, %v56_v3  ;;  %v10001_v13 = vcombine.low %v45_v4, %v57_v5  ;;  %v10119_v4 = vcombine.low %v164_v0, %v176_v42 }
 0x3bc   :  { %8580 = vmatprep.subr.bf16.mxu0 %v10428_v15  ;;  %8666 = vmatprep.subr.bf16.mxu1 %v10430_v16  ;;  %v10024_v15 = vcombine.high %v68_v8, %v80_v9  ;;  %v10026_v16 = vcombine.high %v69_v11, %v81_v12  ;;  %v9086_v5 = vrot.slane %v11945_v54, %v12287_v52 }
 0x3bf   :  { %8581 = vmatpush1.bf16.msra.mxu0 %v10427_v21  ;;  %8667 = vmatpush1.bf16.msra.mxu1 %v10429_v60  ;;  %v10023_v21 = vcombine.low %v68_v8, %v80_v9  ;;  %v10025_v60 = vcombine.low %v69_v11, %v81_v12  ;;  %v212_v8 = vld [vmem:[%s12918_s1 + $0x580] sm:$0xff] }
 0x3c0   :  { %8582 = vmatprep.subr.bf16.mxu0 %v10452_v22  ;;  %8668 = vmatprep.subr.bf16.mxu1 %v10454_v63  ;;  %v10048_v22 = vcombine.high %v92_v17, %v104_v18  ;;  %v10050_v63 = vcombine.high %v93_v20, %v105_v19  ;;  %v224_v9 = vld [vmem:[%s12918_s1 + $0x5e0] sm:$0xff] }
 0x3c3   :  { %8583 = vmatpush1.bf16.msra.mxu0 %v10451_v29  ;;  %8669 = vmatpush1.bf16.msra.mxu1 %v10453_v30  ;;  %v10047_v29 = vcombine.low %v92_v17, %v104_v18  ;;  %v10049_v30 = vcombine.low %v93_v20, %v105_v19 }
 0x3c4   :  { %8584 = vmatprep.subr.bf16.mxu0 %v10476_v31  ;;  %8670 = vmatprep.subr.bf16.mxu1 %v10478_v32  ;;  %v10072_v31 = vcombine.high %v116_v24, %v128_v25  ;;  %v10074_v32 = vcombine.high %v117_v26, %v129_v28 }
 0x3c7   :  { %8585 = vmatpush1.bf16.msra.mxu0 %v10475_v38  ;;  %8671 = vmatpush1.bf16.msra.mxu1 %v10477_v39  ;;  %v10071_v38 = vcombine.low %v116_v24, %v128_v25  ;;  %v10073_v39 = vcombine.low %v117_v26, %v129_v28  ;;  %v10168_v24 = vcombine.high %v212_v8, %v224_v9 }
 0x3c8   :  { %8586 = vmatprep.subr.bf16.mxu0 %v10500_v41  ;;  %8672 = vmatprep.subr.bf16.mxu1 %v10502_v14  ;;  %v10096_v41 = vcombine.high %v140_v33, %v152_v34  ;;  %v10098_v14 = vcombine.high %v141_v35, %v153_v37  ;;  %v237_v35 = vld [vmem:[%s12918_s1 + $0x648] sm:$0xff] }
 0x3c9   :  { %v249_v37 = vld [vmem:[%s12918_s1 + $0x6a8] sm:$0xff] }
 0x3ca   :  { %v10194_v42 = vcombine.high %v237_v35, %v249_v37 }
 0x3cb   :  { %8587 = vmatpush1.bf16.msra.mxu0 %v10499_v45  ;;  %8673 = vmatpush1.bf16.msra.mxu1 %v10501_v46  ;;  %v177_v45 = vld [vmem:[%s12918_s1 + $0x468] sm:$0xff]  ;;  %v10095_v46 = vcombine.low %v140_v33, %v152_v34 }
 0x3cc   :  { %8588 = vmatprep.subr.bf16.mxu0 %v10524_v47  ;;  %8674 = vmatprep.subr.bf16.mxu1 %v10526_v48  ;;  %v12281_v47 = vsub.s32 6, %v11925_v43  ;;  %v12284_v48 = vsub.s32 5, %v11925_v43  ;;  %v10122_v58 = vcombine.high %v165_v56, %v177_v45  ;;  %v201_v43 = vld [vmem:[%s12918_s1 + $0x528] sm:$0xff] }
 0x3ce   :  { %v9082_v2 = vrot.slane %v11945_v54, %v12281_v47  ;;  %v9078_v3 = vrot.slane %v11945_v54, %v12284_v48 }
 0x3cf   :  { %8589 = vmatpush1.bf16.msra.mxu0 %v10523_v40  ;;  %8675 = vmatpush1.bf16.msra.mxu1 %v10525_v61  ;;  %v188_v40 = vld [vmem:[%s12918_s1 + $0x4c0] sm:$0xff] }
 0x3d0   :  { %8590 = vmatprep.subr.bf16.mxu0 %v10548_v62  ;;  %8676 = vmatprep.subr.bf16.mxu1 %v10550_v1  ;;  %v200_v61 = vld [vmem:[%s12918_s1 + $0x520] sm:$0xff]  ;;  %v9074_v62 = vrot.slane %v11945_v54, %v12272_v44  ;;  %v189_v1 = vld [vmem:[%s12918_s1 + $0x4c8] sm:$0xff] }
 0x3d1   :  { %v213_v54 = vld [vmem:[%s12918_s1 + $0x588] sm:$0xff]  ;;  %v10143_v20 = vcombine.low %v188_v40, %v200_v61  ;;  %v10145_v19 = vcombine.low %v189_v1, %v201_v43 }
 0x3d3   :  { %8591 = vmatpush1.bf16.msra.mxu0 %v10547_v6  ;;  %8677 = vmatpush1.bf16.msra.mxu1 %v10549_v7  ;;  %v10121_v6 = vcombine.low %v165_v56, %v177_v45  ;;  %v10144_v7 = vcombine.high %v188_v40, %v200_v61  ;;  %v260_v56 = vld [vmem:[%s12918_s1 + $0x700] sm:$0xff] }
 0x3d4   :  { %8705 = vmatprep.subr.bf16.mxu0 %v10000_v36  ;;  %8791 = vmatprep.subr.bf16.mxu1 %v10002_v51  ;;  %v10146_v51 = vcombine.high %v189_v1, %v201_v43  ;;  %v272_v45 = vld [vmem:[%s12918_s1 + $0x760] sm:$0xff]  ;;  %v285_v43 = vld [vmem:[%s12918_s1 + $0x7c8] sm:$0xff] }
 0x3d5   :  { %v10216_v40 = vcombine.high %v260_v56, %v272_v45  ;;  %v296_v1 = vld [vmem:[%s12918_s1 + $0x820] sm:$0xff] }
 0x3d6   :  { %8609 = vmatmul.mubr.bf16.vlgmr.msra.gmra.mrb[12].mxu0 %v11889_v23  ;;  %8695 = vmatmul.mubr.bf16.vlgmr.msra.gmra.mrb[12].mxu1 %v11889_v23  ;;  %v12243_v23 = vld [vmem:[%s12917_s0 + $0x4] ss:$12 sps:$4 sm:$0xff]  }
 0x3d7   :  { %8706 = vmatpush1.bf16.msra.mxu0 %v9999_v55  ;;  %8792 = vmatpush1.bf16.msra.mxu1 %v10001_v13  ;;  %v225_v13 = vld [vmem:[%s12918_s1 + $0x5e8] sm:$0xff] }
 0x3d8   :  { %8707 = vmatprep.subr.bf16.mxu0 %v10024_v15  ;;  %8793 = vmatprep.subr.bf16.mxu1 %v10026_v16 }
 0x3d9   :  { %8737 = vmatprep.mubr.bf16.mxu0 %v12243_v23  ;;  %8823 = vmatprep.mubr.bf16.mxu1 %v12243_v23 }
 0x3db   :  { %8708 = vmatpush1.bf16.msra.mxu0 %v10023_v21  ;;  %8794 = vmatpush1.bf16.msra.mxu1 %v10025_v60 }
 0x3dc   :  { %8709 = vmatprep.subr.bf16.mxu0 %v10048_v22  ;;  %8795 = vmatprep.subr.bf16.mxu1 %v10050_v63 }
 0x3df   :  { %8710 = vmatpush1.bf16.msra.mxu0 %v10047_v29  ;;  %8796 = vmatpush1.bf16.msra.mxu1 %v10049_v30  ;;  %v10170_v30 = vcombine.high %v213_v54, %v225_v13 }
 0x3e0   :  { %8711 = vmatprep.subr.bf16.mxu0 %v10072_v31  ;;  %8797 = vmatprep.subr.bf16.mxu1 %v10074_v32  ;;  %v236_v31 = vld [vmem:[%s12918_s1 + $0x640] sm:$0xff] }
 0x3e1   :  { %v248_v32 = vld [vmem:[%s12918_s1 + $0x6a0] sm:$0xff] }
 0x3e2   :  { %v10192_v0 = vcombine.high %v236_v31, %v248_v32 }
 0x3e3   :  { %8712 = vmatpush1.bf16.msra.mxu0 %v10071_v38  ;;  %8798 = vmatpush1.bf16.msra.mxu1 %v10073_v39  ;;  %v10167_v39 = vcombine.low %v212_v8, %v224_v9  ;;  %v321_v8 = vld [vmem:[%s12918_s1 + $0x8e8] sm:$0xff] }
 0x3e4   :  { %8713 = vmatprep.subr.bf16.mxu0 %v10096_v41  ;;  %8799 = vmatprep.subr.bf16.mxu1 %v10098_v14  ;;  %v10169_v14 = vcombine.low %v213_v54, %v225_v13  ;;  %v332_v54 = vld [vmem:[%s12918_s1 + $0x940] sm:$0xff] }
 0x3e5   :  { %v344_v13 = vld [vmem:[%s12918_s1 + $0x9a0] sm:$0xff] }
 0x3e7   :  { %8714 = vmatpush1.bf16.msra.mxu0 %v10095_v46  ;;  %8800 = vmatpush1.bf16.msra.mxu1 %v10097_v50  ;;  %v261_v46 = vld [vmem:[%s12918_s1 + $0x708] sm:$0xff] }
 0x3e8   :  { %8715 = vmatprep.subr.bf16.mxu0 %v10120_v53  ;;  %8801 = vmatprep.subr.bf16.mxu1 %v10122_v58  ;;  %v273_v50 = vld [vmem:[%s12918_s1 + $0x768] sm:$0xff]  ;;  %v10191_v53 = vcombine.low %v236_v31, %v248_v32  ;;  %v10193_v58 = vcombine.low %v237_v35, %v249_v37 }
 0x3e9   :  { %v8266_v36 = vpop.f32.mrb[4].mxu0  ;;  %v8352_v12 = vpop.f32.mrb[4].mxu1  ;;  %v10218_v61 = vcombine.high %v261_v46, %v273_v50  ;;  %v381_v31 = vld [vmem:[%s12918_s1 + $0xac8] sm:$0xff] }
 0x3ea   :  { %v9179_v11 = vadd.f32 %v9074_v62, %v8266_v36  ;;  %v8268_v55 = vpop.f32.mrb[5].mxu0  ;;  %v9181_v15 = vadd.f32 %v9082_v2, %v8352_v12  ;;  %v8354_v17 = vpop.f32.mrb[5].mxu1  ;;  %v320_v36 = vld [vmem:[%s12918_s1 + $0x8e0] sm:$0xff]  ;;  %v393_v32 = vld [vmem:[%s12918_s1 + $0xb28] sm:$0xff] }
 0x3eb   :  { %v9180_v16 = vadd.f32 %v9078_v3, %v8268_v55  ;;  %v8270_v18 = vpop.f32.mrb[6].mxu0  ;;  %8716 = vmatpush1.bf16.msra.mxu0 %v10119_v4  ;;  %v9182_v21 = vadd.f32 %v9086_v5, %v8354_v17  ;;  %v8356_v22 = vpop.f32.mrb[6].mxu1  ;;  %8802 = vmatpush1.bf16.msra.mxu1 %v10121_v6  ;;  %v10217_v4 = vcombine.low %v261_v46, %v273_v50  ;;  %v428_v46 = vld [vmem:[%s12918_s1 + $0xc40] sm:$0xff] }
 0x3ec   :  { %v9203_v60 = vadd.f32 %v9074_v62, %v8270_v18  ;;  %v8272_v63 = vpop.f32.mrb[7].mxu0  ;;  %8717 = vmatprep.subr.bf16.mxu0 %v10144_v7  ;;  %v9205_v26 = vadd.f32 %v9082_v2, %v8356_v22  ;;  %v8358_v29 = vpop.f32.mrb[7].mxu1  ;;  %8803 = vmatprep.subr.bf16.mxu1 %v10146_v51  ;;  %v284_v62 = vld [vmem:[%s12918_s1 + $0x7c0] sm:$0xff]  ;;  %v297_v2 = vld [vmem:[%s12918_s1 + $0x828] sm:$0xff]  ;;  %v10338_v37 = vcombine.high %v381_v31, %v393_v32 }
 0x3ed   :  { %v10597_v25 = vpack.c.bf16 %v9180_v16, %v9179_v11  ;;  %v9204_v28 = vadd.f32 %v9078_v3, %v8272_v63  ;;  %v10598_v33 = vpack.c.bf16 %v9182_v21, %v9181_v15  ;;  %v9206_v34 = vadd.f32 %v9086_v5, %v8358_v29  ;;  %v308_v7 = vld [vmem:[%s12918_s1 + $0x880] sm:$0xff]  ;;  %v309_v51 = vld [vmem:[%s12918_s1 + $0x888] sm:$0xff] }
 0x3ee   :  { %v10215_v3 = vcombine.low %v260_v56, %v272_v45  ;;  %v10240_v5 = vcombine.high %v284_v62, %v296_v1  ;;  %v10242_v6 = vcombine.high %v285_v43, %v297_v2  ;;  %v10239_v9 = vcombine.low %v284_v62, %v296_v1  ;;  %v333_v15 = vld [vmem:[%s12918_s1 + $0x948] sm:$0xff]  ;;  %v356_v21 = vld [vmem:[%s12918_s1 + $0xa00] sm:$0xff] }
 0x3ef   :  { %9309 = vst [vmem:[%s12921_s4 + $0x10] sm:$0xff] %v10597_v25  ;;  %v10603_v38 = vpack.c.bf16 %v9204_v28, %v9203_v60  ;;  %8718 = vmatpush1.bf16.msra.mxu0 %v10143_v20  ;;  %9310 = vst [vmem:[%s12921_s4 + $0x18] sm:$0xff] %v10598_v33  ;;  %v10604_v41 = vpack.c.bf16 %v9206_v34, %v9205_v26  ;;  %8804 = vmatpush1.bf16.msra.mxu1 %v10145_v19  ;;  %v345_v16 = vld [vmem:[%s12918_s1 + $0x9a8] sm:$0xff]  ;;  %v368_v60 = vld [vmem:[%s12918_s1 + $0xa60] sm:$0xff] }
 0x3f0   :  { %8719 = vmatprep.subr.bf16.mxu0 %v10168_v24  ;;  %8805 = vmatprep.subr.bf16.mxu1 %v10170_v30  ;;  %v10241_v11 = vcombine.low %v285_v43, %v297_v2  ;;  %v10264_v12 = vcombine.high %v308_v7, %v320_v36  ;;  %v10266_v55 = vcombine.high %v309_v51, %v321_v8  ;;  %v357_v22 = vld [vmem:[%s12918_s1 + $0xa08] sm:$0xff]  ;;  %v380_v29 = vld [vmem:[%s12918_s1 + $0xac0] sm:$0xff] }
 0x3f1   :  { %9315 = vst [vmem:[%s12921_s4 + $0x40] sm:$0xff] %v10603_v38  ;;  %9316 = vst [vmem:[%s12921_s4 + $0x48] sm:$0xff] %v10604_v41  ;;  %v10263_v17 = vcombine.low %v308_v7, %v320_v36  ;;  %v10265_v18 = vcombine.low %v309_v51, %v321_v8  ;;  %v10288_v20 = vcombine.high %v332_v54, %v344_v13  ;;  %v369_v63 = vld [vmem:[%s12918_s1 + $0xa68] sm:$0xff]  ;;  %v392_v30 = vld [vmem:[%s12918_s1 + $0xb20] sm:$0xff] }
 0x3f2   :  { %v10290_v19 = vcombine.high %v333_v15, %v345_v16  ;;  %v10287_v24 = vcombine.low %v332_v54, %v344_v13  ;;  %v10289_v25 = vcombine.low %v333_v15, %v345_v16  ;;  %v10312_v26 = vcombine.high %v356_v21, %v368_v60  ;;  %v404_v38 = vld [vmem:[%s12918_s1 + $0xb80] sm:$0xff]  ;;  %v405_v41 = vld [vmem:[%s12918_s1 + $0xb88] sm:$0xff] }
 0x3f3   :  { %8720 = vmatpush1.bf16.msra.mxu0 %v10167_v39  ;;  %8806 = vmatpush1.bf16.msra.mxu1 %v10169_v14  ;;  %v10314_v28 = vcombine.high %v357_v22, %v369_v63  ;;  %v10311_v33 = vcombine.low %v356_v21, %v368_v60  ;;  %v10313_v34 = vcombine.low %v357_v22, %v369_v63  ;;  %v416_v39 = vld [vmem:[%s12918_s1 + $0xbe0] sm:$0xff]  ;;  %v417_v14 = vld [vmem:[%s12918_s1 + $0xbe8] sm:$0xff] }
 0x3f4   :  { %8721 = vmatprep.subr.bf16.mxu0 %v10192_v0  ;;  %8807 = vmatprep.subr.bf16.mxu1 %v10194_v42  ;;  %v10336_v35 = vcombine.high %v380_v29, %v392_v30  ;;  %v10335_v0 = vcombine.low %v380_v29, %v392_v30  ;;  %v10337_v42 = vcombine.low %v381_v31, %v393_v32  ;;  %v440_v50 = vld [vmem:[%s12918_s1 + $0xca0] sm:$0xff] }
 0x3f5   :  { %v10360_v56 = vcombine.high %v404_v38, %v416_v39  ;;  %v10362_v45 = vcombine.high %v405_v41, %v417_v14  ;;  %v10384_v62 = vcombine.high %v428_v46, %v440_v50  ;;  %v452_v43 = vld [vmem:[%s12918_s1 + $0xd00] sm:$0xff] }
 0x3f6   :  { %v464_v2 = vld [vmem:[%s12918_s1 + $0xd60] sm:$0xff] }
 0x3f7   :  { %8722 = vmatpush1.bf16.msra.mxu0 %v10191_v53  ;;  %8808 = vmatpush1.bf16.msra.mxu1 %v10193_v58  ;;  %v429_v53 = vld [vmem:[%s12918_s1 + $0xc48] sm:$0xff]  ;;  %v10408_v7 = vcombine.high %v452_v43, %v464_v2  ;;  %v476_v51 = vld [vmem:[%s12918_s1 + $0xdc0] sm:$0xff] }
 0x3f8   :  { %8723 = vmatprep.subr.bf16.mxu0 %v10216_v40  ;;  %8809 = vmatprep.subr.bf16.mxu1 %v10218_v61  ;;  %v441_v58 = vld [vmem:[%s12918_s1 + $0xca8] sm:$0xff]  ;;  %v10359_v40 = vcombine.low %v404_v38, %v416_v39  ;;  %v10361_v61 = vcombine.low %v405_v41, %v417_v14  ;;  %v488_v8 = vld [vmem:[%s12918_s1 + $0xe20] sm:$0xff] }
 0x3f9   :  { %v10386_v1 = vcombine.high %v429_v53, %v441_v58  ;;  %v10432_v13 = vcombine.high %v476_v51, %v488_v8  ;;  %v500_v16 = vld [vmem:[%s12918_s1 + $0xe80] sm:$0xff] }
 0x3fa   :  { %v524_v63 = vld [vmem:[%s12918_s1 + $0xf40] sm:$0xff] }
 0x3fb   :  { %8724 = vmatpush1.bf16.msra.mxu0 %v10215_v3  ;;  %8810 = vmatpush1.bf16.msra.mxu1 %v10217_v4  ;;  %v453_v3 = vld [vmem:[%s12918_s1 + $0xd08] sm:$0xff]  ;;  %v548_v32 = vld [vmem:[%s12918_s1 + $0x1000] sm:$0xff] }
 0x3fc   :  { %8725 = vmatprep.subr.bf16.mxu0 %v10240_v5  ;;  %8811 = vmatprep.subr.bf16.mxu1 %v10242_v6  ;;  %v465_v4 = vld [vmem:[%s12918_s1 + $0xd68] sm:$0xff]  ;;  %v10383_v5 = vcombine.low %v428_v46, %v440_v50  ;;  %v10385_v6 = vcombine.low %v429_v53, %v441_v58  ;;  %v572_v14 = vld [vmem:[%s12918_s1 + $0x10c0] sm:$0xff] }
 0x3fd   :  { %v10410_v36 = vcombine.high %v453_v3, %v465_v4  ;;  %v10409_v54 = vcombine.low %v453_v3, %v465_v4  ;;  %v596_v58 = vld [vmem:[%s12918_s1 + $0x1180] sm:$0xff]  ;;  %v46_v4 = vld [vmem:[%s12918_s1 + $0x50] sm:$0xff] }
 0x3ff   :  { %8726 = vmatpush1.bf16.msra.mxu0 %v10239_v9  ;;  %8812 = vmatpush1.bf16.msra.mxu1 %v10241_v11  ;;  %v12462_v9 = vld [vmem:[%s12917_s0] ss:$12 sps:$4 sm:$0xff]  }
 0x400   :  { %8727 = vmatprep.subr.bf16.mxu0 %v10264_v12  ;;  %8813 = vmatprep.subr.bf16.mxu1 %v10266_v55  ;;  %v477_v11 = vld [vmem:[%s12918_s1 + $0xdc8] sm:$0xff]  ;;  %v10407_v55 = vcombine.low %v452_v43, %v464_v2 }
 0x401   :  { %v489_v12 = vld [vmem:[%s12918_s1 + $0xe28] sm:$0xff] }
 0x402   :  { %v10434_v15 = vcombine.high %v477_v11, %v489_v12  ;;  %v10433_v21 = vcombine.low %v477_v11, %v489_v12  ;;  %v70_v12 = vld [vmem:[%s12918_s1 + $0x110] sm:$0xff] }
 0x403   :  { %8728 = vmatpush1.bf16.msra.mxu0 %v10263_v17  ;;  %8814 = vmatpush1.bf16.msra.mxu1 %v10265_v18  ;;  %v512_v17 = vld [vmem:[%s12918_s1 + $0xee0] sm:$0xff]  ;;  %v501_v18 = vld [vmem:[%s12918_s1 + $0xe88] sm:$0xff] }
 0x404   :  { %8729 = vmatprep.subr.bf16.mxu0 %v10288_v20  ;;  %8815 = vmatprep.subr.bf16.mxu1 %v10290_v19  ;;  %v513_v20 = vld [vmem:[%s12918_s1 + $0xee8] sm:$0xff]  ;;  %v10431_v19 = vcombine.low %v476_v51, %v488_v8  ;;  %v10456_v60 = vcombine.high %v500_v16, %v512_v17 }
 0x405   :  { %v10458_v22 = vcombine.high %v501_v18, %v513_v20  ;;  %v10457_v29 = vcombine.low %v501_v18, %v513_v20  ;;  %v94_v20 = vld [vmem:[%s12918_s1 + $0x1d0] sm:$0xff] }
 0x407   :  { %8730 = vmatpush1.bf16.msra.mxu0 %v10287_v24  ;;  %8816 = vmatpush1.bf16.msra.mxu1 %v10289_v25  ;;  %v536_v24 = vld [vmem:[%s12918_s1 + $0xfa0] sm:$0xff]  ;;  %v525_v25 = vld [vmem:[%s12918_s1 + $0xf48] sm:$0xff] }
 0x408   :  { %8731 = vmatprep.subr.bf16.mxu0 %v10312_v26  ;;  %8817 = vmatprep.subr.bf16.mxu1 %v10314_v28  ;;  %v537_v26 = vld [vmem:[%s12918_s1 + $0xfa8] sm:$0xff]  ;;  %v10455_v28 = vcombine.low %v500_v16, %v512_v17  ;;  %v10480_v30 = vcombine.high %v524_v63, %v536_v24 }
 0x409   :  { %v10482_v31 = vcombine.high %v525_v25, %v537_v26  ;;  %v10481_v38 = vcombine.low %v525_v25, %v537_v26 }
 0x40b   :  { %8732 = vmatpush1.bf16.msra.mxu0 %v10311_v33  ;;  %8818 = vmatpush1.bf16.msra.mxu1 %v10313_v34  ;;  %v560_v33 = vld [vmem:[%s12918_s1 + $0x1060] sm:$0xff]  ;;  %v549_v34 = vld [vmem:[%s12918_s1 + $0x1008] sm:$0xff] }
 0x40c   :  { %8733 = vmatprep.subr.bf16.mxu0 %v10336_v35  ;;  %8819 = vmatprep.subr.bf16.mxu1 %v10338_v37  ;;  %v561_v35 = vld [vmem:[%s12918_s1 + $0x1068] sm:$0xff]  ;;  %v10479_v37 = vcombine.low %v524_v63, %v536_v24  ;;  %v10504_v39 = vcombine.high %v548_v32, %v560_v33 }
 0x40d   :  { %v10506_v41 = vcombine.high %v549_v34, %v561_v35  ;;  %v10505_v46 = vcombine.low %v549_v34, %v561_v35 }
 0x40f   :  { %8734 = vmatpush1.bf16.msra.mxu0 %v10335_v0  ;;  %8820 = vmatpush1.bf16.msra.mxu1 %v10337_v42  ;;  %v584_v0 = vld [vmem:[%s12918_s1 + $0x1120] sm:$0xff]  ;;  %v573_v42 = vld [vmem:[%s12918_s1 + $0x10c8] sm:$0xff] }
 0x410   :  { %8735 = vmatprep.subr.bf16.mxu0 %v10360_v56  ;;  %8821 = vmatprep.subr.bf16.mxu1 %v10362_v45  ;;  %v585_v56 = vld [vmem:[%s12918_s1 + $0x1128] sm:$0xff]  ;;  %v10503_v45 = vcombine.low %v548_v32, %v560_v33  ;;  %v10528_v50 = vcombine.high %v572_v14, %v584_v0 }
 0x411   :  { %v10530_v53 = vcombine.high %v573_v42, %v585_v56  ;;  %v10529_v43 = vcombine.low %v573_v42, %v585_v56  ;;  %v166_v56 = vld [vmem:[%s12918_s1 + $0x410] sm:$0xff] }
 0x413   :  { %8736 = vmatpush1.bf16.msra.mxu0 %v10359_v40  ;;  %8822 = vmatpush1.bf16.msra.mxu1 %v10361_v61  ;;  %v608_v40 = vld [vmem:[%s12918_s1 + $0x11e0] sm:$0xff]  ;;  %v597_v61 = vld [vmem:[%s12918_s1 + $0x1188] sm:$0xff] }
 0x414   :  { %8748 = vmatprep.subr.bf16.mxu0 %v10384_v62  ;;  %8834 = vmatprep.subr.bf16.mxu1 %v10386_v1  ;;  %v609_v62 = vld [vmem:[%s12918_s1 + $0x11e8] sm:$0xff]  ;;  %v10527_v1 = vcombine.low %v572_v14, %v584_v0  ;;  %v10552_v2 = vcombine.high %v596_v58, %v608_v40 }
 0x415   :  { %v10554_v3 = vcombine.high %v597_v61, %v609_v62  ;;  %v10553_v51 = vcombine.low %v597_v61, %v609_v62 }
 0x416   :  { %8738 = vmatmul.mubr.bf16.vlgmr.msra.gmra.mrb[16].mxu0 %v12462_v9  ;;  %8824 = vmatmul.mubr.bf16.vlgmr.msra.gmra.mrb[16].mxu1 %v12462_v9 }
 0x417   :  { %8749 = vmatpush1.bf16.msra.mxu0 %v10383_v5  ;;  %8835 = vmatpush1.bf16.msra.mxu1 %v10385_v6  ;;  %v58_v5 = vld [vmem:[%s12918_s1 + $0xb0] sm:$0xff]  ;;  %v47_v6 = vld [vmem:[%s12918_s1 + $0x58] sm:$0xff] }
 0x418   :  { %8750 = vmatprep.subr.bf16.mxu0 %v10408_v7  ;;  %8836 = vmatprep.subr.bf16.mxu1 %v10410_v36  ;;  %v59_v7 = vld [vmem:[%s12918_s1 + $0xb8] sm:$0xff]  ;;  %v10551_v36 = vcombine.low %v596_v58, %v608_v40  ;;  %v10004_v8 = vcombine.high %v46_v4, %v58_v5  ;;  %v12618_v58 = vld [vmem:[%s12920_s3 + $0x8] sm:$0xff] }
 0x419   :  { %8780 = vmatprep.mubr.bf16.mxu0 %v10814_v27  ;;  %8866 = vmatprep.mubr.bf16.mxu1 %v10814_v27  ;;  %v10006_v11 = vcombine.high %v47_v6, %v59_v7  ;;  %v10005_v16 = vcombine.low %v47_v6, %v59_v7  ;;  %v9094_v6 = vrot.slane %v12618_v58, %v11951_v10 }
 0x41b   :  { %8751 = vmatpush1.bf16.msra.mxu0 %v10407_v55  ;;  %8837 = vmatpush1.bf16.msra.mxu1 %v10409_v54  ;;  %v82_v55 = vld [vmem:[%s12918_s1 + $0x170] sm:$0xff]  ;;  %v71_v54 = vld [vmem:[%s12918_s1 + $0x118] sm:$0xff] }
 0x41c   :  { %8752 = vmatprep.subr.bf16.mxu0 %v10432_v13  ;;  %8838 = vmatprep.subr.bf16.mxu1 %v10434_v15  ;;  %v83_v13 = vld [vmem:[%s12918_s1 + $0x178] sm:$0xff]  ;;  %v10003_v15 = vcombine.low %v46_v4, %v58_v5  ;;  %v10028_v17 = vcombine.high %v70_v12, %v82_v55  ;;  %v10027_v63 = vcombine.low %v70_v12, %v82_v55  ;;  %v214_v55 = vld [vmem:[%s12918_s1 + $0x590] sm:$0xff] }
 0x41d   :  { %v10030_v18 = vcombine.high %v71_v54, %v83_v13  ;;  %v10029_v24 = vcombine.low %v71_v54, %v83_v13  ;;  %v203_v4 = vld [vmem:[%s12918_s1 + $0x538] sm:$0xff]  ;;  %v9098_v5 = vrot.slane %v12618_v58, %v11948_v57  ;;  %v226_v54 = vld [vmem:[%s12918_s1 + $0x5f0] sm:$0xff] }
 0x41f   :  { %8753 = vmatpush1.bf16.msra.mxu0 %v10431_v19  ;;  %8839 = vmatpush1.bf16.msra.mxu1 %v10433_v21  ;;  %v106_v19 = vld [vmem:[%s12918_s1 + $0x230] sm:$0xff] }
 0x420   :  { %8754 = vmatprep.subr.bf16.mxu0 %v10456_v60  ;;  %8840 = vmatprep.subr.bf16.mxu1 %v10458_v22  ;;  %v12567_v21 = vld [vmem:[%s12917_s0 + $0x8] ss:$12 sps:$4 sm:$0xff]   ;;  %v95_v60 = vld [vmem:[%s12918_s1 + $0x1d8] sm:$0xff]  ;;  %v10052_v25 = vcombine.high %v94_v20, %v106_v19  ;;  %v10051_v32 = vcombine.low %v94_v20, %v106_v19 }
 0x421   :  { %v107_v22 = vld [vmem:[%s12918_s1 + $0x238] sm:$0xff] }
 0x422   :  { %v10054_v26 = vcombine.high %v95_v60, %v107_v22  ;;  %v10053_v33 = vcombine.low %v95_v60, %v107_v22 }
 0x423   :  { %8755 = vmatpush1.bf16.msra.mxu0 %v10455_v28  ;;  %8841 = vmatpush1.bf16.msra.mxu1 %v10457_v29  ;;  %v118_v28 = vld [vmem:[%s12918_s1 + $0x290] sm:$0xff] }
 0x424   :  { %8756 = vmatprep.subr.bf16.mxu0 %v10480_v30  ;;  %8842 = vmatprep.subr.bf16.mxu1 %v10482_v31  ;;  %v130_v29 = vld [vmem:[%s12918_s1 + $0x2f0] sm:$0xff]  ;;  %v119_v30 = vld [vmem:[%s12918_s1 + $0x298] sm:$0xff] }
 0x425   :  { %v131_v31 = vld [vmem:[%s12918_s1 + $0x2f8] sm:$0xff]  ;;  %v10076_v34 = vcombine.high %v118_v28, %v130_v29 }
 0x426   :  { %v10078_v35 = vcombine.high %v119_v30, %v131_v31  ;;  %v10077_v14 = vcombine.low %v119_v30, %v131_v31  ;;  %v10172_v30 = vcombine.high %v214_v55, %v226_v54 }
 0x427   :  { %8757 = vmatpush1.bf16.msra.mxu0 %v10479_v37  ;;  %8843 = vmatpush1.bf16.msra.mxu1 %v10481_v38  ;;  %v142_v37 = vld [vmem:[%s12918_s1 + $0x350] sm:$0xff] }
 0x428   :  { %8758 = vmatprep.subr.bf16.mxu0 %v10504_v39  ;;  %8844 = vmatprep.subr.bf16.mxu1 %v10506_v41  ;;  %v154_v38 = vld [vmem:[%s12918_s1 + $0x3b0] sm:$0xff]  ;;  %v155_v39 = vld [vmem:[%s12918_s1 + $0x3b8] sm:$0xff]  ;;  %v10075_v41 = vcombine.low %v118_v28, %v130_v29 }
 0x429   :  { %v10100_v0 = vcombine.high %v142_v37, %v154_v38 }
 0x42b   :  { %8759 = vmatpush1.bf16.msra.mxu0 %v10503_v45  ;;  %8845 = vmatpush1.bf16.msra.mxu1 %v10505_v46  ;;  %v178_v45 = vld [vmem:[%s12918_s1 + $0x470] sm:$0xff]  ;;  %v167_v46 = vld [vmem:[%s12918_s1 + $0x418] sm:$0xff] }
 0x42c   :  { %8760 = vmatprep.subr.bf16.mxu0 %v10528_v50  ;;  %8846 = vmatprep.subr.bf16.mxu1 %v10530_v53  ;;  %v179_v50 = vld [vmem:[%s12918_s1 + $0x478] sm:$0xff]  ;;  %v10099_v53 = vcombine.low %v142_v37, %v154_v38  ;;  %v10124_v61 = vcombine.high %v166_v56, %v178_v45  ;;  %v10123_v7 = vcombine.low %v166_v56, %v178_v45  ;;  %v238_v37 = vld [vmem:[%s12918_s1 + $0x650] sm:$0xff] }
 0x42d   :  { %v10126_v62 = vcombine.high %v167_v46, %v179_v50  ;;  %v250_v38 = vld [vmem:[%s12918_s1 + $0x6b0] sm:$0xff] }
 0x42f   :  { %8761 = vmatpush1.bf16.msra.mxu0 %v10527_v1  ;;  %8847 = vmatpush1.bf16.msra.mxu1 %v10529_v43  ;;  %v190_v1 = vld [vmem:[%s12918_s1 + $0x4d0] sm:$0xff] }
 0x430   :  { %8762 = vmatprep.subr.bf16.mxu0 %v10552_v2  ;;  %8848 = vmatprep.subr.bf16.mxu1 %v10554_v3  ;;  %v202_v43 = vld [vmem:[%s12918_s1 + $0x530] sm:$0xff]  ;;  %v9090_v2 = vrot.slane %v12618_v58, %v11934_v49  ;;  %v191_v3 = vld [vmem:[%s12918_s1 + $0x4d8] sm:$0xff] }
 0x431   :  { %v10150_v12 = vcombine.high %v191_v3, %v203_v4 }
 0x433   :  { %8763 = vmatpush1.bf16.msra.mxu0 %v10551_v36  ;;  %8849 = vmatpush1.bf16.msra.mxu1 %v10553_v51  ;;  %v9102_v36 = vrot.slane %v12618_v58, %v11954_v59  ;;  %v10125_v51 = vcombine.low %v167_v46, %v179_v50  ;;  %v10196_v46 = vcombine.high %v238_v37, %v250_v38 }
 0x434   :  { %8877 = vmatprep.subr.bf16.mxu0 %v10004_v8  ;;  %8963 = vmatprep.subr.bf16.mxu1 %v10006_v11  ;;  %v10148_v8 = vcombine.high %v190_v1, %v202_v43 }
 0x436   :  { %8781 = vmatmul.mubr.bf16.vlgmr.msra.gmra.mrb[16].mxu0 %v12567_v21  ;;  %8867 = vmatmul.mubr.bf16.vlgmr.msra.gmra.mrb[16].mxu1 %v12567_v21 }
 0x437   :  { %8878 = vmatpush1.bf16.msra.mxu0 %v10003_v15  ;;  %8964 = vmatpush1.bf16.msra.mxu1 %v10005_v16 }
 0x438   :  { %8879 = vmatprep.subr.bf16.mxu0 %v10028_v17  ;;  %8965 = vmatprep.subr.bf16.mxu1 %v10030_v18  ;;  %v215_v17 = vld [vmem:[%s12918_s1 + $0x598] sm:$0xff] }
 0x439   :  { %8909 = vmatprep.mubr.bf16.mxu0 %v12243_v23  ;;  %8995 = vmatprep.mubr.bf16.mxu1 %v12243_v23  ;;  %v143_v23 = vld [vmem:[%s12918_s1 + $0x358] sm:$0xff] }
 0x43a   :  { %v10102_v42 = vcombine.high %v143_v23, %v155_v39  ;;  %v10101_v40 = vcombine.low %v143_v23, %v155_v39  ;;  %v227_v18 = vld [vmem:[%s12918_s1 + $0x5f8] sm:$0xff] }
 0x43b   :  { %8880 = vmatpush1.bf16.msra.mxu0 %v10027_v63  ;;  %8966 = vmatpush1.bf16.msra.mxu1 %v10029_v24  ;;  %v10147_v63 = vcombine.low %v190_v1, %v202_v43  ;;  %v10149_v24 = vcombine.low %v191_v3, %v203_v4  ;;  %v10173_v45 = vcombine.low %v215_v17, %v227_v18  ;;  %v286_v4 = vld [vmem:[%s12918_s1 + $0x7d0] sm:$0xff] }
 0x43c   :  { %8881 = vmatprep.subr.bf16.mxu0 %v10052_v25  ;;  %8967 = vmatprep.subr.bf16.mxu1 %v10054_v26  ;;  %v10195_v1 = vcombine.low %v238_v37, %v250_v38  ;;  %v382_v37 = vld [vmem:[%s12918_s1 + $0xad0] sm:$0xff] }
 0x43d   :  { %v394_v38 = vld [vmem:[%s12918_s1 + $0xb30] sm:$0xff] }
 0x43f   :  { %8882 = vmatpush1.bf16.msra.mxu0 %v10051_v32  ;;  %8968 = vmatpush1.bf16.msra.mxu1 %v10053_v33 }
 0x440   :  { %8883 = vmatprep.subr.bf16.mxu0 %v10076_v34  ;;  %8969 = vmatprep.subr.bf16.mxu1 %v10078_v35  ;;  %v10174_v35 = vcombine.high %v215_v17, %v227_v18 }
 0x443   :  { %8884 = vmatpush1.bf16.msra.mxu0 %v10075_v41  ;;  %8970 = vmatpush1.bf16.msra.mxu1 %v10077_v14  ;;  %v239_v41 = vld [vmem:[%s12918_s1 + $0x658] sm:$0xff] }
 0x444   :  { %8885 = vmatprep.subr.bf16.mxu0 %v10100_v0  ;;  %8971 = vmatprep.subr.bf16.mxu1 %v10102_v42  ;;  %v251_v14 = vld [vmem:[%s12918_s1 + $0x6b8] sm:$0xff]  ;;  %v10171_v42 = vcombine.low %v214_v55, %v226_v54  ;;  %v322_v55 = vld [vmem:[%s12918_s1 + $0x8f0] sm:$0xff] }
 0x445   :  { %v10198_v50 = vcombine.high %v239_v41, %v251_v14  ;;  %v10197_v43 = vcombine.low %v239_v41, %v251_v14  ;;  %v311_v54 = vld [vmem:[%s12918_s1 + $0x898] sm:$0xff] }
 0x447   :  { %8886 = vmatpush1.bf16.msra.mxu0 %v10099_v53  ;;  %8972 = vmatpush1.bf16.msra.mxu1 %v10101_v40  ;;  %v262_v53 = vld [vmem:[%s12918_s1 + $0x710] sm:$0xff] }
 0x448   :  { %8887 = vmatprep.subr.bf16.mxu0 %v10124_v61  ;;  %8973 = vmatprep.subr.bf16.mxu1 %v10126_v62  ;;  %v274_v40 = vld [vmem:[%s12918_s1 + $0x770] sm:$0xff]  ;;  %v263_v61 = vld [vmem:[%s12918_s1 + $0x718] sm:$0xff] }
 0x449   :  { %v8438_v11 = vpop.f32.mrb[8].mxu0  ;;  %v8524_v15 = vpop.f32.mrb[8].mxu1  ;;  %v275_v62 = vld [vmem:[%s12918_s1 + $0x778] sm:$0xff] }
 0x44a   :  { %v9183_v13 = vadd.f32 %v9090_v2, %v8438_v11  ;;  %v8440_v16 = vpop.f32.mrb[9].mxu0  ;;  %v9185_v20 = vadd.f32 %v9098_v5, %v8524_v15  ;;  %v8526_v60 = vpop.f32.mrb[9].mxu1  ;;  %v10222_v3 = vcombine.high %v263_v61, %v275_v62 }
 0x44b   :  { %v9184_v19 = vadd.f32 %v9094_v6, %v8440_v16  ;;  %v8442_v22 = vpop.f32.mrb[10].mxu0  ;;  %8888 = vmatpush1.bf16.msra.mxu0 %v10123_v7  ;;  %v9186_v25 = vadd.f32 %v9102_v36, %v8526_v60  ;;  %v8528_v28 = vpop.f32.mrb[10].mxu1  ;;  %8974 = vmatpush1.bf16.msra.mxu1 %v10125_v51  ;;  %v299_v7 = vld [vmem:[%s12918_s1 + $0x838] sm:$0xff]  ;;  %v10221_v51 = vcombine.low %v263_v61, %v275_v62 }
 0x44c   :  { %v9207_v26 = vadd.f32 %v9090_v2, %v8442_v22  ;;  %v8444_v29 = vpop.f32.mrb[11].mxu0  ;;  %8889 = vmatprep.subr.bf16.mxu0 %v10148_v8  ;;  %v9209_v32 = vadd.f32 %v9098_v5, %v8528_v28  ;;  %v8530_v34 = vpop.f32.mrb[11].mxu1  ;;  %8975 = vmatprep.subr.bf16.mxu1 %v10150_v12  ;;  %v10220_v2 = vcombine.high %v262_v53, %v274_v40  ;;  %v298_v5 = vld [vmem:[%s12918_s1 + $0x830] sm:$0xff]  ;;  %v335_v60 = vld [vmem:[%s12918_s1 + $0x958] sm:$0xff] }
 0x44d   :  { %v10599_v31 = vpack.c.bf16 %v9184_v19, %v9183_v13  ;;  %v9208_v33 = vadd.f32 %v9094_v6, %v8444_v29  ;;  %v10600_v23 = vpack.c.bf16 %v9186_v25, %v9185_v20  ;;  %v9210_v39 = vadd.f32 %v9102_v36, %v8530_v34  ;;  %v287_v6 = vld [vmem:[%s12918_s1 + $0x7d8] sm:$0xff]  ;;  %v310_v12 = vld [vmem:[%s12918_s1 + $0x890] sm:$0xff] }
 0x44e   :  { %v10219_v36 = vcombine.low %v262_v53, %v274_v40  ;;  %v10244_v8 = vcombine.high %v286_v4, %v298_v5  ;;  %v10246_v11 = vcombine.high %v287_v6, %v299_v7  ;;  %v323_v13 = vld [vmem:[%s12918_s1 + $0x8f8] sm:$0xff]  ;;  %v10243_v15 = vcombine.low %v286_v4, %v298_v5  ;;  %v334_v20 = vld [vmem:[%s12918_s1 + $0x950] sm:$0xff] }
 0x44f   :  { %9311 = vst [vmem:[%s12921_s4 + $0x20] sm:$0xff] %v10599_v31  ;;  %v10605_v0 = vpack.c.bf16 %v9208_v33, %v9207_v26  ;;  %8890 = vmatpush1.bf16.msra.mxu0 %v10147_v63  ;;  %9312 = vst [vmem:[%s12921_s4 + $0x28] sm:$0xff] %v10600_v23  ;;  %v10606_v56 = vpack.c.bf16 %v9210_v39, %v9209_v32  ;;  %8976 = vmatpush1.bf16.msra.mxu1 %v10149_v24  ;;  %v346_v19 = vld [vmem:[%s12918_s1 + $0x9b0] sm:$0xff]  ;;  %v347_v22 = vld [vmem:[%s12918_s1 + $0x9b8] sm:$0xff] }
 0x450   :  { %8891 = vmatprep.subr.bf16.mxu0 %v10172_v30  ;;  %8977 = vmatprep.subr.bf16.mxu1 %v10174_v35  ;;  %v10245_v16 = vcombine.low %v287_v6, %v299_v7  ;;  %v10268_v17 = vcombine.high %v310_v12, %v322_v55  ;;  %v10270_v18 = vcombine.high %v311_v54, %v323_v13  ;;  %v358_v28 = vld [vmem:[%s12918_s1 + $0xa10] sm:$0xff]  ;;  %v359_v30 = vld [vmem:[%s12918_s1 + $0xa18] sm:$0xff] }
 0x451   :  { %9317 = vst [vmem:[%s12921_s4 + $0x50] sm:$0xff] %v10605_v0  ;;  %9318 = vst [vmem:[%s12921_s4 + $0x58] sm:$0xff] %v10606_v56  ;;  %v10267_v63 = vcombine.low %v310_v12, %v322_v55  ;;  %v10269_v24 = vcombine.low %v311_v54, %v323_v13  ;;  %v10292_v25 = vcombine.high %v334_v20, %v346_v19  ;;  %v370_v29 = vld [vmem:[%s12918_s1 + $0xa70] sm:$0xff]  ;;  %v371_v31 = vld [vmem:[%s12918_s1 + $0xa78] sm:$0xff] }
 0x452   :  { %v10294_v26 = vcombine.high %v335_v60, %v347_v22  ;;  %v10291_v32 = vcombine.low %v334_v20, %v346_v19  ;;  %v10293_v33 = vcombine.low %v335_v60, %v347_v22  ;;  %v10316_v34 = vcombine.high %v358_v28, %v370_v29  ;;  %v383_v23 = vld [vmem:[%s12918_s1 + $0xad8] sm:$0xff]  ;;  %v406_v56 = vld [vmem:[%s12918_s1 + $0xb90] sm:$0xff] }
 0x453   :  { %8892 = vmatpush1.bf16.msra.mxu0 %v10171_v42  ;;  %8978 = vmatpush1.bf16.msra.mxu1 %v10173_v45  ;;  %v10318_v35 = vcombine.high %v359_v30, %v371_v31  ;;  %v395_v39 = vld [vmem:[%s12918_s1 + $0xb38] sm:$0xff]  ;;  %v10315_v41 = vcombine.low %v358_v28, %v370_v29  ;;  %v10317_v14 = vcombine.low %v359_v30, %v371_v31  ;;  %v418_v45 = vld [vmem:[%s12918_s1 + $0xbf0] sm:$0xff] }
 0x454   :  { %8893 = vmatprep.subr.bf16.mxu0 %v10196_v46  ;;  %8979 = vmatprep.subr.bf16.mxu1 %v10198_v50  ;;  %v10340_v0 = vcombine.high %v382_v37, %v394_v38  ;;  %v10342_v42 = vcombine.high %v383_v23, %v395_v39  ;;  %v407_v46 = vld [vmem:[%s12918_s1 + $0xb98] sm:$0xff]  ;;  %v10339_v53 = vcombine.low %v382_v37, %v394_v38  ;;  %v526_v31 = vld [vmem:[%s12918_s1 + $0xf50] sm:$0xff] }
 0x455   :  { %v419_v50 = vld [vmem:[%s12918_s1 + $0xbf8] sm:$0xff]  ;;  %v10341_v40 = vcombine.low %v383_v23, %v395_v39  ;;  %v10364_v61 = vcombine.high %v406_v56, %v418_v45  ;;  %v10363_v4 = vcombine.low %v406_v56, %v418_v45  ;;  %v550_v23 = vld [vmem:[%s12918_s1 + $0x1010] sm:$0xff] }
 0x456   :  { %v10366_v62 = vcombine.high %v407_v46, %v419_v50  ;;  %v10365_v5 = vcombine.low %v407_v46, %v419_v50  ;;  %v562_v39 = vld [vmem:[%s12918_s1 + $0x1070] sm:$0xff] }
 0x457   :  { %8894 = vmatpush1.bf16.msra.mxu0 %v10195_v1  ;;  %8980 = vmatpush1.bf16.msra.mxu1 %v10197_v43  ;;  %v430_v1 = vld [vmem:[%s12918_s1 + $0xc50] sm:$0xff]  ;;  %v10508_v56 = vcombine.high %v550_v23, %v562_v39 }
 0x458   :  { %8895 = vmatprep.subr.bf16.mxu0 %v10220_v2  ;;  %8981 = vmatprep.subr.bf16.mxu1 %v10222_v3  ;;  %v442_v43 = vld [vmem:[%s12918_s1 + $0xcb0] sm:$0xff]  ;;  %v431_v2 = vld [vmem:[%s12918_s1 + $0xc58] sm:$0xff] }
 0x459   :  { %v443_v3 = vld [vmem:[%s12918_s1 + $0xcb8] sm:$0xff]  ;;  %v10388_v6 = vcombine.high %v430_v1, %v442_v43  ;;  %v10387_v12 = vcombine.low %v430_v1, %v442_v43  ;;  %v574_v46 = vld [vmem:[%s12918_s1 + $0x10d0] sm:$0xff] }
 0x45a   :  { %v10390_v7 = vcombine.high %v431_v2, %v443_v3  ;;  %v10389_v55 = vcombine.low %v431_v2, %v443_v3  ;;  %v586_v50 = vld [vmem:[%s12918_s1 + $0x1130] sm:$0xff] }
 0x45b   :  { %8896 = vmatpush1.bf16.msra.mxu0 %v10219_v36  ;;  %8982 = vmatpush1.bf16.msra.mxu1 %v10221_v51  ;;  %v454_v36 = vld [vmem:[%s12918_s1 + $0xd10] sm:$0xff]  ;;  %v10532_v1 = vcombine.high %v574_v46, %v586_v50 }
 0x45c   :  { %8897 = vmatprep.subr.bf16.mxu0 %v10244_v8  ;;  %8983 = vmatprep.subr.bf16.mxu1 %v10246_v11  ;;  %v466_v51 = vld [vmem:[%s12918_s1 + $0xd70] sm:$0xff]  ;;  %v455_v8 = vld [vmem:[%s12918_s1 + $0xd18] sm:$0xff] }
 0x45d   :  { %v467_v11 = vld [vmem:[%s12918_s1 + $0xd78] sm:$0xff]  ;;  %v10412_v54 = vcombine.high %v454_v36, %v466_v51  ;;  %v10411_v20 = vcombine.low %v454_v36, %v466_v51  ;;  %v598_v2 = vld [vmem:[%s12918_s1 + $0x1190] sm:$0xff] }
 0x45e   :  { %v10414_v13 = vcombine.high %v455_v8, %v467_v11  ;;  %v10413_v19 = vcombine.low %v455_v8, %v467_v11  ;;  %v610_v3 = vld [vmem:[%s12918_s1 + $0x11f0] sm:$0xff] }
 0x45f   :  { %8898 = vmatpush1.bf16.msra.mxu0 %v10243_v15  ;;  %8984 = vmatpush1.bf16.msra.mxu1 %v10245_v16  ;;  %v478_v15 = vld [vmem:[%s12918_s1 + $0xdd0] sm:$0xff]  ;;  %v10556_v36 = vcombine.high %v598_v2, %v610_v3  ;;  %v10555_v8 = vcombine.low %v598_v2, %v610_v3 }
 0x460   :  { %8899 = vmatprep.subr.bf16.mxu0 %v10268_v17  ;;  %8985 = vmatprep.subr.bf16.mxu1 %v10270_v18  ;;  %v490_v16 = vld [vmem:[%s12918_s1 + $0xe30] sm:$0xff]  ;;  %v479_v17 = vld [vmem:[%s12918_s1 + $0xdd8] sm:$0xff] }
 0x461   :  { %v491_v18 = vld [vmem:[%s12918_s1 + $0xe38] sm:$0xff]  ;;  %v10436_v60 = vcombine.high %v478_v15, %v490_v16 }
 0x462   :  { %v10438_v22 = vcombine.high %v479_v17, %v491_v18  ;;  %v10437_v28 = vcombine.low %v479_v17, %v491_v18 }
 0x463   :  { %8900 = vmatpush1.bf16.msra.mxu0 %v10267_v63  ;;  %8986 = vmatpush1.bf16.msra.mxu1 %v10269_v24  ;;  %v502_v63 = vld [vmem:[%s12918_s1 + $0xe90] sm:$0xff] }
 0x464   :  { %8901 = vmatprep.subr.bf16.mxu0 %v10292_v25  ;;  %8987 = vmatprep.subr.bf16.mxu1 %v10294_v26  ;;  %v514_v24 = vld [vmem:[%s12918_s1 + $0xef0] sm:$0xff]  ;;  %v515_v25 = vld [vmem:[%s12918_s1 + $0xef8] sm:$0xff]  ;;  %v10435_v26 = vcombine.low %v478_v15, %v490_v16 }
 0x465   :  { %v10460_v29 = vcombine.high %v502_v63, %v514_v24 }
 0x467   :  { %8902 = vmatpush1.bf16.msra.mxu0 %v10291_v32  ;;  %8988 = vmatpush1.bf16.msra.mxu1 %v10293_v33  ;;  %v538_v32 = vld [vmem:[%s12918_s1 + $0xfb0] sm:$0xff]  ;;  %v539_v33 = vld [vmem:[%s12918_s1 + $0xfb8] sm:$0xff] }
 0x468   :  { %8903 = vmatprep.subr.bf16.mxu0 %v10316_v34  ;;  %8989 = vmatprep.subr.bf16.mxu1 %v10318_v35  ;;  %v10459_v34 = vcombine.low %v502_v63, %v514_v24  ;;  %v10484_v37 = vcombine.high %v526_v31, %v538_v32 }
 0x46b   :  { %8904 = vmatpush1.bf16.msra.mxu0 %v10315_v41  ;;  %8990 = vmatpush1.bf16.msra.mxu1 %v10317_v14  ;;  %v551_v41 = vld [vmem:[%s12918_s1 + $0x1018] sm:$0xff] }
 0x46c   :  { %8905 = vmatprep.subr.bf16.mxu0 %v10340_v0  ;;  %8991 = vmatprep.subr.bf16.mxu1 %v10342_v42  ;;  %v563_v14 = vld [vmem:[%s12918_s1 + $0x1078] sm:$0xff]  ;;  %v10483_v0 = vcombine.low %v526_v31, %v538_v32 }
 0x46d   :  { %v10510_v45 = vcombine.high %v551_v41, %v563_v14 }
 0x46f   :  { %8906 = vmatpush1.bf16.msra.mxu0 %v10339_v53  ;;  %8992 = vmatpush1.bf16.msra.mxu1 %v10341_v40  ;;  %v575_v53 = vld [vmem:[%s12918_s1 + $0x10d8] sm:$0xff] }
 0x470   :  { %8907 = vmatprep.subr.bf16.mxu0 %v10364_v61  ;;  %8993 = vmatprep.subr.bf16.mxu1 %v10366_v62  ;;  %v587_v40 = vld [vmem:[%s12918_s1 + $0x1138] sm:$0xff]  ;;  %v10507_v61 = vcombine.low %v550_v23, %v562_v39  ;;  %v10509_v62 = vcombine.low %v551_v41, %v563_v14 }
 0x471   :  { %v10534_v43 = vcombine.high %v575_v53, %v587_v40 }
 0x473   :  { %8908 = vmatpush1.bf16.msra.mxu0 %v10363_v4  ;;  %8994 = vmatpush1.bf16.msra.mxu1 %v10365_v5  ;;  %v599_v4 = vld [vmem:[%s12918_s1 + $0x1198] sm:$0xff] }
 0x474   :  { %8920 = vmatprep.subr.bf16.mxu0 %v10388_v6  ;;  %9006 = vmatprep.subr.bf16.mxu1 %v10390_v7  ;;  %v611_v5 = vld [vmem:[%s12918_s1 + $0x11f8] sm:$0xff]  ;;  %v10531_v6 = vcombine.low %v574_v46, %v586_v50  ;;  %v10533_v7 = vcombine.low %v575_v53, %v587_v40 }
 0x475   :  { %v10558_v51 = vcombine.high %v599_v4, %v611_v5  ;;  %v10557_v11 = vcombine.low %v599_v4, %v611_v5 }
 0x476   :  { %8910 = vmatmul.mubr.bf16.vlgmr.msra.gmra.mrb[20].mxu0 %v12462_v9  ;;  %8996 = vmatmul.mubr.bf16.vlgmr.msra.gmra.mrb[20].mxu1 %v12462_v9  ;;  %v503_v9 = vld [vmem:[%s12918_s1 + $0xe98] sm:$0xff] }
 0x477   :  { %8921 = vmatpush1.bf16.msra.mxu0 %v10387_v12  ;;  %9007 = vmatpush1.bf16.msra.mxu1 %v10389_v55  ;;  %v10462_v30 = vcombine.high %v503_v9, %v515_v25  ;;  %v10461_v35 = vcombine.low %v503_v9, %v515_v25  ;;  %v9106_v12 = vrot.slane %v12618_v58, %v12272_v44 }
 0x478   :  { %8922 = vmatprep.subr.bf16.mxu0 %v10412_v54  ;;  %9008 = vmatprep.subr.bf16.mxu1 %v10414_v13  ;;  %v9114_v55 = vrot.slane %v12618_v58, %v12281_v47  ;;  %v9110_v54 = vrot.slane %v12618_v58, %v12284_v48  ;;  %v9118_v13 = vrot.slane %v12618_v58, %v12287_v52 }
 0x479   :  { %8952 = vmatprep.mubr.bf16.mxu0 %v10814_v27  ;;  %9038 = vmatprep.mubr.bf16.mxu1 %v10814_v27  ;;  %v527_v27 = vld [vmem:[%s12918_s1 + $0xf58] sm:$0xff] }
 0x47a   :  { %v10486_v38 = vcombine.high %v527_v27, %v539_v33  ;;  %v10485_v42 = vcombine.low %v527_v27, %v539_v33  ;;  %v9051_v27 = vld [vmem:[%s12920_s3 + $0x10] sm:$0xff] }
 0x47b   :  { %8923 = vmatpush1.bf16.msra.mxu0 %v10411_v20  ;;  %9009 = vmatpush1.bf16.msra.mxu1 %v10413_v19  ;;  %v9122_v33 = vrot.slane %v9051_v27, %v11934_v49  ;;  %v9146_v2 = vrot.slane %v9051_v27, %v12281_v47  ;;  %v9142_v3 = vrot.slane %v9051_v27, %v12284_v48 }
 0x47c   :  { %8924 = vmatprep.subr.bf16.mxu0 %v10436_v60  ;;  %9010 = vmatprep.subr.bf16.mxu1 %v10438_v22  ;;  %v9150_v4 = vrot.slane %v9051_v27, %v12287_v52 }
 0x47f   :  { %8925 = vmatpush1.bf16.msra.mxu0 %v10435_v26  ;;  %9011 = vmatpush1.bf16.msra.mxu1 %v10437_v28 }
 0x480   :  { %8926 = vmatprep.subr.bf16.mxu0 %v10460_v29  ;;  %9012 = vmatprep.subr.bf16.mxu1 %v10462_v30 }
 0x483   :  { %8927 = vmatpush1.bf16.msra.mxu0 %v10459_v34  ;;  %9013 = vmatpush1.bf16.msra.mxu1 %v10461_v35  ;;  %v9130_v34 = vrot.slane %v9051_v27, %v11948_v57  ;;  %v9126_v35 = vrot.slane %v9051_v27, %v11951_v10 }
 0x484   :  { %8928 = vmatprep.subr.bf16.mxu0 %v10484_v37  ;;  %9014 = vmatprep.subr.bf16.mxu1 %v10486_v38  ;;  %v9134_v37 = vrot.slane %v9051_v27, %v11954_v59 }
 0x487   :  { %8929 = vmatpush1.bf16.msra.mxu0 %v10483_v0  ;;  %9015 = vmatpush1.bf16.msra.mxu1 %v10485_v42 }
 0x488   :  { %8930 = vmatprep.subr.bf16.mxu0 %v10508_v56  ;;  %9016 = vmatprep.subr.bf16.mxu1 %v10510_v45 }
 0x48b   :  { %8931 = vmatpush1.bf16.msra.mxu0 %v10507_v61  ;;  %9017 = vmatpush1.bf16.msra.mxu1 %v10509_v62 }
 0x48c   :  { %8932 = vmatprep.subr.bf16.mxu0 %v10532_v1  ;;  %9018 = vmatprep.subr.bf16.mxu1 %v10534_v43  ;;  %v9138_v43 = vrot.slane %v9051_v27, %v12272_v44 }
 0x48f   :  { %8933 = vmatpush1.bf16.msra.mxu0 %v10531_v6  ;;  %9019 = vmatpush1.bf16.msra.mxu1 %v10533_v7 }
 0x490   :  { %8934 = vmatprep.subr.bf16.mxu0 %v10556_v36  ;;  %9020 = vmatprep.subr.bf16.mxu1 %v10558_v51 }
 0x493   :  { %8935 = vmatpush1.bf16.msra.mxu0 %v10555_v8  ;;  %9021 = vmatpush1.bf16.msra.mxu1 %v10557_v11 }
 0x496   :  { %8953 = vmatmul.mubr.bf16.vlgmr.msra.gmra.mrb[20].mxu0 %v12567_v21  ;;  %9039 = vmatmul.mubr.bf16.vlgmr.msra.gmra.mrb[20].mxu1 %v12567_v21 }
 0x4a9   :  { %v8610_v15 = vpop.f32.mrb[12].mxu0  ;;  %v8696_v17 = vpop.f32.mrb[12].mxu1 }
 0x4aa   :  { %v9187_v16 = vadd.f32 %v9106_v12, %v8610_v15  ;;  %v8612_v18 = vpop.f32.mrb[13].mxu0  ;;  %v9189_v20 = vadd.f32 %v9114_v55, %v8696_v17  ;;  %v8698_v60 = vpop.f32.mrb[13].mxu1 }
 0x4ab   :  { %v9188_v19 = vadd.f32 %v9110_v54, %v8612_v18  ;;  %v8614_v21 = vpop.f32.mrb[14].mxu0  ;;  %v9190_v22 = vadd.f32 %v9118_v13, %v8698_v60  ;;  %v8700_v24 = vpop.f32.mrb[14].mxu1 }
 0x4ac   :  { %v9211_v63 = vadd.f32 %v9106_v12, %v8614_v21  ;;  %v8616_v9 = vpop.f32.mrb[15].mxu0  ;;  %v9213_v26 = vadd.f32 %v9114_v55, %v8700_v24  ;;  %v8702_v29 = vpop.f32.mrb[15].mxu1 }
 0x4ad   :  { %v10607_v25 = vpack.c.bf16 %v9188_v19, %v9187_v16  ;;  %v9212_v28 = vadd.f32 %v9110_v54, %v8616_v9  ;;  %v10608_v30 = vpack.c.bf16 %v9190_v22, %v9189_v20  ;;  %v9214_v31 = vadd.f32 %v9118_v13, %v8702_v29 }
 0x4af   :  { %10583 = vst [vmem:[%s12921_s4 + $0x60] sm:$0xff] %v10607_v25  ;;  %v10613_v58 = vpack.c.bf16 %v9212_v28, %v9211_v63  ;;  %10584 = vst [vmem:[%s12921_s4 + $0x68] sm:$0xff] %v10608_v30  ;;  %v10614_v32 = vpack.c.bf16 %v9214_v31, %v9213_v26 }
 0x4b1   :  { %10589 = vst [vmem:[%s12921_s4 + $0x90] sm:$0xff] %v10613_v58  ;;  %10590 = vst [vmem:[%s12921_s4 + $0x98] sm:$0xff] %v10614_v32 }
 0x509   :  { %v8782_v38 = vpop.f32.mrb[16].mxu0  ;;  %v8868_v39 = vpop.f32.mrb[16].mxu1 }
 0x50a   :  { %v9191_v23 = vadd.f32 %v9122_v33, %v8782_v38  ;;  %v8784_v41 = vpop.f32.mrb[17].mxu0  ;;  %v9193_v14 = vadd.f32 %v9130_v34, %v8868_v39  ;;  %v8870_v42 = vpop.f32.mrb[17].mxu1 }
 0x50b   :  { %v9192_v0 = vadd.f32 %v9126_v35, %v8784_v41  ;;  %v8786_v56 = vpop.f32.mrb[18].mxu0  ;;  %v9194_v45 = vadd.f32 %v9134_v37, %v8870_v42  ;;  %v8872_v50 = vpop.f32.mrb[18].mxu1 }
 0x50c   :  { %v9215_v46 = vadd.f32 %v9122_v33, %v8786_v56  ;;  %v8788_v53 = vpop.f32.mrb[19].mxu0  ;;  %v9217_v49 = vadd.f32 %v9130_v34, %v8872_v50  ;;  %v8874_v57 = vpop.f32.mrb[19].mxu1 }
 0x50d   :  { %v10609_v40 = vpack.c.bf16 %v9192_v0, %v9191_v23  ;;  %v9216_v61 = vadd.f32 %v9126_v35, %v8788_v53  ;;  %v10610_v62 = vpack.c.bf16 %v9194_v45, %v9193_v14  ;;  %v9218_v10 = vadd.f32 %v9134_v37, %v8874_v57 }
 0x50f   :  { %10585 = vst [vmem:[%s12921_s4 + $0x70] sm:$0xff] %v10609_v40  ;;  %v10615_v59 = vpack.c.bf16 %v9216_v61, %v9215_v46  ;;  %10586 = vst [vmem:[%s12921_s4 + $0x78] sm:$0xff] %v10610_v62  ;;  %v10616_v1 = vpack.c.bf16 %v9218_v10, %v9217_v49 }
 0x511   :  { %10591 = vst [vmem:[%s12921_s4 + $0xa0] sm:$0xff] %v10615_v59  ;;  %10592 = vst [vmem:[%s12921_s4 + $0xa8] sm:$0xff] %v10616_v1 }
 0x569   :  { %v8954_v5 = vpop.f32.mrb[20].mxu0  ;;  %v9040_v7 = vpop.f32.mrb[20].mxu1 }
 0x56a   :  { %v9195_v6 = vadd.f32 %v9138_v43, %v8954_v5  ;;  %v8956_v36 = vpop.f32.mrb[21].mxu0  ;;  %v9197_v51 = vadd.f32 %v9146_v2, %v9040_v7  ;;  %v9042_v11 = vpop.f32.mrb[21].mxu1 }
 0x56b   :  { %v9196_v8 = vadd.f32 %v9142_v3, %v8956_v36  ;;  %v8958_v12 = vpop.f32.mrb[22].mxu0  ;;  %v9198_v55 = vadd.f32 %v9150_v4, %v9042_v11  ;;  %v9044_v13 = vpop.f32.mrb[22].mxu1 }
 0x56c   :  { %v9219_v54 = vadd.f32 %v9138_v43, %v8958_v12  ;;  %v8960_v15 = vpop.f32.mrb[23].mxu0  ;;  %v9221_v44 = vadd.f32 %v9146_v2, %v9044_v13  ;;  %v9046_v47 = vpop.f32.mrb[23].mxu1 }
 0x56d   :  { %v10611_v16 = vpack.c.bf16 %v9196_v8, %v9195_v6  ;;  %v9220_v17 = vadd.f32 %v9142_v3, %v8960_v15  ;;  %v10612_v18 = vpack.c.bf16 %v9198_v55, %v9197_v51  ;;  %v9222_v48 = vadd.f32 %v9150_v4, %v9046_v47 }
 0x56f   :  { %10587 = vst [vmem:[%s12921_s4 + $0x80] sm:$0xff] %v10611_v16  ;;  %v10617_v52 = vpack.c.bf16 %v9220_v17, %v9219_v54  ;;  %10588 = vst [vmem:[%s12921_s4 + $0x88] sm:$0xff] %v10612_v18  ;;  %v10618_v20 = vpack.c.bf16 %v9222_v48, %v9221_v44 }
 0x571   :  { %10593 = vst [vmem:[%s12921_s4 + $0xb0] sm:$0xff] %v10617_v52  ;;  %10594 = vst [vmem:[%s12921_s4 + $0xb8] sm:$0xff] %v10618_v20 }
 0x572   :  { %9396 = vsyncpa [#allocation3], 1 }

</bundles_post_ra>
